<compile_context>
chip_gen: v6e
topology: v6e:2x2x1
jax: 0.10.0
libtpu: 0.0.40
codegen_flags: <defaults>
</compile_context>

<pallas_src>
import jax
import jax.numpy as jnp
from jax import lax
from jax.experimental import pallas as pl
from jax.experimental.pallas import tpu as pltpu


def _round_up(x, m):
    return ((x + m - 1) // m) * m


def _vmem_capacity_bytes():
    """Per-generation VMEM capacity with a conservative (v7x-sized) fallback."""
    try:
        info = pltpu.get_tpu_info()
        for attr in ("vmem_capacity_bytes", "vmem_size_bytes", "vmem_bytes"):
            v = getattr(info, attr, None)
            if v:
                return int(v)
    except Exception:
        pass
    return 64 << 20


def _make_basic_block_kernel(*, TH, Wo, WoP, W1, Cinp, Cp, stride, NB, has_proj):
    """Kernel closure for one (batch image, output row band) grid step."""
    s = stride
    P_ext = (TH + 2) * WoP      # conv1 outputs incl. one halo row above/below
    P = TH * WoP                # band outputs

    def kernel(*refs):
        if has_proj:
            (xph_ref, w1_ref, w2_ref, b1_ref, b2_ref, ws_ref, bs_ref,
             o_ref, y1pad_ref) = refs
        else:
            xph_ref, w1_ref, w2_ref, b1_ref, b2_ref, o_ref, y1pad_ref = refs
            ws_ref = bs_ref = None
        r = pl.program_id(1)

        # ---- conv1 (3x3, stride s) + BN1 + ReLU: 9 tap-accumulating matmuls ----
        acc1 = None
        for kh in range(3):
            for kw in range(3):
                t = kh * 3 + kw
                p = (kh % s) * s + (kw % s)
                patch = xph_ref[p, pl.ds(kh // s, TH + 2), pl.ds(kw // s, WoP), :]
                patch = patch.reshape(P_ext, Cinp)
                d = jnp.dot(patch, w1_ref[pl.ds(t * Cinp, Cinp), :],
                            preferred_element_type=jnp.float32)
                acc1 = d if acc1 is None else acc1 + d
        y1 = jnp.maximum(acc1 + b1_ref[...], 0.0).astype(jnp.bfloat16)

        # ---- stage y1 into the W-aligned, zero-padded scratch -------------------
        # cols [0, 8): left pad (col 7 = conv2 left halo), aligned unmasked zero;
        # cols [8, 8+WoP): y1 (aligned unmasked bulk store);
        # cols [8+Wo, W1): zeroed (right halo + kills the W-pad garbage columns).
        y1pad_ref[pl.ds(0, TH + 2), pl.ds(8, WoP), :] = y1.reshape(TH + 2, WoP, Cp)
        y1pad_ref[pl.ds(0, TH + 2), pl.ds(0, 8), :] = jnp.zeros(
            (TH + 2, 8, Cp), jnp.bfloat16)
        y1pad_ref[pl.ds(0, TH + 2), pl.ds(8 + Wo, W1 - 8 - Wo), :] = jnp.zeros(
            (TH + 2, W1 - 8 - Wo, Cp), jnp.bfloat16)

        zrow = jnp.zeros((1, WoP, Cp), jnp.bfloat16)

        @pl.when(r == 0)                 # top halo row is conv2 zero padding
        def _():
            y1pad_ref[pl.ds(0, 1), pl.ds(8, WoP), :] = zrow

        @pl.when(r == NB - 1)            # bottom halo row is conv2 zero padding
        def _():
            y1pad_ref[pl.ds(TH + 1, 1), pl.ds(8, WoP), :] = zrow

        # ---- conv2 (3x3, stride 1) + BN2: 9 tap-accumulating matmuls ------------
        acc2 = None
        for kh in range(3):
            for kw in range(3):
                t = kh * 3 + kw
                patch = y1pad_ref[pl.ds(kh, TH), pl.ds(7 + kw, WoP), :]
                patch = patch.reshape(P, Cp)
                d = jnp.dot(patch, w2_ref[pl.ds(t * Cp, Cp), :],
                            preferred_element_type=jnp.float32)
                acc2 = d if acc2 is None else acc2 + d
        y2 = acc2 + b2_ref[...]

        # ---- shortcut (reuses the phase-split band already in VMEM) -------------
        p_sc = (1 % s) * s + (1 % s)
        xsc = xph_ref[p_sc, pl.ds((s + 1) // s, TH), pl.ds(1 // s, WoP), :]
        xsc = xsc.reshape(P, Cinp)
        if has_proj:
            sc = jnp.dot(xsc, ws_ref[...],
                         preferred_element_type=jnp.float32) + bs_ref[...]
        else:
            sc = xsc.astype(jnp.float32)   # identity: no projection matmul at all

        out = jnp.maximum(y2 + sc, 0.0).reshape(TH, WoP, Cp)
        o_ref[0] = out.astype(o_ref.dtype)

    return kernel


def _bn_fold(bn, eps=1e-5):
    g, b, m, v = bn
    sc = g / jnp.sqrt(v + eps)
    return sc, b - m * sc


def _pad_vec(vec, n):
    return jnp.pad(vec, (0, n - vec.shape[0]))


def basic_block_forward_nhwc(x_nhwc, params, stride, *, row_band=None,
                             out_dtype=jnp.bfloat16):
    """One ResNet BasicBlock (eval-mode BN) on an NHWC input, returns NHWC.

    params = (w1, bn1, w2, bn2, ws, bns); bnX = (gamma, beta, mean, var);
    ws/bns are None for the identity shortcut.  Conv weights are PyTorch OIHW.
    """
    w1, bn1, w2, bn2, ws, bns = params
    s = int(stride)
    assert s in (1, 2), "stride-phase decomposition supports stride 1 or 2 only"
    has_proj = ws is not None

    N, H, W, Cin = x_nhwc.shape
    C = w1.shape[0]
    if not has_proj:
        assert Cin == C and s == 1, "identity shortcut requires stride=1, Cin==Cout"

    Ho = (H + 2 - 3) // s + 1
    Wo = (W + 2 - 3) // s + 1

    Cinp = _round_up(Cin, 128)          # lane-dense channels
    Cp = _round_up(C, 128)
    WoP = _round_up(Wo, 8)              # sublane-aligned output width
    W1 = WoP + 16                       # y1 scratch width: 8 left pad + WoP + 8
    kdiv = 2 // s                       # max horizontal/vertical tap shift per phase
    plane_w = max(WoP + kdiv, -(-(W + 2) // s))
    out_isz = jnp.dtype(out_dtype).itemsize

    # ------- per-generation VMEM budget & row-band selection -------
    cap = _vmem_capacity_bytes()
    budget = min(int(cap * 0.70), cap - (12 << 20))

    def vmem_estimate(TH):
        THI = s * (TH + 1) + 3
        Hph = _round_up(THI, s) // s
        inp = s * s * Hph * plane_w * Cinp * 2 * 2            # double-buffered band
        outp = TH * WoP * Cp * out_isz * 2                    # double-buffered out
        wgt = (9 * Cinp * Cp + 9 * Cp * Cp
               + (Cinp * Cp if has_proj else 0)) * 2 + 3 * Cp * 4
        y1pad = (TH + 2) * W1 * Cp * 2
        temps = ((TH + 2) * WoP * Cp * (4 + 2)                # acc1 f32 + y1 bf16
                 + TH * WoP * Cp * (4 + 4)                    # acc2 + shortcut f32
                 + (TH + 2) * WoP * max(Cinp, Cp) * 2 * 2)    # tap patch buffers
        return int((inp + outp + wgt + y1pad + temps) * 1.15) + (2 << 20)

    if row_band is None:
        sel = 1
        for d in range(1, Ho + 1):
            if Ho % d == 0 and vmem_estimate(d) <= budget:
                sel = d
        row_band = sel
    TH = int(row_band)
    assert Ho % TH == 0, "row_band must divide the output height"
    NB = Ho // TH
    est = vmem_estimate(TH)
    vmem_limit = int(min(cap - (2 << 20), max(est + (8 << 20), 32 << 20)))

    # ------- fold eval-mode BN into conv weights / biases, pad channels -------
    s1, b1 = _bn_fold(bn1)
    s2f, b2 = _bn_fold(bn2)

    w1t = jnp.transpose(w1, (2, 3, 1, 0))                                   # (3,3,Cin,C)
    w1t = jnp.pad(w1t, ((0, 0), (0, 0), (0, Cinp - Cin), (0, Cp - C)))
    w1col = (w1t * _pad_vec(s1, Cp)[None, None, None, :]).reshape(9 * Cinp, Cp)
    w1col = w1col.astype(jnp.bfloat16)

    w2t = jnp.transpose(w2, (2, 3, 1, 0))                                   # (3,3,C,C)
    w2t = jnp.pad(w2t, ((0, 0), (0, 0), (0, Cp - C), (0, Cp - C)))
    w2col = (w2t * _pad_vec(s2f, Cp)[None, None, None, :]).reshape(9 * Cp, Cp)
    w2col = w2col.astype(jnp.bfloat16)

    b1p = _pad_vec(b1, Cp).reshape(1, Cp).astype(jnp.float32)
    b2p = _pad_vec(b2, Cp).reshape(1, Cp).astype(jnp.float32)

    if has_proj:
        ssc, bsc = _bn_fold(bns)
        wst = jnp.transpose(ws[:, :, 0, 0], (1, 0))                         # (Cin, C)
        wst = jnp.pad(wst, ((0, Cinp - Cin), (0, Cp - C)))
        wscol = (wst * _pad_vec(ssc, Cp)[None, :]).astype(jnp.bfloat16)
        bsp = _pad_vec(bsc, Cp).reshape(1, Cp).astype(jnp.float32)

    # ------- input: bf16, spatial pad, row bands (+halo), stride-phase split -------
    xb = x_nhwc.astype(jnp.bfloat16)
    Wp_tot = s * plane_w
    xpad = jnp.pad(xb, ((0, 0), (1 + s, 1 + s), (1, Wp_tot - W - 1),
                        (0, Cinp - Cin)))
    THI = s * (TH + 1) + 3
    bands = jnp.stack(
        [xpad[:, s * r * TH: s * r * TH + THI] for r in range(NB)], axis=1)
    THI_p = _round_up(THI, s)
    bands = jnp.pad(bands, ((0, 0), (0, 0), (0, THI_p - THI), (0, 0), (0, 0)))
    Hph = THI_p // s
    s2n = s * s
    xph = bands.reshape(N, NB, Hph, s, plane_w, s, Cinp)
    xph = jnp.transpose(xph, (0, 1, 3, 5, 2, 4, 6))      # (N,NB,ph_r,ph_c,Hph,Wph,C)
    xph = xph.reshape(N * NB * s2n, Hph, plane_w, Cinp)

    kernel = _make_basic_block_kernel(TH=TH, Wo=Wo, WoP=WoP, W1=W1, Cinp=Cinp,
                                      Cp=Cp, stride=s, NB=NB, has_proj=has_proj)

    flops = (2 * (TH + 2) * WoP * 9 * Cinp * Cp
             + 2 * TH * WoP * 9 * Cp * Cp
             + (2 * TH * WoP * Cinp * Cp if has_proj else 0)) * N * NB
    bytes_accessed = (int(xph.size) * 2 + N * Ho * WoP * Cp * out_isz
                      + (int(w1col.size) + int(w2col.size)) * 2
                      + (int(wscol.size) * 2 if has_proj else 0))
    cost = pl.CostEstimate(flops=int(flops), transcendentals=0,
                           bytes_accessed=int(bytes_accessed))

    def _run(single_buffer_weights):
        wkw = dict(pipeline_mode=pl.Buffered(1)) if single_buffer_weights else {}
        in_specs = [
            pl.BlockSpec((s2n, Hph, plane_w, Cinp),
                         lambda n, r: (n * NB + r, 0, 0, 0)),
            pl.BlockSpec((9 * Cinp, Cp), lambda n, r: (0, 0), **wkw),
            pl.BlockSpec((9 * Cp, Cp), lambda n, r: (0, 0), **wkw),
            pl.BlockSpec((1, Cp), lambda n, r: (0, 0), **wkw),
            pl.BlockSpec((1, Cp), lambda n, r: (0, 0), **wkw),
        ]
        args = [xph, w1col, w2col, b1p, b2p]
        if has_proj:
            in_specs += [pl.BlockSpec((Cinp, Cp), lambda n, r: (0, 0), **wkw),
                         pl.BlockSpec((1, Cp), lambda n, r: (0, 0), **wkw)]
            args += [wscol, bsp]
        return pl.pallas_call(
            kernel,
            out_shape=jax.ShapeDtypeStruct((N, Ho, WoP, Cp), out_dtype),
            grid_spec=pltpu.PrefetchScalarGridSpec(
                num_scalar_prefetch=0,
                grid=(N, NB),
                in_specs=in_specs,
                out_specs=pl.BlockSpec((1, TH, WoP, Cp),
                                       lambda n, r: (n, r, 0, 0)),
                scratch_shapes=[pltpu.VMEM((TH + 2, W1, Cp), jnp.bfloat16)],
            ),
            compiler_params=pltpu.CompilerParams(
                dimension_semantics=("parallel", "parallel"),
                vmem_limit_bytes=vmem_limit),
            cost_estimate=cost,
        )(*args)

    try:
        out = _run(True)
    except Exception:
        # Fallback if single-buffered (Buffered(1)) operands are not supported.
        out = _run(False)

    return out[:, :, :Wo, :C]                       # drop W / channel padding


def basic_block_forward(x_nchw, params, stride, *, row_band=None,
                        out_dtype=jnp.bfloat16):
    """NCHW wrapper matching the PyTorch BasicBlock layout."""
    x = jnp.transpose(x_nchw, (0, 2, 3, 1))
    y = basic_block_forward_nhwc(x, params, stride, row_band=row_band,
                                 out_dtype=out_dtype)
    return jnp.transpose(y, (0, 3, 1, 2))


def reference_forward(x, params, stride):
    """Pure-JAX reference (lax convs), matching PyTorch eval-mode BasicBlock."""
    w1, bn1, w2, bn2, ws, bns = params
    eps = 1e-5

    def bn(y, p):
        g, b, m, v = p
        g, b, m, v = (t[None, :, None, None] for t in (g, b, m, v))
        return g * (y - m) / jnp.sqrt(v + eps) + b

    dn = ('NCHW', 'OIHW', 'NCHW')
    y = lax.conv_general_dilated(x, w1, (stride, stride), ((1, 1), (1, 1)),
                                 dimension_numbers=dn)
    y = jnp.maximum(bn(y, bn1), 0.0)
    y = lax.conv_general_dilated(y, w2, (1, 1), ((1, 1), (1, 1)),
                                 dimension_numbers=dn)
    y = bn(y, bn2)
    if ws is not None:
        s = lax.conv_general_dilated(x, ws, (stride, stride), ((0, 0), (0, 0)),
                                     dimension_numbers=dn)
        s = bn(s, bns)
    else:
        s = x
    return jnp.maximum(y + s, 0.0)


if __name__ == "__main__":
    key = jax.random.PRNGKey(0)

    def rand_bn(keys, c):
        return (1.0 + 0.1 * jax.random.normal(keys[0], (c,), jnp.float32),
                0.1 * jax.random.normal(keys[1], (c,), jnp.float32),
                0.1 * jax.random.normal(keys[2], (c,), jnp.float32),
                1.0 + 0.1 * jnp.abs(jax.random.normal(keys[3], (c,), jnp.float32)))

    def check(name, x, params, stride, row_band):
        out = jax.block_until_ready(
            basic_block_forward(x, params, stride, row_band=row_band))
        ref = reference_forward(x, params, stride)
        assert out.shape == ref.shape, (name, out.shape, ref.shape)
        err = float(jnp.max(jnp.abs(out.astype(jnp.float32) - ref)))
        scale = float(jnp.max(jnp.abs(ref))) + 1.0
        assert err <= 3e-2 * scale, f"{name}: max abs err = {err} (scale {scale})"

    # ---- projection-shortcut block params (stride 2, Cin != Cout) ----
    N, Cin, Cout = 2, 4, 8
    k = jax.random.split(key, 17)
    w1 = 0.2 * jax.random.normal(k[0], (Cout, Cin, 3, 3), jnp.float32)
    bn1 = rand_bn(k[1:5], Cout)
    w2 = 0.2 * jax.random.normal(k[5], (Cout, Cout, 3, 3), jnp.float32)
    bn2 = rand_bn(k[6:10], Cout)
    ws = 0.2 * jax.random.normal(k[10], (Cout, Cin, 1, 1), jnp.float32)
    bns = rand_bn(k[11:15], Cout)
    params_proj = (w1, bn1, w2, bn2, ws, bns)

    # A: unaligned output width (Wo = 7), auto row band (whole image, NB = 1).
    xa = jax.random.normal(k[15], (N, Cin, 14, 14), jnp.float32)
    check("proj s2 14x14 auto-band", xa, params_proj, 2, None)

    # B: aligned output width (Wo = 8), explicit multi-band grid (NB = 2).
    xb = jax.random.normal(k[16], (N, Cin, 16, 16), jnp.float32)
    check("proj s2 16x16 band4", xb, params_proj, 2, 4)

    # ---- identity-shortcut block (stride 1, Cin == Cout), unaligned width, NB = 2 ----
    Cid = 8
    k2 = jax.random.split(k[16], 12)
    w1b = 0.2 * jax.random.normal(k2[0], (Cid, Cid, 3, 3), jnp.float32)
    bn1b = rand_bn(k2[1:5], Cid)
    w2b = 0.2 * jax.random.normal(k2[5], (Cid, Cid, 3, 3), jnp.float32)
    bn2b = rand_bn(k2[6:10], Cid)
    params_id = (w1b, bn1b, w2b, bn2b, None, None)
    xc = jax.random.normal(k2[10], (N, Cid, 14, 14), jnp.float32)
    check("identity s1 14x14 band7", xc, params_id, 1, 7)

    print("KERNEL_OK")
</pallas_src>

<mosaic_0001>
module attributes {stable_mosaic.version = 11 : i64} {
  func.func @kernel(%arg0: i32, %arg1: i32, %arg2: memref<4x10x9x128xbf16, #tpu.memory_space<vmem>>, %arg3: memref<1152x128xbf16, #tpu.memory_space<vmem>>, %arg4: memref<1152x128xbf16, #tpu.memory_space<vmem>>, %arg5: memref<1x128xf32, #tpu.memory_space<vmem>>, %arg6: memref<1x128xf32, #tpu.memory_space<vmem>>, %arg7: memref<128x128xbf16, #tpu.memory_space<vmem>>, %arg8: memref<1x128xf32, #tpu.memory_space<vmem>>, %arg9: memref<1x7x8x128xbf16, #tpu.memory_space<vmem>>, %arg10: memref<9x24x128xbf16, #tpu.memory_space<vmem>>) attributes {dimension_semantics = [#tpu.dimension_semantics<parallel>, #tpu.dimension_semantics<parallel>], iteration_bounds = array<i64: 2, 1>, scalar_prefetch = 0 : i64, scratch_operands = 1 : i64, tpu.core_type = #tpu.core_type<tc>, window_params = [{transform_indices = @transform_0, window_bounds = array<i64: 4, 10, 9, 128>}, {pipeline_mode = #tpu.pipeline_mode<synchronous>, transform_indices = @transform_1, window_bounds = array<i64: 1152, 128>}, {pipeline_mode = #tpu.pipeline_mode<synchronous>, transform_indices = @transform_2, window_bounds = array<i64: 1152, 128>}, {pipeline_mode = #tpu.pipeline_mode<synchronous>, transform_indices = @transform_3, window_bounds = array<i64: 1, 128>}, {pipeline_mode = #tpu.pipeline_mode<synchronous>, transform_indices = @transform_4, window_bounds = array<i64: 1, 128>}, {pipeline_mode = #tpu.pipeline_mode<synchronous>, transform_indices = @transform_5, window_bounds = array<i64: 128, 128>}, {pipeline_mode = #tpu.pipeline_mode<synchronous>, transform_indices = @transform_6, window_bounds = array<i64: 1, 128>}, {transform_indices = @transform_7, window_bounds = array<i64: 1, 7, 8, 128>}]} {
    %c0 = arith.constant 0 : index
    %c0_0 = arith.constant 0 : index
    %c0_1 = arith.constant 0 : index
    %c0_2 = arith.constant 0 : index
    %0 = vector.load %arg2[%c0, %c0_0, %c0_1, %c0_2] : memref<4x10x9x128xbf16, #tpu.memory_space<vmem>>, vector<1x9x8x128xbf16>
    %1 = vector.shape_cast %0 : vector<1x9x8x128xbf16> to vector<9x8x128xbf16>
    %2 = vector.shape_cast %1 : vector<9x8x128xbf16> to vector<72x128xbf16>
    %c0_3 = arith.constant 0 : index
    %c0_4 = arith.constant 0 : index
    %3 = vector.load %arg3[%c0_3, %c0_4] : memref<1152x128xbf16, #tpu.memory_space<vmem>>, vector<128x128xbf16>
    %cst = arith.constant dense<0.000000e+00> : vector<72x128xf32>
    %4 = tpu.matmul %2, %3, %cst {dimension_numbers = #tpu.dot_dimension_numbers<[1], [0], [0], [1], [0, 0, 1, 1], [], []>} : vector<72x128xbf16>, vector<128x128xbf16>, vector<72x128xf32> -> vector<72x128xf32>
    %c1 = arith.constant 1 : index
    %c0_5 = arith.constant 0 : index
    %c0_6 = arith.constant 0 : index
    %c0_7 = arith.constant 0 : index
    %5 = vector.load %arg2[%c1, %c0_5, %c0_6, %c0_7] : memref<4x10x9x128xbf16, #tpu.memory_space<vmem>>, vector<1x9x8x128xbf16>
    %6 = vector.shape_cast %5 : vector<1x9x8x128xbf16> to vector<9x8x128xbf16>
    %7 = vector.shape_cast %6 : vector<9x8x128xbf16> to vector<72x128xbf16>
    %c128 = arith.constant 128 : index
    %c0_8 = arith.constant 0 : index
    %8 = vector.load %arg3[%c128, %c0_8] : memref<1152x128xbf16, #tpu.memory_space<vmem>>, vector<128x128xbf16>
    %cst_9 = arith.constant dense<0.000000e+00> : vector<72x128xf32>
    %9 = tpu.matmul %7, %8, %cst_9 {dimension_numbers = #tpu.dot_dimension_numbers<[1], [0], [0], [1], [0, 0, 1, 1], [], []>} : vector<72x128xbf16>, vector<128x128xbf16>, vector<72x128xf32> -> vector<72x128xf32>
    %10 = arith.addf %4, %9 : vector<72x128xf32>
    %c0_10 = arith.constant 0 : index
    %c0_11 = arith.constant 0 : index
    %c1_12 = arith.constant 1 : index
    %c0_13 = arith.constant 0 : index
    %11 = vector.load %arg2[%c0_10, %c0_11, %c1_12, %c0_13] : memref<4x10x9x128xbf16, #tpu.memory_space<vmem>>, vector<1x9x8x128xbf16>
    %12 = vector.shape_cast %11 : vector<1x9x8x128xbf16> to vector<9x8x128xbf16>
    %13 = vector.shape_cast %12 : vector<9x8x128xbf16> to vector<72x128xbf16>
    %c256 = arith.constant 256 : index
    %c0_14 = arith.constant 0 : index
    %14 = vector.load %arg3[%c256, %c0_14] : memref<1152x128xbf16, #tpu.memory_space<vmem>>, vector<128x128xbf16>
    %cst_15 = arith.constant dense<0.000000e+00> : vector<72x128xf32>
    %15 = tpu.matmul %13, %14, %cst_15 {dimension_numbers = #tpu.dot_dimension_numbers<[1], [0], [0], [1], [0, 0, 1, 1], [], []>} : vector<72x128xbf16>, vector<128x128xbf16>, vector<72x128xf32> -> vector<72x128xf32>
    %16 = arith.addf %10, %15 : vector<72x128xf32>
    %c2 = arith.constant 2 : index
    %c0_16 = arith.constant 0 : index
    %c0_17 = arith.constant 0 : index
    %c0_18 = arith.constant 0 : index
    %17 = vector.load %arg2[%c2, %c0_16, %c0_17, %c0_18] : memref<4x10x9x128xbf16, #tpu.memory_space<vmem>>, vector<1x9x8x128xbf16>
    %18 = vector.shape_cast %17 : vector<1x9x8x128xbf16> to vector<9x8x128xbf16>
    %19 = vector.shape_cast %18 : vector<9x8x128xbf16> to vector<72x128xbf16>
    %c384 = arith.constant 384 : index
    %c0_19 = arith.constant 0 : index
    %20 = vector.load %arg3[%c384, %c0_19] : memref<1152x128xbf16, #tpu.memory_space<vmem>>, vector<128x128xbf16>
    %cst_20 = arith.constant dense<0.000000e+00> : vector<72x128xf32>
    %21 = tpu.matmul %19, %20, %cst_20 {dimension_numbers = #tpu.dot_dimension_numbers<[1], [0], [0], [1], [0, 0, 1, 1], [], []>} : vector<72x128xbf16>, vector<128x128xbf16>, vector<72x128xf32> -> vector<72x128xf32>
    %22 = arith.addf %16, %21 : vector<72x128xf32>
    %c3 = arith.constant 3 : index
    %c0_21 = arith.constant 0 : index
    %c0_22 = arith.constant 0 : index
    %c0_23 = arith.constant 0 : index
    %23 = vector.load %arg2[%c3, %c0_21, %c0_22, %c0_23] : memref<4x10x9x128xbf16, #tpu.memory_space<vmem>>, vector<1x9x8x128xbf16>
    %24 = vector.shape_cast %23 : vector<1x9x8x128xbf16> to vector<9x8x128xbf16>
    %25 = vector.shape_cast %24 : vector<9x8x128xbf16> to vector<72x128xbf16>
    %c512 = arith.constant 512 : index
    %c0_24 = arith.constant 0 : index
    %26 = vector.load %arg3[%c512, %c0_24] : memref<1152x128xbf16, #tpu.memory_space<vmem>>, vector<128x128xbf16>
    %cst_25 = arith.constant dense<0.000000e+00> : vector<72x128xf32>
    %27 = tpu.matmul %25, %26, %cst_25 {dimension_numbers = #tpu.dot_dimension_numbers<[1], [0], [0], [1], [0, 0, 1, 1], [], []>} : vector<72x128xbf16>, vector<128x128xbf16>, vector<72x128xf32> -> vector<72x128xf32>
    %28 = arith.addf %22, %27 : vector<72x128xf32>
    %c2_26 = arith.constant 2 : index
    %c0_27 = arith.constant 0 : index
    %c1_28 = arith.constant 1 : index
    %c0_29 = arith.constant 0 : index
    %29 = vector.load %arg2[%c2_26, %c0_27, %c1_28, %c0_29] : memref<4x10x9x128xbf16, #tpu.memory_space<vmem>>, vector<1x9x8x128xbf16>
    %30 = vector.shape_cast %29 : vector<1x9x8x128xbf16> to vector<9x8x128xbf16>
    %31 = vector.shape_cast %30 : vector<9x8x128xbf16> to vector<72x128xbf16>
    %c640 = arith.constant 640 : index
    %c0_30 = arith.constant 0 : index
    %32 = vector.load %arg3[%c640, %c0_30] : memref<1152x128xbf16, #tpu.memory_space<vmem>>, vector<128x128xbf16>
    %cst_31 = arith.constant dense<0.000000e+00> : vector<72x128xf32>
    %33 = tpu.matmul %31, %32, %cst_31 {dimension_numbers = #tpu.dot_dimension_numbers<[1], [0], [0], [1], [0, 0, 1, 1], [], []>} : vector<72x128xbf16>, vector<128x128xbf16>, vector<72x128xf32> -> vector<72x128xf32>
    %34 = arith.addf %28, %33 : vector<72x128xf32>
    %c0_32 = arith.constant 0 : index
    %c1_33 = arith.constant 1 : index
    %c0_34 = arith.constant 0 : index
    %c0_35 = arith.constant 0 : index
    %35 = vector.load %arg2[%c0_32, %c1_33, %c0_34, %c0_35] : memref<4x10x9x128xbf16, #tpu.memory_space<vmem>>, vector<1x9x8x128xbf16>
    %36 = vector.shape_cast %35 : vector<1x9x8x128xbf16> to vector<9x8x128xbf16>
    %37 = vector.shape_cast %36 : vector<9x8x128xbf16> to vector<72x128xbf16>
    %c768 = arith.constant 768 : index
    %c0_36 = arith.constant 0 : index
    %38 = vector.load %arg3[%c768, %c0_36] : memref<1152x128xbf16, #tpu.memory_space<vmem>>, vector<128x128xbf16>
    %cst_37 = arith.constant dense<0.000000e+00> : vector<72x128xf32>
    %39 = tpu.matmul %37, %38, %cst_37 {dimension_numbers = #tpu.dot_dimension_numbers<[1], [0], [0], [1], [0, 0, 1, 1], [], []>} : vector<72x128xbf16>, vector<128x128xbf16>, vector<72x128xf32> -> vector<72x128xf32>
    %40 = arith.addf %34, %39 : vector<72x128xf32>
    %c1_38 = arith.constant 1 : index
    %c1_39 = arith.constant 1 : index
    %c0_40 = arith.constant 0 : index
    %c0_41 = arith.constant 0 : index
    %41 = vector.load %arg2[%c1_38, %c1_39, %c0_40, %c0_41] : memref<4x10x9x128xbf16, #tpu.memory_space<vmem>>, vector<1x9x8x128xbf16>
    %42 = vector.shape_cast %41 : vector<1x9x8x128xbf16> to vector<9x8x128xbf16>
    %43 = vector.shape_cast %42 : vector<9x8x128xbf16> to vector<72x128xbf16>
    %c896 = arith.constant 896 : index
    %c0_42 = arith.constant 0 : index
    %44 = vector.load %arg3[%c896, %c0_42] : memref<1152x128xbf16, #tpu.memory_space<vmem>>, vector<128x128xbf16>
    %cst_43 = arith.constant dense<0.000000e+00> : vector<72x128xf32>
    %45 = tpu.matmul %43, %44, %cst_43 {dimension_numbers = #tpu.dot_dimension_numbers<[1], [0], [0], [1], [0, 0, 1, 1], [], []>} : vector<72x128xbf16>, vector<128x128xbf16>, vector<72x128xf32> -> vector<72x128xf32>
    %46 = arith.addf %40, %45 : vector<72x128xf32>
    %c0_44 = arith.constant 0 : index
    %c1_45 = arith.constant 1 : index
    %c1_46 = arith.constant 1 : index
    %c0_47 = arith.constant 0 : index
    %47 = vector.load %arg2[%c0_44, %c1_45, %c1_46, %c0_47] : memref<4x10x9x128xbf16, #tpu.memory_space<vmem>>, vector<1x9x8x128xbf16>
    %48 = vector.shape_cast %47 : vector<1x9x8x128xbf16> to vector<9x8x128xbf16>
    %49 = vector.shape_cast %48 : vector<9x8x128xbf16> to vector<72x128xbf16>
    %c1024 = arith.constant 1024 : index
    %c0_48 = arith.constant 0 : index
    %50 = vector.load %arg3[%c1024, %c0_48] : memref<1152x128xbf16, #tpu.memory_space<vmem>>, vector<128x128xbf16>
    %cst_49 = arith.constant dense<0.000000e+00> : vector<72x128xf32>
    %51 = tpu.matmul %49, %50, %cst_49 {dimension_numbers = #tpu.dot_dimension_numbers<[1], [0], [0], [1], [0, 0, 1, 1], [], []>} : vector<72x128xbf16>, vector<128x128xbf16>, vector<72x128xf32> -> vector<72x128xf32>
    %52 = arith.addf %46, %51 : vector<72x128xf32>
    %c0_50 = arith.constant 0 : index
    %c0_51 = arith.constant 0 : index
    %53 = vector.load %arg5[%c0_50, %c0_51] : memref<1x128xf32, #tpu.memory_space<vmem>>, vector<1x128xf32>
    %54 = vector.broadcast %53 : vector<1x128xf32> to vector<72x128xf32>
    %55 = arith.addf %52, %54 : vector<72x128xf32>
    %cst_52 = arith.constant 0.000000e+00 : f32
    %56 = vector.broadcast %cst_52 : f32 to vector<72x128xf32>
    %57 = arith.maximumf %55, %56 : vector<72x128xf32>
    %58 = arith.truncf %57 : vector<72x128xf32> to vector<72x128xbf16>
    %59 = vector.shape_cast %58 : vector<72x128xbf16> to vector<9x8x128xbf16>
    %c0_53 = arith.constant 0 : index
    %c8 = arith.constant 8 : index
    %c0_54 = arith.constant 0 : index
    %60 = vector.load %arg10[%c0_53, %c8, %c0_54] : memref<9x24x128xbf16, #tpu.memory_space<vmem>>, vector<9x8x128xbf16>
    tpu.vector_store %arg10[%c0_53, %c8, %c0_54], %59 {strides = array<i32>} : memref<9x24x128xbf16, #tpu.memory_space<vmem>>, vector<9x8x128xbf16>,
    %cst_55 = arith.constant 0.000000e+00 : bf16
    %61 = vector.broadcast %cst_55 : bf16 to vector<9x8x128xbf16>
    %c0_56 = arith.constant 0 : index
    %c0_57 = arith.constant 0 : index
    %c0_58 = arith.constant 0 : index
    %62 = vector.load %arg10[%c0_56, %c0_57, %c0_58] : memref<9x24x128xbf16, #tpu.memory_space<vmem>>, vector<9x8x128xbf16>
    tpu.vector_store %arg10[%c0_56, %c0_57, %c0_58], %61 {strides = array<i32>} : memref<9x24x128xbf16, #tpu.memory_space<vmem>>, vector<9x8x128xbf16>,
    %cst_59 = arith.constant 0.000000e+00 : bf16
    %63 = vector.broadcast %cst_59 : bf16 to vector<9x9x128xbf16>
    %c0_60 = arith.constant 0 : index
    %c15 = arith.constant 15 : index
    %c0_61 = arith.constant 0 : index
    %64 = vector.load %arg10[%c0_60, %c15, %c0_61] : memref<9x24x128xbf16, #tpu.memory_space<vmem>>, vector<9x9x128xbf16>
    tpu.vector_store %arg10[%c0_60, %c15, %c0_61], %63 {strides = array<i32>} : memref<9x24x128xbf16, #tpu.memory_space<vmem>>, vector<9x9x128xbf16>,
    %cst_62 = arith.constant 0.000000e+00 : bf16
    %65 = vector.broadcast %cst_62 : bf16 to vector<1x8x128xbf16>
    %c0_i32 = arith.constant 0 : i32
    %66 = arith.cmpi eq, %arg1, %c0_i32 : i32
    %67 = arith.extui %66 : i1 to i32
    %c0_i32_63 = arith.constant 0 : i32
    %68 = arith.cmpi ne, %67, %c0_i32_63 : i32
    scf.if %68 {
      %c0_134 = arith.constant 0 : index
      %c8_135 = arith.constant 8 : index
      %c0_136 = arith.constant 0 : index
      %135 = vector.load %arg10[%c0_134, %c8_135, %c0_136] : memref<9x24x128xbf16, #tpu.memory_space<vmem>>, vector<1x8x128xbf16>
      tpu.vector_store %arg10[%c0_134, %c8_135, %c0_136], %65 {strides = array<i32>} : memref<9x24x128xbf16, #tpu.memory_space<vmem>>, vector<1x8x128xbf16>,
    } else {
    }
    %c0_i32_64 = arith.constant 0 : i32
    %69 = arith.cmpi eq, %arg1, %c0_i32_64 : i32
    %70 = arith.extui %69 : i1 to i32
    %c0_i32_65 = arith.constant 0 : i32
    %71 = arith.cmpi ne, %70, %c0_i32_65 : i32
    scf.if %71 {
      %c8_134 = arith.constant 8 : index
      %c8_135 = arith.constant 8 : index
      %c0_136 = arith.constant 0 : index
      %135 = vector.load %arg10[%c8_134, %c8_135, %c0_136] : memref<9x24x128xbf16, #tpu.memory_space<vmem>>, vector<1x8x128xbf16>
      tpu.vector_store %arg10[%c8_134, %c8_135, %c0_136], %65 {strides = array<i32>} : memref<9x24x128xbf16, #tpu.memory_space<vmem>>, vector<1x8x128xbf16>,
    } else {
    }
    %c0_66 = arith.constant 0 : index
    %c7 = arith.constant 7 : index
    %c0_67 = arith.constant 0 : index
    %72 = vector.load %arg10[%c0_66, %c7, %c0_67] : memref<9x24x128xbf16, #tpu.memory_space<vmem>>, vector<7x8x128xbf16>
    %73 = vector.shape_cast %72 : vector<7x8x128xbf16> to vector<56x128xbf16>
    %c0_68 = arith.constant 0 : index
    %c0_69 = arith.constant 0 : index
    %74 = vector.load %arg4[%c0_68, %c0_69] : memref<1152x128xbf16, #tpu.memory_space<vmem>>, vector<128x128xbf16>
    %cst_70 = arith.constant dense<0.000000e+00> : vector<56x128xf32>
    %75 = tpu.matmul %73, %74, %cst_70 {dimension_numbers = #tpu.dot_dimension_numbers<[1], [0], [0], [1], [0, 0, 1, 1], [], []>} : vector<56x128xbf16>, vector<128x128xbf16>, vector<56x128xf32> -> vector<56x128xf32>
    %c0_71 = arith.constant 0 : index
    %c8_72 = arith.constant 8 : index
    %c0_73 = arith.constant 0 : index
    %76 = vector.load %arg10[%c0_71, %c8_72, %c0_73] : memref<9x24x128xbf16, #tpu.memory_space<vmem>>, vector<7x8x128xbf16>
    %77 = vector.shape_cast %76 : vector<7x8x128xbf16> to vector<56x128xbf16>
    %c128_74 = arith.constant 128 : index
    %c0_75 = arith.constant 0 : index
    %78 = vector.load %arg4[%c128_74, %c0_75] : memref<1152x128xbf16, #tpu.memory_space<vmem>>, vector<128x128xbf16>
    %cst_76 = arith.constant dense<0.000000e+00> : vector<56x128xf32>
    %79 = tpu.matmul %77, %78, %cst_76 {dimension_numbers = #tpu.dot_dimension_numbers<[1], [0], [0], [1], [0, 0, 1, 1], [], []>} : vector<56x128xbf16>, vector<128x128xbf16>, vector<56x128xf32> -> vector<56x128xf32>
    %80 = arith.addf %75, %79 : vector<56x128xf32>
    %c0_77 = arith.constant 0 : index
    %c9 = arith.constant 9 : index
    %c0_78 = arith.constant 0 : index
    %81 = vector.load %arg10[%c0_77, %c9, %c0_78] : memref<9x24x128xbf16, #tpu.memory_space<vmem>>, vector<7x8x128xbf16>
    %82 = vector.shape_cast %81 : vector<7x8x128xbf16> to vector<56x128xbf16>
    %c256_79 = arith.constant 256 : index
    %c0_80 = arith.constant 0 : index
    %83 = vector.load %arg4[%c256_79, %c0_80] : memref<1152x128xbf16, #tpu.memory_space<vmem>>, vector<128x128xbf16>
    %cst_81 = arith.constant dense<0.000000e+00> : vector<56x128xf32>
    %84 = tpu.matmul %82, %83, %cst_81 {dimension_numbers = #tpu.dot_dimension_numbers<[1], [0], [0], [1], [0, 0, 1, 1], [], []>} : vector<56x128xbf16>, vector<128x128xbf16>, vector<56x128xf32> -> vector<56x128xf32>
    %85 = arith.addf %80, %84 : vector<56x128xf32>
    %c1_82 = arith.constant 1 : index
    %c7_83 = arith.constant 7 : index
    %c0_84 = arith.constant 0 : index
    %86 = vector.load %arg10[%c1_82, %c7_83, %c0_84] : memref<9x24x128xbf16, #tpu.memory_space<vmem>>, vector<7x8x128xbf16>
    %87 = vector.shape_cast %86 : vector<7x8x128xbf16> to vector<56x128xbf16>
    %c384_85 = arith.constant 384 : index
    %c0_86 = arith.constant 0 : index
    %88 = vector.load %arg4[%c384_85, %c0_86] : memref<1152x128xbf16, #tpu.memory_space<vmem>>, vector<128x128xbf16>
    %cst_87 = arith.constant dense<0.000000e+00> : vector<56x128xf32>
    %89 = tpu.matmul %87, %88, %cst_87 {dimension_numbers = #tpu.dot_dimension_numbers<[1], [0], [0], [1], [0, 0, 1, 1], [], []>} : vector<56x128xbf16>, vector<128x128xbf16>, vector<56x128xf32> -> vector<56x128xf32>
    %90 = arith.addf %85, %89 : vector<56x128xf32>
    %c1_88 = arith.constant 1 : index
    %c8_89 = arith.constant 8 : index
    %c0_90 = arith.constant 0 : index
    %91 = vector.load %arg10[%c1_88, %c8_89, %c0_90] : memref<9x24x128xbf16, #tpu.memory_space<vmem>>, vector<7x8x128xbf16>
    %92 = vector.shape_cast %91 : vector<7x8x128xbf16> to vector<56x128xbf16>
    %c512_91 = arith.constant 512 : index
    %c0_92 = arith.constant 0 : index
    %93 = vector.load %arg4[%c512_91, %c0_92] : memref<1152x128xbf16, #tpu.memory_space<vmem>>, vector<128x128xbf16>
    %cst_93 = arith.constant dense<0.000000e+00> : vector<56x128xf32>
    %94 = tpu.matmul %92, %93, %cst_93 {dimension_numbers = #tpu.dot_dimension_numbers<[1], [0], [0], [1], [0, 0, 1, 1], [], []>} : vector<56x128xbf16>, vector<128x128xbf16>, vector<56x128xf32> -> vector<56x128xf32>
    %95 = arith.addf %90, %94 : vector<56x128xf32>
    %c1_94 = arith.constant 1 : index
    %c9_95 = arith.constant 9 : index
    %c0_96 = arith.constant 0 : index
    %96 = vector.load %arg10[%c1_94, %c9_95, %c0_96] : memref<9x24x128xbf16, #tpu.memory_space<vmem>>, vector<7x8x128xbf16>
    %97 = vector.shape_cast %96 : vector<7x8x128xbf16> to vector<56x128xbf16>
    %c640_97 = arith.constant 640 : index
    %c0_98 = arith.constant 0 : index
    %98 = vector.load %arg4[%c640_97, %c0_98] : memref<1152x128xbf16, #tpu.memory_space<vmem>>, vector<128x128xbf16>
    %cst_99 = arith.constant dense<0.000000e+00> : vector<56x128xf32>
    %99 = tpu.matmul %97, %98, %cst_99 {dimension_numbers = #tpu.dot_dimension_numbers<[1], [0], [0], [1], [0, 0, 1, 1], [], []>} : vector<56x128xbf16>, vector<128x128xbf16>, vector<56x128xf32> -> vector<56x128xf32>
    %100 = arith.addf %95, %99 : vector<56x128xf32>
    %c2_100 = arith.constant 2 : index
    %c7_101 = arith.constant 7 : index
    %c0_102 = arith.constant 0 : index
    %101 = vector.load %arg10[%c2_100, %c7_101, %c0_102] : memref<9x24x128xbf16, #tpu.memory_space<vmem>>, vector<7x8x128xbf16>
    %102 = vector.shape_cast %101 : vector<7x8x128xbf16> to vector<56x128xbf16>
    %c768_103 = arith.constant 768 : index
    %c0_104 = arith.constant 0 : index
    %103 = vector.load %arg4[%c768_103, %c0_104] : memref<1152x128xbf16, #tpu.memory_space<vmem>>, vector<128x128xbf16>
    %cst_105 = arith.constant dense<0.000000e+00> : vector<56x128xf32>
    %104 = tpu.matmul %102, %103, %cst_105 {dimension_numbers = #tpu.dot_dimension_numbers<[1], [0], [0], [1], [0, 0, 1, 1], [], []>} : vector<56x128xbf16>, vector<128x128xbf16>, vector<56x128xf32> -> vector<56x128xf32>
    %105 = arith.addf %100, %104 : vector<56x128xf32>
    %c2_106 = arith.constant 2 : index
    %c8_107 = arith.constant 8 : index
    %c0_108 = arith.constant 0 : index
    %106 = vector.load %arg10[%c2_106, %c8_107, %c0_108] : memref<9x24x128xbf16, #tpu.memory_space<vmem>>, vector<7x8x128xbf16>
    %107 = vector.shape_cast %106 : vector<7x8x128xbf16> to vector<56x128xbf16>
    %c896_109 = arith.constant 896 : index
    %c0_110 = arith.constant 0 : index
    %108 = vector.load %arg4[%c896_109, %c0_110] : memref<1152x128xbf16, #tpu.memory_space<vmem>>, vector<128x128xbf16>
    %cst_111 = arith.constant dense<0.000000e+00> : vector<56x128xf32>
    %109 = tpu.matmul %107, %108, %cst_111 {dimension_numbers = #tpu.dot_dimension_numbers<[1], [0], [0], [1], [0, 0, 1, 1], [], []>} : vector<56x128xbf16>, vector<128x128xbf16>, vector<56x128xf32> -> vector<56x128xf32>
    %110 = arith.addf %105, %109 : vector<56x128xf32>
    %c2_112 = arith.constant 2 : index
    %c9_113 = arith.constant 9 : index
    %c0_114 = arith.constant 0 : index
    %111 = vector.load %arg10[%c2_112, %c9_113, %c0_114] : memref<9x24x128xbf16, #tpu.memory_space<vmem>>, vector<7x8x128xbf16>
    %112 = vector.shape_cast %111 : vector<7x8x128xbf16> to vector<56x128xbf16>
    %c1024_115 = arith.constant 1024 : index
    %c0_116 = arith.constant 0 : index
    %113 = vector.load %arg4[%c1024_115, %c0_116] : memref<1152x128xbf16, #tpu.memory_space<vmem>>, vector<128x128xbf16>
    %cst_117 = arith.constant dense<0.000000e+00> : vector<56x128xf32>
    %114 = tpu.matmul %112, %113, %cst_117 {dimension_numbers = #tpu.dot_dimension_numbers<[1], [0], [0], [1], [0, 0, 1, 1], [], []>} : vector<56x128xbf16>, vector<128x128xbf16>, vector<56x128xf32> -> vector<56x128xf32>
    %115 = arith.addf %110, %114 : vector<56x128xf32>
    %c0_118 = arith.constant 0 : index
    %c0_119 = arith.constant 0 : index
    %116 = vector.load %arg6[%c0_118, %c0_119] : memref<1x128xf32, #tpu.memory_space<vmem>>, vector<1x128xf32>
    %117 = vector.broadcast %116 : vector<1x128xf32> to vector<56x128xf32>
    %118 = arith.addf %115, %117 : vector<56x128xf32>
    %c3_120 = arith.constant 3 : index
    %c1_121 = arith.constant 1 : index
    %c0_122 = arith.constant 0 : index
    %c0_123 = arith.constant 0 : index
    %119 = vector.load %arg2[%c3_120, %c1_121, %c0_122, %c0_123] : memref<4x10x9x128xbf16, #tpu.memory_space<vmem>>, vector<1x7x8x128xbf16>
    %120 = vector.shape_cast %119 : vector<1x7x8x128xbf16> to vector<7x8x128xbf16>
    %121 = vector.shape_cast %120 : vector<7x8x128xbf16> to vector<56x128xbf16>
    %c0_124 = arith.constant 0 : index
    %c0_125 = arith.constant 0 : index
    %122 = vector.load %arg7[%c0_124, %c0_125] : memref<128x128xbf16, #tpu.memory_space<vmem>>, vector<128x128xbf16>
    %cst_126 = arith.constant dense<0.000000e+00> : vector<56x128xf32>
    %123 = tpu.matmul %121, %122, %cst_126 {dimension_numbers = #tpu.dot_dimension_numbers<[1], [0], [0], [1], [0, 0, 1, 1], [], []>} : vector<56x128xbf16>, vector<128x128xbf16>, vector<56x128xf32> -> vector<56x128xf32>
    %c0_127 = arith.constant 0 : index
    %c0_128 = arith.constant 0 : index
    %124 = vector.load %arg8[%c0_127, %c0_128] : memref<1x128xf32, #tpu.memory_space<vmem>>, vector<1x128xf32>
    %125 = vector.broadcast %124 : vector<1x128xf32> to vector<56x128xf32>
    %126 = arith.addf %123, %125 : vector<56x128xf32>
    %127 = arith.addf %118, %126 : vector<56x128xf32>
    %cst_129 = arith.constant 0.000000e+00 : f32
    %128 = vector.broadcast %cst_129 : f32 to vector<56x128xf32>
    %129 = arith.maximumf %127, %128 : vector<56x128xf32>
    %130 = vector.shape_cast %129 : vector<56x128xf32> to vector<7x8x128xf32>
    %131 = arith.truncf %130 : vector<7x8x128xf32> to vector<7x8x128xbf16>
    %c0_130 = arith.constant 0 : index
    %c0_131 = arith.constant 0 : index
    %c0_132 = arith.constant 0 : index
    %c0_133 = arith.constant 0 : index
    %132 = vector.load %arg9[%c0_130, %c0_131, %c0_132, %c0_133] : memref<1x7x8x128xbf16, #tpu.memory_space<vmem>>, vector<1x7x8x128xbf16>
    %133 = vector.shape_cast %132 : vector<1x7x8x128xbf16> to vector<7x8x128xbf16>
    %134 = vector.shape_cast %131 : vector<7x8x128xbf16> to vector<1x7x8x128xbf16>
    tpu.vector_store %arg9[%c0_130, %c0_131, %c0_132, %c0_133], %134 {strides = array<i32>} : memref<1x7x8x128xbf16, #tpu.memory_space<vmem>>, vector<1x7x8x128xbf16>,
    return
  }
  func.func @transform_0(%arg0: i32, %arg1: i32) -> (i32, i32, i32, i32) {
    %c1_i32 = arith.constant 1 : i32
    %0 = arith.muli %arg0, %c1_i32 : i32
    %1 = arith.addi %0, %arg1 : i32
    %c0_i32 = arith.constant 0 : i32
    %c0_i32_0 = arith.constant 0 : i32
    %c0_i32_1 = arith.constant 0 : i32
    %c0_i32_2 = arith.constant 0 : i32
    return %1, %c0_i32, %c0_i32_0, %c0_i32_1 : i32, i32, i32, i32
  }
  func.func @transform_1(%arg0: i32, %arg1: i32) -> (i32, i32) {
    %c0_i32 = arith.constant 0 : i32
    %c0_i32_0 = arith.constant 0 : i32
    %c0_i32_1 = arith.constant 0 : i32
    return %c0_i32, %c0_i32_0 : i32, i32
  }
  func.func @transform_2(%arg0: i32, %arg1: i32) -> (i32, i32) {
    %c0_i32 = arith.constant 0 : i32
    %c0_i32_0 = arith.constant 0 : i32
    %c0_i32_1 = arith.constant 0 : i32
    return %c0_i32, %c0_i32_0 : i32, i32
  }
  func.func @transform_3(%arg0: i32, %arg1: i32) -> (i32, i32) {
    %c0_i32 = arith.constant 0 : i32
    %c0_i32_0 = arith.constant 0 : i32
    %c0_i32_1 = arith.constant 0 : i32
    return %c0_i32, %c0_i32_0 : i32, i32
  }
  func.func @transform_4(%arg0: i32, %arg1: i32) -> (i32, i32) {
    %c0_i32 = arith.constant 0 : i32
    %c0_i32_0 = arith.constant 0 : i32
    %c0_i32_1 = arith.constant 0 : i32
    return %c0_i32, %c0_i32_0 : i32, i32
  }
  func.func @transform_5(%arg0: i32, %arg1: i32) -> (i32, i32) {
    %c0_i32 = arith.constant 0 : i32
    %c0_i32_0 = arith.constant 0 : i32
    %c0_i32_1 = arith.constant 0 : i32
    return %c0_i32, %c0_i32_0 : i32, i32
  }
  func.func @transform_6(%arg0: i32, %arg1: i32) -> (i32, i32) {
    %c0_i32 = arith.constant 0 : i32
    %c0_i32_0 = arith.constant 0 : i32
    %c0_i32_1 = arith.constant 0 : i32
    return %c0_i32, %c0_i32_0 : i32, i32
  }
  func.func @transform_7(%arg0: i32, %arg1: i32) -> (i32, i32, i32, i32) {
    %c0_i32 = arith.constant 0 : i32
    %c0_i32_0 = arith.constant 0 : i32
    %c0_i32_1 = arith.constant 0 : i32
    return %arg0, %arg1, %c0_i32, %c0_i32_0 : i32, i32, i32, i32
  }
}

module attributes {stable_mosaic.version = 11 : i64} {
  func.func @kernel(%arg0: i32, %arg1: i32, %arg2: memref<4x10x9x128xbf16, #tpu.memory_space<vmem>>, %arg3: memref<1152x128xbf16, #tpu.memory_space<vmem>>, %arg4: memref<1152x128xbf16, #tpu.memory_space<vmem>>, %arg5: memref<1x128xf32, #tpu.memory_space<vmem>>, %arg6: memref<1x128xf32, #tpu.memory_space<vmem>>, %arg7: memref<128x128xbf16, #tpu.memory_space<vmem>>, %arg8: memref<1x128xf32, #tpu.memory_space<vmem>>, %arg9: memref<1x7x8x128xbf16, #tpu.memory_space<vmem>>, %arg10: memref<9x24x128xbf16, #tpu.memory_space<vmem>>) attributes {dimension_semantics = [#tpu.dimension_semantics<parallel>, #tpu.dimension_semantics<parallel>], iteration_bounds = array<i64: 2, 1>, scalar_prefetch = 0 : i64, scratch_operands = 1 : i64, tpu.core_type = #tpu.core_type<tc>, window_params = [{transform_indices = @transform_0, window_bounds = array<i64: 4, 10, 9, 128>}, {pipeline_mode = #tpu.pipeline_mode<synchronous>, transform_indices = @transform_1, window_bounds = array<i64: 1152, 128>}, {pipeline_mode = #tpu.pipeline_mode<synchronous>, transform_indices = @transform_2, window_bounds = array<i64: 1152, 128>}, {pipeline_mode = #tpu.pipeline_mode<synchronous>, transform_indices = @transform_3, window_bounds = array<i64: 1, 128>}, {pipeline_mode = #tpu.pipeline_mode<synchronous>, transform_indices = @transform_4, window_bounds = array<i64: 1, 128>}, {pipeline_mode = #tpu.pipeline_mode<synchronous>, transform_indices = @transform_5, window_bounds = array<i64: 128, 128>}, {pipeline_mode = #tpu.pipeline_mode<synchronous>, transform_indices = @transform_6, window_bounds = array<i64: 1, 128>}, {transform_indices = @transform_7, window_bounds = array<i64: 1, 7, 8, 128>}]} {
    %c0 = arith.constant 0 : index
    %c0_0 = arith.constant 0 : index
    %c0_1 = arith.constant 0 : index
    %c0_2 = arith.constant 0 : index
    %0 = vector.load %arg2[%c0, %c0_0, %c0_1, %c0_2] : memref<4x10x9x128xbf16, #tpu.memory_space<vmem>>, vector<1x9x8x128xbf16>
    %1 = vector.shape_cast %0 : vector<1x9x8x128xbf16> to vector<9x8x128xbf16>
    %2 = vector.shape_cast %1 : vector<9x8x128xbf16> to vector<72x128xbf16>
    %c0_3 = arith.constant 0 : index
    %c0_4 = arith.constant 0 : index
    %3 = vector.load %arg3[%c0_3, %c0_4] : memref<1152x128xbf16, #tpu.memory_space<vmem>>, vector<128x128xbf16>
    %cst = arith.constant dense<0.000000e+00> : vector<72x128xf32>
    %4 = tpu.matmul %2, %3, %cst {dimension_numbers = #tpu.dot_dimension_numbers<[1], [0], [0], [1], [0, 0, 1, 1], [], []>} : vector<72x128xbf16>, vector<128x128xbf16>, vector<72x128xf32> -> vector<72x128xf32>
    %c1 = arith.constant 1 : index
    %c0_5 = arith.constant 0 : index
    %c0_6 = arith.constant 0 : index
    %c0_7 = arith.constant 0 : index
    %5 = vector.load %arg2[%c1, %c0_5, %c0_6, %c0_7] : memref<4x10x9x128xbf16, #tpu.memory_space<vmem>>, vector<1x9x8x128xbf16>
    %6 = vector.shape_cast %5 : vector<1x9x8x128xbf16> to vector<9x8x128xbf16>
    %7 = vector.shape_cast %6 : vector<9x8x128xbf16> to vector<72x128xbf16>
    %c128 = arith.constant 128 : index
    %c0_8 = arith.constant 0 : index
    %8 = vector.load %arg3[%c128, %c0_8] : memref<1152x128xbf16, #tpu.memory_space<vmem>>, vector<128x128xbf16>
    %cst_9 = arith.constant dense<0.000000e+00> : vector<72x128xf32>
    %9 = tpu.matmul %7, %8, %cst_9 {dimension_numbers = #tpu.dot_dimension_numbers<[1], [0], [0], [1], [0, 0, 1, 1], [], []>} : vector<72x128xbf16>, vector<128x128xbf16>, vector<72x128xf32> -> vector<72x128xf32>
    %10 = arith.addf %4, %9 : vector<72x128xf32>
    %c0_10 = arith.constant 0 : index
    %c0_11 = arith.constant 0 : index
    %c1_12 = arith.constant 1 : index
    %c0_13 = arith.constant 0 : index
    %11 = vector.load %arg2[%c0_10, %c0_11, %c1_12, %c0_13] : memref<4x10x9x128xbf16, #tpu.memory_space<vmem>>, vector<1x9x8x128xbf16>
    %12 = vector.shape_cast %11 : vector<1x9x8x128xbf16> to vector<9x8x128xbf16>
    %13 = vector.shape_cast %12 : vector<9x8x128xbf16> to vector<72x128xbf16>
    %c256 = arith.constant 256 : index
    %c0_14 = arith.constant 0 : index
    %14 = vector.load %arg3[%c256, %c0_14] : memref<1152x128xbf16, #tpu.memory_space<vmem>>, vector<128x128xbf16>
    %cst_15 = arith.constant dense<0.000000e+00> : vector<72x128xf32>
    %15 = tpu.matmul %13, %14, %cst_15 {dimension_numbers = #tpu.dot_dimension_numbers<[1], [0], [0], [1], [0, 0, 1, 1], [], []>} : vector<72x128xbf16>, vector<128x128xbf16>, vector<72x128xf32> -> vector<72x128xf32>
    %16 = arith.addf %10, %15 : vector<72x128xf32>
    %c2 = arith.constant 2 : index
    %c0_16 = arith.constant 0 : index
    %c0_17 = arith.constant 0 : index
    %c0_18 = arith.constant 0 : index
    %17 = vector.load %arg2[%c2, %c0_16, %c0_17, %c0_18] : memref<4x10x9x128xbf16, #tpu.memory_space<vmem>>, vector<1x9x8x128xbf16>
    %18 = vector.shape_cast %17 : vector<1x9x8x128xbf16> to vector<9x8x128xbf16>
    %19 = vector.shape_cast %18 : vector<9x8x128xbf16> to vector<72x128xbf16>
    %c384 = arith.constant 384 : index
    %c0_19 = arith.constant 0 : index
    %20 = vector.load %arg3[%c384, %c0_19] : memref<1152x128xbf16, #tpu.memory_space<vmem>>, vector<128x128xbf16>
    %cst_20 = arith.constant dense<0.000000e+00> : vector<72x128xf32>
    %21 = tpu.matmul %19, %20, %cst_20 {dimension_numbers = #tpu.dot_dimension_numbers<[1], [0], [0], [1], [0, 0, 1, 1], [], []>} : vector<72x128xbf16>, vector<128x128xbf16>, vector<72x128xf32> -> vector<72x128xf32>
    %22 = arith.addf %16, %21 : vector<72x128xf32>
    %c3 = arith.constant 3 : index
    %c0_21 = arith.constant 0 : index
    %c0_22 = arith.constant 0 : index
    %c0_23 = arith.constant 0 : index
    %23 = vector.load %arg2[%c3, %c0_21, %c0_22, %c0_23] : memref<4x10x9x128xbf16, #tpu.memory_space<vmem>>, vector<1x9x8x128xbf16>
    %24 = vector.shape_cast %23 : vector<1x9x8x128xbf16> to vector<9x8x128xbf16>
    %25 = vector.shape_cast %24 : vector<9x8x128xbf16> to vector<72x128xbf16>
    %c512 = arith.constant 512 : index
    %c0_24 = arith.constant 0 : index
    %26 = vector.load %arg3[%c512, %c0_24] : memref<1152x128xbf16, #tpu.memory_space<vmem>>, vector<128x128xbf16>
    %cst_25 = arith.constant dense<0.000000e+00> : vector<72x128xf32>
    %27 = tpu.matmul %25, %26, %cst_25 {dimension_numbers = #tpu.dot_dimension_numbers<[1], [0], [0], [1], [0, 0, 1, 1], [], []>} : vector<72x128xbf16>, vector<128x128xbf16>, vector<72x128xf32> -> vector<72x128xf32>
    %28 = arith.addf %22, %27 : vector<72x128xf32>
    %c2_26 = arith.constant 2 : index
    %c0_27 = arith.constant 0 : index
    %c1_28 = arith.constant 1 : index
    %c0_29 = arith.constant 0 : index
    %29 = vector.load %arg2[%c2_26, %c0_27, %c1_28, %c0_29] : memref<4x10x9x128xbf16, #tpu.memory_space<vmem>>, vector<1x9x8x128xbf16>
    %30 = vector.shape_cast %29 : vector<1x9x8x128xbf16> to vector<9x8x128xbf16>
    %31 = vector.shape_cast %30 : vector<9x8x128xbf16> to vector<72x128xbf16>
    %c640 = arith.constant 640 : index
    %c0_30 = arith.constant 0 : index
    %32 = vector.load %arg3[%c640, %c0_30] : memref<1152x128xbf16, #tpu.memory_space<vmem>>, vector<128x128xbf16>
    %cst_31 = arith.constant dense<0.000000e+00> : vector<72x128xf32>
    %33 = tpu.matmul %31, %32, %cst_31 {dimension_numbers = #tpu.dot_dimension_numbers<[1], [0], [0], [1], [0, 0, 1, 1], [], []>} : vector<72x128xbf16>, vector<128x128xbf16>, vector<72x128xf32> -> vector<72x128xf32>
    %34 = arith.addf %28, %33 : vector<72x128xf32>
    %c0_32 = arith.constant 0 : index
    %c1_33 = arith.constant 1 : index
    %c0_34 = arith.constant 0 : index
    %c0_35 = arith.constant 0 : index
    %35 = vector.load %arg2[%c0_32, %c1_33, %c0_34, %c0_35] : memref<4x10x9x128xbf16, #tpu.memory_space<vmem>>, vector<1x9x8x128xbf16>
    %36 = vector.shape_cast %35 : vector<1x9x8x128xbf16> to vector<9x8x128xbf16>
    %37 = vector.shape_cast %36 : vector<9x8x128xbf16> to vector<72x128xbf16>
    %c768 = arith.constant 768 : index
    %c0_36 = arith.constant 0 : index
    %38 = vector.load %arg3[%c768, %c0_36] : memref<1152x128xbf16, #tpu.memory_space<vmem>>, vector<128x128xbf16>
    %cst_37 = arith.constant dense<0.000000e+00> : vector<72x128xf32>
    %39 = tpu.matmul %37, %38, %cst_37 {dimension_numbers = #tpu.dot_dimension_numbers<[1], [0], [0], [1], [0, 0, 1, 1], [], []>} : vector<72x128xbf16>, vector<128x128xbf16>, vector<72x128xf32> -> vector<72x128xf32>
    %40 = arith.addf %34, %39 : vector<72x128xf32>
    %c1_38 = arith.constant 1 : index
    %c1_39 = arith.constant 1 : index
    %c0_40 = arith.constant 0 : index
    %c0_41 = arith.constant 0 : index
    %41 = vector.load %arg2[%c1_38, %c1_39, %c0_40, %c0_41] : memref<4x10x9x128xbf16, #tpu.memory_space<vmem>>, vector<1x9x8x128xbf16>
    %42 = vector.shape_cast %41 : vector<1x9x8x128xbf16> to vector<9x8x128xbf16>
    %43 = vector.shape_cast %42 : vector<9x8x128xbf16> to vector<72x128xbf16>
    %c896 = arith.constant 896 : index
    %c0_42 = arith.constant 0 : index
    %44 = vector.load %arg3[%c896, %c0_42] : memref<1152x128xbf16, #tpu.memory_space<vmem>>, vector<128x128xbf16>
    %cst_43 = arith.constant dense<0.000000e+00> : vector<72x128xf32>
    %45 = tpu.matmul %43, %44, %cst_43 {dimension_numbers = #tpu.dot_dimension_numbers<[1], [0], [0], [1], [0, 0, 1, 1], [], []>} : vector<72x128xbf16>, vector<128x128xbf16>, vector<72x128xf32> -> vector<72x128xf32>
    %46 = arith.addf %40, %45 : vector<72x128xf32>
    %c0_44 = arith.constant 0 : index
    %c1_45 = arith.constant 1 : index
    %c1_46 = arith.constant 1 : index
    %c0_47 = arith.constant 0 : index
    %47 = vector.load %arg2[%c0_44, %c1_45, %c1_46, %c0_47] : memref<4x10x9x128xbf16, #tpu.memory_space<vmem>>, vector<1x9x8x128xbf16>
    %48 = vector.shape_cast %47 : vector<1x9x8x128xbf16> to vector<9x8x128xbf16>
    %49 = vector.shape_cast %48 : vector<9x8x128xbf16> to vector<72x128xbf16>
    %c1024 = arith.constant 1024 : index
    %c0_48 = arith.constant 0 : index
    %50 = vector.load %arg3[%c1024, %c0_48] : memref<1152x128xbf16, #tpu.memory_space<vmem>>, vector<128x128xbf16>
    %cst_49 = arith.constant dense<0.000000e+00> : vector<72x128xf32>
    %51 = tpu.matmul %49, %50, %cst_49 {dimension_numbers = #tpu.dot_dimension_numbers<[1], [0], [0], [1], [0, 0, 1, 1], [], []>} : vector<72x128xbf16>, vector<128x128xbf16>, vector<72x128xf32> -> vector<72x128xf32>
    %52 = arith.addf %46, %51 : vector<72x128xf32>
    %c0_50 = arith.constant 0 : index
    %c0_51 = arith.constant 0 : index
    %53 = vector.load %arg5[%c0_50, %c0_51] : memref<1x128xf32, #tpu.memory_space<vmem>>, vector<1x128xf32>
    %54 = vector.broadcast %53 : vector<1x128xf32> to vector<72x128xf32>
    %55 = arith.addf %52, %54 : vector<72x128xf32>
    %cst_52 = arith.constant 0.000000e+00 : f32
    %56 = vector.broadcast %cst_52 : f32 to vector<72x128xf32>
    %57 = arith.maximumf %55, %56 : vector<72x128xf32>
    %58 = arith.truncf %57 : vector<72x128xf32> to vector<72x128xbf16>
    %59 = vector.shape_cast %58 : vector<72x128xbf16> to vector<9x8x128xbf16>
    %c0_53 = arith.constant 0 : index
    %c8 = arith.constant 8 : index
    %c0_54 = arith.constant 0 : index
    %60 = vector.load %arg10[%c0_53, %c8, %c0_54] : memref<9x24x128xbf16, #tpu.memory_space<vmem>>, vector<9x8x128xbf16>
    tpu.vector_store %arg10[%c0_53, %c8, %c0_54], %59 {strides = array<i32>} : memref<9x24x128xbf16, #tpu.memory_space<vmem>>, vector<9x8x128xbf16>,
    %cst_55 = arith.constant 0.000000e+00 : bf16
    %61 = vector.broadcast %cst_55 : bf16 to vector<9x8x128xbf16>
    %c0_56 = arith.constant 0 : index
    %c0_57 = arith.constant 0 : index
    %c0_58 = arith.constant 0 : index
    %62 = vector.load %arg10[%c0_56, %c0_57, %c0_58] : memref<9x24x128xbf16, #tpu.memory_space<vmem>>, vector<9x8x128xbf16>
    tpu.vector_store %arg10[%c0_56, %c0_57, %c0_58], %61 {strides = array<i32>} : memref<9x24x128xbf16, #tpu.memory_space<vmem>>, vector<9x8x128xbf16>,
    %cst_59 = arith.constant 0.000000e+00 : bf16
    %63 = vector.broadcast %cst_59 : bf16 to vector<9x9x128xbf16>
    %c0_60 = arith.constant 0 : index
    %c15 = arith.constant 15 : index
    %c0_61 = arith.constant 0 : index
    %64 = vector.load %arg10[%c0_60, %c15, %c0_61] : memref<9x24x128xbf16, #tpu.memory_space<vmem>>, vector<9x9x128xbf16>
    tpu.vector_store %arg10[%c0_60, %c15, %c0_61], %63 {strides = array<i32>} : memref<9x24x128xbf16, #tpu.memory_space<vmem>>, vector<9x9x128xbf16>,
    %cst_62 = arith.constant 0.000000e+00 : bf16
    %65 = vector.broadcast %cst_62 : bf16 to vector<1x8x128xbf16>
    %c0_i32 = arith.constant 0 : i32
    %66 = arith.cmpi eq, %arg1, %c0_i32 : i32
    %67 = arith.extui %66 : i1 to i32
    %c0_i32_63 = arith.constant 0 : i32
    %68 = arith.cmpi ne, %67, %c0_i32_63 : i32
    scf.if %68 {
      %c0_134 = arith.constant 0 : index
      %c8_135 = arith.constant 8 : index
      %c0_136 = arith.constant 0 : index
      %135 = vector.load %arg10[%c0_134, %c8_135, %c0_136] : memref<9x24x128xbf16, #tpu.memory_space<vmem>>, vector<1x8x128xbf16>
      tpu.vector_store %arg10[%c0_134, %c8_135, %c0_136], %65 {strides = array<i32>} : memref<9x24x128xbf16, #tpu.memory_space<vmem>>, vector<1x8x128xbf16>,
    } else {
    }
    %c0_i32_64 = arith.constant 0 : i32
    %69 = arith.cmpi eq, %arg1, %c0_i32_64 : i32
    %70 = arith.extui %69 : i1 to i32
    %c0_i32_65 = arith.constant 0 : i32
    %71 = arith.cmpi ne, %70, %c0_i32_65 : i32
    scf.if %71 {
      %c8_134 = arith.constant 8 : index
      %c8_135 = arith.constant 8 : index
      %c0_136 = arith.constant 0 : index
      %135 = vector.load %arg10[%c8_134, %c8_135, %c0_136] : memref<9x24x128xbf16, #tpu.memory_space<vmem>>, vector<1x8x128xbf16>
      tpu.vector_store %arg10[%c8_134, %c8_135, %c0_136], %65 {strides = array<i32>} : memref<9x24x128xbf16, #tpu.memory_space<vmem>>, vector<1x8x128xbf16>,
    } else {
    }
    %c0_66 = arith.constant 0 : index
    %c7 = arith.constant 7 : index
    %c0_67 = arith.constant 0 : index
    %72 = vector.load %arg10[%c0_66, %c7, %c0_67] : memref<9x24x128xbf16, #tpu.memory_space<vmem>>, vector<7x8x128xbf16>
    %73 = vector.shape_cast %72 : vector<7x8x128xbf16> to vector<56x128xbf16>
    %c0_68 = arith.constant 0 : index
    %c0_69 = arith.constant 0 : index
    %74 = vector.load %arg4[%c0_68, %c0_69] : memref<1152x128xbf16, #tpu.memory_space<vmem>>, vector<128x128xbf16>
    %cst_70 = arith.constant dense<0.000000e+00> : vector<56x128xf32>
    %75 = tpu.matmul %73, %74, %cst_70 {dimension_numbers = #tpu.dot_dimension_numbers<[1], [0], [0], [1], [0, 0, 1, 1], [], []>} : vector<56x128xbf16>, vector<128x128xbf16>, vector<56x128xf32> -> vector<56x128xf32>
    %c0_71 = arith.constant 0 : index
    %c8_72 = arith.constant 8 : index
    %c0_73 = arith.constant 0 : index
    %76 = vector.load %arg10[%c0_71, %c8_72, %c0_73] : memref<9x24x128xbf16, #tpu.memory_space<vmem>>, vector<7x8x128xbf16>
    %77 = vector.shape_cast %76 : vector<7x8x128xbf16> to vector<56x128xbf16>
    %c128_74 = arith.constant 128 : index
    %c0_75 = arith.constant 0 : index
    %78 = vector.load %arg4[%c128_74, %c0_75] : memref<1152x128xbf16, #tpu.memory_space<vmem>>, vector<128x128xbf16>
    %cst_76 = arith.constant dense<0.000000e+00> : vector<56x128xf32>
    %79 = tpu.matmul %77, %78, %cst_76 {dimension_numbers = #tpu.dot_dimension_numbers<[1], [0], [0], [1], [0, 0, 1, 1], [], []>} : vector<56x128xbf16>, vector<128x128xbf16>, vector<56x128xf32> -> vector<56x128xf32>
    %80 = arith.addf %75, %79 : vector<56x128xf32>
    %c0_77 = arith.constant 0 : index
    %c9 = arith.constant 9 : index
    %c0_78 = arith.constant 0 : index
    %81 = vector.load %arg10[%c0_77, %c9, %c0_78] : memref<9x24x128xbf16, #tpu.memory_space<vmem>>, vector<7x8x128xbf16>
    %82 = vector.shape_cast %81 : vector<7x8x128xbf16> to vector<56x128xbf16>
    %c256_79 = arith.constant 256 : index
    %c0_80 = arith.constant 0 : index
    %83 = vector.load %arg4[%c256_79, %c0_80] : memref<1152x128xbf16, #tpu.memory_space<vmem>>, vector<128x128xbf16>
    %cst_81 = arith.constant dense<0.000000e+00> : vector<56x128xf32>
    %84 = tpu.matmul %82, %83, %cst_81 {dimension_numbers = #tpu.dot_dimension_numbers<[1], [0], [0], [1], [0, 0, 1, 1], [], []>} : vector<56x128xbf16>, vector<128x128xbf16>, vector<56x128xf32> -> vector<56x128xf32>
    %85 = arith.addf %80, %84 : vector<56x128xf32>
    %c1_82 = arith.constant 1 : index
    %c7_83 = arith.constant 7 : index
    %c0_84 = arith.constant 0 : index
    %86 = vector.load %arg10[%c1_82, %c7_83, %c0_84] : memref<9x24x128xbf16, #tpu.memory_space<vmem>>, vector<7x8x128xbf16>
    %87 = vector.shape_cast %86 : vector<7x8x128xbf16> to vector<56x128xbf16>
    %c384_85 = arith.constant 384 : index
    %c0_86 = arith.constant 0 : index
    %88 = vector.load %arg4[%c384_85, %c0_86] : memref<1152x128xbf16, #tpu.memory_space<vmem>>, vector<128x128xbf16>
    %cst_87 = arith.constant dense<0.000000e+00> : vector<56x128xf32>
    %89 = tpu.matmul %87, %88, %cst_87 {dimension_numbers = #tpu.dot_dimension_numbers<[1], [0], [0], [1], [0, 0, 1, 1], [], []>} : vector<56x128xbf16>, vector<128x128xbf16>, vector<56x128xf32> -> vector<56x128xf32>
    %90 = arith.addf %85, %89 : vector<56x128xf32>
    %c1_88 = arith.constant 1 : index
    %c8_89 = arith.constant 8 : index
    %c0_90 = arith.constant 0 : index
    %91 = vector.load %arg10[%c1_88, %c8_89, %c0_90] : memref<9x24x128xbf16, #tpu.memory_space<vmem>>, vector<7x8x128xbf16>
    %92 = vector.shape_cast %91 : vector<7x8x128xbf16> to vector<56x128xbf16>
    %c512_91 = arith.constant 512 : index
    %c0_92 = arith.constant 0 : index
    %93 = vector.load %arg4[%c512_91, %c0_92] : memref<1152x128xbf16, #tpu.memory_space<vmem>>, vector<128x128xbf16>
    %cst_93 = arith.constant dense<0.000000e+00> : vector<56x128xf32>
    %94 = tpu.matmul %92, %93, %cst_93 {dimension_numbers = #tpu.dot_dimension_numbers<[1], [0], [0], [1], [0, 0, 1, 1], [], []>} : vector<56x128xbf16>, vector<128x128xbf16>, vector<56x128xf32> -> vector<56x128xf32>
    %95 = arith.addf %90, %94 : vector<56x128xf32>
    %c1_94 = arith.constant 1 : index
    %c9_95 = arith.constant 9 : index
    %c0_96 = arith.constant 0 : index
    %96 = vector.load %arg10[%c1_94, %c9_95, %c0_96] : memref<9x24x128xbf16, #tpu.memory_space<vmem>>, vector<7x8x128xbf16>
    %97 = vector.shape_cast %96 : vector<7x8x128xbf16> to vector<56x128xbf16>
    %c640_97 = arith.constant 640 : index
    %c0_98 = arith.constant 0 : index
    %98 = vector.load %arg4[%c640_97, %c0_98] : memref<1152x128xbf16, #tpu.memory_space<vmem>>, vector<128x128xbf16>
    %cst_99 = arith.constant dense<0.000000e+00> : vector<56x128xf32>
    %99 = tpu.matmul %97, %98, %cst_99 {dimension_numbers = #tpu.dot_dimension_numbers<[1], [0], [0], [1], [0, 0, 1, 1], [], []>} : vector<56x128xbf16>, vector<128x128xbf16>, vector<56x128xf32> -> vector<56x128xf32>
    %100 = arith.addf %95, %99 : vector<56x128xf32>
    %c2_100 = arith.constant 2 : index
    %c7_101 = arith.constant 7 : index
    %c0_102 = arith.constant 0 : index
    %101 = vector.load %arg10[%c2_100, %c7_101, %c0_102] : memref<9x24x128xbf16, #tpu.memory_space<vmem>>, vector<7x8x128xbf16>
    %102 = vector.shape_cast %101 : vector<7x8x128xbf16> to vector<56x128xbf16>
    %c768_103 = arith.constant 768 : index
    %c0_104 = arith.constant 0 : index
    %103 = vector.load %arg4[%c768_103, %c0_104] : memref<1152x128xbf16, #tpu.memory_space<vmem>>, vector<128x128xbf16>
    %cst_105 = arith.constant dense<0.000000e+00> : vector<56x128xf32>
    %104 = tpu.matmul %102, %103, %cst_105 {dimension_numbers = #tpu.dot_dimension_numbers<[1], [0], [0], [1], [0, 0, 1, 1], [], []>} : vector<56x128xbf16>, vector<128x128xbf16>, vector<56x128xf32> -> vector<56x128xf32>
    %105 = arith.addf %100, %104 : vector<56x128xf32>
    %c2_106 = arith.constant 2 : index
    %c8_107 = arith.constant 8 : index
    %c0_108 = arith.constant 0 : index
    %106 = vector.load %arg10[%c2_106, %c8_107, %c0_108] : memref<9x24x128xbf16, #tpu.memory_space<vmem>>, vector<7x8x128xbf16>
    %107 = vector.shape_cast %106 : vector<7x8x128xbf16> to vector<56x128xbf16>
    %c896_109 = arith.constant 896 : index
    %c0_110 = arith.constant 0 : index
    %108 = vector.load %arg4[%c896_109, %c0_110] : memref<1152x128xbf16, #tpu.memory_space<vmem>>, vector<128x128xbf16>
    %cst_111 = arith.constant dense<0.000000e+00> : vector<56x128xf32>
    %109 = tpu.matmul %107, %108, %cst_111 {dimension_numbers = #tpu.dot_dimension_numbers<[1], [0], [0], [1], [0, 0, 1, 1], [], []>} : vector<56x128xbf16>, vector<128x128xbf16>, vector<56x128xf32> -> vector<56x128xf32>
    %110 = arith.addf %105, %109 : vector<56x128xf32>
    %c2_112 = arith.constant 2 : index
    %c9_113 = arith.constant 9 : index
    %c0_114 = arith.constant 0 : index
    %111 = vector.load %arg10[%c2_112, %c9_113, %c0_114] : memref<9x24x128xbf16, #tpu.memory_space<vmem>>, vector<7x8x128xbf16>
    %112 = vector.shape_cast %111 : vector<7x8x128xbf16> to vector<56x128xbf16>
    %c1024_115 = arith.constant 1024 : index
    %c0_116 = arith.constant 0 : index
    %113 = vector.load %arg4[%c1024_115, %c0_116] : memref<1152x128xbf16, #tpu.memory_space<vmem>>, vector<128x128xbf16>
    %cst_117 = arith.constant dense<0.000000e+00> : vector<56x128xf32>
    %114 = tpu.matmul %112, %113, %cst_117 {dimension_numbers = #tpu.dot_dimension_numbers<[1], [0], [0], [1], [0, 0, 1, 1], [], []>} : vector<56x128xbf16>, vector<128x128xbf16>, vector<56x128xf32> -> vector<56x128xf32>
    %115 = arith.addf %110, %114 : vector<56x128xf32>
    %c0_118 = arith.constant 0 : index
    %c0_119 = arith.constant 0 : index
    %116 = vector.load %arg6[%c0_118, %c0_119] : memref<1x128xf32, #tpu.memory_space<vmem>>, vector<1x128xf32>
    %117 = vector.broadcast %116 : vector<1x128xf32> to vector<56x128xf32>
    %118 = arith.addf %115, %117 : vector<56x128xf32>
    %c3_120 = arith.constant 3 : index
    %c1_121 = arith.constant 1 : index
    %c0_122 = arith.constant 0 : index
    %c0_123 = arith.constant 0 : index
    %119 = vector.load %arg2[%c3_120, %c1_121, %c0_122, %c0_123] : memref<4x10x9x128xbf16, #tpu.memory_space<vmem>>, vector<1x7x8x128xbf16>
    %120 = vector.shape_cast %119 : vector<1x7x8x128xbf16> to vector<7x8x128xbf16>
    %121 = vector.shape_cast %120 : vector<7x8x128xbf16> to vector<56x128xbf16>
    %c0_124 = arith.constant 0 : index
    %c0_125 = arith.constant 0 : index
    %122 = vector.load %arg7[%c0_124, %c0_125] : memref<128x128xbf16, #tpu.memory_space<vmem>>, vector<128x128xbf16>
    %cst_126 = arith.constant dense<0.000000e+00> : vector<56x128xf32>
    %123 = tpu.matmul %121, %122, %cst_126 {dimension_numbers = #tpu.dot_dimension_numbers<[1], [0], [0], [1], [0, 0, 1, 1], [], []>} : vector<56x128xbf16>, vector<128x128xbf16>, vector<56x128xf32> -> vector<56x128xf32>
    %c0_127 = arith.constant 0 : index
    %c0_128 = arith.constant 0 : index
    %124 = vector.load %arg8[%c0_127, %c0_128] : memref<1x128xf32, #tpu.memory_space<vmem>>, vector<1x128xf32>
    %125 = vector.broadcast %124 : vector<1x128xf32> to vector<56x128xf32>
    %126 = arith.addf %123, %125 : vector<56x128xf32>
    %127 = arith.addf %118, %126 : vector<56x128xf32>
    %cst_129 = arith.constant 0.000000e+00 : f32
    %128 = vector.broadcast %cst_129 : f32 to vector<56x128xf32>
    %129 = arith.maximumf %127, %128 : vector<56x128xf32>
    %130 = vector.shape_cast %129 : vector<56x128xf32> to vector<7x8x128xf32>
    %131 = arith.truncf %130 : vector<7x8x128xf32> to vector<7x8x128xbf16>
    %c0_130 = arith.constant 0 : index
    %c0_131 = arith.constant 0 : index
    %c0_132 = arith.constant 0 : index
    %c0_133 = arith.constant 0 : index
    %132 = vector.load %arg9[%c0_130, %c0_131, %c0_132, %c0_133] : memref<1x7x8x128xbf16, #tpu.memory_space<vmem>>, vector<1x7x8x128xbf16>
    %133 = vector.shape_cast %132 : vector<1x7x8x128xbf16> to vector<7x8x128xbf16>
    %134 = vector.shape_cast %131 : vector<7x8x128xbf16> to vector<1x7x8x128xbf16>
    tpu.vector_store %arg9[%c0_130, %c0_131, %c0_132, %c0_133], %134 {strides = array<i32>} : memref<1x7x8x128xbf16, #tpu.memory_space<vmem>>, vector<1x7x8x128xbf16>,
    return
  }
  func.func @transform_0(%arg0: i32, %arg1: i32) -> (i32, i32, i32, i32) {
    %c1_i32 = arith.constant 1 : i32
    %0 = arith.muli %arg0, %c1_i32 : i32
    %1 = arith.addi %0, %arg1 : i32
    %c0_i32 = arith.constant 0 : i32
    %c0_i32_0 = arith.constant 0 : i32
    %c0_i32_1 = arith.constant 0 : i32
    %c0_i32_2 = arith.constant 0 : i32
    return %1, %c0_i32, %c0_i32_0, %c0_i32_1 : i32, i32, i32, i32
  }
  func.func @transform_1(%arg0: i32, %arg1: i32) -> (i32, i32) {
    %c0_i32 = arith.constant 0 : i32
    %c0_i32_0 = arith.constant 0 : i32
    %c0_i32_1 = arith.constant 0 : i32
    return %c0_i32, %c0_i32_0 : i32, i32
  }
  func.func @transform_2(%arg0: i32, %arg1: i32) -> (i32, i32) {
    %c0_i32 = arith.constant 0 : i32
    %c0_i32_0 = arith.constant 0 : i32
    %c0_i32_1 = arith.constant 0 : i32
    return %c0_i32, %c0_i32_0 : i32, i32
  }
  func.func @transform_3(%arg0: i32, %arg1: i32) -> (i32, i32) {
    %c0_i32 = arith.constant 0 : i32
    %c0_i32_0 = arith.constant 0 : i32
    %c0_i32_1 = arith.constant 0 : i32
    return %c0_i32, %c0_i32_0 : i32, i32
  }
  func.func @transform_4(%arg0: i32, %arg1: i32) -> (i32, i32) {
    %c0_i32 = arith.constant 0 : i32
    %c0_i32_0 = arith.constant 0 : i32
    %c0_i32_1 = arith.constant 0 : i32
    return %c0_i32, %c0_i32_0 : i32, i32
  }
  func.func @transform_5(%arg0: i32, %arg1: i32) -> (i32, i32) {
    %c0_i32 = arith.constant 0 : i32
    %c0_i32_0 = arith.constant 0 : i32
    %c0_i32_1 = arith.constant 0 : i32
    return %c0_i32, %c0_i32_0 : i32, i32
  }
  func.func @transform_6(%arg0: i32, %arg1: i32) -> (i32, i32) {
    %c0_i32 = arith.constant 0 : i32
    %c0_i32_0 = arith.constant 0 : i32
    %c0_i32_1 = arith.constant 0 : i32
    return %c0_i32, %c0_i32_0 : i32, i32
  }
  func.func @transform_7(%arg0: i32, %arg1: i32) -> (i32, i32, i32, i32) {
    %c0_i32 = arith.constant 0 : i32
    %c0_i32_0 = arith.constant 0 : i32
    %c0_i32_1 = arith.constant 0 : i32
    return %arg0, %arg1, %c0_i32, %c0_i32_0 : i32, i32, i32, i32
  }
}

</mosaic_0001>

<bundles_post_ra>
// kernel: tpu_custom_call.1
= control target key start
LH: loop header
LB: loop body
LE: loop exit
PB: predicated region body
PF: predicated region fallthrough
CT: control target
= control target key end

     0   :  { %12 = vsyncpa [#allocation4], 0  ;;  %s7559_s0 = inlined_call_operand.vmem [shape: bf16[8,10,9,128], index: 0, kind: input, shape index: {}]   ;;  %s7560_s1 = inlined_call_operand.vmem [shape: bf16[1152,128], index: 1, kind: input, shape index: {}]   ;;  %s7561_s2 = inlined_call_operand.hbm [shape: bf16[1152,128], index: 2, kind: input, shape index: {}]   ;;  %s7562_s3 = inlined_call_operand.vmem [shape: f32[1,128], index: 3, kind: input, shape index: {}]   ;;  %s7563_s4 = inlined_call_operand.vmem [shape: f32[1,128], index: 4, kind: input, shape index: {}]   ;;  %s7564_s5 = inlined_call_operand.vmem [shape: bf16[128,128], index: 5, kind: input, shape index: {}]   ;;  %s7565_s6 = inlined_call_operand.vmem [shape: f32[1,128], index: 6, kind: input, shape index: {}]   ;;  %s7566_s7 = inlined_call_operand.hbm [shape: bf16[2,7,8,128], index: 7, kind: output, shape index: {}]  }
   0x1   :  { %13 = vsyncpa [#allocation5], 0 }
   0x2   :  { %15 = vsyncpa [#allocation5 + $0x1], 0  ;;  %s6401_s24 = smov 0   ;;  %s6403_s25 = smov 0  }
   0x3   :  { %s6405_s26 = smov 0   ;;  %s6407_s27 = smov 0  }
   0x4   :  { %s6409_s28 = smov 0   ;;  %s6411_s29 = smov 0  }
   0x5 LB: > { %s4773_s30 = sadd.s32 4294967295, %s6350_s29   ;;  %s4774_s8 = sadd.s32 4294967294, %s6350_s29   ;;  %s6350_s29 = sphi %s6411_s29, %s21_s29   ;;  %s6346_s28 = sphi %s6409_s28, %s7581_s28   ;;  %s6342_s27 = sphi %s6407_s27, %s7580_s27   ;;  %s6338_s26 = sphi %s6405_s26, %s7579_s26   ;;  %s6334_s25 = sphi %s6403_s25, %s7578_s25   ;;  %s6330_s24 = sphi %s6401_s24, %s7577_s24  }
   0x6   : > { %s33_s9 = sadd.s32 1, %s6346_s28  ;;  %s196_s10 = sadd.s32 1, %s6338_s26 }
   0x7   : > { %p35_p0 = scmp.ge.s32.totalorder %s33_s9, 2  ;;  %p206_p1 = scmp.ne.s32.totalorder %s6338_s26, %s6334_s25 }
   0x8   : > { %p207_p2 = scmp.eq.s32.totalorder %s4773_s30, 1  ;;  %p212_p3 = scmp.ne.s32.totalorder %s6334_s25, %s6330_s24 }
   0x9   : > { %s7583_s9 = smov (%p35_p0, %s33_s9), 0  ;;  %p213_p5 = scmp.eq.s32.totalorder %s4774_s8, 1 }
   0xa   : > { %p6441_p4 = por %p207_p2, %p206_p1  ;;  %s191_s12 = ssub.s32 %s6346_s28, %s7583_s9 }
   0xb   : > { %p4775_p6 = scmp.ge.s32.totalorder %s6350_s29, 1  ;;  %p194_p7 = scmp.eq.s32.totalorder %s191_s12, 0 }
   0xc   : > { %p6448_p8 = por %p213_p5, %p212_p3  ;;  %p220_p9 = scmp.lt.s32.totalorder %s6350_s29, 3 }
   0xd   : > { %s6454_s14 = scalar_select %p194_p7, %s6338_s26, %s196_s10  }
   0xe   : > { %p6456_p10 = pnand %p4775_p6, %p220_p9  ;;  %p6460_p11 = scmp.eq.s32.totalorder %s4773_s30, 0 }
   0xf   : > { %s6352_s17 = smov [#allocation3]  }
  0x10   : > { %p5979_p12 = pneg %p6456_p10  ;;  %s235_s18 = sshll.u32 %s6352_s17, 4  ;;  %s236_s18 = int_to_ptr.vmem [resolvable:$true] %s235_s18 }
  0x11   : > { %s6255_s19 = scalar_lea.vmem %s236_s18, 9216  ;;  %p6263_p5 = scmp.lt.s32.totalorder %s236_s18, %s236_s18 }
  0x12   : > { %p5980_p13 = pnand %p6460_p11, %p5979_p12  ;;  %p6256_p1 = scmp.ne.s32.totalorder %s236_s18, %s6255_s19 }
  0x13   : > { %p6264_p6 = scmp.lt.s32.totalorder %s6255_s19, %s6255_s19 }
  0x14   : > { %p6246_p0 = pneg %p5980_p13 }
  0x15   : > { %p6265_p7 = por %p6264_p6, %p6263_p5 }
  0x16   : > { %p6258_p2 = pnand %p6256_p1, %p6246_p0 }
  0x18   : > { %p6259_p3 = pneg %p6258_p2 }
  0x1a   : > { %p6266_p9 = pnand %p6265_p7, %p6259_p3 }
  0x1c   : > { %6269 = shalt.err (!%p6266_p9)
}
  0x1d   : > { %s6353_s20 = smov 64   ;;  %s6354_s21 = smov 4  }
  0x1e   : > { %5982 = dma.hbm_to_vmem [thread:$0]  (!%p5980_p13), %s7561_s2, 9216, %s236_s18, [#allocation4], %s6353_s20, %s6353_s20, %s6354_s21  }
  0x1f   : > { %275 = sbr.rel (%p6456_p10) target bundleno = 852 (0x354), region = 48 }
  0x24   : > { %6321 = dma.done.wait (%p6460_p11), [#allocation4], 9216  }
  0x25   : > { %6323 = vsyncadd (%p6460_p11), [#allocation4], 4294958080  ;;  %v6355_v0 = vmov 0.0   ;;  %vm6356_vm0 = vmmov 0   ;;  %v6046_v1 = vld [vmem:[%s7560_s1 + $0x78] sm:$0xff]   ;;  %s4780_s10 = sshll.u32 %s6342_s27, 2 }
  0x26   : > { %5406 = vmatprep.subr.bf16.mxu0 %v6355_v0  ;;  %5442 = vmatprep.subr.bf16.mxu1 %v6355_v0  ;;  %v6047_v2 = vld [vmem:[%s7560_s1 + $0x38] sm:$0xff]   ;;  %v6048_v3 = vld [vmem:[%s7560_s1 + $0x70] sm:$0xff]   ;;  %p311_p10 = scmp.lt.s32.totalorder %s4780_s10, 7  ;;  %v6050_v5 = vld [vmem:[%s7560_s1 + $0x68] sm:$0xff]   ;;  %vm685_vm1 = vsmask.f32 3328 }
  0x27   : > { %5422 = vmatprep.mubr.msk.bf16.mxu0 %vm6356_vm0, %v6355_v0  ;;  %5458 = vmatprep.mubr.msk.bf16.mxu1 %vm6356_vm0, %v6355_v0  ;;  %v6049_v4 = vld [vmem:[%s7560_s1 + $0x30] sm:$0xff]   ;;  %v6051_v6 = vld [vmem:[%s7560_s1 + $0x28] sm:$0xff]   ;;  %v6052_v7 = vld [vmem:[%s7560_s1 + $0x60] sm:$0xff]   ;;  %vm686_vm2 = vsmask.f32 7440  ;;  %vm2406_vm4 = vcmask 1043459  }
  0x28   : > { %5407 = vmatpush3.bf16.msra.mxu0 %v6046_v1  ;;  %5443 = vmatpush3.bf16.msra.mxu1 %v6047_v2  ;;  %s7585_s10 = smov (!%p311_p10, %s4780_s10), 7  ;;  %v6053_v8 = vld [vmem:[%s7560_s1 + $0x20] sm:$0xff]   ;;  %v6054_v9 = vld [vmem:[%s7560_s1 + $0x58] sm:$0xff]   ;;  %v6056_v11 = vld [vmem:[%s7560_s1 + $0x50] sm:$0xff]   ;;  %vm2407_vm5 = vsmask.f32 7950 }
  0x29   : > { %5408 = vmatprep.subr.bf16.mxu0 %v6355_v0  ;;  %5444 = vmatprep.subr.bf16.mxu1 %v6355_v0  ;;  %s5971_s16 = smul.u32 80, %s7585_s10  ;;  %v6055_v10 = vld [vmem:[%s7560_s1 + $0x18] sm:$0xff]   ;;  %v6057_v12 = vld [vmem:[%s7560_s1 + $0x10] sm:$0xff]   ;;  %v6058_v13 = vld [vmem:[%s7560_s1 + $0x48] sm:$0xff]   ;;  %vm2466_vm7 = vsmask.f32 256 }
  0x2a   : > { %v6059_v14 = vld [vmem:[%s7560_s1 + $0x8] sm:$0xff]   ;;  %v6060_v15 = vld [vmem:[%s7560_s1 + $0x40] sm:$0xff]   ;;  %v6064_v19 = vld [vmem:[%s7560_s1 + $0xb8] sm:$0xff]   ;;  %vm2467_vm8 = vsmask.f32 4368  ;;  %s306_s30 = sand.u32 1, %s6334_s25  }
  0x2b   : > { %s6524_s23 = scalar_lea.vmem %s7559_s0, %s5971_s16  ;;  %v6061_v16 = vld [vmem:[%s7560_s1] sm:$0xff]   ;;  %v6069_v20 = vld [vmem:[%s7560_s1 + $0xf8] sm:$0xff]   ;;  %v6065_v21 = vld [vmem:[%s7560_s1 + $0xb0] sm:$0xff]   ;;  %s5970_s8 = smul.u32 28, %s306_s30 }
  0x2c   : > { %5409 = vmatpush3.bf16.msra.mxu0 %v6048_v3  ;;  %5445 = vmatpush3.bf16.msra.mxu1 %v6049_v4  ;;  %v6062_v17 = vld [vmem:[%s6524_s23 + $0x50] ss:$8 sps:$4 sm:$0xff]   ;;  %v6063_v18 = vld [vmem:[%s6524_s23] ss:$8 sps:$4 sm:$0xff]   ;;  %v668_v39 = vld [vmem:[%s6524_s23 + $0x4] sm:$0x1] }
  0x2d   : > { %5410 = vmatprep.subr.bf16.mxu0 %v6355_v0  ;;  %5446 = vmatprep.subr.bf16.mxu1 %v6355_v0  ;;  %v6066_v22 = vld [vmem:[%s6524_s23 + $0x60] ss:$8 sps:$4 sm:$0xff]   ;;  %v6070_v23 = vld [vmem:[%s7560_s1 + $0xf0] sm:$0xff]   ;;  %v6075_v33 = vld [vmem:[%s7560_s1 + $0x98] sm:$0xff]   ;;  %v698_v51 = vshll.u32 %v668_v39, 16  ;;  %s308_s12 = scalar_lea.vmem [#allocation6], %s5970_s8 }
  0x2e   : > { %v6067_v24 = vld [vmem:[%s6524_s23 + $0x10] ss:$8 sps:$4 sm:$0xff]   ;;  %v6068_v25 = vld [vmem:[%s7560_s1 + $0xa8] sm:$0xff]   ;;  %v6073_v27 = vld [vmem:[%s7560_s1 + $0xa0] sm:$0xff]   ;;  %s4688_s15 = sshll.u32 %s308_s12, 4  ;;  %s5972_s16 = smul.u32 448, %s6342_s27  ;;  %s7505_s15 = int_to_ptr.vmem [resolvable:$true] %s4688_s15 }
  0x2f   : > { %v6074_v26 = vld [vmem:[%s7560_s1 + $0xe8] sm:$0xff]   ;;  %v6071_v28 = vld [vmem:[%s6524_s23 + $0x70] ss:$8 sps:$4 sm:$0xff]   ;;  %v667_v29 = vld [vmem:[%s6524_s23] sm:$0xf]  ;;  %v700_v61 = vrot.slane %v698_v51, 5 }
  0x30   : > { %5411 = vmatpush3.bf16.msra.mxu0 %v6050_v5  ;;  %5447 = vmatpush3.bf16.msra.mxu1 %v6051_v6  ;;  %v6076_v30 = vld [vmem:[%s7560_s1 + $0xe0] sm:$0xff]   ;;  %v669_v31 = vld [vmem:[%s6524_s23 + $0x8] sm:$0xf]  ;;  %v689_v34 = vshrl.u32 %v667_v29, 16  ;;  %v692_v35 = vshll.u32 %v667_v29, 16  ;;  %v6080_v38 = vld [vmem:[%s7560_s1 + $0xd8] sm:$0xff]   ;;  %s7510_s19 = scalar_lea.hbm %s7566_s7, %s5972_s16 }
  0x31   : > { %5412 = vmatprep.subr.bf16.mxu0 %v6355_v0  ;;  %5448 = vmatprep.subr.bf16.mxu1 %v6355_v0  ;;  %v6072_v32 = vld [vmem:[%s6524_s23 + $0x20] ss:$8 sps:$4 sm:$0xff]   ;;  %v703_v36 = vshrl.u32 %v669_v31, 16  ;;  %v706_v37 = vshll.u32 %v669_v31, 16  ;;  %v670_v40 = vld [vmem:[%s6524_s23 + $0xc] sm:$0x1]  ;;  %vm6653_vm3 = vmor %vm685_vm1, %vm686_vm2 }
  0x32   : > { %v6079_v41 = vld [vmem:[%s7560_s1 + $0x90] sm:$0xff]   ;;  %v691_v43 = vrot.slane %v689_v34, 4  ;;  %v694_v44 = vrot.slane %v692_v35, 5  ;;  %v6077_v45 = vld [vmem:[%s6524_s23 + $0x80] ss:$8 sps:$4 sm:$0xff]   ;;  %v712_v52 = vshll.u32 %v670_v40, 16  ;;  %vm7170_vm6 = vmand %vm2406_vm4, %vm2407_vm5 }
  0x33   : > { %v6082_v42 = vld [vmem:[%s7560_s1 + $0xd0] sm:$0xff]   ;;  %v705_v46 = vrot.slane %v703_v36, 4  ;;  %v708_v47 = vrot.slane %v706_v37, 5  ;;  %v673_v49 = vld [vmem:[%s6524_s23 + $0x18] sm:$0xf]  ;;  %v6081_v57 = vld [vmem:[%s7560_s1 + $0x88] sm:$0xff]  }
  0x34   : > { %5413 = vmatpush3.bf16.msra.mxu0 %v6052_v7  ;;  %5449 = vmatpush3.bf16.msra.mxu1 %v6053_v8  ;;  %v671_v48 = vld [vmem:[%s6524_s23 + $0x10] sm:$0xf]  ;;  %v731_v55 = vshrl.u32 %v673_v49, 16  ;;  %v734_v56 = vshll.u32 %v673_v49, 16  ;;  %v695_v58 = vor.u32 %v694_v44, %v691_v43  ;;  %v6085_v60 = vld [vmem:[%s7560_s1 + $0xc8] sm:$0xff]   ;;  %v714_v62 = vrot.slane %v712_v52, 5  ;;  %vm7251_vm9 = vmor %vm2466_vm7, %vm2467_vm8 }
  0x35   : > { %5414 = vmatprep.subr.bf16.mxu0 %v6355_v0  ;;  %5450 = vmatprep.subr.bf16.mxu1 %v6355_v0  ;;  %v6078_v50 = vld [vmem:[%s6524_s23 + $0x30] ss:$8 sps:$4 sm:$0xff]   ;;  %v717_v53 = vshrl.u32 %v671_v48, 16  ;;  %v720_v54 = vshll.u32 %v671_v48, 16  ;;  %v709_v59 = vor.u32 %v708_v47, %v705_v46  ;;  %v6086_v63 = vld [vmem:[%s7560_s1 + $0x80] sm:$0xff]   ;;  %s7514_s20 = scalar_lea.sflag [#allocation5], %s306_s30 }
  0x36   : > { %v672_v1 = vld [vmem:[%s6524_s23 + $0x14] sm:$0x1]  ;;  %v674_v2 = vld [vmem:[%s6524_s23 + $0x1c] sm:$0x1]  ;;  %v6087_v3 = vld [vmem:[%s7560_s1 + $0xc0] sm:$0xff]   ;;  %v733_v6 = vrot.slane %v731_v55, 4 }
  0x37   : > { %v719_v4 = vrot.slane %v717_v53, 4  ;;  %v722_v5 = vrot.slane %v720_v54, 5  ;;  %v736_v7 = vrot.slane %v734_v56, 5  ;;  %v6083_v8 = vld [vmem:[%s6524_s23 + $0x90] ss:$0 sps:$4 sm:$0xff]   ;;  %v6088_v35 = vld [vmem:[%s7560_s1 + $0x138] sm:$0xff]  }
  0x38   : > { %5415 = vmatpush3.bf16.msra.mxu0 %v6054_v9  ;;  %5451 = vmatpush3.bf16.msra.mxu1 %v6055_v10  ;;  %v696_v9 = vrot.slane %v695_v58, 4  ;;  %v710_v10 = vrot.slane %v709_v59, 4  ;;  %v6089_v36 = vld [vmem:[%s6524_s23 + $0xa0] ss:$8 sps:$4 sm:$0xff]   ;;  %v679_v40 = vld [vmem:[%s6524_s23 + $0x30] sm:$0xf] }
  0x39   : > { %5416 = vmatprep.subr.bf16.mxu0 %v6355_v0  ;;  %5452 = vmatprep.subr.bf16.mxu1 %v6355_v0  ;;  %v6090_v46 = vld [vmem:[%s7560_s1 + $0x130] sm:$0xff]   ;;  %v773_v49 = vshrl.u32 %v679_v40, 16  ;;  %v6092_v58 = vld [vmem:[%s7560_s1 + $0x128] sm:$0xff]   ;;  %s6358_s27 = smov [#allocation6]  }
  0x3a   : > { %v6094_v53 = vld [vmem:[%s7560_s1 + $0x170] sm:$0xff]   ;;  %s6274_s21 = sshll.u32 %s6358_s27, 4  ;;  %s6275_s21 = int_to_ptr.vmem [resolvable:$false] %s6274_s21 }
  0x3b   : > { %s6276_s22 = scalar_lea.vmem %s6275_s21, 896  ;;  %p6277_p0 = scmp.lt.s32.totalorder %s7505_s15, %s6275_s21 }
  0x3c   : > { %5417 = vmatpush3.bf16.msra.mxu0 %v6056_v11  ;;  %5453 = vmatpush3.bf16.msra.mxu1 %v6057_v12  ;;  %v6084_v11 = vld [vmem:[%s6524_s23 + $0x40] ss:$0 sps:$4 sm:$0xff]  }
  0x3d   : > { %5418 = vmatprep.subr.bf16.mxu0 %v6355_v0  ;;  %5454 = vmatprep.subr.bf16.mxu1 %v6355_v0  ;;  %v675_v12 = vld [vmem:[%s6524_s23 + $0x20] sm:$0xf] }
  0x40   : > { %5419 = vmatpush3.bf16.msra.mxu0 %v6058_v13  ;;  %5455 = vmatpush3.bf16.msra.mxu1 %v6059_v14  ;;  %v677_v13 = vld [vmem:[%s6524_s23 + $0x28] sm:$0xf] }
  0x41   : > { %5420 = vmatprep.subr.bf16.mxu0 %v6355_v0  ;;  %5456 = vmatprep.subr.bf16.mxu1 %v6355_v0 }
  0x44   : > { %5421 = vmatpush3.bf16.msra.mxu0 %v6060_v15  ;;  %5457 = vmatpush3.bf16.msra.mxu1 %v6061_v16  ;;  %v723_v15 = vor.u32 %v722_v5, %v719_v4  ;;  %v726_v16 = vshll.u32 %v672_v1, 16  ;;  %v680_v4 = vld [vmem:[%s6524_s23 + $0x34] sm:$0x1]  ;;  %v682_v5 = vld [vmem:[%s6524_s23 + $0x3c] sm:$0x1] }
  0x45   : > { %5478 = vmatprep.subr.bf16.mxu0 %v6355_v0  ;;  %5514 = vmatprep.subr.bf16.mxu1 %v6355_v0 }
  0x47   : > { %5423 = vmatmul.mubr.bf16.vlgmr.msra.gmra.mxu0 %v6062_v17  ;;  %5459 = vmatmul.mubr.bf16.vlgmr.msra.gmra.mxu1 %v6063_v18  ;;  %v737_v17 = vor.u32 %v736_v7, %v733_v6  ;;  %v740_v18 = vshll.u32 %v674_v2, 16  ;;  %v6097_v6 = vld [vmem:[%s7560_s1 + $0x168] sm:$0xff]  }
  0x48   : > { %5479 = vmatpush3.bf16.msra.mxu0 %v6064_v19  ;;  %5426 = vmatprep.mubr.msk.bf16.mxu0 %vm6356_vm0, %v6355_v0  ;;  %v745_v19 = vshrl.u32 %v675_v12, 16 }
  0x49   : > { %5480 = vmatprep.subr.bf16.mxu0 %v6355_v0  ;;  %5462 = vmatprep.mubr.msk.bf16.mxu1 %vm6356_vm0, %v6355_v0  ;;  %v738_v29 = vrot.slane %v737_v17, 4  ;;  %v796_v17 = vshll.u32 %v682_v5, 16 }
  0x4a   : > { %5515 = vmatpush3.bf16.msra.mxu1 %v6069_v20  ;;  %v748_v20 = vshll.u32 %v675_v12, 16  ;;  %v747_v31 = vrot.slane %v745_v19, 4  ;;  %v6095_v12 = vld [vmem:[%s7560_s1 + $0x120] sm:$0xff]  }
  0x4b   : > { %5516 = vmatprep.subr.bf16.mxu1 %v6355_v0 }
  0x4c   : > { %5481 = vmatpush3.bf16.msra.mxu0 %v6065_v21  ;;  %v676_v21 = vld [vmem:[%s6524_s23 + $0x24] sm:$0x1] }
  0x4d   : > { %5482 = vmatprep.subr.bf16.mxu0 %v6355_v0 }
  0x4e   : > { %5517 = vmatpush3.bf16.msra.mxu1 %v6070_v23  ;;  %v759_v23 = vshrl.u32 %v677_v13, 16 }
  0x4f   : > { %5427 = vmatmul.mubr.bf16.gmra.mxu0 %v6066_v22  ;;  %5518 = vmatprep.subr.bf16.mxu1 %v6355_v0  ;;  %v678_v22 = vld [vmem:[%s6524_s23 + $0x2c] sm:$0x1] }
  0x50   : > { %5463 = vmatmul.mubr.bf16.gmra.mxu1 %v6067_v24  ;;  %5483 = vmatpush3.bf16.msra.mxu0 %v6068_v25  ;;  %v762_v24 = vshll.u32 %v677_v13, 16  ;;  %v701_v25 = vsel %vm6653_vm3, %v696_v9, %v700_v61  ;;  %v768_v34 = vshll.u32 %v678_v22, 16  ;;  %v761_v37 = vrot.slane %v759_v23, 4  ;;  %v6096_v22 = vld [vmem:[%s6524_s23 + $0xc0] ss:$8 sps:$4 sm:$0xff]   ;;  %v6098_v23 = vld [vmem:[%s7560_s1 + $0x118] sm:$0xff]  }
  0x51   : > { %5430 = vmatprep.mubr.msk.bf16.mxu0 %vm6356_vm0, %v6355_v0  ;;  %5466 = vmatprep.mubr.msk.bf16.mxu1 %vm6356_vm0, %v6355_v0 }
  0x52   : > { %5484 = vmatprep.subr.bf16.mxu0 %v6355_v0  ;;  %5519 = vmatpush3.bf16.msra.mxu1 %v6074_v26  ;;  %v715_v26 = vsel %vm6653_vm3, %v710_v10, %v714_v62  ;;  %v770_v44 = vrot.slane %v768_v34, 5  ;;  %v6091_v62 = vld [vmem:[%s6524_s23 + $0xb0] ss:$8 sps:$4 sm:$0xff]  }
  0x53   : > { %5520 = vmatprep.subr.bf16.mxu1 %v6355_v0  ;;  %v4817_v39 = vcombine.low %v701_v25, %v715_v26 }
  0x54   : > { %5485 = vmatpush3.bf16.msra.mxu0 %v6073_v27  ;;  %v724_v27 = vrot.slane %v723_v15, 4  ;;  %v782_v15 = vshll.u32 %v680_v4, 16  ;;  %v4881_v4 = vld [vmem:[%s6524_s23 + $0xbc] sm:$0x1] }
  0x55   : > { %5486 = vmatprep.subr.bf16.mxu0 %v6355_v0 }
  0x56   : > { %5521 = vmatpush3.bf16.msra.mxu1 %v6076_v30  ;;  %v742_v30 = vrot.slane %v740_v18, 5  ;;  %v6099_v18 = vld [vmem:[%s7560_s1 + $0x160] sm:$0xff]   ;;  %v784_v26 = vrot.slane %v782_v15, 5 }
  0x57   : > { %5431 = vmatmul.mubr.bf16.gmra.mxu0 %v6071_v28  ;;  %5522 = vmatprep.subr.bf16.mxu1 %v6355_v0  ;;  %v728_v28 = vrot.slane %v726_v16, 5  ;;  %v6105_v15 = vld [vmem:[%s6524_s23 + $0xe0] ss:$0 sps:$4 sm:$0xff]  }
  0x58   : > { %5467 = vmatmul.mubr.bf16.gmra.mxu1 %v6072_v32  ;;  %5487 = vmatpush3.bf16.msra.mxu0 %v6075_v33  ;;  %v750_v32 = vrot.slane %v748_v20, 5  ;;  %v754_v33 = vshll.u32 %v676_v21, 16  ;;  %v743_v52 = vsel %vm6653_vm3, %v738_v29, %v742_v30  ;;  %v6102_v29 = vld [vmem:[%s7560_s1 + $0x158] sm:$0xff]   ;;  %v4876_v30 = vld [vmem:[%s6524_s23 + $0xa8] sm:$0xf] }
  0x59   : > { %5434 = vmatprep.mubr.msk.bf16.mxu0 %vm6356_vm0, %v6355_v0  ;;  %5470 = vmatprep.mubr.msk.bf16.mxu1 %vm6356_vm0, %v6355_v0  ;;  %v729_v51 = vsel %vm6653_vm3, %v724_v27, %v728_v28  ;;  %v798_v28 = vrot.slane %v796_v17, 5 }
  0x5a   : > { %5488 = vmatprep.subr.bf16.mxu0 %v6355_v0  ;;  %5523 = vmatpush3.bf16.msra.mxu1 %v6080_v38  ;;  %v764_v38 = vrot.slane %v762_v24, 5  ;;  %v756_v43 = vrot.slane %v754_v33, 5  ;;  %v751_v47 = vor.u32 %v750_v32, %v747_v31  ;;  %v4818_v59 = vcombine.low %v729_v51, %v743_v52  ;;  %v4874_v24 = vld [vmem:[%s6524_s23 + $0xa0] sm:$0xf]  ;;  %v6101_v31 = vld [vmem:[%s7560_s1 + $0x110] sm:$0xff]   ;;  %v6106_v51 = vld [vmem:[%s7560_s1 + $0x148] sm:$0xff]  }
  0x5b   : > { %5524 = vmatprep.subr.bf16.mxu1 %v6355_v0  ;;  %v1363_v34 = vshrl.u32 %v4874_v24, 16 }
  0x5c   : > { %5489 = vmatpush3.bf16.msra.mxu0 %v6079_v41  ;;  %v6093_v41 = vld [vmem:[%s7560_s1 + $0x178] sm:$0xff]   ;;  %v765_v48 = vor.u32 %v764_v38, %v761_v37  ;;  %v1377_v38 = vshrl.u32 %v4876_v30, 16 }
  0x5d   : > { %5490 = vmatprep.subr.bf16.mxu0 %v6355_v0 }
  0x5e   : > { %5525 = vmatpush3.bf16.msra.mxu1 %v6082_v42  ;;  %v681_v42 = vld [vmem:[%s6524_s23 + $0x38] sm:$0xf]  ;;  %v766_v61 = vrot.slane %v765_v48, 4  ;;  %v1379_v52 = vrot.slane %v1377_v38, 4 }
  0x5f   : > { %5435 = vmatmul.mubr.bf16.gmra.mxu0 %v6077_v45  ;;  %5526 = vmatprep.subr.bf16.mxu1 %v6355_v0  ;;  %v683_v45 = vld [vmem:[%s6524_s23 + $0x40] sm:$0xf]  ;;  %v787_v54 = vshrl.u32 %v681_v42, 16  ;;  %v790_v55 = vshll.u32 %v681_v42, 16  ;;  %v4877_v42 = vld [vmem:[%s6524_s23 + $0xac] sm:$0x1] }
  0x60   : > { %5471 = vmatmul.mubr.bf16.gmra.mxu1 %v6078_v50  ;;  %5438 = vmatprep.mubr.msk.bf16.mxu0 %vm6356_vm0, %v6355_v0  ;;  %v776_v50 = vshll.u32 %v679_v40, 16  ;;  %v801_v56 = vshrl.u32 %v683_v45, 16  ;;  %v771_v10 = vsel %vm6653_vm3, %v766_v61, %v770_v44  ;;  %v6104_v40 = vld [vmem:[%s7560_s1 + $0x150] sm:$0xff]   ;;  %v4880_v48 = vld [vmem:[%s6524_s23 + $0xb8] sm:$0xf] }
  0x61   : > { %5491 = vmatpush3.bf16.msra.mxu0 %v6081_v57  ;;  %5474 = vmatprep.mubr.msk.bf16.mxu1 %vm6356_vm0, %v6355_v0  ;;  %v804_v57 = vshll.u32 %v683_v45, 16  ;;  %v789_v2 = vrot.slane %v787_v54, 4  ;;  %v6100_v45 = vld [vmem:[%s6524_s23 + $0xd0] ss:$8 sps:$4 sm:$0xff]   ;;  %v4882_v61 = vld [vmem:[%s6524_s23 + $0xc0] sm:$0xf] }
  0x62   : > { %5492 = vmatprep.subr.bf16.mxu0 %v6355_v0  ;;  %5527 = vmatpush3.bf16.msra.mxu1 %v6085_v60  ;;  %v752_v60 = vrot.slane %v751_v47, 4  ;;  %v778_v1 = vrot.slane %v776_v50, 5  ;;  %v803_v7 = vrot.slane %v801_v56, 4  ;;  %v6110_v38 = vld [vmem:[%s7560_s1 + $0x1b8] sm:$0xff]  }
  0x63   : > { %5528 = vmatprep.subr.bf16.mxu1 %v6355_v0 }
  0x64   : > { %v757_v9 = vsel %vm6653_vm3, %v752_v60, %v756_v43  ;;  %v4878_v43 = vld [vmem:[%s6524_s23 + $0xb0] sm:$0xf]  ;;  %v1408_v60 = vshll.u32 %v4880_v48, 16 }
  0x65   : > { %5493 = vmatpush3.bf16.msra.mxu0 %v6086_v63  ;;  %v775_v63 = vrot.slane %v773_v49, 4  ;;  %v4819_v21 = vcombine.low %v757_v9, %v771_v10  ;;  %v6103_v49 = vld [vmem:[%s7560_s1 + $0x108] sm:$0xff]   ;;  %v1391_v56 = vshrl.u32 %v4878_v43, 16  ;;  %v6108_v9 = vld [vmem:[%s7560_s1 + $0x140] sm:$0xff]  }
  0x66   : > { %5529 = vmatpush3.bf16.msra.mxu1 %v6087_v3  ;;  %5550 = vmatprep.subr.bf16.mxu0 %v6355_v0  ;;  %v792_v3 = vrot.slane %v790_v55, 5  ;;  %v1386_v55 = vshll.u32 %v4877_v42, 16 }
  0x67   : > { %5439 = vmatmul.mubr.bf16.gmra.mxu0 %v6083_v8  ;;  %5586 = vmatprep.subr.bf16.mxu1 %v6355_v0  ;;  %v806_v8 = vrot.slane %v804_v57, 5  ;;  %v779_v13 = vor.u32 %v778_v1, %v775_v63  ;;  %v1394_v57 = vshll.u32 %v4878_v43, 16  ;;  %v4884_v1 = vld [vmem:[%s6524_s23 + $0xc8] sm:$0xf]  ;;  %v1393_v5 = vrot.slane %v1391_v56, 4 }
  0x68   : > { %5475 = vmatmul.mubr.bf16.gmra.mxu1 %v6084_v11  ;;  %5494 = vmatprep.mubr.msk.bf16.mxu0 %vm6356_vm0, %v6355_v0  ;;  %v684_v11 = vld [vmem:[%s6524_s23 + $0x44] sm:$0x1]  ;;  %v793_v16 = vor.u32 %v792_v3, %v789_v2 }
  0x69   : > { %5530 = vmatprep.mubr.msk.bf16.mxu1 %vm6356_vm0, %v6355_v0  ;;  %v807_v19 = vor.u32 %v806_v8, %v803_v7  ;;  %v810_v20 = vshll.u32 %v684_v11, 16  ;;  %v780_v25 = vrot.slane %v779_v13, 4  ;;  %v1419_v7 = vshrl.u32 %v4882_v61, 16 }
  0x6a   : > { %v794_v27 = vrot.slane %v793_v16, 4  ;;  %v1422_v8 = vshll.u32 %v4882_v61, 16  ;;  %v1410_v11 = vrot.slane %v1408_v60, 5  ;;  %v1436_v13 = vshll.u32 %v4884_v1, 16  ;;  %v4890_v61 = vld [vmem:[%s6524_s23 + $0xe0] sm:$0xf] }
  0x6b   : > { %v808_v32 = vrot.slane %v807_v19, 4  ;;  %v812_v33 = vrot.slane %v810_v20, 5 }
  0x6c   : > { %v799_v37 = vsel %vm6653_vm3, %v794_v27, %v798_v28 }
  0x6d   : > { %v813_v50 = vsel %vm6653_vm3, %v808_v32, %v812_v33 }
  0x6e   : > { %v4821_v2 = vcombine.low %v813_v50, %v813_v50  ;;  %v6111_v50 = vld [vmem:[%s7560_s1 + $0x1b0] sm:$0xff]  }
  0x6f   : > { %5495 = vmatmul.mubr.bf16.vlgmr.msra.gmra.mxu0 %v4817_v39  ;;  %v1380_v39 = vshll.u32 %v4876_v30, 16 }
  0x70   : > { %5551 = vmatpush3.bf16.msra.mxu0 %v6088_v35  ;;  %5531 = vmatmul.mubr.bf16.vlgmr.msra.gmra.mxu1 %v6089_v36  ;;  %v1366_v35 = vshll.u32 %v4874_v24, 16  ;;  %v785_v36 = vsel %vm6653_vm3, %v780_v25, %v784_v26  ;;  %v1421_v24 = vrot.slane %v1419_v7, 4  ;;  %v1424_v25 = vrot.slane %v1422_v8, 5  ;;  %v6117_v7 = vld [vmem:[%s7560_s1 + $0x1a0] sm:$0xff]   ;;  %v6118_v8 = vld [vmem:[%s7560_s1 + $0x1e8] sm:$0xff]  }
  0x71   : > { %5552 = vmatprep.subr.bf16.mxu0 %v6355_v0  ;;  %5498 = vmatprep.mubr.msk.bf16.mxu0 %vm6356_vm0, %v6355_v0  ;;  %v4820_v44 = vcombine.low %v785_v36, %v799_v37  ;;  %v4886_v37 = vld [vmem:[%s6524_s23 + $0xd0] sm:$0xf] }
  0x72   : > { %5534 = vmatprep.mubr.msk.bf16.mxu1 %vm6356_vm0, %v6355_v0  ;;  %5587 = vmatpush3.bf16.msra.mxu1 %v6093_v41  ;;  %v4875_v41 = vld [vmem:[%s6524_s23 + $0xa4] sm:$0x1]  ;;  %v1368_v47 = vrot.slane %v1366_v35, 5  ;;  %v1425_v43 = vor.u32 %v1424_v25, %v1421_v24 }
  0x73   : > { %5588 = vmatprep.subr.bf16.mxu1 %v6355_v0  ;;  %v1372_v54 = vshll.u32 %v4875_v41, 16  ;;  %v4888_v41 = vld [vmem:[%s6524_s23 + $0xd8] sm:$0xf] }
  0x74   : > { %5553 = vmatpush3.bf16.msra.mxu0 %v6090_v46  ;;  %v1365_v46 = vrot.slane %v1363_v34, 4  ;;  %v6109_v34 = vld [vmem:[%s6524_s23 + $0xf0] ss:$8 sps:$4 sm:$0xff]  }
  0x75   : > { %5554 = vmatprep.subr.bf16.mxu0 %v6355_v0  ;;  %v1374_v17 = vrot.slane %v1372_v54, 5 }
  0x76   : > { %5589 = vmatpush3.bf16.msra.mxu1 %v6094_v53  ;;  %v1382_v53 = vrot.slane %v1380_v39, 5  ;;  %v1369_v63 = vor.u32 %v1368_v47, %v1365_v46 }
  0x77   : > { %5499 = vmatmul.mubr.bf16.gmra.mxu0 %v4818_v59  ;;  %5590 = vmatprep.subr.bf16.mxu1 %v6355_v0  ;;  %v1405_v59 = vshrl.u32 %v4880_v48, 16  ;;  %v1447_v48 = vshrl.u32 %v4886_v37, 16 }
  0x78   : > { %5535 = vmatmul.mubr.bf16.gmra.mxu1 %v6091_v62  ;;  %5555 = vmatpush3.bf16.msra.mxu0 %v6092_v58  ;;  %v4879_v58 = vld [vmem:[%s6524_s23 + $0xb4] sm:$0x1]  ;;  %v6107_v62 = vld [vmem:[%s7560_s1 + $0x100] sm:$0xff]   ;;  %v1383_v3 = vor.u32 %v1382_v53, %v1379_v52  ;;  %v1370_v16 = vrot.slane %v1369_v63, 4  ;;  %v1464_v52 = vshll.u32 %v4888_v41, 16  ;;  %v1426_v53 = vrot.slane %v1425_v43, 4 }
  0x79   : > { %5502 = vmatprep.mubr.msk.bf16.mxu0 %vm6356_vm0, %v6355_v0  ;;  %5556 = vmatprep.subr.bf16.mxu0 %v6355_v0  ;;  %v1407_v10 = vrot.slane %v1405_v59, 4  ;;  %v1400_v19 = vshll.u32 %v4879_v58, 16  ;;  %v1449_v56 = vrot.slane %v1447_v48, 4  ;;  %v6112_v58 = vld [vmem:[%s6524_s23 + $0x100] ss:$8 sps:$4 sm:$0xff]  }
  0x7a   : > { %5538 = vmatprep.mubr.msk.bf16.mxu1 %vm6356_vm0, %v6355_v0  ;;  %5591 = vmatpush3.bf16.msra.mxu1 %v6097_v6  ;;  %v1396_v6 = vrot.slane %v1394_v57, 5  ;;  %v1384_v20 = vrot.slane %v1383_v3, 4  ;;  %v1375_v30 = vsel %vm6653_vm3, %v1370_v16, %v1374_v17  ;;  %v4887_v63 = vld [vmem:[%s6524_s23 + $0xd4] sm:$0x1]  ;;  %v1466_v3 = vrot.slane %v1464_v52, 5 }
  0x7b   : > { %5592 = vmatprep.subr.bf16.mxu1 %v6355_v0  ;;  %v1411_v27 = vor.u32 %v1410_v11, %v1407_v10  ;;  %v1402_v35 = vrot.slane %v1400_v19, 5  ;;  %v6120_v11 = vld [vmem:[%s7560_s1 + $0x1e0] sm:$0xff]   ;;  %v6119_v19 = vld [vmem:[%s7560_s1 + $0x198] sm:$0xff]   ;;  %v4952_v48 = vld [vmem:[%s6524_s23 + $0x14] sm:$0x1] }
  0x7c   : > { %5557 = vmatpush3.bf16.msra.mxu0 %v6095_v12  ;;  %v1433_v12 = vshrl.u32 %v4884_v1, 16  ;;  %v1397_v26 = vor.u32 %v1396_v6, %v1393_v5  ;;  %v4889_v1 = vld [vmem:[%s6524_s23 + $0xdc] sm:$0x1]  ;;  %v1475_v5 = vshrl.u32 %v4890_v61, 16  ;;  %v1478_v6 = vshll.u32 %v4890_v61, 16  ;;  %v6128_v61 = vld [vmem:[%s7560_s1 + $0x180] sm:$0xff]  }
  0x7d   : > { %5558 = vmatprep.subr.bf16.mxu0 %v6355_v0  ;;  %v1470_v10 = vshll.u32 %v4889_v1, 16 }
  0x7e   : > { %5593 = vmatpush3.bf16.msra.mxu1 %v6099_v18  ;;  %v1388_v18 = vrot.slane %v1386_v55, 5  ;;  %v1435_v28 = vrot.slane %v1433_v12, 4  ;;  %v1398_v39 = vrot.slane %v1397_v26, 4  ;;  %v6115_v55 = vld [vmem:[%s7560_s1 + $0x1f0] sm:$0xff]   ;;  %v1480_v16 = vrot.slane %v1478_v6, 5 }
  0x7f   : > { %5503 = vmatmul.mubr.bf16.gmra.mxu0 %v4819_v21  ;;  %5594 = vmatprep.subr.bf16.mxu1 %v6355_v0  ;;  %v1414_v21 = vshll.u32 %v4881_v4, 16 }
  0x80   : > { %5539 = vmatmul.mubr.bf16.gmra.mxu1 %v6096_v22  ;;  %5559 = vmatpush3.bf16.msra.mxu0 %v6098_v23  ;;  %v4883_v22 = vld [vmem:[%s6524_s23 + $0xc4] sm:$0x1]  ;;  %v4885_v23 = vld [vmem:[%s6524_s23 + $0xcc] sm:$0x1]  ;;  %v1403_v59 = vsel %vm6653_vm3, %v1398_v39, %v1402_v35  ;;  %v6121_v39 = vld [vmem:[%s6524_s23 + $0x120] ss:$8 sps:$4 sm:$0xff]  }
  0x81   : > { %5506 = vmatprep.mubr.msk.bf16.mxu0 %vm6356_vm0, %v6355_v0  ;;  %5542 = vmatprep.mubr.msk.bf16.mxu1 %vm6356_vm0, %v6355_v0  ;;  %v1428_v32 = vshll.u32 %v4883_v22, 16  ;;  %v1442_v33 = vshll.u32 %v4885_v23, 16  ;;  %v1416_v36 = vrot.slane %v1414_v21, 5  ;;  %v6116_v21 = vld [vmem:[%s6524_s23 + $0x110] ss:$8 sps:$4 sm:$0xff]   ;;  %v1472_v23 = vrot.slane %v1470_v10, 5 }
  0x82   : > { %5560 = vmatprep.subr.bf16.mxu0 %v6355_v0  ;;  %5595 = vmatpush3.bf16.msra.mxu1 %v6102_v29  ;;  %v1438_v29 = vrot.slane %v1436_v13, 5  ;;  %v4956_v10 = vld [vmem:[%s6524_s23 + $0x24] sm:$0x1] }
  0x83   : > { %5596 = vmatprep.subr.bf16.mxu1 %v6355_v0  ;;  %v1430_v46 = vrot.slane %v1428_v32, 5  ;;  %v1444_v47 = vrot.slane %v1442_v33, 5  ;;  %v6122_v33 = vld [vmem:[%s7560_s1 + $0x190] sm:$0xff]  }
  0x84   : > { %5561 = vmatpush3.bf16.msra.mxu0 %v6101_v31  ;;  %v1389_v31 = vsel %vm6653_vm3, %v1384_v20, %v1388_v18  ;;  %v4891_v20 = vld [vmem:[%s6524_s23 + $0xe4] sm:$0x1] }
  0x85   : > { %5562 = vmatprep.subr.bf16.mxu0 %v6355_v0  ;;  %v4892_v42 = vcombine.low %v1375_v30, %v1389_v31  ;;  %v1431_v17 = vsel %vm6653_vm3, %v1426_v53, %v1430_v46  ;;  %v4949_v30 = vld [vmem:[%s6524_s23 + $0x8] sm:$0xf] }
  0x86   : > { %5597 = vmatpush3.bf16.msra.mxu1 %v6104_v40  ;;  %v1412_v40 = vrot.slane %v1411_v27, 4  ;;  %v6124_v53 = vld [vmem:[%s7560_s1 + $0x188] sm:$0xff]  }
  0x87   : > { %5507 = vmatmul.mubr.bf16.gmra.mxu0 %v4820_v44  ;;  %5598 = vmatprep.subr.bf16.mxu1 %v6355_v0  ;;  %v1439_v44 = vor.u32 %v1438_v29, %v1435_v28  ;;  %v1484_v28 = vshll.u32 %v4891_v20, 16  ;;  %v6123_v29 = vld [vmem:[%s7560_s1 + $0x1d8] sm:$0xff]  }
  0x88   : > { %5543 = vmatmul.mubr.bf16.gmra.mxu1 %v6100_v45  ;;  %5510 = vmatprep.mubr.msk.bf16.mxu0 %vm6356_vm0, %v6355_v0  ;;  %v6114_v45 = vld [vmem:[%s7560_s1 + $0x1f8] sm:$0xff]   ;;  %v1417_v60 = vsel %vm6653_vm3, %v1412_v40, %v1416_v36  ;;  %v6125_v40 = vld [vmem:[%s7560_s1 + $0x1d0] sm:$0xff]  }
  0x89   : > { %5563 = vmatpush3.bf16.msra.mxu0 %v6103_v49  ;;  %5546 = vmatprep.mubr.msk.bf16.mxu1 %vm6356_vm0, %v6355_v0  ;;  %v1450_v49 = vshll.u32 %v4886_v37, 16  ;;  %v1440_v54 = vrot.slane %v1439_v44, 4  ;;  %v4893_v4 = vcombine.low %v1403_v59, %v1417_v60  ;;  %v1486_v36 = vrot.slane %v1484_v28, 5  ;;  %v4953_v37 = vld [vmem:[%s6524_s23 + $0x18] sm:$0xf] }
  0x8a   : > { %5564 = vmatprep.subr.bf16.mxu0 %v6355_v0  ;;  %5599 = vmatpush3.bf16.msra.mxu1 %v6106_v51  ;;  %v1461_v51 = vshrl.u32 %v4888_v41, 16  ;;  %v2037_v41 = vshrl.u32 %v4949_v30, 16  ;;  %v4950_v44 = vld [vmem:[%s6524_s23 + $0xc] sm:$0x1]  ;;  %v4963_v28 = vld [vmem:[%s6524_s23 + $0x40] sm:$0xf] }
  0x8b   : > { %5600 = vmatprep.subr.bf16.mxu1 %v6355_v0  ;;  %v1452_v57 = vrot.slane %v1450_v49, 5  ;;  %v1445_v18 = vsel %vm6653_vm3, %v1440_v54, %v1444_v47  ;;  %v4957_v47 = vld [vmem:[%s6524_s23 + $0x28] sm:$0xf]  ;;  %v2065_v49 = vshrl.u32 %v4953_v37, 16 }
  0x8c   : > { %v4894_v24 = vcombine.low %v1431_v17, %v1445_v18  ;;  %v2093_v59 = vshrl.u32 %v4957_v47, 16  ;;  %v2096_v60 = vshll.u32 %v4957_v47, 16  ;;  %v2138_v47 = vshll.u32 %v4963_v28, 16 }
  0x8d   : > { %5565 = vmatpush3.bf16.msra.mxu0 %v6107_v62  ;;  %v6113_v62 = vld [vmem:[%s7560_s1 + $0x1a8] sm:$0xff]   ;;  %v1453_v12 = vor.u32 %v1452_v57, %v1449_v56  ;;  %v2039_v56 = vrot.slane %v2037_v41, 4 }
  0x8e   : > { %5601 = vmatpush3.bf16.msra.mxu1 %v6108_v9  ;;  %5622 = vmatprep.subr.bf16.mxu0 %v6355_v0  ;;  %v1456_v9 = vshll.u32 %v4887_v63, 16  ;;  %v2095_v17 = vrot.slane %v2093_v59, 4  ;;  %v2098_v18 = vrot.slane %v2096_v60, 5  ;;  %v6136_v59 = vld [vmem:[%s7560_s1 + $0x228] sm:$0xff]   ;;  %v6138_v60 = vld [vmem:[%s7560_s1 + $0x220] sm:$0xff]  }
  0x8f   : > { %5511 = vmatmul.mubr.bf16.gmra.mxu0 %v4821_v2  ;;  %5658 = vmatprep.subr.bf16.mxu1 %v6355_v0  ;;  %v1463_v2 = vrot.slane %v1461_v51, 4  ;;  %v1454_v25 = vrot.slane %v1453_v12, 4 }
  0x90   : > { %5547 = vmatmul.mubr.bf16.gmra.mxu1 %v6105_v15  ;;  %5566 = vmatprep.mubr.msk.bf16.mxu0 %vm6356_vm0, %v6355_v0  ;;  %v1477_v15 = vrot.slane %v1475_v5, 4  ;;  %v1458_v22 = vrot.slane %v1456_v9, 5  ;;  %v2067_v5 = vrot.slane %v2065_v49, 4  ;;  %v6126_v9 = vld [vmem:[%s6524_s23 + $0x130] ss:$0 sps:$4 sm:$0xff]  }
  0x91   : > { %5602 = vmatprep.mubr.msk.bf16.mxu1 %vm6356_vm0, %v6355_v0  ;;  %v1467_v13 = vor.u32 %v1466_v3, %v1463_v2  ;;  %v2060_v2 = vshll.u32 %v4952_v48, 16  ;;  %v6129_v3 = vld [vmem:[%s7560_s1 + $0x1c0] sm:$0xff]   ;;  %v6131_v48 = vld [vmem:[%s7560_s1 + $0x238] sm:$0xff]  }
  0x92   : > { %v1481_v27 = vor.u32 %v1480_v16, %v1477_v15  ;;  %v1459_v31 = vsel %vm6653_vm3, %v1454_v25, %v1458_v22  ;;  %v4960_v16 = vld [vmem:[%s6524_s23 + $0x34] sm:$0x1]  ;;  %v6132_v49 = vld [vmem:[%s6524_s23 + $0x58] ss:$8 sps:$4 sm:$0xff]  }
  0x93   : > { %v1468_v26 = vrot.slane %v1467_v13, 4 }
  0x94   : > { %v1482_v35 = vrot.slane %v1481_v27, 4 }
  0x95   : > { %v1473_v32 = vsel %vm6653_vm3, %v1468_v26, %v1472_v23  ;;  %v4961_v23 = vld [vmem:[%s6524_s23 + $0x38] sm:$0xf]  ;;  %v2088_v26 = vshll.u32 %v4956_v10, 16 }
  0x96   : > { %v4895_v43 = vcombine.low %v1459_v31, %v1473_v32  ;;  %v1487_v54 = vsel %vm6653_vm3, %v1482_v35, %v1486_v36  ;;  %v2116_v32 = vshll.u32 %v4960_v16, 16  ;;  %v2121_v35 = vshrl.u32 %v4961_v23, 16 }
  0x97   : > { %5567 = vmatmul.mubr.bf16.vlgmr.msra.gmra.mxu0 %v6109_v34  ;;  %v4951_v34 = vld [vmem:[%s6524_s23 + $0x10] sm:$0xf] }
  0x98   : > { %5623 = vmatpush3.bf16.msra.mxu0 %v6110_v38  ;;  %5603 = vmatmul.mubr.bf16.vlgmr.msra.gmra.mxu1 %v4892_v42  ;;  %v4955_v38 = vld [vmem:[%s6524_s23 + $0x20] sm:$0xf]  ;;  %v2040_v42 = vshll.u32 %v4949_v30, 16  ;;  %v2054_v46 = vshll.u32 %v4951_v34, 16 }
  0x99   : > { %5624 = vmatprep.subr.bf16.mxu0 %v6355_v0  ;;  %5570 = vmatprep.mubr.msk.bf16.mxu0 %vm6356_vm0, %v6355_v0  ;;  %v2079_v51 = vshrl.u32 %v4955_v38, 16  ;;  %v2082_v52 = vshll.u32 %v4955_v38, 16  ;;  %v2124_v38 = vshll.u32 %v4961_v23, 16 }
  0x9a   : > { %5606 = vmatprep.mubr.msk.bf16.mxu1 %vm6356_vm0, %v6355_v0  ;;  %5659 = vmatpush3.bf16.msra.mxu1 %v6114_v45  ;;  %v2051_v45 = vshrl.u32 %v4951_v34, 16  ;;  %v2042_v57 = vrot.slane %v2040_v42, 5  ;;  %v2056_v1 = vrot.slane %v2054_v46, 5  ;;  %v2099_v34 = vor.u32 %v2098_v18, %v2095_v17  ;;  %v4965_v17 = vld [vmem:[%s6524_s23 + $0x48] sm:$0xf] }
  0x9b   : > { %5660 = vmatprep.subr.bf16.mxu1 %v6355_v0  ;;  %v6928_v42 = vrot.slane %v2088_v26, 5  ;;  %v6935_v46 = vrot.slane %v2116_v32, 5 }
  0x9c   : > { %5625 = vmatpush3.bf16.msra.mxu0 %v6111_v50  ;;  %v2068_v50 = vshll.u32 %v4953_v37, 16  ;;  %v2053_v63 = vrot.slane %v2051_v45, 4  ;;  %v2043_v15 = vor.u32 %v2042_v57, %v2039_v56  ;;  %v6133_v56 = vld [vmem:[%s7560_s1 + $0x230] sm:$0xff]   ;;  %v6134_v57 = vld [vmem:[%s6524_s23 + $0x18] ss:$8 sps:$4 sm:$0xff]  }
  0x9d   : > { %5626 = vmatprep.subr.bf16.mxu0 %v6355_v0 }
  0x9e   : > { %5661 = vmatpush3.bf16.msra.mxu1 %v6115_v55  ;;  %v6127_v55 = vld [vmem:[%s7560_s1 + $0x1c8] sm:$0xff]   ;;  %v2070_v6 = vrot.slane %v2068_v50, 5  ;;  %v6941_v50 = vrot.slane %v2099_v34, 4 }
  0x9f   : > { %5571 = vmatmul.mubr.bf16.gmra.mxu0 %v6112_v58  ;;  %5662 = vmatprep.subr.bf16.mxu1 %v6355_v0  ;;  %v4959_v58 = vld [vmem:[%s6524_s23 + $0x30] sm:$0xf] }
  0xa0   : > { %5607 = vmatmul.mubr.bf16.gmra.mxu1 %v4893_v4  ;;  %5627 = vmatpush3.bf16.msra.mxu0 %v6113_v62  ;;  %v2046_v62 = vshll.u32 %v4950_v44, 16  ;;  %v4954_v4 = vld [vmem:[%s6524_s23 + $0x1c] sm:$0x1]  ;;  %v2107_v12 = vshrl.u32 %v4959_v58, 16  ;;  %v2110_v13 = vshll.u32 %v4959_v58, 16 }
  0xa1   : > { %5574 = vmatprep.mubr.msk.bf16.mxu0 %vm6356_vm0, %v6355_v0  ;;  %5628 = vmatprep.subr.bf16.mxu0 %v6355_v0  ;;  %v2074_v22 = vshll.u32 %v4954_v4, 16  ;;  %v6130_v44 = vld [vmem:[%s6524_s23 + $0x8] ss:$8 sps:$4 sm:$0xff]  }
  0xa2   : > { %5610 = vmatprep.mubr.msk.bf16.mxu1 %vm6356_vm0, %v6355_v0  ;;  %5663 = vmatpush3.bf16.msra.mxu1 %v6118_v8  ;;  %v2084_v8 = vrot.slane %v2082_v52, 5  ;;  %v6909_v20 = vrot.slane %v2046_v62, 5  ;;  %v2109_v30 = vrot.slane %v2107_v12, 4  ;;  %v2112_v31 = vrot.slane %v2110_v13, 5  ;;  %v6135_v58 = vld [vmem:[%s6524_s23 + $0x68] ss:$8 sps:$4 sm:$0xff]  }
  0xa3   : > { %5664 = vmatprep.subr.bf16.mxu1 %v6355_v0  ;;  %v6920_v37 = vrot.slane %v2074_v22, 5  ;;  %v6945_v52 = vrot.slane %v2124_v38, 5  ;;  %v6139_v62 = vld [vmem:[%s6524_s23 + $0x78] ss:$8 sps:$4 sm:$0xff]   ;;  %v6144_v4 = vld [vmem:[%s7560_s1 + $0x208] sm:$0xff]  }
  0xa4   : > { %5629 = vmatpush3.bf16.msra.mxu0 %v6117_v7  ;;  %v2081_v7 = vrot.slane %v2079_v51, 4  ;;  %v2113_v45 = vor.u32 %v2112_v31, %v2109_v30  ;;  %v6943_v51 = vrot.slane %v2121_v35, 4  ;;  %v4962_v13 = vld [vmem:[%s6524_s23 + $0x3c] sm:$0x1] }
  0xa5   : > { %5630 = vmatprep.subr.bf16.mxu0 %v6355_v0 }
  0xa6   : > { %5665 = vmatpush3.bf16.msra.mxu1 %v6120_v11  ;;  %v4958_v11 = vld [vmem:[%s6524_s23 + $0x2c] sm:$0x1]  ;;  %v2085_v25 = vor.u32 %v2084_v8, %v2081_v7  ;;  %v6146_v7 = vld [vmem:[%s6524_s23 + $0x98] ss:$0 sps:$4 sm:$0xff]  }
  0xa7   : > { %5575 = vmatmul.mubr.bf16.gmra.mxu0 %v6116_v21  ;;  %5666 = vmatprep.subr.bf16.mxu1 %v6355_v0  ;;  %v2057_v21 = vor.u32 %v2056_v1, %v2053_v63  ;;  %v2102_v27 = vshll.u32 %v4958_v11, 16  ;;  %v6140_v63 = vld [vmem:[%s7560_s1 + $0x218] sm:$0xff]   ;;  %v6143_v1 = vld [vmem:[%s7560_s1 + $0x210] sm:$0xff]  }
  0xa8   : > { %5611 = vmatmul.mubr.bf16.gmra.mxu1 %v4894_v24  ;;  %5631 = vmatpush3.bf16.msra.mxu0 %v6119_v19  ;;  %v4896_v19 = vcombine.low %v1487_v54, %v1487_v54  ;;  %v2071_v24 = vor.u32 %v2070_v6, %v2067_v5  ;;  %v6926_v41 = vrot.slane %v2085_v25, 4  ;;  %v6949_v54 = vrot.slane %v2113_v45, 4  ;;  %v6147_v5 = vld [vmem:[%s7560_s1 + $0x200] sm:$0xff]   ;;  %v6145_v6 = vld [vmem:[%s6524_s23 + $0x48] ss:$0 sps:$4 sm:$0xff]  }
  0xa9   : > { %5578 = vmatprep.mubr.msk.bf16.mxu0 %vm6356_vm0, %v6355_v0  ;;  %5614 = vmatprep.mubr.msk.bf16.mxu1 %vm6356_vm0, %v6355_v0  ;;  %v6918_v36 = vrot.slane %v2057_v21, 4  ;;  %v2152_v25 = vshll.u32 %v4965_v17, 16 }
  0xaa   : > { %5632 = vmatprep.subr.bf16.mxu0 %v6355_v0  ;;  %5667 = vmatpush3.bf16.msra.mxu1 %v6123_v29  ;;  %v6913_v29 = vrot.slane %v2060_v2, 5  ;;  %v6141_v2 = vld [vmem:[%s6524_s23 + $0x38] ss:$8 sps:$4 sm:$0xff]   ;;  %v2091_v12 = vsel %vm6653_vm3, %v6926_v41, %v6928_v42  ;;  %v2119_v22 = vsel %vm6653_vm3, %v6949_v54, %v6935_v46 }
  0xab   : > { %5668 = vmatprep.subr.bf16.mxu1 %v6355_v0  ;;  %v2154_v32 = vrot.slane %v2152_v25, 5 }
  0xac   : > { %5633 = vmatpush3.bf16.msra.mxu0 %v6122_v33  ;;  %v6916_v33 = vrot.slane %v2043_v15, 4  ;;  %v4964_v15 = vld [vmem:[%s6524_s23 + $0x44] sm:$0x1] }
  0xad   : > { %5634 = vmatprep.subr.bf16.mxu0 %v6355_v0  ;;  %v2144_v21 = vshll.u32 %v4964_v15, 16 }
  0xae   : > { %5669 = vmatpush3.bf16.msra.mxu1 %v6125_v40  ;;  %v6924_v40 = vrot.slane %v2071_v24, 4  ;;  %v2049_v8 = vsel %vm6653_vm3, %v6916_v33, %v6909_v20  ;;  %v2130_v20 = vshll.u32 %v4962_v13, 16  ;;  %v2149_v24 = vshrl.u32 %v4965_v17, 16  ;;  %v4966_v33 = vld [vmem:[%s6524_s23 + $0x4c] sm:$0x1] }
  0xaf   : > { %5579 = vmatmul.mubr.bf16.gmra.mxu0 %v6121_v39  ;;  %5670 = vmatprep.subr.bf16.mxu1 %v6355_v0  ;;  %v2135_v39 = vshrl.u32 %v4963_v28, 16  ;;  %v2146_v28 = vrot.slane %v2144_v21, 5 }
  0xb0   : > { %5615 = vmatmul.mubr.bf16.gmra.mxu1 %v4895_v43  ;;  %5582 = vmatprep.mubr.msk.bf16.mxu0 %vm6356_vm0, %v6355_v0  ;;  %v6930_v43 = vrot.slane %v2102_v27, 5  ;;  %v2077_v11 = vsel %vm6653_vm3, %v6924_v40, %v6920_v37  ;;  %v2132_v27 = vrot.slane %v2130_v20, 5  ;;  %v2151_v31 = vrot.slane %v2149_v24, 4 }
  0xb1   : > { %5635 = vmatpush3.bf16.msra.mxu0 %v6124_v53  ;;  %5618 = vmatprep.mubr.msk.bf16.mxu1 %vm6356_vm0, %v6355_v0  ;;  %v6947_v53 = vrot.slane %v2135_v39, 4  ;;  %v4968_v16 = vcombine.low %v2077_v11, %v2091_v12  ;;  %v2158_v37 = vshll.u32 %v4966_v33, 16 }
  0xb2   : > { %5636 = vmatprep.subr.bf16.mxu0 %v6355_v0  ;;  %5671 = vmatpush3.bf16.msra.mxu1 %v6127_v55  ;;  %v6951_v55 = vrot.slane %v2138_v47, 5  ;;  %v2105_v18 = vsel %vm6653_vm3, %v6941_v50, %v6930_v43 }
  0xb3   : > { %5672 = vmatprep.subr.bf16.mxu1 %v6355_v0  ;;  %v4969_v26 = vcombine.low %v2105_v18, %v2119_v22  ;;  %v2160_v40 = vrot.slane %v2158_v37, 5 }
  0xb4   : > { %v2141_v23 = vor.u32 %v6951_v55, %v6947_v53 }
  0xb5   : > { %5637 = vmatpush3.bf16.msra.mxu0 %v6128_v61  ;;  %v6137_v61 = vld [vmem:[%s6524_s23 + $0x28] ss:$8 sps:$4 sm:$0xff]  }
  0xb6   : > { %5673 = vmatpush3.bf16.msra.mxu1 %v6129_v3  ;;  %5694 = vmatprep.subr.bf16.mxu0 %v6355_v0  ;;  %v6142_v3 = vld [vmem:[%s6524_s23 + $0x88] ss:$8 sps:$4 sm:$0xff]   ;;  %v2142_v30 = vrot.slane %v2141_v23, 4 }
  0xb7   : > { %5583 = vmatmul.mubr.bf16.gmra.mxu0 %v6126_v9  ;;  %v2063_v9 = vsel %vm6653_vm3, %v6918_v36, %v6913_v29  ;;  %v2155_v36 = vor.u32 %v2154_v32, %v2151_v31 }
  0xb8   : > { %5619 = vmatmul.mubr.bf16.gmra.mxu1 %v4896_v19  ;;  %5638 = vmatprep.mubr.msk.bf16.mxu0 %vm6356_vm0, %v6355_v0  ;;  %v4967_v10 = vcombine.low %v2049_v8, %v2063_v9  ;;  %v2127_v19 = vor.u32 %v6945_v52, %v6943_v51  ;;  %v2147_v35 = vsel %vm6653_vm3, %v2142_v30, %v2146_v28  ;;  %v6148_v28 = vld [vmem:[#allocation3 + $0x78] sm:$0xff]  }
  0xb9   : > { %5674 = vmatprep.mubr.msk.bf16.mxu1 %vm6356_vm0, %v6355_v0  ;;  %v2156_v39 = vrot.slane %v2155_v36, 4  ;;  %5730 = vmatprep.subr.bf16.mxu1 %v6148_v28 }
  0xba   : > { %v2128_v29 = vrot.slane %v2127_v19, 4 }
  0xbb   : > { %v2161_v41 = vsel %vm6653_vm3, %v2156_v39, %v2160_v40 }
  0xbc   : > { %v2133_v34 = vsel %vm6653_vm3, %v2128_v29, %v2132_v27  ;;  %v4971_v42 = vcombine.low %v2161_v41, %v2161_v41 }
  0xbd   : > { %v4970_v38 = vcombine.low %v2133_v34, %v2147_v35  ;;  %v6357_v34 = vmov 0   ;;  %v6149_v35 = vld [vmem:[#allocation3 + $0x70] sm:$0xff]  }
  0xbe   : > { %2397 = vst [vmem:[#allocation2] sm:$0xf] %v6357_v34  ;;  %2398 = vst [vmem:[#allocation2 + $0xc] sm:$0xf] %v6357_v34 }
  0xbf   : > { %5639 = vmatmul.mubr.bf16.vlgmr.msra.gmra.mxu0 %v6130_v44  ;;  %2399 = vst [vmem:[#allocation2 + $0x18] sm:$0xf] %v6357_v34  ;;  %2400 = vst [vmem:[#allocation2 + $0x24] sm:$0xf] %v6357_v34 }
  0xc0   : > { %5695 = vmatpush3.bf16.msra.mxu0 %v6131_v48  ;;  %5675 = vmatmul.mubr.bf16.vlgmr.msra.gmra.mxu1 %v6132_v49  ;;  %2401 = vst [vmem:[#allocation2 + $0x30] sm:$0xf] %v6357_v34  ;;  %2402 = vst [vmem:[#allocation2 + $0x3c] sm:$0xf] %v6357_v34 }
  0xc1   : > { %5696 = vmatprep.subr.bf16.mxu0 %v6355_v0  ;;  %5642 = vmatprep.mubr.msk.bf16.mxu0 %vm6356_vm0, %v6355_v0  ;;  %2403 = vst [vmem:[#allocation2 + $0x48] sm:$0xf] %v6357_v34  ;;  %2404 = vst [vmem:[#allocation2 + $0x54] sm:$0xf] %v6357_v34 }
  0xc2   : > { %5678 = vmatprep.mubr.msk.bf16.mxu1 %vm6356_vm0, %v6355_v0  ;;  %5731 = vmatpush3.bf16.msra.mxu1 %v6148_v28  ;;  %2405 = vst [vmem:[#allocation2 + $0x60] sm:$0xf] %v6357_v34  ;;  %2412 = vst [vmem:[#allocation2 + $0x8] sm:$0xf] %v6357_v34 }
  0xc3   : > { %2416 = vst [vmem:[#allocation2 + $0x14] sm:$0xf] %v6357_v34  ;;  %2420 = vst [vmem:[#allocation2 + $0x20] sm:$0xf] %v6357_v34  ;;  %5732 = vmatprep.subr.bf16.mxu1 %v6149_v35 }
  0xc4   : > { %5697 = vmatpush3.bf16.msra.mxu0 %v6133_v56  ;;  %2424 = vst [vmem:[#allocation2 + $0x2c] sm:$0xf] %v6357_v34  ;;  %2428 = vst [vmem:[#allocation2 + $0x38] sm:$0xf] %v6357_v34 }
  0xc5   : > { %5698 = vmatprep.subr.bf16.mxu0 %v6355_v0  ;;  %2432 = vst [vmem:[#allocation2 + $0x44] sm:$0xf] %v6357_v34  ;;  %2436 = vst [vmem:[#allocation2 + $0x50] sm:$0xf] %v6357_v34 }
  0xc6   : > { %2440 = vst [vmem:[#allocation2 + $0x5c] sm:$0xf] %v6357_v34  ;;  %2444 = vst [vmem:[#allocation2 + $0x68] sm:$0xf] %v6357_v34  ;;  %5733 = vmatpush3.bf16.msra.mxu1 %v6149_v35 }
  0xc7   : > { %5643 = vmatmul.mubr.bf16.gmra.mxu0 %v6134_v57 }
  0xc8   : > { %5679 = vmatmul.mubr.bf16.gmra.mxu1 %v6135_v58  ;;  %5699 = vmatpush3.bf16.msra.mxu0 %v6136_v59 }
  0xc9   : > { %5646 = vmatprep.mubr.msk.bf16.mxu0 %vm6356_vm0, %v6355_v0  ;;  %5700 = vmatprep.subr.bf16.mxu0 %v6355_v0 }
  0xca   : > { %5682 = vmatprep.mubr.msk.bf16.mxu1 %vm6356_vm0, %v6355_v0 }
  0xcc   : > { %5701 = vmatpush3.bf16.msra.mxu0 %v6138_v60 }
  0xcd   : > { %5702 = vmatprep.subr.bf16.mxu0 %v6355_v0 }
  0xcf   : > { %5647 = vmatmul.mubr.bf16.gmra.mxu0 %v6137_v61 }
  0xd0   : > { %5683 = vmatmul.mubr.bf16.gmra.mxu1 %v6139_v62  ;;  %5703 = vmatpush3.bf16.msra.mxu0 %v6140_v63 }
  0xd1   : > { %5650 = vmatprep.mubr.msk.bf16.mxu0 %vm6356_vm0, %v6355_v0  ;;  %5686 = vmatprep.mubr.msk.bf16.mxu1 %vm6356_vm0, %v6355_v0 }
  0xd2   : > { %5704 = vmatprep.subr.bf16.mxu0 %v6355_v0 }
  0xd4   : > { %5705 = vmatpush3.bf16.msra.mxu0 %v6143_v1 }
  0xd5   : > { %5706 = vmatprep.subr.bf16.mxu0 %v6355_v0 }
  0xd7   : > { %5651 = vmatmul.mubr.bf16.gmra.mxu0 %v6141_v2 }
  0xd8   : > { %5687 = vmatmul.mubr.bf16.gmra.mxu1 %v6142_v3  ;;  %5654 = vmatprep.mubr.msk.bf16.mxu0 %vm6356_vm0, %v6355_v0 }
  0xd9   : > { %5707 = vmatpush3.bf16.msra.mxu0 %v6144_v4  ;;  %5690 = vmatprep.mubr.msk.bf16.mxu1 %vm6356_vm0, %v6355_v0 }
  0xda   : > { %5708 = vmatprep.subr.bf16.mxu0 %v6355_v0 }
  0xdd   : > { %5709 = vmatpush3.bf16.msra.mxu0 %v6147_v5 }
  0xdf   : > { %5655 = vmatmul.mubr.bf16.gmra.mxu0 %v6145_v6 }
  0xe0   : > { %5691 = vmatmul.mubr.bf16.gmra.mxu1 %v6146_v7  ;;  %5710 = vmatprep.mubr.msk.bf16.mxu0 %vm6356_vm0, %v6355_v0 }
  0xe7   : > { %5711 = vmatmul.mubr.bf16.vlgmr.msra.gmra.mxu0 %v4967_v10 }
  0xe8   : > { %5714 = vmatprep.mubr.msk.bf16.mxu0 %vm6356_vm0, %v6355_v0 }
  0xef   : > { %5715 = vmatmul.mubr.bf16.gmra.mxu0 %v4968_v16 }
  0xf0   : > { %5718 = vmatprep.mubr.msk.bf16.mxu0 %vm6356_vm0, %v6355_v0 }
  0xf7   : > { %5719 = vmatmul.mubr.bf16.gmra.mxu0 %v4969_v26 }
  0xf8   : > { %5722 = vmatprep.mubr.msk.bf16.mxu0 %vm6356_vm0, %v6355_v0 }
  0xff   : > { %5723 = vmatmul.mubr.bf16.gmra.mxu0 %v4970_v38 }
 0x100   : > { %5726 = vmatprep.mubr.msk.bf16.mxu0 %vm6356_vm0, %v6355_v0 }
 0x107   : > { %v481_v43 = vpop.f32.mrf.mxu0  ;;  %5727 = vmatmul.mubr.bf16.gmra.mxu0 %v4971_v42  ;;  %v629_v44 = vpop.f32.mrf.mxu1  ;;  %v6150_v42 = vld [vmem:[#allocation3 + $0x68] sm:$0xff]  }
 0x108   : > { %v630_v45 = vadd.f32 %v629_v44, %v481_v43  ;;  %5734 = vmatprep.subr.bf16.mxu1 %v6150_v42 }
 0x109   : > { %v5424_v46 = vpop.f32.mrf.mxu0  ;;  %v5460_v47 = vpop.f32.mrf.mxu1  ;;  %5735 = vmatpush3.bf16.msra.mxu1 %v6150_v42 }
 0x10b   : > { %v484_v48 = vpop.f32.mrf.mxu0  ;;  %v632_v49 = vpop.f32.mrf.mxu1 }
 0x10c   : > { %v7053_v50 = vadd.f32 %v632_v49, %v484_v48 }
 0x10d   : > { %v5425_v51 = vpop.f32.mrf.mxu0  ;;  %v5461_v52 = vpop.f32.mrf.mxu1 }
 0x10e   : > { %v6151_v51 = vld [vmem:[#allocation3 + $0x60] sm:$0xff]  }
 0x10f   : > { %v489_v53 = vpop.f32.mrf.mxu0  ;;  %5736 = vmatprep.subr.bf16.mxu1 %v6151_v51 }
 0x110   : > { %v637_v54 = vpop.f32.mrf.mxu1  ;;  %5737 = vmatpush3.bf16.msra.mxu1 %v6151_v51 }
 0x111   : > { %v7055_v55 = vadd.f32 %v637_v54, %v489_v53  ;;  %v5428_v0 = vpop.f32.mrf.mxu0  ;;  %v6154_v53 = vld [vmem:[#allocation3 + $0xb0] sm:$0xff]  }
 0x112   : > { %v5464_v56 = vpop.f32.mrf.mxu1 }
 0x113   : > { %v492_v57 = vpop.f32.mrf.mxu0 }
 0x114   : > { %v640_v58 = vpop.f32.mrf.mxu1 }
 0x115   : > { %v7057_v59 = vadd.f32 %v640_v58, %v492_v57  ;;  %v5429_v60 = vpop.f32.mrf.mxu0  ;;  %v6153_v58 = vld [vmem:[#allocation3 + $0x58] sm:$0xff]  }
 0x116   : > { %v5465_v61 = vpop.f32.mrf.mxu1  ;;  %5738 = vmatprep.subr.bf16.mxu1 %v6153_v58 }
 0x117   : > { %v497_v62 = vpop.f32.mrf.mxu0  ;;  %v6155_v61 = vld [vmem:[#allocation3 + $0xa8] sm:$0xff]   ;;  %5739 = vmatpush3.bf16.msra.mxu1 %v6153_v58 }
 0x118   : > { %v645_v63 = vpop.f32.mrf.mxu1 }
 0x119   : > { %v7059_v1 = vadd.f32 %v645_v63, %v497_v62  ;;  %v5432_v2 = vpop.f32.mrf.mxu0 }
 0x11a   : > { %v5468_v3 = vpop.f32.mrf.mxu1 }
 0x11b   : > { %v500_v4 = vpop.f32.mrf.mxu0 }
 0x11c   : > { %v648_v5 = vpop.f32.mrf.mxu1 }
 0x11d   : > { %v7061_v6 = vadd.f32 %v648_v5, %v500_v4  ;;  %v5433_v7 = vpop.f32.mrf.mxu0  ;;  %v6156_v4 = vld [vmem:[#allocation3 + $0x50] sm:$0xff]  }
 0x11e   : > { %v5469_v8 = vpop.f32.mrf.mxu1  ;;  %v6157_v7 = vld [vmem:[#allocation3 + $0xa0] sm:$0xff]   ;;  %5740 = vmatprep.subr.bf16.mxu1 %v6156_v4 }
 0x11f   : > { %v505_v9 = vpop.f32.mrf.mxu0  ;;  %5741 = vmatpush3.bf16.msra.mxu1 %v6156_v4 }
 0x120   : > { %v653_v10 = vpop.f32.mrf.mxu1 }
 0x121   : > { %v7063_v11 = vadd.f32 %v653_v10, %v505_v9  ;;  %v5436_v12 = vpop.f32.mrf.mxu0 }
 0x122   : > { %v5472_v13 = vpop.f32.mrf.mxu1 }
 0x123   : > { %v508_v15 = vpop.f32.mrf.mxu0 }
 0x124   : > { %v656_v16 = vpop.f32.mrf.mxu1 }
 0x125   : > { %v7065_v17 = vadd.f32 %v656_v16, %v508_v15  ;;  %v5437_v18 = vpop.f32.mrf.mxu0  ;;  %v6160_v16 = vld [vmem:[#allocation3 + $0x98] sm:$0xff]  }
 0x126   : > { %v5473_v19 = vpop.f32.mrf.mxu1 }
 0x127   : > { %v513_v20 = vpop.f32.mrf.mxu0 }
 0x128   : > { %v661_v21 = vpop.f32.mrf.mxu1 }
 0x129   : > { %v7067_v22 = vadd.f32 %v661_v21, %v513_v20  ;;  %v5440_v23 = vpop.f32.mrf.mxu0 }
 0x12a   : > { %v5476_v24 = vpop.f32.mrf.mxu1 }
 0x12b   : > { %v516_v25 = vpop.f32.mrf.mxu0 }
 0x12c   : > { %v664_v26 = vpop.f32.mrf.mxu1  ;;  %v6162_v25 = vld [vmem:[#allocation3 + $0x90] sm:$0xff]  }
 0x12d   : > { %v5441_v27 = vpop.f32.mrf.mxu0 }
 0x12e   : > { %v5477_v29 = vpop.f32.mrf.mxu1 }
 0x12f   : > { %v931_v30 = vpop.f32.mrf.mxu0 }
 0x130   : > { %v969_v31 = vadd.f32 %v931_v30, %v630_v45  ;;  %v1114_v32 = vpop.f32.mrf.mxu1  ;;  %v6152_v45 = vld [vmem:[#allocation3 + $0xb8] sm:$0xff]  }
 0x131   : > { %v5496_v33 = vpop.f32.mrf.mxu0  ;;  %5778 = vmatprep.subr.bf16.mxu0 %v6152_v45 }
 0x132   : > { %v7087_v36 = vadd.f32 %v1114_v32, %v969_v31  ;;  %v5532_v37 = vpop.f32.mrf.mxu1  ;;  %5779 = vmatpush3.bf16.msra.mxu0 %v6152_v45  ;;  %v6165_v32 = vld [vmem:[#allocation3 + $0x88] sm:$0xff]  }
 0x133   : > { %v934_v38 = vpop.f32.mrf.mxu0  ;;  %5780 = vmatprep.subr.bf16.mxu0 %v6154_v53 }
 0x134   : > { %v970_v39 = vadd.f32 %v934_v38, %v7053_v50  ;;  %v1117_v40 = vpop.f32.mrf.mxu1 }
 0x135   : > { %v5497_v41 = vpop.f32.mrf.mxu0 }
 0x136   : > { %v7090_v43 = vadd.f32 %v1117_v40, %v970_v39  ;;  %v5533_v44 = vpop.f32.mrf.mxu1  ;;  %5781 = vmatpush3.bf16.msra.mxu0 %v6154_v53  ;;  %v6167_v41 = vld [vmem:[#allocation3 + $0x80] sm:$0xff]  }
 0x137   : > { %v939_v46 = vpop.f32.mrf.mxu0  ;;  %5782 = vmatprep.subr.bf16.mxu0 %v6155_v61 }
 0x138   : > { %v971_v47 = vadd.f32 %v939_v46, %v7055_v55  ;;  %v1122_v48 = vpop.f32.mrf.mxu1 }
 0x139   : > { %v5500_v49 = vpop.f32.mrf.mxu0 }
 0x13a   : > { %v7093_v52 = vadd.f32 %v1122_v48, %v971_v47  ;;  %v5536_v50 = vpop.f32.mrf.mxu1  ;;  %5783 = vmatpush3.bf16.msra.mxu0 %v6155_v61  ;;  %v7114_v47 = vld [vmem:[#allocation3 + $0x138] sm:$0xff]  }
 0x13b   : > { %v942_v54 = vpop.f32.mrf.mxu0  ;;  %5784 = vmatprep.subr.bf16.mxu0 %v6157_v7 }
 0x13c   : > { %v972_v0 = vadd.f32 %v942_v54, %v7057_v59  ;;  %v1125_v56 = vpop.f32.mrf.mxu1 }
 0x13d   : > { %v5501_v57 = vpop.f32.mrf.mxu0 }
 0x13e   : > { %v7096_v55 = vadd.f32 %v1125_v56, %v972_v0  ;;  %v5537_v60 = vpop.f32.mrf.mxu1  ;;  %5785 = vmatpush3.bf16.msra.mxu0 %v6157_v7 }
 0x13f   : > { %v947_v62 = vpop.f32.mrf.mxu0  ;;  %5786 = vmatprep.subr.bf16.mxu0 %v6160_v16 }
 0x140   : > { %v973_v63 = vadd.f32 %v947_v62, %v7059_v1  ;;  %v1130_v2 = vpop.f32.mrf.mxu1  ;;  %v6158_v1 = vld [vmem:[#allocation3 + $0x48] sm:$0xff]  }
 0x141   : > { %v5504_v3 = vpop.f32.mrf.mxu0  ;;  %5742 = vmatprep.subr.bf16.mxu1 %v6158_v1 }
 0x142   : > { %v7099_v59 = vadd.f32 %v1130_v2, %v973_v63  ;;  %v5540_v5 = vpop.f32.mrf.mxu1  ;;  %5743 = vmatpush3.bf16.msra.mxu1 %v6158_v1  ;;  %5787 = vmatpush3.bf16.msra.mxu0 %v6160_v16 }
 0x143   : > { %v950_v8 = vpop.f32.mrf.mxu0  ;;  %5788 = vmatprep.subr.bf16.mxu0 %v6162_v25 }
 0x144   : > { %v974_v9 = vadd.f32 %v950_v8, %v7061_v6  ;;  %v1133_v10 = vpop.f32.mrf.mxu1  ;;  %v6161_v6 = vld [vmem:[#allocation3 + $0x40] sm:$0xff]  }
 0x145   : > { %v5505_v12 = vpop.f32.mrf.mxu0  ;;  %5744 = vmatprep.subr.bf16.mxu1 %v6161_v6 }
 0x146   : > { %v7102_v13 = vadd.f32 %v1133_v10, %v974_v9  ;;  %v5541_v15 = vpop.f32.mrf.mxu1  ;;  %5745 = vmatpush3.bf16.msra.mxu1 %v6161_v6  ;;  %5789 = vmatpush3.bf16.msra.mxu0 %v6162_v25 }
 0x147   : > { %v955_v18 = vpop.f32.mrf.mxu0  ;;  %5790 = vmatprep.subr.bf16.mxu0 %v6165_v32 }
 0x148   : > { %v975_v19 = vadd.f32 %v955_v18, %v7063_v11  ;;  %v1138_v20 = vpop.f32.mrf.mxu1  ;;  %v7108_v11 = vld [vmem:[#allocation3 + $0x38] sm:$0xff]  }
 0x149   : > { %v5508_v21 = vpop.f32.mrf.mxu0  ;;  %5754 = vmatprep.subr.bf16.mxu1 %v7108_v11 }
 0x14a   : > { %v7105_v23 = vadd.f32 %v1138_v20, %v975_v19  ;;  %v5544_v24 = vpop.f32.mrf.mxu1  ;;  %5791 = vmatpush3.bf16.msra.mxu0 %v6165_v32 }
 0x14b   : > { %v958_v26 = vpop.f32.mrf.mxu0  ;;  %5792 = vmatprep.subr.bf16.mxu0 %v6167_v41 }
 0x14c   : > { %v976_v27 = vadd.f32 %v958_v26, %v7065_v17  ;;  %v1141_v28 = vpop.f32.mrf.mxu1 }
 0x14d   : > { %v5509_v29 = vpop.f32.mrf.mxu0 }
 0x14e   : > { %v7110_v30 = vadd.f32 %v1141_v28, %v976_v27  ;;  %v5545_v31 = vpop.f32.mrf.mxu1  ;;  %5793 = vmatpush3.bf16.msra.mxu0 %v6167_v41 }
 0x14f   : > { %v963_v33 = vpop.f32.mrf.mxu0  ;;  %5826 = vmatprep.subr.bf16.mxu0 %v7114_v47 }
 0x150   : > { %v977_v35 = vadd.f32 %v963_v33, %v7067_v22  ;;  %v1146_v37 = vpop.f32.mrf.mxu1 }
 0x151   : > { %v5512_v38 = vpop.f32.mrf.mxu0 }
 0x152   : > { %v1160_v17 = vadd.f32 %v1146_v37, %v977_v35  ;;  %v5548_v39 = vpop.f32.mrf.mxu1 }
 0x153   : > { %v966_v40 = vpop.f32.mrf.mxu0 }
 0x154   : > { %v1149_v42 = vpop.f32.mrf.mxu1 }
 0x155   : > { %v5513_v44 = vpop.f32.mrf.mxu0 }
 0x156   : > { %v5549_v45 = vpop.f32.mrf.mxu1 }
 0x157   : > { %v1297_v46 = vpop.f32.mrf.mxu0 }
 0x158   : > { %v1335_v48 = vadd.f32 %v1297_v46, %v7087_v36  ;;  %v1605_v49 = vpop.f32.mrf.mxu1 }
 0x159   : > { %v5568_v22 = vpop.f32.mrf.mxu0 }
 0x15a   : > { %v7118_v51 = vadd.f32 %v1605_v49, %v1335_v48  ;;  %v5604_v50 = vpop.f32.mrf.mxu1 }
 0x15b   : > { %v1300_v53 = vpop.f32.mrf.mxu0 }
 0x15c   : > { %v1336_v54 = vadd.f32 %v1300_v53, %v7090_v43  ;;  %v1608_v0 = vpop.f32.mrf.mxu1 }
 0x15d   : > { %v5569_v56 = vpop.f32.mrf.mxu0 }
 0x15e   : > { %v7121_v57 = vadd.f32 %v1608_v0, %v1336_v54  ;;  %v5605_v58 = vpop.f32.mrf.mxu1 }
 0x15f   : > { %v1305_v60 = vpop.f32.mrf.mxu0 }
 0x160   : > { %v1337_v61 = vadd.f32 %v1305_v60, %v7093_v52  ;;  %v1613_v62 = vpop.f32.mrf.mxu1 }
 0x161   : > { %v5572_v36 = vpop.f32.mrf.mxu0 }
 0x162   : > { %v7124_v63 = vadd.f32 %v1613_v62, %v1337_v61  ;;  %v5608_v2 = vpop.f32.mrf.mxu1 }
 0x163   : > { %v1308_v3 = vpop.f32.mrf.mxu0 }
 0x164   : > { %v1338_v4 = vadd.f32 %v1308_v3, %v7096_v55  ;;  %v1616_v5 = vpop.f32.mrf.mxu1 }
 0x165   : > { %v5573_v7 = vpop.f32.mrf.mxu0 }
 0x166   : > { %v7127_v8 = vadd.f32 %v1616_v5, %v1338_v4  ;;  %v5609_v43 = vpop.f32.mrf.mxu1 }
 0x167   : > { %v1313_v9 = vpop.f32.mrf.mxu0 }
 0x168   : > { %v1339_v10 = vadd.f32 %v1313_v9, %v7099_v59  ;;  %v1621_v12 = vpop.f32.mrf.mxu1 }
 0x169   : > { %v5576_v1 = vpop.f32.mrf.mxu0 }
 0x16a   : > { %v7130_v15 = vadd.f32 %v1621_v12, %v1339_v10  ;;  %v5612_v52 = vpop.f32.mrf.mxu1 }
 0x16b   : > { %v1316_v16 = vpop.f32.mrf.mxu0 }
 0x16c   : > { %v1340_v18 = vadd.f32 %v1316_v16, %v7102_v13  ;;  %v1624_v19 = vpop.f32.mrf.mxu1 }
 0x16d   : > { %v5577_v20 = vpop.f32.mrf.mxu0 }
 0x16e   : > { %v7133_v21 = vadd.f32 %v1624_v19, %v1340_v18  ;;  %v5613_v55 = vpop.f32.mrf.mxu1 }
 0x16f   : > { %v1321_v6 = vpop.f32.mrf.mxu0 }
 0x170   : > { %v1341_v24 = vadd.f32 %v1321_v6, %v7105_v23  ;;  %v1629_v25 = vpop.f32.mrf.mxu1 }
 0x171   : > { %v5580_v26 = vpop.f32.mrf.mxu0 }
 0x172   : > { %v7136_v27 = vadd.f32 %v1629_v25, %v1341_v24  ;;  %v5616_v59 = vpop.f32.mrf.mxu1 }
 0x173   : > { %v1324_v28 = vpop.f32.mrf.mxu0 }
 0x174   : > { %v1342_v29 = vadd.f32 %v1324_v28, %v7110_v30  ;;  %v1632_v31 = vpop.f32.mrf.mxu1 }
 0x175   : > { %v5581_v32 = vpop.f32.mrf.mxu0 }
 0x176   : > { %v7139_v33 = vadd.f32 %v1632_v31, %v1342_v29  ;;  %v5617_v13 = vpop.f32.mrf.mxu1 }
 0x177   : > { %v1329_v35 = vpop.f32.mrf.mxu0 }
 0x178   : > { %v1343_v37 = vadd.f32 %v1329_v35, %v1160_v17  ;;  %v1637_v38 = vpop.f32.mrf.mxu1 }
 0x179   : > { %v5584_v39 = vpop.f32.mrf.mxu0 }
 0x17a   : > { %v7141_v40 = vadd.f32 %v1637_v38, %v1343_v37  ;;  %v5620_v23 = vpop.f32.mrf.mxu1  ;;  %v7162_v38 = vld [vmem:[%s7562_s3] ss:$0 sm:$0xff] }
 0x17b   : > { %v1332_v41 = vpop.f32.mrf.mxu0 }
 0x17c   : > { %v1640_v42 = vpop.f32.mrf.mxu1 }
 0x17d   : > { %v5585_v44 = vpop.f32.mrf.mxu0 }
 0x17e   : > { %v5621_v45 = vpop.f32.mrf.mxu1 }
 0x17f   : > { %v1788_v46 = vpop.f32.mrf.mxu0 }
 0x180   : > { %v1971_v48 = vpop.f32.mrf.mxu1  ;;  %v1826_v26 = vadd.f32 %v1788_v46, %v7118_v51 }
 0x181   : > { %v5640_v49 = vpop.f32.mrf.mxu0 }
 0x182   : > { %v5676_v30 = vpop.f32.mrf.mxu1  ;;  %v2009_v32 = vadd.f32 %v1971_v48, %v1826_v26 }
 0x183   : > { %v1791_v22 = vpop.f32.mrf.mxu0 }
 0x184   : > { %v1974_v50 = vpop.f32.mrf.mxu1  ;;  %v1827_v13 = vadd.f32 %v1791_v22, %v7121_v57 }
 0x185   : > { %v5641_v53 = vpop.f32.mrf.mxu0 }
 0x186   : > { %v5677_v54 = vpop.f32.mrf.mxu1  ;;  %v2010_v41 = vadd.f32 %v1974_v50, %v1827_v13 }
 0x187   : > { %v1796_v0 = vpop.f32.mrf.mxu0 }
 0x188   : > { %v1979_v56 = vpop.f32.mrf.mxu1  ;;  %v1828_v42 = vadd.f32 %v1796_v0, %v7124_v63 }
 0x189   : > { %v5644_v17 = vpop.f32.mrf.mxu0 }
 0x18a   : > { %v5680_v58 = vpop.f32.mrf.mxu1  ;;  %v2011_v49 = vadd.f32 %v1979_v56, %v1828_v42  ;;  %v2452_v42 = vld [vmem:[#allocation2] sm:$0x8] }
 0x18b   : > { %v1799_v60 = vpop.f32.mrf.mxu0 }
 0x18c   : > { %v1982_v61 = vpop.f32.mrf.mxu1  ;;  %v1829_v57 = vadd.f32 %v1799_v60, %v7127_v8 }
 0x18d   : > { %v5645_v62 = vpop.f32.mrf.mxu0 }
 0x18e   : > { %v5681_v36 = vpop.f32.mrf.mxu1  ;;  %v2012_v63 = vadd.f32 %v1982_v61, %v1829_v57 }
 0x18f   : > { %v1804_v2 = vpop.f32.mrf.mxu0 }
 0x190   : > { %v1987_v3 = vpop.f32.mrf.mxu1  ;;  %v1830_v0 = vadd.f32 %v1804_v2, %v7130_v15 }
 0x191   : > { %v5648_v4 = vpop.f32.mrf.mxu0 }
 0x192   : > { %v5684_v5 = vpop.f32.mrf.mxu1 }
 0x193   : > { %v1807_v7 = vpop.f32.mrf.mxu0  ;;  %v2013_v5 = vadd.f32 %v1987_v3, %v1830_v0 }
 0x194   : > { %v7143_v43 = vpop.f32.mrf.mxu1 }
 0x195   : > { %v5649_v9 = vpop.f32.mrf.mxu0 }
 0x196   : > { %v5685_v10 = vpop.f32.mrf.mxu1  ;;  %v1831_v9 = vadd.f32 %v1807_v7, %v7133_v21 }
 0x197   : > { %v7145_v12 = vpop.f32.mrf.mxu0 }
 0x198   : > { %v7147_v1 = vpop.f32.mrf.mxu1  ;;  %v1832_v3 = vadd.f32 %v7145_v12, %v7136_v27 }
 0x199   : > { %v5652_v52 = vpop.f32.mrf.mxu0 }
 0x19a   : > { %v5688_v16 = vpop.f32.mrf.mxu1 }
 0x19b   : > { %v7149_v18 = vpop.f32.mrf.mxu0 }
 0x19c   : > { %v7151_v19 = vpop.f32.mrf.mxu1  ;;  %v1833_v27 = vadd.f32 %v7149_v18, %v7139_v33 }
 0x19d   : > { %v5653_v20 = vpop.f32.mrf.mxu0 }
 0x19e   : > { %v5689_v55 = vpop.f32.mrf.mxu1 }
 0x19f   : > { %v7153_v6 = vpop.f32.mrf.mxu0 }
 0x1a0   : > { %v7155_v24 = vpop.f32.mrf.mxu1 }
 0x1a1   : > { %v5656_v25 = vpop.f32.mrf.mxu0 }
 0x1a2   : > { %v5692_v59 = vpop.f32.mrf.mxu1  ;;  %v2014_v25 = vadd.f32 %v7143_v43, %v1831_v9  ;;  %v2015_v43 = vadd.f32 %v7147_v1, %v1832_v3  ;;  %v1834_v1 = vadd.f32 %v7153_v6, %v7141_v40 }
 0x1a3   : > { %v1823_v28 = vpop.f32.mrf.mxu0 }
 0x1a4   : > { %v2006_v29 = vpop.f32.mrf.mxu1 }
 0x1a5   : > { %v5657_v31 = vpop.f32.mrf.mxu0 }
 0x1a6   : > { %v5693_v35 = vpop.f32.mrf.mxu1 }
 0x1a7   : > { %v2279_v37 = vpop.f32.mrf.mxu0 }
 0x1a8   : > { %v2317_v39 = vadd.f32 %v2279_v37, %v2009_v32  ;;  %v2854_v32 = vld [vmem:[#allocation2 + $0x8] sm:$0x1]  ;;  %v2856_v37 = vld [vmem:[#allocation2 + $0x14] sm:$0x1] }
 0x1a9   : > { %v5712_v23 = vpop.f32.mrf.mxu0 }
 0x1aa   : > { %v2333_v51 = vadd.f32 %v7162_v38, %v2317_v39 }
 0x1ab   : > { %v2282_v44 = vpop.f32.mrf.mxu0 }
 0x1ac   : > { %v2342_v45 = vmax.f32 %v2333_v51, 0.0  ;;  %v2318_v46 = vadd.f32 %v2282_v44, %v2010_v41  ;;  %v2877_v41 = vshll.u32 %v2854_v32, 16 }
 0x1ad   : > { %v5713_v48 = vpop.f32.mrf.mxu0 }
 0x1ae   : > { %v5143_v30 = vpack.c.bf16 %v2342_v45, %v2342_v45  ;;  %v2334_v22 = vadd.f32 %v7162_v38, %v2318_v46  ;;  %v2454_v46 = vld [vmem:[#allocation2 + $0xc] sm:$0x8]  ;;  %v2891_v48 = vshll.u32 %v2856_v37, 16  ;;  %v7197_v0 = vrot.slane %v2877_v41, 5 }
 0x1af   : > { %v2287_v53 = vpop.f32.mrf.mxu0 }
 0x1b0   : > { %2388 = vst [vmem:[#allocation2 + $0x4] sm:$0xf] %v5143_v30  ;;  %v2343_v54 = vmax.f32 %v2334_v22, 0.0  ;;  %v2319_v17 = vadd.f32 %v2287_v53, %v2011_v49  ;;  %v2016_v49 = vadd.f32 %v7151_v19, %v1833_v27  ;;  %v2470_v53 = vshrl.u32 %v2452_v42, 16 }
 0x1b1   : > { %v5716_v50 = vpop.f32.mrf.mxu0 }
 0x1b2   : > { %v5144_v58 = vpack.c.bf16 %v2343_v54, %v2343_v54  ;;  %v2335_v62 = vadd.f32 %v7162_v38, %v2319_v17  ;;  %v7214_v3 = vrot.slane %v2470_v53, 11 }
 0x1b3   : > { %v2290_v36 = vpop.f32.mrf.mxu0 }
 0x1b4   : > { %2389 = vst [vmem:[#allocation2 + $0x10] sm:$0xf] %v5144_v58  ;;  %v2344_v56 = vmax.f32 %v2335_v62, 0.0  ;;  %v2320_v8 = vadd.f32 %v2290_v36, %v2012_v63  ;;  %v2483_v58 = vshrl.u32 %v2454_v46, 16  ;;  %v7203_v36 = vld [vmem:[#allocation2 + $0x20] sm:$0x1] }
 0x1b5   : > { %v5717_v4 = vpop.f32.mrf.mxu0 }
 0x1b6   : > { %v5145_v10 = vpack.c.bf16 %v2344_v56, %v2344_v56  ;;  %v2336_v61 = vadd.f32 %v7162_v38, %v2320_v8  ;;  %v2017_v56 = vadd.f32 %v7155_v24, %v1834_v1 }
 0x1b7   : > { %v2409_v52 = vld [vmem:[#allocation2 + $0x4] sm:$0x8]  ;;  %v2295_v15 = vpop.f32.mrf.mxu0 }
 0x1b8   : > { %v2410_v2 = vsel %vm7170_vm6, 0, %v2409_v52  ;;  %2390 = vst [vmem:[#allocation2 + $0x1c] sm:$0xf] %v5145_v10  ;;  %v2345_v16 = vmax.f32 %v2336_v61, 0.0  ;;  %v2321_v20 = vadd.f32 %v2295_v15, %v2013_v5  ;;  %v7208_v10 = vrot.slane %v2891_v48, 5 }
 0x1b9   : > { %2411 = vst [vmem:[#allocation2 + $0x4] sm:$0x8] %v2410_v2  ;;  %v5720_v55 = vpop.f32.mrf.mxu0 }
 0x1ba   : > { %2449 = vst [vmem:[#allocation2 + $0x4] sm:$0xf] %v6357_v34  ;;  %v5146_v21 = vpack.c.bf16 %v2345_v16, %v2345_v16  ;;  %v2337_v7 = vadd.f32 %v7162_v38, %v2321_v20  ;;  %v7211_v16 = vld [vmem:[#allocation2 + $0x2c] sm:$0x1] }
 0x1bb   : > { %v2413_v26 = vld [vmem:[#allocation2 + $0x10] sm:$0x8]  ;;  %v2298_v59 = vpop.f32.mrf.mxu0 }
 0x1bc   : > { %v2414_v28 = vsel %vm7170_vm6, 0, %v2413_v26  ;;  %2391 = vst [vmem:[#allocation2 + $0x28] sm:$0xf] %v5146_v21  ;;  %v2346_v29 = vmax.f32 %v2337_v7, 0.0  ;;  %v2322_v31 = vadd.f32 %v2298_v59, %v2014_v25  ;;  %v2905_v25 = vshll.u32 %v7203_v36, 16 }
 0x1bd   : > { %2415 = vst [vmem:[#allocation2 + $0x10] sm:$0x8] %v2414_v28  ;;  %v5721_v13 = vpop.f32.mrf.mxu0  ;;  %v7216_v21 = vrot.slane %v2483_v58, 11 }
 0x1be   : > { %v5147_v12 = vpack.c.bf16 %v2346_v29, %v2346_v29  ;;  %v2338_v35 = vadd.f32 %v7162_v38, %v2322_v31 }
 0x1bf   : > { %v2417_v39 = vld [vmem:[#allocation2 + $0x1c] sm:$0x8]  ;;  %v2303_v23 = vpop.f32.mrf.mxu0 }
 0x1c0   : > { %v2418_v51 = vsel %vm7170_vm6, 0, %v2417_v39  ;;  %2392 = vst [vmem:[#allocation2 + $0x34] sm:$0xf] %v5147_v12  ;;  %v2347_v44 = vmax.f32 %v2338_v35, 0.0  ;;  %v2323_v45 = vadd.f32 %v2303_v23, %v2015_v43  ;;  %v2919_v43 = vshll.u32 %v7211_v16, 16 }
 0x1c1   : > { %2419 = vst [vmem:[#allocation2 + $0x1c] sm:$0x8] %v2418_v51  ;;  %v5724_v33 = vpop.f32.mrf.mxu0  ;;  %v2853_v18 = vld [vmem:[#allocation2 + $0x4] sm:$0xf] }
 0x1c2   : > { %v5148_v57 = vpack.c.bf16 %v2347_v44, %v2347_v44  ;;  %v2339_v30 = vadd.f32 %v7162_v38, %v2323_v45  ;;  %v7195_v22 = vld [vmem:[#allocation2 + $0x4] sm:$0xf]  ;;  %v2868_v50 = vshrl.u32 %v2853_v18, 16  ;;  %v2871_v63 = vshll.u32 %v2853_v18, 16 }
 0x1c3   : > { %v2421_v54 = vld [vmem:[#allocation2 + $0x28] sm:$0x8]  ;;  %v2306_v17 = vpop.f32.mrf.mxu0  ;;  %v2475_v31 = vshrl.u32 %v7195_v22, 16 }
 0x1c4   : > { %v2422_v40 = vsel %vm7170_vm6, 0, %v2421_v54  ;;  %2393 = vst [vmem:[#allocation2 + $0x40] sm:$0xf] %v5148_v57  ;;  %v2348_v6 = vmax.f32 %v2339_v30, 0.0  ;;  %v2324_v62 = vadd.f32 %v2306_v17, %v2016_v49  ;;  %v7201_v19 = vld [vmem:[#allocation2 + $0x10] sm:$0xf] }
 0x1c5   : > { %2423 = vst [vmem:[#allocation2 + $0x28] sm:$0x8] %v2422_v40  ;;  %v5725_v8 = vpop.f32.mrf.mxu0  ;;  %v4997_v4 = vcombine.low %v7195_v22, %v7201_v19  ;;  %v2855_v5 = vld [vmem:[#allocation2 + $0x10] sm:$0xf]  ;;  %v2870_v9 = vrot.slane %v2868_v50, 4  ;;  %v2873_v15 = vrot.slane %v2871_v63, 5 }
 0x1c6   : > { %v5149_v61 = vpack.c.bf16 %v2348_v6, %v2348_v6  ;;  %v2340_v52 = vadd.f32 %v7162_v38, %v2324_v62  ;;  %v2882_v2 = vshrl.u32 %v2855_v5, 16  ;;  %v2885_v24 = vshll.u32 %v2855_v5, 16  ;;  %v6166_v30 = vld [vmem:[#allocation3 + $0x30] sm:$0xff]  }
 0x1c7   : > { %v2425_v20 = vld [vmem:[#allocation2 + $0x34] sm:$0x8]  ;;  %v2311_v55 = vpop.f32.mrf.mxu0  ;;  %5746 = vmatprep.mubr.bf16.mxu1 %v4997_v4  ;;  %v2874_v28 = vor.u32 %v2873_v15, %v2870_v9  ;;  %v2488_v41 = vshrl.u32 %v7201_v19, 16  ;;  %v2477_v40 = vrot.slane %v2475_v31, 7  ;;  %v2491_v5 = vshll.u32 %v7201_v19, 16 }
 0x1c8   : > { %v2426_v7 = vsel %vm7170_vm6, 0, %v2425_v20  ;;  %2394 = vst [vmem:[#allocation2 + $0x4c] sm:$0xf] %v5149_v61  ;;  %v2349_v26 = vmax.f32 %v2340_v52, 0.0  ;;  %v2325_v59 = vadd.f32 %v2311_v55, %v2017_v56  ;;  %v2857_v29 = vld [vmem:[#allocation2 + $0x1c] sm:$0xf] }
 0x1c9   : > { %2427 = vst [vmem:[#allocation2 + $0x34] sm:$0x8] %v2426_v7  ;;  %v2884_v32 = vrot.slane %v2882_v2, 4  ;;  %v2887_v13 = vrot.slane %v2885_v24, 5  ;;  %v5728_v27 = vpop.f32.mrf.mxu0  ;;  %v2875_v37 = vrot.slane %v2874_v28, 4  ;;  %v2896_v39 = vshrl.u32 %v2857_v29, 16 }
 0x1ca   : > { %v5150_v12 = vpack.c.bf16 %v2349_v26, %v2349_v26  ;;  %v2341_v35 = vadd.f32 %v7162_v38, %v2325_v59  ;;  %v7224_v42 = vld [vmem:[#allocation2 + $0x1c] sm:$0xf]  ;;  %v2899_v44 = vshll.u32 %v2857_v29, 16  ;;  %v2478_v38 = vshll.u32 %v7195_v22, 16  ;;  %v6168_v9 = vld [vmem:[#allocation3 + $0x28] sm:$0xff]  }
 0x1cb   : > { %v2429_v23 = vld [vmem:[#allocation2 + $0x40] sm:$0x8]  ;;  %v2888_v51 = vor.u32 %v2887_v13, %v2884_v32  ;;  %v2314_v45 = vpop.f32.mrf.mxu0  ;;  %v2880_v49 = vsel %vm6653_vm3, %v2875_v37, %v7197_v0  ;;  %v2898_v17 = vrot.slane %v2896_v39, 4  ;;  %v2490_v6 = vrot.slane %v2488_v41, 7  ;;  %v2864_v2 = vld [vmem:[#allocation2 + $0x44] sm:$0x1] }
 0x1cc   : > { %v2430_v46 = vsel %vm7170_vm6, 0, %v2429_v23  ;;  %2395 = vst [vmem:[#allocation2 + $0x58] sm:$0xf] %v5150_v12  ;;  %v2350_v1 = vmax.f32 %v2341_v35, 0.0  ;;  %v7228_v33 = vld [vmem:[#allocation2 + $0x28] sm:$0xf]  ;;  %v2480_v26 = vor.u32 %v2478_v38, %v2477_v40 }
 0x1cd   : > { %v2859_v18 = vld [vmem:[#allocation2 + $0x28] sm:$0xf]  ;;  %2431 = vst [vmem:[#allocation2 + $0x40] sm:$0x8] %v2430_v46  ;;  %v4998_v48 = vcombine.low %v7224_v42, %v7228_v33  ;;  %v2889_v57 = vrot.slane %v2888_v51, 4  ;;  %v5729_v53 = vpop.f32.mrf.mxu0  ;;  %v2901_v50 = vrot.slane %v2899_v44, 5  ;;  %v2493_v59 = vor.u32 %v2491_v5, %v2490_v6 }
 0x1ce   : > { %v5151_v54 = vpack.c.bf16 %v2350_v1, %v2350_v1  ;;  %v2910_v63 = vshrl.u32 %v2859_v18, 16  ;;  %v2913_v62 = vshll.u32 %v2859_v18, 16  ;;  %v2907_v61 = vrot.slane %v2905_v25, 5  ;;  %v6173_v44 = vld [vmem:[#allocation3 + $0x130] sm:$0xff]   ;;  %v2866_v1 = vld [vmem:[#allocation2 + $0x50] sm:$0x1] }
 0x1cf   : > { %v2433_v58 = vld [vmem:[#allocation2 + $0x4c] sm:$0x8]  ;;  %5747 = vmatmul.mubr.bf16.vlgmr.msra.gmra.mxu1 %v4998_v48  ;;  %v2894_v22 = vsel %vm6653_vm3, %v2889_v57, %v7208_v10  ;;  %v2902_v56 = vor.u32 %v2901_v50, %v2898_v17  ;;  %v2921_v15 = vrot.slane %v2919_v43, 5  ;;  %v2862_v10 = vld [vmem:[#allocation2 + $0x38] sm:$0x1]  ;;  %v2947_v39 = vshll.u32 %v2864_v2, 16 }
 0x1d0   : > { %v2434_v36 = vsel %vm7170_vm6, 0, %v2433_v58  ;;  %2396 = vst [vmem:[#allocation2 + $0x64] sm:$0xf] %v5151_v54  ;;  %5755 = vmatpush3.bf16.msra.mxu1 %v7108_v11  ;;  %v5021_v0 = vcombine.low %v2880_v49, %v2894_v22  ;;  %v2912_v8 = vrot.slane %v2910_v63, 4  ;;  %v2861_v4 = vld [vmem:[#allocation2 + $0x34] sm:$0xf]  ;;  %v2481_v45 = vsel %vm7251_vm9, %v7214_v3, %v2480_v26 }
 0x1d1   : > { %2435 = vst [vmem:[#allocation2 + $0x4c] sm:$0x8] %v2434_v36  ;;  %5756 = vmatprep.subr.bf16.mxu1 %v6166_v30  ;;  %v2915_v52 = vrot.slane %v2913_v62, 5  ;;  %v2924_v16 = vshrl.u32 %v2861_v4, 16  ;;  %v2927_v20 = vshll.u32 %v2861_v4, 16  ;;  %v2903_v11 = vrot.slane %v2902_v56, 4 }
 0x1d2   : > { %5794 = vmatprep.mubr.bf16.mxu0 %v5021_v0  ;;  %v7243_v24 = vld [vmem:[#allocation2 + $0x34] sm:$0xf]  ;;  %v6171_v43 = vld [vmem:[#allocation3 + $0x20] sm:$0xff]   ;;  %v2933_v27 = vshll.u32 %v2862_v10, 16  ;;  %v2494_v46 = vsel %vm7251_vm9, %v7216_v21, %v2493_v59  ;;  %v6174_v53 = vld [vmem:[#allocation3 + $0x18] sm:$0xff]   ;;  %v2961_v50 = vshll.u32 %v2866_v1, 16 }
 0x1d3   : > { %v2437_v55 = vld [vmem:[#allocation2 + $0x58] sm:$0x8]  ;;  %v2916_v7 = vor.u32 %v2915_v52, %v2912_v8  ;;  %v2926_v31 = vrot.slane %v2924_v16, 4  ;;  %v2929_v12 = vrot.slane %v2927_v20, 5  ;;  %v2908_v41 = vsel %vm6653_vm3, %v2903_v11, %v2907_v61  ;;  %v6176_v0 = vld [vmem:[#allocation3 + $0x10] sm:$0xff]   ;;  %v6177_v10 = vld [vmem:[#allocation3 + $0x120] sm:$0xff]  }
 0x1d4   : > { %v2438_v19 = vsel %vm7170_vm6, 0, %v2437_v55  ;;  %5757 = vmatpush3.bf16.msra.mxu1 %v6166_v30  ;;  %v7247_v28 = vld [vmem:[#allocation2 + $0x40] sm:$0xf]  ;;  %v2935_v21 = vrot.slane %v2933_v27, 5  ;;  %v5009_v63 = vcombine.low %v2481_v45, %v2494_v46  ;;  %v2949_v6 = vrot.slane %v2947_v39, 5  ;;  %v6175_v22 = vld [vmem:[#allocation3 + $0x128] sm:$0xff]  }
 0x1d5   : > { %v2863_v29 = vld [vmem:[#allocation2 + $0x40] sm:$0xf]  ;;  %2439 = vst [vmem:[#allocation2 + $0x58] sm:$0x8] %v2438_v19  ;;  %5758 = vmatprep.subr.bf16.mxu1 %v6168_v9  ;;  %v4999_v32 = vcombine.low %v7243_v24, %v7247_v28  ;;  %v2917_v13 = vrot.slane %v2916_v7, 4  ;;  %v2930_v49 = vor.u32 %v2929_v12, %v2926_v31  ;;  %v2514_v56 = vshrl.u32 %v7228_v33, 16 }
 0x1d6   : > { %v2938_v35 = vshrl.u32 %v2863_v29, 16  ;;  %v2941_v37 = vshll.u32 %v2863_v29, 16  ;;  %v2963_v4 = vrot.slane %v2961_v50, 5  ;;  %v2458_v61 = vld [vmem:[#allocation2 + $0x24] sm:$0x8]  ;;  %v2501_v52 = vshrl.u32 %v7224_v42, 16 }
 0x1d7   : > { %v2441_v23 = vld [vmem:[#allocation2 + $0x64] sm:$0x8]  ;;  %5750 = vmatprep.mubr.bf16.mxu1 %v4999_v32  ;;  %v2922_v51 = vsel %vm6653_vm3, %v2917_v13, %v2921_v15  ;;  %v2931_v58 = vrot.slane %v2930_v49, 4  ;;  %v2462_v16 = vld [vmem:[#allocation2 + $0x3c] sm:$0x8]  ;;  %v2527_v20 = vshrl.u32 %v7243_v24, 16 }
 0x1d8   : > { %v2442_v18 = vsel %vm7170_vm6, 0, %v2441_v23  ;;  %5759 = vmatpush3.bf16.msra.mxu1 %v6168_v9  ;;  %v5022_v38 = vcombine.low %v2908_v41, %v2922_v51  ;;  %v7269_v48 = vld [vmem:[#allocation2 + $0x4c] sm:$0xf]  ;;  %v2940_v57 = vrot.slane %v2938_v35, 4  ;;  %v2943_v54 = vrot.slane %v2941_v37, 5  ;;  %v6179_v11 = vld [vmem:[#allocation3 + $0x8] sm:$0xff]  }
 0x1d9   : > { %v2865_v30 = vld [vmem:[#allocation2 + $0x4c] sm:$0xf]  ;;  %2443 = vst [vmem:[#allocation2 + $0x64] sm:$0x8] %v2442_v18  ;;  %5760 = vmatprep.subr.bf16.mxu1 %v6171_v43  ;;  %v5000_v3 = vcombine.low %v7269_v48, %v7269_v48  ;;  %v2936_v5 = vsel %vm6653_vm3, %v2931_v58, %v2935_v21  ;;  %v7283_v55 = vld [vmem:[#allocation2 + $0x1c] sm:$0xf] }
 0x1da   : > { %2451 = vst [vmem:[#allocation2 + $0x64] sm:$0xf] %v6357_v34  ;;  %5795 = vmatmul.mubr.bf16.vlgmr.msra.gmra.mxu0 %v5022_v38  ;;  %v2952_v60 = vshrl.u32 %v2865_v30, 16  ;;  %v2955_v17 = vshll.u32 %v2865_v30, 16  ;;  %v2944_v40 = vor.u32 %v2943_v54, %v2940_v57  ;;  %v2456_v7 = vld [vmem:[#allocation2 + $0x18] sm:$0x8] }
 0x1db   : > { %5827 = vmatpush3.bf16.msra.mxu0 %v7114_v47  ;;  %5751 = vmatmul.mubr.bf16.gmra.mxu1 %v5000_v3  ;;  %v2540_v47 = vshrl.u32 %v7247_v28, 16  ;;  %v2516_v26 = vrot.slane %v2514_v56, 7  ;;  %v2509_v19 = vshrl.u32 %v2458_v61, 16  ;;  %v2460_v29 = vld [vmem:[#allocation2 + $0x30] sm:$0x8]  ;;  %v2503_v27 = vrot.slane %v2501_v52, 7 }
 0x1dc   : > { %5761 = vmatpush3.bf16.msra.mxu1 %v6171_v43  ;;  %5828 = vmatprep.subr.bf16.mxu0 %v6173_v44  ;;  %v2954_v62 = vrot.slane %v2952_v60, 4  ;;  %v2957_v36 = vrot.slane %v2955_v17, 5  ;;  %v2945_v34 = vrot.slane %v2944_v40, 4  ;;  %v7287_v13 = vld [vmem:[#allocation2 + $0x10] sm:$0xf]  ;;  %v2535_v43 = vshrl.u32 %v2462_v16, 16 }
 0x1dd   : > { %5770 = vmatprep.mubr.bf16.mxu1 %v5009_v63  ;;  %5762 = vmatprep.subr.bf16.mxu1 %v6174_v53  ;;  %v2542_v31 = vrot.slane %v2540_v47, 7  ;;  %v2517_v12 = vshll.u32 %v7228_v33, 16  ;;  %v5052_v35 = vcombine.low %v7287_v13, %v7283_v55  ;;  %v6180_v37 = vld [vmem:[#allocation3 + $0x118] sm:$0xff]   ;;  %v2496_v39 = vshrl.u32 %v2456_v7, 16  ;;  %v6181_v51 = vld [vmem:[#allocation3] sm:$0xff]   ;;  %v6184_v47 = vld [vmem:[#allocation3 + $0x108] sm:$0xff]  }
 0x1de   : > { %v2958_v8 = vor.u32 %v2957_v36, %v2954_v62  ;;  %v2950_v9 = vsel %vm6653_vm3, %v2945_v34, %v2949_v6  ;;  %v2529_v23 = vrot.slane %v2527_v20, 7  ;;  %v2543_v41 = vshll.u32 %v7247_v28, 16  ;;  %v2464_v30 = vld [vmem:[#allocation2 + $0x48] sm:$0x8]  ;;  %v6182_v28 = vld [vmem:[#allocation3 + $0x110] sm:$0xff]   ;;  %v6186_v16 = vld [vmem:[#allocation3 + $0x100] sm:$0xff]  }
 0x1df   : > { %5829 = vmatpush3.bf16.msra.mxu0 %v6173_v44  ;;  %v5023_v15 = vcombine.low %v2936_v5, %v2950_v9  ;;  %v2522_v44 = vshrl.u32 %v2460_v29, 16  ;;  %v2504_v45 = vshll.u32 %v7224_v42, 16  ;;  %v2553_v46 = vshrl.u32 %v7269_v48, 16  ;;  %v3118_v54 = vld [vmem:[#allocation2 + $0x18] sm:$0x8]  ;;  %v6183_v21 = vld [vmem:[#allocation3 + $0xf8] sm:$0xff]  }
 0x1e0   : > { %5763 = vmatpush3.bf16.msra.mxu1 %v6174_v53  ;;  %5830 = vmatprep.subr.bf16.mxu0 %v6175_v22  ;;  %v2959_v2 = vrot.slane %v2958_v8, 4  ;;  %v4993_v33 = vrot.slane %v2509_v19, 11  ;;  %v2519_v1 = vor.u32 %v2517_v12, %v2516_v26  ;;  %v2530_v18 = vshll.u32 %v7243_v24, 16  ;;  %v3116_v50 = vld [vmem:[#allocation2 + $0xc] sm:$0x8]  ;;  %v6185_v5 = vld [vmem:[#allocation3 + $0xf0] sm:$0xff]  }
 0x1e1   : > { %5764 = vmatprep.subr.bf16.mxu1 %v6176_v0  ;;  %5798 = vmatprep.mubr.bf16.mxu0 %v5023_v15  ;;  %v3149_v38 = vshrl.u32 %v7283_v55, 16  ;;  %v4995_v49 = vrot.slane %v2535_v43, 11  ;;  %v2545_v57 = vor.u32 %v2543_v41, %v2542_v31  ;;  %v4992_v3 = vrot.slane %v2496_v39, 11  ;;  %v6187_v20 = vld [vmem:[#allocation3 + $0xe8] sm:$0xff]   ;;  %v7311_v7 = vld [vmem:[#allocation2 + $0x1c] sm:$0xf] }
 0x1e2   : > { %v2964_v59 = vsel %vm6653_vm3, %v2959_v2, %v2963_v4  ;;  %v2506_v53 = vor.u32 %v2504_v45, %v2503_v27  ;;  %v3136_v42 = vshrl.u32 %v7287_v13, 16  ;;  %v4994_v60 = vrot.slane %v2522_v44, 11  ;;  %v7309_v2 = vld [vmem:[#allocation2 + $0x28] sm:$0xf]  ;;  %v3793_v29 = vld [vmem:[#allocation2 + $0x24] sm:$0x8] }
 0x1e3   : > { %5831 = vmatpush3.bf16.msra.mxu0 %v6175_v22  ;;  %v5024_v32 = vcombine.low %v2964_v59, %v2964_v59  ;;  %v2532_v17 = vor.u32 %v2530_v18, %v2529_v23  ;;  %v2555_v24 = vrot.slane %v2553_v46, 7  ;;  %v2520_v63 = vsel %vm7251_vm9, %v4993_v33, %v2519_v1  ;;  %v3791_v31 = vld [vmem:[#allocation2 + $0x18] sm:$0x8]  ;;  %v7321_v27 = vld [vmem:[#allocation2 + $0x34] sm:$0xf]  ;;  %v6189_v12 = vld [vmem:[#allocation3 + $0x1b8] sm:$0xff]  }
 0x1e4   : > { %5765 = vmatpush3.bf16.msra.mxu1 %v6176_v0  ;;  %5832 = vmatprep.subr.bf16.mxu0 %v6177_v10  ;;  %v2548_v58 = vshrl.u32 %v2464_v30, 16  ;;  %v3151_v40 = vrot.slane %v3149_v38, 7  ;;  %v2546_v6 = vsel %vm7251_vm9, %v4995_v49, %v2545_v57  ;;  %v3144_v22 = vshrl.u32 %v3118_v54, 16  ;;  %v7323_v39 = vld [vmem:[#allocation2 + $0x4c] sm:$0xf]  ;;  %v6192_v33 = vld [vmem:[#allocation3 + $0x1b0] sm:$0xff]  }
 0x1e5   : > { %5799 = vmatmul.mubr.bf16.gmra.mxu0 %v5024_v32  ;;  %5766 = vmatprep.subr.bf16.mxu1 %v6179_v11  ;;  %v2556_v62 = vshll.u32 %v7269_v48, 16  ;;  %v2507_v36 = vsel %vm7251_vm9, %v4992_v3, %v2506_v53  ;;  %v3131_v34 = vshrl.u32 %v3116_v50, 16  ;;  %v3138_v0 = vrot.slane %v3136_v42, 7  ;;  %v3120_v44 = vld [vmem:[#allocation2 + $0x24] sm:$0x8]  ;;  %v6195_v50 = vld [vmem:[#allocation3 + $0x1a8] sm:$0xff]  }
 0x1e6   : > { %5842 = vmatprep.mubr.bf16.mxu0 %v5052_v35  ;;  %v3152_v56 = vshll.u32 %v7283_v55, 16  ;;  %v5010_v8 = vcombine.low %v2507_v36, %v2520_v63  ;;  %v2533_v4 = vsel %vm7251_vm9, %v4994_v60, %v2532_v17  ;;  %v4996_v61 = vrot.slane %v2548_v58, 11  ;;  %v6191_v35 = vld [vmem:[#allocation3 + $0xe0] sm:$0xff]   ;;  %v7329_v46 = vld [vmem:[#allocation2 + $0x40] sm:$0xf]  ;;  %v6193_v57 = vld [vmem:[#allocation3 + $0xd8] sm:$0xff]  }
 0x1e7   : > { %5833 = vmatpush3.bf16.msra.mxu0 %v6177_v10  ;;  %v5011_v9 = vcombine.low %v2533_v4, %v2546_v6  ;;  %v2558_v52 = vor.u32 %v2556_v62, %v2555_v24  ;;  %v3139_v48 = vshll.u32 %v7287_v13, 16  ;;  %v5034_v15 = vrot.slane %v3144_v22, 11  ;;  %v3529_v30 = vld [vmem:[#allocation2 + $0x14] sm:$0x1]  ;;  %v3122_v54 = vld [vmem:[#allocation2 + $0x30] sm:$0x8] }
 0x1e8   : > { %5767 = vmatpush3.bf16.msra.mxu1 %v6179_v11  ;;  %5834 = vmatprep.subr.bf16.mxu0 %v6180_v37  ;;  %v3154_v10 = vor.u32 %v3152_v56, %v3151_v40  ;;  %v5033_v55 = vrot.slane %v3131_v34, 11  ;;  %v3824_v59 = vshrl.u32 %v7309_v2, 16  ;;  %v3811_v32 = vshrl.u32 %v7311_v7, 16  ;;  %v3124_v42 = vld [vmem:[#allocation2 + $0x3c] sm:$0x8] }
 0x1e9   : > { %5768 = vmatprep.subr.bf16.mxu1 %v6181_v51  ;;  %v3141_v11 = vor.u32 %v3139_v48, %v3138_v0  ;;  %v2559_v26 = vsel %vm7251_vm9, %v4996_v61, %v2558_v52  ;;  %v3819_v23 = vshrl.u32 %v3793_v29, 16  ;;  %v3806_v1 = vshrl.u32 %v3791_v31, 16  ;;  %v3126_v60 = vld [vmem:[#allocation2 + $0x48] sm:$0x8]  ;;  %v3531_v17 = vld [vmem:[#allocation2 + $0x20] sm:$0x1] }
 0x1ea   : > { %v3155_v19 = vsel %vm7251_vm9, %v5034_v15, %v3154_v10  ;;  %v5012_v13 = vcombine.low %v2559_v26, %v2559_v26  ;;  %v3826_v41 = vrot.slane %v3824_v59, 7  ;;  %v3813_v18 = vrot.slane %v3811_v32, 7  ;;  %v3795_v58 = vld [vmem:[#allocation2 + $0x30] sm:$0x8]  ;;  %v7335_v40 = vld [vmem:[#allocation2 + $0x58] sm:$0xf] }
 0x1eb   : > { %5835 = vmatpush3.bf16.msra.mxu0 %v6180_v37  ;;  %v3142_v43 = vsel %vm7251_vm9, %v5033_v55, %v3141_v11  ;;  %v3827_v38 = vshll.u32 %v7309_v2, 16  ;;  %v5054_v49 = vcombine.low %v7329_v46, %v7323_v39  ;;  %v5077_v3 = vrot.slane %v3819_v23, 11  ;;  %v6196_v6 = vld [vmem:[#allocation3 + $0xd0] sm:$0xff]   ;;  %v6197_v10 = vld [vmem:[#allocation3 + $0x1a0] sm:$0xff]   ;;  %v6198_v55 = vld [vmem:[#allocation3 + $0xc8] sm:$0xff]  }
 0x1ec   : > { %5769 = vmatpush3.bf16.msra.mxu1 %v6181_v51  ;;  %5836 = vmatprep.subr.bf16.mxu0 %v6182_v28  ;;  %v5040_v37 = vcombine.low %v3142_v43, %v3155_v19  ;;  %v7325_v51 = vld [vmem:[#allocation2 + $0x28] sm:$0xf]  ;;  %v5076_v24 = vrot.slane %v3806_v1, 11  ;;  %v3170_v22 = vshrl.u32 %v3122_v54, 16  ;;  %v3183_v62 = vshrl.u32 %v3124_v42, 16 }
 0x1ed   : > { %5802 = vmatprep.subr.bf16.mxu1 %v6183_v21  ;;  %v5053_v45 = vcombine.low %v7325_v51, %v7321_v27  ;;  %v3829_v53 = vor.u32 %v3827_v38, %v3826_v41  ;;  %v3552_v36 = vshll.u32 %v3529_v30, 16  ;;  %v3175_v34 = vshrl.u32 %v7321_v27, 16  ;;  %v3797_v19 = vld [vmem:[#allocation2 + $0x3c] sm:$0x8]  ;;  %v3801_v41 = vld [vmem:[#allocation2 + $0x54] sm:$0x8] }
 0x1ee   : > { %v3196_v56 = vshrl.u32 %v3126_v60, 16  ;;  %v3201_v4 = vshrl.u32 %v7323_v39, 16  ;;  %v3162_v61 = vshrl.u32 %v7325_v51, 16  ;;  %v3188_v52 = vshrl.u32 %v7329_v46, 16  ;;  %v6199_v1 = vld [vmem:[#allocation3 + $0x198] sm:$0xff]   ;;  %v6201_v60 = vld [vmem:[#allocation3 + $0x190] sm:$0xff]  }
 0x1ef   : > { %5837 = vmatpush3.bf16.msra.mxu0 %v6182_v28  ;;  %5771 = vmatmul.mubr.bf16.vlgmr.msra.gmra.mxu1 %v5010_v8  ;;  %v3814_v28 = vshll.u32 %v7311_v7, 16  ;;  %v3830_v0 = vsel %vm7251_vm9, %v5077_v3, %v3829_v53  ;;  %v3566_v8 = vshll.u32 %v3531_v17, 16  ;;  %v5055_v48 = vcombine.low %v7335_v40, %v7335_v40  ;;  %v7364_v3 = vld [vmem:[#allocation2 + $0x48] sm:$0x8]  ;;  %v7368_v42 = vld [vmem:[#allocation2 + $0x40] sm:$0xf] }
 0x1f0   : > { %5774 = vmatprep.mubr.bf16.mxu1 %v5011_v9  ;;  %5803 = vmatpush3.bf16.msra.mxu1 %v6183_v21  ;;  %v3157_v21 = vshrl.u32 %v3120_v44, 16  ;;  %v3832_v9 = vshrl.u32 %v3795_v58, 16  ;;  %v7349_v11 = vrot.slane %v3170_v22, 11  ;;  %v7351_v26 = vrot.slane %v3183_v62, 11  ;;  %v7374_v22 = vld [vmem:[#allocation2 + $0x34] sm:$0xf] }
 0x1f1   : > { %5838 = vmatprep.subr.bf16.mxu0 %v6184_v47  ;;  %5804 = vmatprep.subr.bf16.mxu1 %v6185_v5  ;;  %v3816_v63 = vor.u32 %v3814_v28, %v3813_v18  ;;  %v7353_v59 = vrot.slane %v3552_v36, 5  ;;  %v3177_v29 = vrot.slane %v3175_v34, 7  ;;  %v7355_v31 = vrot.slane %v3196_v56, 11  ;;  %v7378_v62 = vld [vmem:[#allocation2 + $0x60] sm:$0x8] }
 0x1f2   : > { %v7357_v43 = vrot.slane %v3566_v8, 5  ;;  %v7359_v23 = vrot.slane %v3832_v9, 11  ;;  %v3164_v44 = vrot.slane %v3162_v61, 7  ;;  %v3845_v18 = vshrl.u32 %v3797_v19, 16  ;;  %v7381_v8 = vld [vmem:[#allocation2 + $0x4c] sm:$0xf] }
 0x1f3   : > { %5839 = vmatpush3.bf16.msra.mxu0 %v6184_v47  ;;  %v7341_v47 = vrot.slane %v3157_v21, 11  ;;  %v3817_v15 = vsel %vm7251_vm9, %v5076_v24, %v3816_v63  ;;  %v3204_v38 = vshll.u32 %v7323_v39, 16  ;;  %v3165_v53 = vshll.u32 %v7325_v51, 16  ;;  %v7372_v63 = vld [vmem:[#allocation2 + $0x58] sm:$0xf] }
 0x1f4   : > { %5805 = vmatpush3.bf16.msra.mxu1 %v6185_v5  ;;  %5840 = vmatprep.subr.bf16.mxu0 %v6186_v16  ;;  %v3128_v5 = vld [vmem:[#allocation2 + $0x54] sm:$0x8]  ;;  %v3191_v54 = vshll.u32 %v7329_v46, 16  ;;  %v3871_v21 = vshrl.u32 %v3801_v41, 16  ;;  %v7376_v46 = vrot.slane %v3845_v18, 11  ;;  %v3850_v56 = vshrl.u32 %v7368_v42, 16 }
 0x1f5   : > { %5806 = vmatprep.subr.bf16.mxu1 %v6187_v20  ;;  %v3209_v32 = vshrl.u32 %v3128_v5, 16  ;;  %v3167_v58 = vor.u32 %v3165_v53, %v3164_v44  ;;  %v3858_v5 = vshrl.u32 %v7364_v3, 16  ;;  %v3876_v61 = vshrl.u32 %v7372_v63, 16  ;;  %v7402_v19 = vld [vmem:[#allocation2 + $0x64] sm:$0xf]  ;;  %v6206_v53 = vld [vmem:[#allocation3 + $0x168] sm:$0xff]  }
 0x1f6   : > { %v7387_v9 = vrot.slane %v3871_v21, 11  ;;  %v3889_v18 = vshrl.u32 %v7402_v19, 16  ;;  %v5096_v14 = vcombine.low %v7374_v22, %v7368_v42 }
 0x1f7   : > { %5841 = vmatpush3.bf16.msra.mxu0 %v6186_v16  ;;  %5775 = vmatmul.mubr.bf16.gmra.mxu1 %v5012_v13  ;;  %v3530_v16 = vld [vmem:[#allocation2 + $0x1c] sm:$0xf]  ;;  %v3528_v13 = vld [vmem:[#allocation2 + $0x10] sm:$0xf]  ;;  %v7370_v39 = vrot.slane %v3209_v32, 11 }
 0x1f8   : > { %5807 = vmatpush3.bf16.msra.mxu1 %v6187_v20  ;;  %5818 = vmatprep.mubr.bf16.mxu1 %v5040_v37  ;;  %v5083_v20 = vcombine.low %v3817_v15, %v3830_v0  ;;  %v3560_v37 = vshll.u32 %v3530_v16, 16  ;;  %v3543_v30 = vshrl.u32 %v3528_v13, 16  ;;  %v3546_v28 = vshll.u32 %v3528_v13, 16  ;;  %v6204_v32 = vld [vmem:[#allocation3 + $0x170] sm:$0xff]  }
 0x1f9   : > { %5874 = vmatprep.subr.bf16.mxu0 %v6189_v12  ;;  %5808 = vmatprep.subr.bf16.mxu1 %v6191_v35 }
 0x1fa   : > { %5843 = vmatmul.mubr.bf16.vlgmr.msra.gmra.mxu0 %v5053_v45  ;;  %v3178_v45 = vshll.u32 %v7321_v27, 16  ;;  %v3562_v24 = vrot.slane %v3560_v37, 5  ;;  %v3545_v34 = vrot.slane %v3543_v30, 4  ;;  %v3548_v0 = vrot.slane %v3546_v28, 5  ;;  %v4203_v37 = vld [vmem:[#allocation2 + $0x1c] sm:$0xf] }
 0x1fb   : > { %5846 = vmatprep.mubr.bf16.mxu0 %v5054_v49  ;;  %5875 = vmatpush3.bf16.msra.mxu0 %v6189_v12  ;;  %v3203_v12 = vrot.slane %v3201_v4, 7  ;;  %v6200_v49 = vld [vmem:[#allocation3 + $0xc0] sm:$0xff]   ;;  %v4218_v30 = vshrl.u32 %v4203_v37, 16  ;;  %v4221_v28 = vshll.u32 %v4203_v37, 16 }
 0x1fc   : > { %5809 = vmatpush3.bf16.msra.mxu1 %v6191_v35  ;;  %5876 = vmatprep.subr.bf16.mxu0 %v6192_v33  ;;  %v3557_v35 = vshrl.u32 %v3530_v16, 16  ;;  %v3180_v27 = vor.u32 %v3178_v45, %v3177_v29  ;;  %v4205_v16 = vld [vmem:[#allocation2 + $0x28] sm:$0xf]  ;;  %v3538_v37 = vld [vmem:[#allocation2 + $0x4c] sm:$0xf] }
 0x1fd   : > { %5810 = vmatprep.subr.bf16.mxu1 %v6193_v57  ;;  %v3206_v17 = vor.u32 %v3204_v38, %v3203_v12  ;;  %v3549_v12 = vor.u32 %v3548_v0, %v3545_v34  ;;  %v4232_v44 = vshrl.u32 %v4205_v16, 16  ;;  %v4235_v45 = vshll.u32 %v4205_v16, 16  ;;  %v6205_v38 = vld [vmem:[#allocation3 + $0x180] sm:$0xff]  }
 0x1fe   : > { %v3181_v4 = vsel %vm7251_vm9, %v7349_v11, %v3180_v27  ;;  %v3863_v11 = vshrl.u32 %v7381_v8, 16  ;;  %v3840_v27 = vshll.u32 %v7374_v22, 16  ;;  %v4206_v34 = vld [vmem:[#allocation2 + $0x2c] sm:$0x1]  ;;  %v5080_v0 = vrot.slane %v3858_v5, 11 }
 0x1ff   : > { %5877 = vmatpush3.bf16.msra.mxu0 %v6192_v33  ;;  %v3190_v33 = vrot.slane %v3188_v52, 7  ;;  %v3207_v52 = vsel %vm7251_vm9, %v7355_v31, %v3206_v17  ;;  %v6203_v31 = vld [vmem:[#allocation3 + $0x188] sm:$0xff]  }
 0x200   : > { %5811 = vmatpush3.bf16.msra.mxu1 %v6193_v57  ;;  %5878 = vmatprep.subr.bf16.mxu0 %v6195_v50  ;;  %v3214_v57 = vshrl.u32 %v7335_v40, 16 }
 0x201   : > { %5812 = vmatprep.subr.bf16.mxu1 %v6196_v6  ;;  %v3193_v51 = vor.u32 %v3191_v54, %v3190_v33  ;;  %v3550_v54 = vrot.slane %v3549_v12, 4 }
 0x202   : > { %5847 = vmatmul.mubr.bf16.gmra.mxu0 %v5055_v48  ;;  %v3216_v36 = vrot.slane %v3214_v57, 7  ;;  %v3217_v48 = vshll.u32 %v7335_v40, 16  ;;  %v3884_v40 = vshrl.u32 %v7378_v62, 16  ;;  %v3879_v57 = vshll.u32 %v7372_v63, 16  ;;  %v3536_v62 = vld [vmem:[#allocation2 + $0x40] sm:$0xf] }
 0x203   : > { %5879 = vmatpush3.bf16.msra.mxu0 %v6195_v50  ;;  %5890 = vmatprep.mubr.bf16.mxu0 %v5083_v20  ;;  %v3559_v50 = vrot.slane %v3557_v35, 4  ;;  %v3168_v20 = vsel %vm7251_vm9, %v7341_v47, %v3167_v58  ;;  %v3852_v35 = vrot.slane %v3850_v56, 7  ;;  %v3878_v47 = vrot.slane %v3876_v61, 7 }
 0x204   : > { %5813 = vmatpush3.bf16.msra.mxu1 %v6196_v6  ;;  %5880 = vmatprep.subr.bf16.mxu0 %v6197_v10  ;;  %v6202_v6 = vld [vmem:[#allocation3 + $0x178] sm:$0xff]   ;;  %v5041_v29 = vcombine.low %v3168_v20, %v3181_v4  ;;  %v3219_v13 = vor.u32 %v3217_v48, %v3216_v36  ;;  %v4237_v58 = vrot.slane %v4235_v45, 5  ;;  %v3891_v36 = vrot.slane %v3889_v18, 7 }
 0x205   : > { %5814 = vmatprep.subr.bf16.mxu1 %v6198_v55  ;;  %v3563_v15 = vor.u32 %v3562_v24, %v3559_v50  ;;  %v3881_v17 = vor.u32 %v3879_v57, %v3878_v47  ;;  %v4204_v50 = vld [vmem:[#allocation2 + $0x20] sm:$0x1]  ;;  %v4234_v24 = vrot.slane %v4232_v44, 4  ;;  %v4220_v4 = vrot.slane %v4218_v30, 4  ;;  %v6210_v47 = vld [vmem:[#allocation3 + $0x158] sm:$0xff]  }
 0x206   : > { %v3220_v3 = vsel %vm7251_vm9, %v7370_v39, %v3219_v13  ;;  %v3892_v39 = vshll.u32 %v7402_v19, 16  ;;  %v4223_v61 = vrot.slane %v4221_v28, 5  ;;  %v3555_v48 = vsel %vm6653_vm3, %v3550_v54, %v7353_v59  ;;  %v6211_v28 = vld [vmem:[#allocation3 + $0x228] sm:$0xff]  }
 0x207   : > { %5881 = vmatpush3.bf16.msra.mxu0 %v6197_v10  ;;  %v3837_v10 = vshrl.u32 %v7374_v22, 16  ;;  %v4227_v16 = vshll.u32 %v4204_v50, 16  ;;  %v3882_v5 = vsel %vm7251_vm9, %v7387_v9, %v3881_v17  ;;  %v6209_v9 = vld [vmem:[#allocation3 + $0x230] sm:$0xff]   ;;  %v3613_v57 = vshrl.u32 %v3538_v37, 16 }
 0x208   : > { %5815 = vmatpush3.bf16.msra.mxu1 %v6198_v55  ;;  %5882 = vmatprep.subr.bf16.mxu0 %v6199_v1  ;;  %v3194_v55 = vsel %vm7251_vm9, %v7351_v26, %v3193_v51  ;;  %v3564_v26 = vrot.slane %v3563_v15, 4  ;;  %v6207_v15 = vld [vmem:[#allocation3 + $0x238] sm:$0xff]   ;;  %v4224_v12 = vor.u32 %v4223_v61, %v4220_v4  ;;  %v3616_v30 = vshll.u32 %v3538_v37, 16  ;;  %v3539_v61 = vld [vmem:[#allocation2 + $0x50] sm:$0x1] }
 0x209   : > { %5816 = vmatprep.subr.bf16.mxu1 %v6200_v49  ;;  %v5042_v41 = vcombine.low %v3194_v55, %v3207_v52  ;;  %v3839_v33 = vrot.slane %v3837_v10, 7  ;;  %v5043_v52 = vcombine.low %v3220_v3, %v3220_v3  ;;  %v6208_v10 = vld [vmem:[#allocation3 + $0x160] sm:$0xff]   ;;  %v4238_v55 = vor.u32 %v4237_v58, %v4234_v24  ;;  %v3541_v37 = vld [vmem:[#allocation2 + $0x5c] sm:$0x1]  ;;  %v6235_v22 = vld [vmem:[%s7564_s5 + $0x20] sm:$0xff]  }
 0x20a   : > { %v4229_v44 = vrot.slane %v4227_v16, 5  ;;  %v4225_v3 = vrot.slane %v4224_v12, 4  ;;  %v3599_v54 = vshrl.u32 %v3536_v62, 16 }
 0x20b   : > { %5883 = vmatpush3.bf16.msra.mxu0 %v6199_v1  ;;  %v3853_v1 = vshll.u32 %v7368_v42, 16  ;;  %v3842_v51 = vor.u32 %v3840_v27, %v3839_v33  ;;  %v3533_v33 = vld [vmem:[#allocation2 + $0x2c] sm:$0x1]  ;;  %v3602_v27 = vshll.u32 %v3536_v62, 16  ;;  %v6240_v42 = vld [vmem:[%s6524_s23 + $0xf8] ss:$8 sps:$4 sm:$0xff]  }
 0x20c   : > { %5817 = vmatpush3.bf16.msra.mxu1 %v6200_v49  ;;  %5884 = vmatprep.subr.bf16.mxu0 %v6201_v60  ;;  %v3865_v49 = vrot.slane %v3863_v11, 7  ;;  %v4241_v11 = vshll.u32 %v4206_v34, 16  ;;  %v3580_v24 = vshll.u32 %v3533_v33, 16  ;;  %v3618_v34 = vrot.slane %v3616_v30, 5 }
 0x20d   : > { %5850 = vmatprep.subr.bf16.mxu1 %v6202_v6  ;;  %v3855_v21 = vor.u32 %v3853_v1, %v3852_v35  ;;  %v3843_v59 = vsel %vm7251_vm9, %v7359_v23, %v3842_v51  ;;  %v3532_v35 = vld [vmem:[#allocation2 + $0x28] sm:$0xf]  ;;  %v3535_v1 = vld [vmem:[#allocation2 + $0x38] sm:$0x1] }
 0x20e   : > { %v3594_v58 = vshll.u32 %v3535_v1, 16 }
 0x20f   : > { %5885 = vmatpush3.bf16.msra.mxu0 %v6201_v60  ;;  %5819 = vmatmul.mubr.bf16.vlgmr.msra.gmra.mxu1 %v5041_v29  ;;  %v3866_v60 = vshll.u32 %v7381_v8, 16  ;;  %v3534_v29 = vld [vmem:[#allocation2 + $0x34] sm:$0xf] }
 0x210   : > { %5822 = vmatprep.mubr.bf16.mxu1 %v5042_v41  ;;  %5851 = vmatpush3.bf16.msra.mxu1 %v6202_v6  ;;  %v3569_v6 = vsel %vm6653_vm3, %v3564_v26, %v7357_v43  ;;  %v3856_v43 = vsel %vm7251_vm9, %v7376_v46, %v3855_v21  ;;  %v5082_v46 = vrot.slane %v3884_v40, 11  ;;  %v3585_v23 = vshrl.u32 %v3534_v29, 16  ;;  %v6212_v21 = vld [vmem:[#allocation3 + $0x150] sm:$0xff]  }
 0x211   : > { %5886 = vmatprep.subr.bf16.mxu0 %v6203_v31  ;;  %5852 = vmatprep.subr.bf16.mxu1 %v6204_v32  ;;  %v3868_v56 = vor.u32 %v3866_v60, %v3865_v49  ;;  %v5064_v20 = vcombine.low %v3555_v48, %v3569_v6  ;;  %v3588_v45 = vshll.u32 %v3534_v29, 16  ;;  %v4239_v40 = vrot.slane %v4238_v55, 4  ;;  %v3537_v49 = vld [vmem:[#allocation2 + $0x44] sm:$0x1]  ;;  %v3540_v6 = vld [vmem:[#allocation2 + $0x58] sm:$0xf] }
 0x212   : > { %v4243_v26 = vrot.slane %v4241_v11, 5  ;;  %v3587_v60 = vrot.slane %v3585_v23, 4  ;;  %v3604_v48 = vrot.slane %v3602_v27, 5  ;;  %v3627_v16 = vshrl.u32 %v3540_v6, 16  ;;  %v6218_v27 = vld [vmem:[#allocation3 + $0x1f8] sm:$0xff]  }
 0x213   : > { %5887 = vmatpush3.bf16.msra.mxu0 %v6203_v31  ;;  %v3894_v31 = vor.u32 %v3892_v39, %v3891_v36  ;;  %v3869_v13 = vsel %vm7251_vm9, %v5080_v0, %v3868_v56  ;;  %v3590_v17 = vrot.slane %v3588_v45, 5  ;;  %v3608_v36 = vshll.u32 %v3537_v49, 16  ;;  %v6213_v56 = vld [vmem:[#allocation3 + $0x220] sm:$0xff]  }
 0x214   : > { %5853 = vmatpush3.bf16.msra.mxu1 %v6204_v32  ;;  %5888 = vmatprep.subr.bf16.mxu0 %v6205_v38  ;;  %v5084_v32 = vcombine.low %v3843_v59, %v3856_v43  ;;  %v5085_v41 = vcombine.low %v3869_v13, %v3882_v5  ;;  %v4244_v25 = vsel %vm6653_vm3, %v4239_v40, %v4243_v26  ;;  %v3615_v39 = vrot.slane %v3613_v57, 4  ;;  %v4209_v5 = vld [vmem:[#allocation2 + $0x40] sm:$0xf]  ;;  %v4207_v59 = vld [vmem:[#allocation2 + $0x34] sm:$0xf] }
 0x215   : > { %5854 = vmatprep.subr.bf16.mxu1 %v6206_v53  ;;  %v3895_v18 = vsel %vm7251_vm9, %v5082_v46, %v3894_v31  ;;  %v4230_v0 = vsel %vm6653_vm3, %v4225_v3, %v4229_v44  ;;  %v3582_v55 = vrot.slane %v3580_v24, 5  ;;  %v3622_v29 = vshll.u32 %v3539_v61, 16  ;;  %v4213_v46 = vld [vmem:[#allocation2 + $0x58] sm:$0xf]  ;;  %v6215_v31 = vld [vmem:[#allocation3 + $0x218] sm:$0xff]   ;;  %v6217_v57 = vld [vmem:[#allocation3 + $0x210] sm:$0xff]  }
 0x216   : > { %v5086_v50 = vcombine.low %v3895_v18, %v3895_v18  ;;  %v5107_v43 = vcombine.low %v4230_v0, %v4244_v25  ;;  %v3619_v11 = vor.u32 %v3618_v34, %v3615_v39  ;;  %v4260_v44 = vshrl.u32 %v4209_v5, 16  ;;  %v4211_v45 = vld [vmem:[#allocation2 + $0x4c] sm:$0xf]  ;;  %v4214_v39 = vld [vmem:[#allocation2 + $0x5c] sm:$0x1] }
 0x217   : > { %5889 = vmatpush3.bf16.msra.mxu0 %v6205_v38  ;;  %5823 = vmatmul.mubr.bf16.gmra.mxu1 %v5043_v52  ;;  %v3571_v38 = vshrl.u32 %v3532_v35, 16  ;;  %v3601_v52 = vrot.slane %v3599_v54, 4  ;;  %v4263_v23 = vshll.u32 %v4209_v5, 16  ;;  %v4246_v40 = vshrl.u32 %v4207_v59, 16 }
 0x218   : > { %5855 = vmatpush3.bf16.msra.mxu1 %v6206_v53  ;;  %5866 = vmatprep.mubr.bf16.mxu1 %v5064_v20  ;;  %v3574_v53 = vshll.u32 %v3532_v35, 16  ;;  %v3630_v20 = vshll.u32 %v3540_v6, 16  ;;  %v3610_v35 = vrot.slane %v3608_v36, 5  ;;  %v4288_v26 = vshrl.u32 %v4213_v46, 16 }
 0x219   : > { %5922 = vmatprep.subr.bf16.mxu0 %v6207_v15  ;;  %5856 = vmatprep.subr.bf16.mxu1 %v6208_v10  ;;  %v3573_v51 = vrot.slane %v3571_v38, 4  ;;  %v3605_v12 = vor.u32 %v3604_v48, %v3601_v52  ;;  %v4291_v33 = vshll.u32 %v4213_v46, 16  ;;  %v3620_v1 = vrot.slane %v3619_v11, 4  ;;  %v4212_v11 = vld [vmem:[#allocation2 + $0x50] sm:$0x1] }
 0x21a   : > { %5891 = vmatmul.mubr.bf16.vlgmr.msra.gmra.mxu0 %v5084_v32  ;;  %v3576_v4 = vrot.slane %v3574_v53, 5  ;;  %v6216_v32 = vld [vmem:[#allocation3 + $0x140] sm:$0xff]   ;;  %v3632_v62 = vrot.slane %v3630_v20, 5  ;;  %v3624_v18 = vrot.slane %v3622_v29, 5  ;;  %v3636_v38 = vshll.u32 %v3541_v37, 16 }
 0x21b   : > { %5894 = vmatprep.mubr.bf16.mxu0 %v5085_v41  ;;  %5923 = vmatpush3.bf16.msra.mxu0 %v6207_v15  ;;  %v6214_v15 = vld [vmem:[#allocation3 + $0x148] sm:$0xff]   ;;  %v4249_v49 = vshll.u32 %v4207_v59, 16  ;;  %v4277_v3 = vshll.u32 %v4211_v45, 16  ;;  %v4215_v53 = vld [vmem:[#allocation2 + $0x64] sm:$0xf]  ;;  %v4248_v24 = vrot.slane %v4246_v40, 4 }
 0x21c   : > { %5857 = vmatpush3.bf16.msra.mxu1 %v6208_v10  ;;  %5924 = vmatprep.subr.bf16.mxu0 %v6209_v9  ;;  %v3591_v10 = vor.u32 %v3590_v17, %v3587_v60  ;;  %v3577_v13 = vor.u32 %v3576_v4, %v3573_v51  ;;  %v4210_v60 = vld [vmem:[#allocation2 + $0x44] sm:$0x1]  ;;  %v4262_v17 = vrot.slane %v4260_v44, 4  ;;  %v4293_v6 = vrot.slane %v4291_v33, 5  ;;  %v4208_v4 = vld [vmem:[#allocation2 + $0x38] sm:$0x1] }
 0x21d   : > { %5858 = vmatprep.subr.bf16.mxu1 %v6210_v47  ;;  %v3625_v51 = vsel %vm6653_vm3, %v3620_v1, %v3624_v18  ;;  %v4251_v36 = vrot.slane %v4249_v49, 5  ;;  %v4302_v34 = vshrl.u32 %v4215_v53, 16  ;;  %v4305_v0 = vshll.u32 %v4215_v53, 16 }
 0x21e   : > { %v3592_v41 = vrot.slane %v3591_v10, 4  ;;  %v3578_v30 = vrot.slane %v3577_v13, 4  ;;  %v4269_v61 = vshll.u32 %v4210_v60, 16  ;;  %v4279_v48 = vrot.slane %v4277_v3, 5  ;;  %v6219_v10 = vld [vmem:[#allocation3 + $0x208] sm:$0xff]  }
 0x21f   : > { %5925 = vmatpush3.bf16.msra.mxu0 %v6209_v9  ;;  %v3596_v9 = vrot.slane %v3594_v58, 5  ;;  %v4290_v58 = vrot.slane %v4288_v26, 4  ;;  %v3638_v20 = vrot.slane %v3636_v38, 5  ;;  %v4304_v13 = vrot.slane %v4302_v34, 4  ;;  %v6234_v34 = vld [vmem:[%s7564_s5 + $0x28] sm:$0xff]  }
 0x220   : > { %5859 = vmatpush3.bf16.msra.mxu1 %v6210_v47  ;;  %5926 = vmatprep.subr.bf16.mxu0 %v6211_v28  ;;  %v3629_v47 = vrot.slane %v3627_v16, 4  ;;  %v6220_v16 = vld [vmem:[#allocation3 + $0x1f0] sm:$0xff]   ;;  %v5095_v3 = vcombine.low %v7311_v7, %v7309_v2 }
 0x221   : > { %5860 = vmatprep.subr.bf16.mxu1 %v6212_v21  ;;  %v3597_v54 = vsel %vm6653_vm3, %v3592_v41, %v3596_v9  ;;  %v4294_v46 = vor.u32 %v4293_v6, %v4290_v58  ;;  %v4307_v9 = vrot.slane %v4305_v0, 5  ;;  %v4216_v41 = vld [vmem:[#allocation2 + $0x68] sm:$0x1]  ;;  %v6226_v7 = vld [vmem:[#allocation3 + $0x1d0] sm:$0xff]   ;;  %v6227_v58 = vld [vmem:[#allocation3 + $0x1c8] sm:$0xff]   ;;  %v5098_v0 = vcombine.low %v7402_v19, %v7402_v19 }
 0x222   : > { %5895 = vmatmul.mubr.bf16.gmra.mxu0 %v5086_v50  ;;  %v4265_v50 = vrot.slane %v4263_v23, 5  ;;  %v3633_v25 = vor.u32 %v3632_v62, %v3629_v47  ;;  %v6222_v47 = vld [vmem:[#allocation3 + $0x1e8] sm:$0xff]   ;;  %v4271_v23 = vrot.slane %v4269_v61, 5  ;;  %v4311_v18 = vshll.u32 %v4216_v41, 16  ;;  %v6228_v6 = vld [vmem:[#allocation3 + $0x1c0] sm:$0xff]  }
 0x223   : > { %5927 = vmatpush3.bf16.msra.mxu0 %v6211_v28  ;;  %5938 = vmatprep.mubr.bf16.mxu0 %v5107_v43  ;;  %v4274_v28 = vshrl.u32 %v4211_v45, 16  ;;  %v4295_v62 = vrot.slane %v4294_v46, 4  ;;  %v4308_v1 = vor.u32 %v4307_v9, %v4304_v13  ;;  %v6238_v19 = vld [vmem:[%s7564_s5 + $0x8] sm:$0xff]   ;;  %v6242_v61 = vld [vmem:[%s6524_s23 + $0x118] ss:$8 sps:$4 sm:$0xff]  }
 0x224   : > { %5861 = vmatpush3.bf16.msra.mxu1 %v6212_v21  ;;  %5928 = vmatprep.subr.bf16.mxu0 %v6213_v56  ;;  %v3606_v21 = vrot.slane %v3605_v12, 4  ;;  %v4266_v5 = vor.u32 %v4265_v50, %v4262_v17  ;;  %v3634_v59 = vrot.slane %v3633_v25, 4  ;;  %v6221_v12 = vld [vmem:[#allocation3 + $0x200] sm:$0xff]   ;;  %v6225_v25 = vld [vmem:[#allocation3 + $0x1d8] sm:$0xff]  }
 0x225   : > { %5862 = vmatprep.subr.bf16.mxu1 %v6214_v15  ;;  %v4276_v52 = vrot.slane %v4274_v28, 4  ;;  %v6224_v28 = vld [vmem:[#allocation3 + $0x1e0] sm:$0xff]  }
 0x226   : > { %v4267_v44 = vrot.slane %v4266_v5, 4  ;;  %v3639_v45 = vsel %vm6653_vm3, %v3634_v59, %v3638_v20 }
 0x227   : > { %5929 = vmatpush3.bf16.msra.mxu0 %v6213_v56  ;;  %v3583_v56 = vsel %vm6653_vm3, %v3578_v30, %v3582_v55  ;;  %v4252_v55 = vor.u32 %v4251_v36, %v4248_v24  ;;  %v4280_v37 = vor.u32 %v4279_v48, %v4276_v52  ;;  %v6232_v36 = vld [vmem:[%s7564_s5 + $0x30] sm:$0xff]   ;;  %v6243_v52 = vld [vmem:[%s6524_s23 + $0x128] ss:$0 sps:$4 sm:$0xff]  }
 0x228   : > { %5863 = vmatpush3.bf16.msra.mxu1 %v6214_v15  ;;  %5930 = vmatprep.subr.bf16.mxu0 %v6215_v31  ;;  %v5065_v43 = vcombine.low %v3583_v56, %v3597_v54  ;;  %v3611_v15 = vsel %vm6653_vm3, %v3606_v21, %v3610_v35  ;;  %v4283_v35 = vshll.u32 %v4212_v11, 16  ;;  %v4272_v30 = vsel %vm6653_vm3, %v4267_v44, %v4271_v23  ;;  %v6239_v56 = vld [vmem:[%s7564_s5] sm:$0xff]  }
 0x229   : > { %5864 = vmatprep.subr.bf16.mxu1 %v6216_v32  ;;  %v5066_v29 = vcombine.low %v3611_v15, %v3625_v51  ;;  %v4253_v26 = vrot.slane %v4252_v55, 4  ;;  %v4281_v38 = vrot.slane %v4280_v37, 4  ;;  %v4313_v21 = vrot.slane %v4311_v18, 5  ;;  %v6230_v51 = vld [vmem:[%s7564_s5 + $0x38] sm:$0xff]  }
 0x22a   : > { %v4285_v49 = vrot.slane %v4283_v35, 5 }
 0x22b   : > { %5931 = vmatpush3.bf16.msra.mxu0 %v6215_v31  ;;  %v4297_v31 = vshll.u32 %v4214_v39, 16  ;;  %v5097_v39 = vcombine.low %v7381_v8, %v7372_v63  ;;  %v6236_v63 = vld [vmem:[%s7564_s5 + $0x18] sm:$0xff]   ;;  %v6237_v8 = vld [vmem:[%s7564_s5 + $0x10] sm:$0xff]  }
 0x22c   : > { %5865 = vmatpush3.bf16.msra.mxu1 %v6216_v32  ;;  %5932 = vmatprep.subr.bf16.mxu0 %v6217_v57  ;;  %v4255_v32 = vshll.u32 %v4208_v4, 16  ;;  %v4286_v17 = vsel %vm6653_vm3, %v4281_v38, %v4285_v49  ;;  %v6241_v4 = vld [vmem:[%s6524_s23 + $0x108] ss:$8 sps:$4 sm:$0xff]   ;;  %s6270_s23 = scalar_lea.vmem %s7505_s15, 448 }
 0x22d   : > { %5898 = vmatprep.subr.bf16.mxu1 %v6218_v27  ;;  %v4299_v40 = vrot.slane %v4297_v31, 5  ;;  %p6271_p11 = scmp.ne.s32.totalorder %s7505_s15, %s6270_s23  ;;  %p6278_p1 = scmp.lt.s32.totalorder %s6276_s22, %s6270_s23 }
 0x22e   : > { %v4257_v33 = vrot.slane %v4255_v32, 5 }
 0x22f   : > { %5933 = vmatpush3.bf16.msra.mxu0 %v6217_v57  ;;  %5867 = vmatmul.mubr.bf16.vlgmr.msra.gmra.mxu1 %v5065_v43  ;;  %v5067_v57 = vcombine.low %v3639_v45, %v3639_v45  ;;  %v4300_v53 = vsel %vm6653_vm3, %v4295_v62, %v4299_v40  ;;  %p6272_p12 = pnand %p6271_p11, %p6441_p4  ;;  %p6279_p2 = por %p6278_p1, %p6277_p0 }
 0x230   : > { %5870 = vmatprep.mubr.bf16.mxu1 %v5066_v29  ;;  %5899 = vmatpush3.bf16.msra.mxu1 %v6218_v27  ;;  %v4258_v54 = vsel %vm6653_vm3, %v4253_v26, %v4257_v33  ;;  %v4309_v27 = vrot.slane %v4308_v1, 4  ;;  %v5109_v50 = vcombine.low %v4286_v17, %v4300_v53 }
 0x231   : > { %5934 = vmatprep.subr.bf16.mxu0 %v6219_v10  ;;  %5900 = vmatprep.subr.bf16.mxu1 %v6220_v16  ;;  %v5108_v60 = vcombine.low %v4258_v54, %v4272_v30  ;;  %p6273_p13 = pneg %p6272_p12 }
 0x232   : > { %v4314_v2 = vsel %vm6653_vm3, %v4309_v27, %v4313_v21 }
 0x233   : > { %5935 = vmatpush3.bf16.msra.mxu0 %v6219_v10  ;;  %v5110_v24 = vcombine.low %v4314_v2, %v4314_v2  ;;  %p6280_p3 = pnand %p6279_p2, %p6273_p13 }
 0x234   : > { %5901 = vmatpush3.bf16.msra.mxu1 %v6220_v16  ;;  %5936 = vmatprep.subr.bf16.mxu0 %v6221_v12 }
 0x235   : > { %5902 = vmatprep.subr.bf16.mxu1 %v6222_v47 }
 0x237   : > { %5937 = vmatpush3.bf16.msra.mxu0 %v6221_v12  ;;  %5871 = vmatmul.mubr.bf16.gmra.mxu1 %v5067_v57 }
 0x238   : > { %5903 = vmatpush3.bf16.msra.mxu1 %v6222_v47  ;;  %5914 = vmatprep.mubr.bf16.mxu1 %v5095_v3 }
 0x239   : > { %5904 = vmatprep.subr.bf16.mxu1 %v6224_v28 }
 0x23a   : > { %5939 = vmatmul.mubr.bf16.vlgmr.msra.gmra.mxu0 %v5108_v60 }
 0x23b   : > { %5942 = vmatprep.mubr.bf16.mxu0 %v5109_v50 }
 0x23c   : > { %5905 = vmatpush3.bf16.msra.mxu1 %v6224_v28 }
 0x23d   : > { %5906 = vmatprep.subr.bf16.mxu1 %v6225_v25 }
 0x240   : > { %5907 = vmatpush3.bf16.msra.mxu1 %v6225_v25 }
 0x241   : > { %5908 = vmatprep.subr.bf16.mxu1 %v6226_v7 }
 0x242   : > { %5943 = vmatmul.mubr.bf16.gmra.mxu0 %v5110_v24 }
 0x244   : > { %5909 = vmatpush3.bf16.msra.mxu1 %v6226_v7 }
 0x245   : > { %5910 = vmatprep.subr.bf16.mxu1 %v6227_v58 }
 0x248   : > { %5911 = vmatpush3.bf16.msra.mxu1 %v6227_v58 }
 0x249   : > { %5912 = vmatprep.subr.bf16.mxu1 %v6228_v6 }
 0x24c   : > { %5913 = vmatpush3.bf16.msra.mxu1 %v6228_v6 }
 0x24d   : > { %5946 = vmatprep.subr.bf16.mxu1 %v6230_v51 }
 0x24f   : > { %5915 = vmatmul.mubr.bf16.vlgmr.msra.gmra.mxu1 %v5096_v14 }
 0x250   : > { %5918 = vmatprep.mubr.bf16.mxu1 %v5097_v39  ;;  %5947 = vmatpush3.bf16.msra.mxu1 %v6230_v51 }
 0x251   : > { %5948 = vmatprep.subr.bf16.mxu1 %v6232_v36 }
 0x254   : > { %5949 = vmatpush3.bf16.msra.mxu1 %v6232_v36 }
 0x255   : > { %5950 = vmatprep.subr.bf16.mxu1 %v6234_v34 }
 0x257   : > { %5919 = vmatmul.mubr.bf16.gmra.mxu1 %v5098_v0 }
 0x258   : > { %5951 = vmatpush3.bf16.msra.mxu1 %v6234_v34  ;;  %5962 = vmatprep.mubr.bf16.mxu1 %v6240_v42 }
 0x259   : > { %5952 = vmatprep.subr.bf16.mxu1 %v6235_v22 }
 0x25c   : > { %5953 = vmatpush3.bf16.msra.mxu1 %v6235_v22 }
 0x25d   : > { %5954 = vmatprep.subr.bf16.mxu1 %v6236_v63 }
 0x260   : > { %5955 = vmatpush3.bf16.msra.mxu1 %v6236_v63 }
 0x261   : > { %5956 = vmatprep.subr.bf16.mxu1 %v6237_v8 }
 0x264   : > { %5957 = vmatpush3.bf16.msra.mxu1 %v6237_v8 }
 0x265   : > { %5958 = vmatprep.subr.bf16.mxu1 %v6238_v19 }
 0x268   : > { %5959 = vmatpush3.bf16.msra.mxu1 %v6238_v19 }
 0x269   : > { %5960 = vmatprep.subr.bf16.mxu1 %v6239_v56 }
 0x26c   : > { %5961 = vmatpush3.bf16.msra.mxu1 %v6239_v56 }
 0x26f   : > { %5963 = vmatmul.mubr.bf16.vlgmr.msra.gmra.mxu1 %v6241_v4 }
 0x270   : > { %5966 = vmatprep.mubr.bf16.mxu1 %v6242_v61 }
 0x277   : > { %5967 = vmatmul.mubr.bf16.gmra.mxu1 %v6243_v52 }
 0x28f   : > { %v5748_v48 = vpop.f32.mrf.mxu1 }
 0x291   : > { %v2696_v43 = vpop.f32.mrf.mxu1 }
 0x293   : > { %v5749_v15 = vpop.f32.mrf.mxu1 }
 0x295   : > { %v2699_v10 = vpop.f32.mrf.mxu1 }
 0x29a   : > { %v5796_v16 = vpop.f32.mrf.mxu0 }
 0x29b   : > { %v5752_v20 = vpop.f32.mrf.mxu1 }
 0x29c   : > { %v3078_v5 = vpop.f32.mrf.mxu0 }
 0x29d   : > { %v2712_v11 = vpop.f32.mrf.mxu1 }
 0x29e   : > { %v5797_v29 = vpop.f32.mrf.mxu0 }
 0x29f   : > { %v5753_v59 = vpop.f32.mrf.mxu1 }
 0x2a0   : > { %v3081_v46 = vpop.f32.mrf.mxu0 }
 0x2a1   : > { %v2715_v13 = vpop.f32.mrf.mxu1 }
 0x2a5   : > { %v5800_v31 = vpop.f32.mrf.mxu0 }
 0x2a7   : > { %v3094_v55 = vpop.f32.mrf.mxu0 }
 0x2a9   : > { %v5801_v32 = vpop.f32.mrf.mxu0 }
 0x2ab   : > { %v3097_v33 = vpop.f32.mrf.mxu0 }
 0x2af   : > { %v5772_v9 = vpop.f32.mrf.mxu1 }
 0x2b0   : > { %v2832_v12 = vadd.f32 %v5772_v9, %v5748_v48 }
 0x2b1   : > { %v2823_v37 = vpop.f32.mrf.mxu1 }
 0x2b2   : > { %v2824_v35 = vadd.f32 %v2823_v37, %v2696_v43  ;;  %v3110_v41 = vadd.f32 %v5796_v16, %v2832_v12 }
 0x2b3   : > { %v5773_v47 = vpop.f32.mrf.mxu1 }
 0x2b4   : > { %v2835_v44 = vadd.f32 %v5773_v47, %v5749_v15  ;;  %v3108_v23 = vadd.f32 %v3078_v5, %v2824_v35 }
 0x2b5   : > { %v2826_v45 = vpop.f32.mrf.mxu1 }
 0x2b6   : > { %v2827_v62 = vadd.f32 %v2826_v45, %v2699_v10  ;;  %v3111_v40 = vadd.f32 %v5797_v29, %v2835_v44 }
 0x2b7   : > { %v5776_v26 = vpop.f32.mrf.mxu1 }
 0x2b8   : > { %v2848_v1 = vadd.f32 %v5776_v26, %v5752_v20  ;;  %v3109_v18 = vadd.f32 %v3081_v46, %v2827_v62 }
 0x2b9   : > { %v2839_v38 = vpop.f32.mrf.mxu1 }
 0x2ba   : > { %v5844_v49 = vpop.f32.mrf.mxu0  ;;  %v2840_v57 = vadd.f32 %v2839_v38, %v2712_v11  ;;  %v3114_v30 = vadd.f32 %v5800_v31, %v2848_v1 }
 0x2bb   : > { %v5777_v28 = vpop.f32.mrf.mxu1 }
 0x2bc   : > { %v3491_v3 = vpop.f32.mrf.mxu0  ;;  %v3112_v53 = vadd.f32 %v3094_v55, %v2840_v57 }
 0x2bd   : > { %v2842_v54 = vpop.f32.mrf.mxu1 }
 0x2be   : > { %v5845_v27 = vpop.f32.mrf.mxu0  ;;  %v2843_v21 = vadd.f32 %v2842_v54, %v2715_v13 }
 0x2c0   : > { %v3494_v60 = vpop.f32.mrf.mxu0  ;;  %v3113_v17 = vadd.f32 %v3097_v33, %v2843_v21 }
 0x2c2   : > { %v5848_v50 = vpop.f32.mrf.mxu0 }
 0x2c4   : > { %v3507_v25 = vpop.f32.mrf.mxu0 }
 0x2c6   : > { %v5849_v2 = vpop.f32.mrf.mxu0 }
 0x2c8   : > { %v3510_v63 = vpop.f32.mrf.mxu0 }
 0x2cf   : > { %v5820_v7 = vpop.f32.mrf.mxu1 }
 0x2d0   : > { %v3366_v24 = vadd.f32 %v5820_v7, %v3110_v41 }
 0x2d1   : > { %v3334_v58 = vpop.f32.mrf.mxu1 }
 0x2d2   : > { %v3364_v6 = vadd.f32 %v3334_v58, %v3108_v23  ;;  %v3523_v51 = vadd.f32 %v5844_v49, %v3366_v24 }
 0x2d3   : > { %v5821_v14 = vpop.f32.mrf.mxu1 }
 0x2d4   : > { %v3367_v36 = vadd.f32 %v5821_v14, %v3111_v40  ;;  %v3521_v39 = vadd.f32 %v3491_v3, %v3364_v6  ;;  %v5127_v14 = vld [vmem:[%s7565_s6] ss:$0 sm:$0xff] }
 0x2d5   : > { %v3337_v34 = vpop.f32.mrf.mxu1 }
 0x2d6   : > { %v3365_v0 = vadd.f32 %v3337_v34, %v3109_v18  ;;  %v3524_v42 = vadd.f32 %v5845_v27, %v3367_v36 }
 0x2d7   : > { %v5824_v22 = vpop.f32.mrf.mxu1 }
 0x2d8   : > { %v3370_v8 = vadd.f32 %v5824_v22, %v3114_v30  ;;  %v3522_v19 = vadd.f32 %v3494_v60, %v3365_v0  ;;  %v5119_v22 = vld [vmem:[%s7563_s4] ss:$0 sm:$0xff] }
 0x2d9   : > { %v3350_v56 = vpop.f32.mrf.mxu1 }
 0x2da   : > { %v5892_v4 = vpop.f32.mrf.mxu0  ;;  %v3368_v61 = vadd.f32 %v3350_v56, %v3112_v53  ;;  %v3527_v52 = vadd.f32 %v5848_v50, %v3370_v8 }
 0x2db   : > { %v5825_v48 = vpop.f32.mrf.mxu1 }
 0x2dc   : > { %v4009_v43 = vpop.f32.mrf.mxu0  ;;  %v3525_v15 = vadd.f32 %v3507_v25, %v3368_v61 }
 0x2dd   : > { %v3353_v10 = vpop.f32.mrf.mxu1 }
 0x2de   : > { %v5893_v16 = vpop.f32.mrf.mxu0  ;;  %v3369_v20 = vadd.f32 %v3353_v10, %v3113_v17 }
 0x2e0   : > { %v4012_v5 = vpop.f32.mrf.mxu0  ;;  %v3526_v11 = vadd.f32 %v3510_v63, %v3369_v20 }
 0x2e2   : > { %v5896_v29 = vpop.f32.mrf.mxu0 }
 0x2e4   : > { %v4025_v59 = vpop.f32.mrf.mxu0 }
 0x2e6   : > { %v5897_v46 = vpop.f32.mrf.mxu0 }
 0x2e8   : > { %v4028_v44 = vpop.f32.mrf.mxu0 }
 0x2ef   : > { %v5868_v31 = vpop.f32.mrf.mxu1 }
 0x2f0   : > { %v3785_v55 = vadd.f32 %v5868_v31, %v3523_v51 }
 0x2f1   : > { %v3753_v32 = vpop.f32.mrf.mxu1 }
 0x2f2   : > { %v3783_v13 = vadd.f32 %v3753_v32, %v3521_v39  ;;  %v4041_v9 = vadd.f32 %v5892_v4, %v3785_v55 }
 0x2f3   : > { %v5869_v12 = vpop.f32.mrf.mxu1 }
 0x2f4   : > { %v3786_v37 = vadd.f32 %v5869_v12, %v3524_v42  ;;  %v4039_v35 = vadd.f32 %v4009_v43, %v3783_v13 }
 0x2f5   : > { %v3756_v41 = vpop.f32.mrf.mxu1 }
 0x2f6   : > { %v3784_v47 = vadd.f32 %v3756_v41, %v3522_v19  ;;  %v4042_v23 = vadd.f32 %v5893_v16, %v3786_v37 }
 0x2f7   : > { %v5872_v45 = vpop.f32.mrf.mxu1 }
 0x2f8   : > { %v3789_v62 = vadd.f32 %v5872_v45, %v3527_v52  ;;  %v4040_v40 = vadd.f32 %v4012_v5, %v3784_v47 }
 0x2f9   : > { %v3769_v26 = vpop.f32.mrf.mxu1 }
 0x2fa   : > { %v5940_v33 = vpop.f32.mrf.mxu0  ;;  %v3787_v1 = vadd.f32 %v3769_v26, %v3525_v15  ;;  %v4045_v18 = vadd.f32 %v5896_v29, %v3789_v62 }
 0x2fb   : > { %v5873_v38 = vpop.f32.mrf.mxu1 }
 0x2fc   : > { %v4428_v49 = vpop.f32.mrf.mxu0  ;;  %v4043_v57 = vadd.f32 %v4025_v59, %v3787_v1 }
 0x2fd   : > { %v3772_v27 = vpop.f32.mrf.mxu1 }
 0x2fe   : > { %v5941_v30 = vpop.f32.mrf.mxu0  ;;  %v3788_v34 = vadd.f32 %v3772_v27, %v3526_v11 }
 0x300   : > { %v4431_v28 = vpop.f32.mrf.mxu0  ;;  %v4044_v15 = vadd.f32 %v4028_v44, %v3788_v34 }
 0x302   : > { %v5944_v3 = vpop.f32.mrf.mxu0 }
 0x304   : > { %v4444_v53 = vpop.f32.mrf.mxu0 }
 0x306   : > { %v5945_v54 = vpop.f32.mrf.mxu0 }
 0x308   : > { %v4447_v31 = vpop.f32.mrf.mxu0 }
 0x30f   : > { %v5916_v21 = vpop.f32.mrf.mxu1 }
 0x310   : > { %v4198_v24 = vadd.f32 %v5916_v21, %v4041_v9 }
 0x311   : > { %v4166_v60 = vpop.f32.mrf.mxu1 }
 0x312   : > { %v4196_v58 = vadd.f32 %v4166_v60, %v4039_v35  ;;  %v4460_v36 = vadd.f32 %v5940_v33, %v4198_v24 }
 0x313   : > { %v5917_v17 = vpop.f32.mrf.mxu1 }
 0x314   : > { %v4199_v6 = vadd.f32 %v5917_v17, %v4042_v23  ;;  %v4458_v0 = vadd.f32 %v4428_v49, %v4196_v58  ;;  %v4474_v61 = vadd.f32 %v5119_v22, %v4460_v36 }
 0x315   : > { %v4169_v50 = vpop.f32.mrf.mxu1 }
 0x316   : > { %v4197_v39 = vadd.f32 %v4169_v50, %v4040_v40  ;;  %v4461_v8 = vadd.f32 %v5941_v30, %v4199_v6  ;;  %v4472_v10 = vadd.f32 %v5119_v22, %v4458_v0 }
 0x317   : > { %v5920_v25 = vpop.f32.mrf.mxu1 }
 0x318   : > { %v4202_v42 = vadd.f32 %v5920_v25, %v4045_v18  ;;  %v4459_v4 = vadd.f32 %v4431_v28, %v4197_v39  ;;  %v4475_v5 = vadd.f32 %v5119_v22, %v4461_v8 }
 0x319   : > { %v4182_v2 = vpop.f32.mrf.mxu1 }
 0x31a   : > { %v4200_v48 = vadd.f32 %v4182_v2, %v4043_v57  ;;  %v4464_v43 = vadd.f32 %v5944_v3, %v4202_v42  ;;  %v4473_v32 = vadd.f32 %v5119_v22, %v4459_v4 }
 0x31b   : > { %v5921_v7 = vpop.f32.mrf.mxu1 }
 0x31c   : > { %v4478_v9 = vadd.f32 %v5119_v22, %v4464_v43  ;;  %v4462_v12 = vadd.f32 %v4444_v53, %v4200_v48 }
 0x31d   : > { %v4185_v51 = vpop.f32.mrf.mxu1 }
 0x31e   : > { %v4201_v29 = vadd.f32 %v4185_v51, %v4044_v15  ;;  %v4476_v38 = vadd.f32 %v5119_v22, %v4462_v12 }
 0x320   : > { %v4463_v23 = vadd.f32 %v4447_v31, %v4201_v29 }
 0x322   : > { %v4477_v28 = vadd.f32 %v5119_v22, %v4463_v23 }
 0x32f   : > { %v5964_v63 = vpop.f32.mrf.mxu1 }
 0x330   : > { %v4623_v19 = vadd.f32 %v5964_v63, %v5127_v14 }
 0x331   : > { %v4614_v56 = vpop.f32.mrf.mxu1 }
 0x332   : > { %v4615_v52 = vadd.f32 %v5127_v14, %v4614_v56  ;;  %v4646_v20 = vadd.f32 %v4623_v19, %v4474_v61 }
 0x333   : > { %v5965_v16 = vpop.f32.mrf.mxu1 }
 0x334   : > { %v4626_v11 = vadd.f32 %v5965_v16, %v5127_v14  ;;  %v4644_v59 = vadd.f32 %v4615_v52, %v4472_v10  ;;  %v4653_v35 = vmax.f32 %v4646_v20, 0.0 }
 0x335   : > { %v4617_v46 = vpop.f32.mrf.mxu1 }
 0x336   : > { %v4647_v55 = vadd.f32 %v4626_v11, %v4475_v5  ;;  %v4618_v13 = vadd.f32 %v5127_v14, %v4617_v46  ;;  %v4651_v45 = vmax.f32 %v4644_v59, 0.0 }
 0x337   : > { %v5968_v37 = vpop.f32.mrf.mxu1 }
 0x338   : > { %v4654_v41 = vmax.f32 %v4647_v55, 0.0  ;;  %v4645_v47 = vadd.f32 %v4618_v13, %v4473_v32  ;;  %v4639_v44 = vadd.f32 %v5968_v37, %v5127_v14 }
 0x339   : > { %v4630_v62 = vpop.f32.mrf.mxu1 }
 0x33a   : > { %v5160_v40 = vpack.c.bf16 %v4654_v41, %v4653_v35  ;;  %v4652_v26 = vmax.f32 %v4645_v47, 0.0  ;;  %v4650_v33 = vadd.f32 %v4639_v44, %v4478_v9  ;;  %v4631_v1 = vadd.f32 %v5127_v14, %v4630_v62 }
 0x33b   : > { %v5969_v18 = vpop.f32.mrf.mxu1 }
 0x33c   : > { %5167 = vst [vmem:[%s308_s12 + $0x8] sm:$0xff] %v5160_v40   ;;  %v5155_v49 = vpack.c.bf16 %v4652_v26, %v4651_v45  ;;  %v4657_v57 = vmax.f32 %v4650_v33, 0.0  ;;  %v4648_v53 = vadd.f32 %v4631_v1, %v4476_v38 }
 0x33d   : > { %v4633_v30 = vpop.f32.mrf.mxu1 }
 0x33e   : > { %5156 = vst [vmem:[%s308_s12] sm:$0xff] %v5155_v49   ;;  %v4664_v3 = vpack.c.bf16 %v4657_v57, %v4657_v57  ;;  %v4634_v54 = vadd.f32 %v5127_v14, %v4633_v30  ;;  %v4655_v21 = vmax.f32 %v4648_v53, 0.0 }
 0x340   : > { %4671 = vst [vmem:[%s308_s12 + $0x18] sm:$0xf] %v4664_v3  ;;  %v4649_v27 = vadd.f32 %v4634_v54, %v4477_v28 }
 0x342   : > { %v4656_v60 = vmax.f32 %v4649_v27, 0.0 }
 0x344   : > { %v5165_v17 = vpack.c.bf16 %v4656_v60, %v4655_v21 }
 0x346   : > { %5168 = vst [vmem:[%s308_s12 + $0x10] sm:$0xff] %v5165_v17  }
 0x347   : > { %6283 = shalt.err (!%p6280_p3)
}
 0x348   : > { %s6284_s10 = scalar_lea.hbm %s7510_s19, 448  ;;  %s6288_s12 = scalar_lea.hbm %s7566_s7, 896 }
 0x349   : > { %p6285_p5 = scmp.ne.s32.totalorder %s7510_s19, %s6284_s10  ;;  %p6289_p9 = scmp.lt.s32.totalorder %s7510_s19, %s7566_s7 }
 0x34a   : > { %p6290_p10 = scmp.lt.s32.totalorder %s6288_s12, %s6284_s10 }
 0x34b   : > { %p6286_p6 = pnand %p6285_p5, %p6441_p4 }
 0x34c   : > { %p6291_p11 = por %p6290_p10, %p6289_p9 }
 0x34d   : > { %p6287_p7 = pneg %p6286_p6 }
 0x34f   : > { %p6292_p12 = pnand %p6291_p11, %p6287_p7 }
 0x351   : > { %6295 = shalt.err (!%p6292_p12)
}
 0x352   : > { %s6359_s18 = smov 64   ;;  %s6360_s23 = smov 4  }
 0x353   : > { %5977 = dma.vmem_to_hbm [thread:$0]  (%p6441_p4), %s7505_s15, 448, %s7510_s19, %s7514_s20, %s6359_s18, %s6359_s18, %s6360_s23  }
 0x354 PF: > { %p5989_p13 = scmp.ge.s32.totalorder %s6350_s29, 2  ;;  %s4703_s27 = sand.u32 1, %s6330_s24  }
 0x355   : > { %s4704_s21 = scalar_lea.sflag [#allocation5], %s4703_s27 }
 0x356   : > { %p5984_p0 = pnand %p5989_p13, %p6448_p8 }
 0x358   : > { %p5985_p1 = pneg %p5984_p0 }
 0x35a   : > { %6325 = dma.done.wait (%p5985_p1), %s4704_s21, 448  }
 0x35b   : > { %6327 = vsyncadd (%p5985_p1), %s4704_s21, 4294966848  ;;  %s21_s29 = sadd.s32 1, %s6350_s29   ;;  %s7577_s24 = smov %s6334_s25 }
 0x35c   : > { %p18_p2 = scmp.ge.s32.totalorder %s21_s29, 4   ;;  %s7578_s25 = smov %s6338_s26 }
 0x35d   : > { %s7579_s26 = smov %s6454_s14  ;;  %s7580_s27 = smov %s6346_s28 }
 0x35e   : > { %s7581_s28 = smov %s7583_s9  ;;  %20 = sbr.rel (!%p18_p2) target bundleno = 5 (0x5), region = 101 }
 0x363   :  { %4709 = vsyncpa [#allocation4], 1 }
 0x364   :  { %4711 = vsyncpa [#allocation4 + $0x1], 1 }
 0x365   :  { %4712 = vsyncpa [#allocation5], 1 }
 0x366   :  { %4714 = vsyncpa [#allocation5 + $0x1], 1 }

// kernel: tpu_custom_call.1
= control target key start
LH: loop header
LB: loop body
LE: loop exit
PB: predicated region body
PF: predicated region fallthrough
CT: control target
= control target key end

     0   :  { %12 = vsyncpa [#allocation4], 0  ;;  %s7559_s0 = inlined_call_operand.vmem [shape: bf16[8,10,9,128], index: 0, kind: input, shape index: {}]   ;;  %s7560_s1 = inlined_call_operand.vmem [shape: bf16[1152,128], index: 1, kind: input, shape index: {}]   ;;  %s7561_s2 = inlined_call_operand.hbm [shape: bf16[1152,128], index: 2, kind: input, shape index: {}]   ;;  %s7562_s3 = inlined_call_operand.vmem [shape: f32[1,128], index: 3, kind: input, shape index: {}]   ;;  %s7563_s4 = inlined_call_operand.vmem [shape: f32[1,128], index: 4, kind: input, shape index: {}]   ;;  %s7564_s5 = inlined_call_operand.vmem [shape: bf16[128,128], index: 5, kind: input, shape index: {}]   ;;  %s7565_s6 = inlined_call_operand.vmem [shape: f32[1,128], index: 6, kind: input, shape index: {}]   ;;  %s7566_s7 = inlined_call_operand.hbm [shape: bf16[2,7,8,128], index: 7, kind: output, shape index: {}]  }
   0x1   :  { %13 = vsyncpa [#allocation5], 0 }
   0x2   :  { %15 = vsyncpa [#allocation5 + $0x1], 0  ;;  %s6401_s24 = smov 0   ;;  %s6403_s25 = smov 0  }
   0x3   :  { %s6405_s26 = smov 0   ;;  %s6407_s27 = smov 0  }
   0x4   :  { %s6409_s28 = smov 0   ;;  %s6411_s29 = smov 0  }
   0x5 LB: > { %s4773_s30 = sadd.s32 4294967295, %s6350_s29   ;;  %s4774_s8 = sadd.s32 4294967294, %s6350_s29   ;;  %s6350_s29 = sphi %s6411_s29, %s21_s29   ;;  %s6346_s28 = sphi %s6409_s28, %s7581_s28   ;;  %s6342_s27 = sphi %s6407_s27, %s7580_s27   ;;  %s6338_s26 = sphi %s6405_s26, %s7579_s26   ;;  %s6334_s25 = sphi %s6403_s25, %s7578_s25   ;;  %s6330_s24 = sphi %s6401_s24, %s7577_s24  }
   0x6   : > { %s33_s9 = sadd.s32 1, %s6346_s28  ;;  %s196_s10 = sadd.s32 1, %s6338_s26 }
   0x7   : > { %p35_p0 = scmp.ge.s32.totalorder %s33_s9, 2  ;;  %p206_p1 = scmp.ne.s32.totalorder %s6338_s26, %s6334_s25 }
   0x8   : > { %p207_p2 = scmp.eq.s32.totalorder %s4773_s30, 1  ;;  %p212_p3 = scmp.ne.s32.totalorder %s6334_s25, %s6330_s24 }
   0x9   : > { %s7583_s9 = smov (%p35_p0, %s33_s9), 0  ;;  %p213_p5 = scmp.eq.s32.totalorder %s4774_s8, 1 }
   0xa   : > { %p6441_p4 = por %p207_p2, %p206_p1  ;;  %s191_s12 = ssub.s32 %s6346_s28, %s7583_s9 }
   0xb   : > { %p4775_p6 = scmp.ge.s32.totalorder %s6350_s29, 1  ;;  %p194_p7 = scmp.eq.s32.totalorder %s191_s12, 0 }
   0xc   : > { %p6448_p8 = por %p213_p5, %p212_p3  ;;  %p220_p9 = scmp.lt.s32.totalorder %s6350_s29, 3 }
   0xd   : > { %s6454_s14 = scalar_select %p194_p7, %s6338_s26, %s196_s10  }
   0xe   : > { %p6456_p10 = pnand %p4775_p6, %p220_p9  ;;  %p6460_p11 = scmp.eq.s32.totalorder %s4773_s30, 0 }
   0xf   : > { %s6352_s17 = smov [#allocation3]  }
  0x10   : > { %p5979_p12 = pneg %p6456_p10  ;;  %s235_s18 = sshll.u32 %s6352_s17, 4  ;;  %s236_s18 = int_to_ptr.vmem [resolvable:$true] %s235_s18 }
  0x11   : > { %s6255_s19 = scalar_lea.vmem %s236_s18, 9216  ;;  %p6263_p5 = scmp.lt.s32.totalorder %s236_s18, %s236_s18 }
  0x12   : > { %p5980_p13 = pnand %p6460_p11, %p5979_p12  ;;  %p6256_p1 = scmp.ne.s32.totalorder %s236_s18, %s6255_s19 }
  0x13   : > { %p6264_p6 = scmp.lt.s32.totalorder %s6255_s19, %s6255_s19 }
  0x14   : > { %p6246_p0 = pneg %p5980_p13 }
  0x15   : > { %p6265_p7 = por %p6264_p6, %p6263_p5 }
  0x16   : > { %p6258_p2 = pnand %p6256_p1, %p6246_p0 }
  0x18   : > { %p6259_p3 = pneg %p6258_p2 }
  0x1a   : > { %p6266_p9 = pnand %p6265_p7, %p6259_p3 }
  0x1c   : > { %6269 = shalt.err (!%p6266_p9)
}
  0x1d   : > { %s6353_s20 = smov 64   ;;  %s6354_s21 = smov 4  }
  0x1e   : > { %5982 = dma.hbm_to_vmem [thread:$0]  (!%p5980_p13), %s7561_s2, 9216, %s236_s18, [#allocation4], %s6353_s20, %s6353_s20, %s6354_s21  }
  0x1f   : > { %275 = sbr.rel (%p6456_p10) target bundleno = 852 (0x354), region = 48 }
  0x24   : > { %6321 = dma.done.wait (%p6460_p11), [#allocation4], 9216  }
  0x25   : > { %6323 = vsyncadd (%p6460_p11), [#allocation4], 4294958080  ;;  %v6355_v0 = vmov 0.0   ;;  %vm6356_vm0 = vmmov 0   ;;  %v6046_v1 = vld [vmem:[%s7560_s1 + $0x78] sm:$0xff]   ;;  %s4780_s10 = sshll.u32 %s6342_s27, 2 }
  0x26   : > { %5406 = vmatprep.subr.bf16.mxu0 %v6355_v0  ;;  %5442 = vmatprep.subr.bf16.mxu1 %v6355_v0  ;;  %v6047_v2 = vld [vmem:[%s7560_s1 + $0x38] sm:$0xff]   ;;  %v6048_v3 = vld [vmem:[%s7560_s1 + $0x70] sm:$0xff]   ;;  %p311_p10 = scmp.lt.s32.totalorder %s4780_s10, 7  ;;  %v6050_v5 = vld [vmem:[%s7560_s1 + $0x68] sm:$0xff]   ;;  %vm685_vm1 = vsmask.f32 3328 }
  0x27   : > { %5422 = vmatprep.mubr.msk.bf16.mxu0 %vm6356_vm0, %v6355_v0  ;;  %5458 = vmatprep.mubr.msk.bf16.mxu1 %vm6356_vm0, %v6355_v0  ;;  %v6049_v4 = vld [vmem:[%s7560_s1 + $0x30] sm:$0xff]   ;;  %v6051_v6 = vld [vmem:[%s7560_s1 + $0x28] sm:$0xff]   ;;  %v6052_v7 = vld [vmem:[%s7560_s1 + $0x60] sm:$0xff]   ;;  %vm686_vm2 = vsmask.f32 7440  ;;  %vm2406_vm4 = vcmask 1043459  }
  0x28   : > { %5407 = vmatpush3.bf16.msra.mxu0 %v6046_v1  ;;  %5443 = vmatpush3.bf16.msra.mxu1 %v6047_v2  ;;  %s7585_s10 = smov (!%p311_p10, %s4780_s10), 7  ;;  %v6053_v8 = vld [vmem:[%s7560_s1 + $0x20] sm:$0xff]   ;;  %v6054_v9 = vld [vmem:[%s7560_s1 + $0x58] sm:$0xff]   ;;  %v6056_v11 = vld [vmem:[%s7560_s1 + $0x50] sm:$0xff]   ;;  %vm2407_vm5 = vsmask.f32 7950 }
  0x29   : > { %5408 = vmatprep.subr.bf16.mxu0 %v6355_v0  ;;  %5444 = vmatprep.subr.bf16.mxu1 %v6355_v0  ;;  %s5971_s16 = smul.u32 80, %s7585_s10  ;;  %v6055_v10 = vld [vmem:[%s7560_s1 + $0x18] sm:$0xff]   ;;  %v6057_v12 = vld [vmem:[%s7560_s1 + $0x10] sm:$0xff]   ;;  %v6058_v13 = vld [vmem:[%s7560_s1 + $0x48] sm:$0xff]   ;;  %vm2466_vm7 = vsmask.f32 256 }
  0x2a   : > { %v6059_v14 = vld [vmem:[%s7560_s1 + $0x8] sm:$0xff]   ;;  %v6060_v15 = vld [vmem:[%s7560_s1 + $0x40] sm:$0xff]   ;;  %v6064_v19 = vld [vmem:[%s7560_s1 + $0xb8] sm:$0xff]   ;;  %vm2467_vm8 = vsmask.f32 4368  ;;  %s306_s30 = sand.u32 1, %s6334_s25  }
  0x2b   : > { %s6524_s23 = scalar_lea.vmem %s7559_s0, %s5971_s16  ;;  %v6061_v16 = vld [vmem:[%s7560_s1] sm:$0xff]   ;;  %v6069_v20 = vld [vmem:[%s7560_s1 + $0xf8] sm:$0xff]   ;;  %v6065_v21 = vld [vmem:[%s7560_s1 + $0xb0] sm:$0xff]   ;;  %s5970_s8 = smul.u32 28, %s306_s30 }
  0x2c   : > { %5409 = vmatpush3.bf16.msra.mxu0 %v6048_v3  ;;  %5445 = vmatpush3.bf16.msra.mxu1 %v6049_v4  ;;  %v6062_v17 = vld [vmem:[%s6524_s23 + $0x50] ss:$8 sps:$4 sm:$0xff]   ;;  %v6063_v18 = vld [vmem:[%s6524_s23] ss:$8 sps:$4 sm:$0xff]   ;;  %v668_v39 = vld [vmem:[%s6524_s23 + $0x4] sm:$0x1] }
  0x2d   : > { %5410 = vmatprep.subr.bf16.mxu0 %v6355_v0  ;;  %5446 = vmatprep.subr.bf16.mxu1 %v6355_v0  ;;  %v6066_v22 = vld [vmem:[%s6524_s23 + $0x60] ss:$8 sps:$4 sm:$0xff]   ;;  %v6070_v23 = vld [vmem:[%s7560_s1 + $0xf0] sm:$0xff]   ;;  %v6075_v33 = vld [vmem:[%s7560_s1 + $0x98] sm:$0xff]   ;;  %v698_v51 = vshll.u32 %v668_v39, 16  ;;  %s308_s12 = scalar_lea.vmem [#allocation6], %s5970_s8 }
  0x2e   : > { %v6067_v24 = vld [vmem:[%s6524_s23 + $0x10] ss:$8 sps:$4 sm:$0xff]   ;;  %v6068_v25 = vld [vmem:[%s7560_s1 + $0xa8] sm:$0xff]   ;;  %v6073_v27 = vld [vmem:[%s7560_s1 + $0xa0] sm:$0xff]   ;;  %s4688_s15 = sshll.u32 %s308_s12, 4  ;;  %s5972_s16 = smul.u32 448, %s6342_s27  ;;  %s7505_s15 = int_to_ptr.vmem [resolvable:$true] %s4688_s15 }
  0x2f   : > { %v6074_v26 = vld [vmem:[%s7560_s1 + $0xe8] sm:$0xff]   ;;  %v6071_v28 = vld [vmem:[%s6524_s23 + $0x70] ss:$8 sps:$4 sm:$0xff]   ;;  %v667_v29 = vld [vmem:[%s6524_s23] sm:$0xf]  ;;  %v700_v61 = vrot.slane %v698_v51, 5 }
  0x30   : > { %5411 = vmatpush3.bf16.msra.mxu0 %v6050_v5  ;;  %5447 = vmatpush3.bf16.msra.mxu1 %v6051_v6  ;;  %v6076_v30 = vld [vmem:[%s7560_s1 + $0xe0] sm:$0xff]   ;;  %v669_v31 = vld [vmem:[%s6524_s23 + $0x8] sm:$0xf]  ;;  %v689_v34 = vshrl.u32 %v667_v29, 16  ;;  %v692_v35 = vshll.u32 %v667_v29, 16  ;;  %v6080_v38 = vld [vmem:[%s7560_s1 + $0xd8] sm:$0xff]   ;;  %s7510_s19 = scalar_lea.hbm %s7566_s7, %s5972_s16 }
  0x31   : > { %5412 = vmatprep.subr.bf16.mxu0 %v6355_v0  ;;  %5448 = vmatprep.subr.bf16.mxu1 %v6355_v0  ;;  %v6072_v32 = vld [vmem:[%s6524_s23 + $0x20] ss:$8 sps:$4 sm:$0xff]   ;;  %v703_v36 = vshrl.u32 %v669_v31, 16  ;;  %v706_v37 = vshll.u32 %v669_v31, 16  ;;  %v670_v40 = vld [vmem:[%s6524_s23 + $0xc] sm:$0x1]  ;;  %vm6653_vm3 = vmor %vm685_vm1, %vm686_vm2 }
  0x32   : > { %v6079_v41 = vld [vmem:[%s7560_s1 + $0x90] sm:$0xff]   ;;  %v691_v43 = vrot.slane %v689_v34, 4  ;;  %v694_v44 = vrot.slane %v692_v35, 5  ;;  %v6077_v45 = vld [vmem:[%s6524_s23 + $0x80] ss:$8 sps:$4 sm:$0xff]   ;;  %v712_v52 = vshll.u32 %v670_v40, 16  ;;  %vm7170_vm6 = vmand %vm2406_vm4, %vm2407_vm5 }
  0x33   : > { %v6082_v42 = vld [vmem:[%s7560_s1 + $0xd0] sm:$0xff]   ;;  %v705_v46 = vrot.slane %v703_v36, 4  ;;  %v708_v47 = vrot.slane %v706_v37, 5  ;;  %v673_v49 = vld [vmem:[%s6524_s23 + $0x18] sm:$0xf]  ;;  %v6081_v57 = vld [vmem:[%s7560_s1 + $0x88] sm:$0xff]  }
  0x34   : > { %5413 = vmatpush3.bf16.msra.mxu0 %v6052_v7  ;;  %5449 = vmatpush3.bf16.msra.mxu1 %v6053_v8  ;;  %v671_v48 = vld [vmem:[%s6524_s23 + $0x10] sm:$0xf]  ;;  %v731_v55 = vshrl.u32 %v673_v49, 16  ;;  %v734_v56 = vshll.u32 %v673_v49, 16  ;;  %v695_v58 = vor.u32 %v694_v44, %v691_v43  ;;  %v6085_v60 = vld [vmem:[%s7560_s1 + $0xc8] sm:$0xff]   ;;  %v714_v62 = vrot.slane %v712_v52, 5  ;;  %vm7251_vm9 = vmor %vm2466_vm7, %vm2467_vm8 }
  0x35   : > { %5414 = vmatprep.subr.bf16.mxu0 %v6355_v0  ;;  %5450 = vmatprep.subr.bf16.mxu1 %v6355_v0  ;;  %v6078_v50 = vld [vmem:[%s6524_s23 + $0x30] ss:$8 sps:$4 sm:$0xff]   ;;  %v717_v53 = vshrl.u32 %v671_v48, 16  ;;  %v720_v54 = vshll.u32 %v671_v48, 16  ;;  %v709_v59 = vor.u32 %v708_v47, %v705_v46  ;;  %v6086_v63 = vld [vmem:[%s7560_s1 + $0x80] sm:$0xff]   ;;  %s7514_s20 = scalar_lea.sflag [#allocation5], %s306_s30 }
  0x36   : > { %v672_v1 = vld [vmem:[%s6524_s23 + $0x14] sm:$0x1]  ;;  %v674_v2 = vld [vmem:[%s6524_s23 + $0x1c] sm:$0x1]  ;;  %v6087_v3 = vld [vmem:[%s7560_s1 + $0xc0] sm:$0xff]   ;;  %v733_v6 = vrot.slane %v731_v55, 4 }
  0x37   : > { %v719_v4 = vrot.slane %v717_v53, 4  ;;  %v722_v5 = vrot.slane %v720_v54, 5  ;;  %v736_v7 = vrot.slane %v734_v56, 5  ;;  %v6083_v8 = vld [vmem:[%s6524_s23 + $0x90] ss:$0 sps:$4 sm:$0xff]   ;;  %v6088_v35 = vld [vmem:[%s7560_s1 + $0x138] sm:$0xff]  }
  0x38   : > { %5415 = vmatpush3.bf16.msra.mxu0 %v6054_v9  ;;  %5451 = vmatpush3.bf16.msra.mxu1 %v6055_v10  ;;  %v696_v9 = vrot.slane %v695_v58, 4  ;;  %v710_v10 = vrot.slane %v709_v59, 4  ;;  %v6089_v36 = vld [vmem:[%s6524_s23 + $0xa0] ss:$8 sps:$4 sm:$0xff]   ;;  %v679_v40 = vld [vmem:[%s6524_s23 + $0x30] sm:$0xf] }
  0x39   : > { %5416 = vmatprep.subr.bf16.mxu0 %v6355_v0  ;;  %5452 = vmatprep.subr.bf16.mxu1 %v6355_v0  ;;  %v6090_v46 = vld [vmem:[%s7560_s1 + $0x130] sm:$0xff]   ;;  %v773_v49 = vshrl.u32 %v679_v40, 16  ;;  %v6092_v58 = vld [vmem:[%s7560_s1 + $0x128] sm:$0xff]   ;;  %s6358_s27 = smov [#allocation6]  }
  0x3a   : > { %v6094_v53 = vld [vmem:[%s7560_s1 + $0x170] sm:$0xff]   ;;  %s6274_s21 = sshll.u32 %s6358_s27, 4  ;;  %s6275_s21 = int_to_ptr.vmem [resolvable:$false] %s6274_s21 }
  0x3b   : > { %s6276_s22 = scalar_lea.vmem %s6275_s21, 896  ;;  %p6277_p0 = scmp.lt.s32.totalorder %s7505_s15, %s6275_s21 }
  0x3c   : > { %5417 = vmatpush3.bf16.msra.mxu0 %v6056_v11  ;;  %5453 = vmatpush3.bf16.msra.mxu1 %v6057_v12  ;;  %v6084_v11 = vld [vmem:[%s6524_s23 + $0x40] ss:$0 sps:$4 sm:$0xff]  }
  0x3d   : > { %5418 = vmatprep.subr.bf16.mxu0 %v6355_v0  ;;  %5454 = vmatprep.subr.bf16.mxu1 %v6355_v0  ;;  %v675_v12 = vld [vmem:[%s6524_s23 + $0x20] sm:$0xf] }
  0x40   : > { %5419 = vmatpush3.bf16.msra.mxu0 %v6058_v13  ;;  %5455 = vmatpush3.bf16.msra.mxu1 %v6059_v14  ;;  %v677_v13 = vld [vmem:[%s6524_s23 + $0x28] sm:$0xf] }
  0x41   : > { %5420 = vmatprep.subr.bf16.mxu0 %v6355_v0  ;;  %5456 = vmatprep.subr.bf16.mxu1 %v6355_v0 }
  0x44   : > { %5421 = vmatpush3.bf16.msra.mxu0 %v6060_v15  ;;  %5457 = vmatpush3.bf16.msra.mxu1 %v6061_v16  ;;  %v723_v15 = vor.u32 %v722_v5, %v719_v4  ;;  %v726_v16 = vshll.u32 %v672_v1, 16  ;;  %v680_v4 = vld [vmem:[%s6524_s23 + $0x34] sm:$0x1]  ;;  %v682_v5 = vld [vmem:[%s6524_s23 + $0x3c] sm:$0x1] }
  0x45   : > { %5478 = vmatprep.subr.bf16.mxu0 %v6355_v0  ;;  %5514 = vmatprep.subr.bf16.mxu1 %v6355_v0 }
  0x47   : > { %5423 = vmatmul.mubr.bf16.vlgmr.msra.gmra.mxu0 %v6062_v17  ;;  %5459 = vmatmul.mubr.bf16.vlgmr.msra.gmra.mxu1 %v6063_v18  ;;  %v737_v17 = vor.u32 %v736_v7, %v733_v6  ;;  %v740_v18 = vshll.u32 %v674_v2, 16  ;;  %v6097_v6 = vld [vmem:[%s7560_s1 + $0x168] sm:$0xff]  }
  0x48   : > { %5479 = vmatpush3.bf16.msra.mxu0 %v6064_v19  ;;  %5426 = vmatprep.mubr.msk.bf16.mxu0 %vm6356_vm0, %v6355_v0  ;;  %v745_v19 = vshrl.u32 %v675_v12, 16 }
  0x49   : > { %5480 = vmatprep.subr.bf16.mxu0 %v6355_v0  ;;  %5462 = vmatprep.mubr.msk.bf16.mxu1 %vm6356_vm0, %v6355_v0  ;;  %v738_v29 = vrot.slane %v737_v17, 4  ;;  %v796_v17 = vshll.u32 %v682_v5, 16 }
  0x4a   : > { %5515 = vmatpush3.bf16.msra.mxu1 %v6069_v20  ;;  %v748_v20 = vshll.u32 %v675_v12, 16  ;;  %v747_v31 = vrot.slane %v745_v19, 4  ;;  %v6095_v12 = vld [vmem:[%s7560_s1 + $0x120] sm:$0xff]  }
  0x4b   : > { %5516 = vmatprep.subr.bf16.mxu1 %v6355_v0 }
  0x4c   : > { %5481 = vmatpush3.bf16.msra.mxu0 %v6065_v21  ;;  %v676_v21 = vld [vmem:[%s6524_s23 + $0x24] sm:$0x1] }
  0x4d   : > { %5482 = vmatprep.subr.bf16.mxu0 %v6355_v0 }
  0x4e   : > { %5517 = vmatpush3.bf16.msra.mxu1 %v6070_v23  ;;  %v759_v23 = vshrl.u32 %v677_v13, 16 }
  0x4f   : > { %5427 = vmatmul.mubr.bf16.gmra.mxu0 %v6066_v22  ;;  %5518 = vmatprep.subr.bf16.mxu1 %v6355_v0  ;;  %v678_v22 = vld [vmem:[%s6524_s23 + $0x2c] sm:$0x1] }
  0x50   : > { %5463 = vmatmul.mubr.bf16.gmra.mxu1 %v6067_v24  ;;  %5483 = vmatpush3.bf16.msra.mxu0 %v6068_v25  ;;  %v762_v24 = vshll.u32 %v677_v13, 16  ;;  %v701_v25 = vsel %vm6653_vm3, %v696_v9, %v700_v61  ;;  %v768_v34 = vshll.u32 %v678_v22, 16  ;;  %v761_v37 = vrot.slane %v759_v23, 4  ;;  %v6096_v22 = vld [vmem:[%s6524_s23 + $0xc0] ss:$8 sps:$4 sm:$0xff]   ;;  %v6098_v23 = vld [vmem:[%s7560_s1 + $0x118] sm:$0xff]  }
  0x51   : > { %5430 = vmatprep.mubr.msk.bf16.mxu0 %vm6356_vm0, %v6355_v0  ;;  %5466 = vmatprep.mubr.msk.bf16.mxu1 %vm6356_vm0, %v6355_v0 }
  0x52   : > { %5484 = vmatprep.subr.bf16.mxu0 %v6355_v0  ;;  %5519 = vmatpush3.bf16.msra.mxu1 %v6074_v26  ;;  %v715_v26 = vsel %vm6653_vm3, %v710_v10, %v714_v62  ;;  %v770_v44 = vrot.slane %v768_v34, 5  ;;  %v6091_v62 = vld [vmem:[%s6524_s23 + $0xb0] ss:$8 sps:$4 sm:$0xff]  }
  0x53   : > { %5520 = vmatprep.subr.bf16.mxu1 %v6355_v0  ;;  %v4817_v39 = vcombine.low %v701_v25, %v715_v26 }
  0x54   : > { %5485 = vmatpush3.bf16.msra.mxu0 %v6073_v27  ;;  %v724_v27 = vrot.slane %v723_v15, 4  ;;  %v782_v15 = vshll.u32 %v680_v4, 16  ;;  %v4881_v4 = vld [vmem:[%s6524_s23 + $0xbc] sm:$0x1] }
  0x55   : > { %5486 = vmatprep.subr.bf16.mxu0 %v6355_v0 }
  0x56   : > { %5521 = vmatpush3.bf16.msra.mxu1 %v6076_v30  ;;  %v742_v30 = vrot.slane %v740_v18, 5  ;;  %v6099_v18 = vld [vmem:[%s7560_s1 + $0x160] sm:$0xff]   ;;  %v784_v26 = vrot.slane %v782_v15, 5 }
  0x57   : > { %5431 = vmatmul.mubr.bf16.gmra.mxu0 %v6071_v28  ;;  %5522 = vmatprep.subr.bf16.mxu1 %v6355_v0  ;;  %v728_v28 = vrot.slane %v726_v16, 5  ;;  %v6105_v15 = vld [vmem:[%s6524_s23 + $0xe0] ss:$0 sps:$4 sm:$0xff]  }
  0x58   : > { %5467 = vmatmul.mubr.bf16.gmra.mxu1 %v6072_v32  ;;  %5487 = vmatpush3.bf16.msra.mxu0 %v6075_v33  ;;  %v750_v32 = vrot.slane %v748_v20, 5  ;;  %v754_v33 = vshll.u32 %v676_v21, 16  ;;  %v743_v52 = vsel %vm6653_vm3, %v738_v29, %v742_v30  ;;  %v6102_v29 = vld [vmem:[%s7560_s1 + $0x158] sm:$0xff]   ;;  %v4876_v30 = vld [vmem:[%s6524_s23 + $0xa8] sm:$0xf] }
  0x59   : > { %5434 = vmatprep.mubr.msk.bf16.mxu0 %vm6356_vm0, %v6355_v0  ;;  %5470 = vmatprep.mubr.msk.bf16.mxu1 %vm6356_vm0, %v6355_v0  ;;  %v729_v51 = vsel %vm6653_vm3, %v724_v27, %v728_v28  ;;  %v798_v28 = vrot.slane %v796_v17, 5 }
  0x5a   : > { %5488 = vmatprep.subr.bf16.mxu0 %v6355_v0  ;;  %5523 = vmatpush3.bf16.msra.mxu1 %v6080_v38  ;;  %v764_v38 = vrot.slane %v762_v24, 5  ;;  %v756_v43 = vrot.slane %v754_v33, 5  ;;  %v751_v47 = vor.u32 %v750_v32, %v747_v31  ;;  %v4818_v59 = vcombine.low %v729_v51, %v743_v52  ;;  %v4874_v24 = vld [vmem:[%s6524_s23 + $0xa0] sm:$0xf]  ;;  %v6101_v31 = vld [vmem:[%s7560_s1 + $0x110] sm:$0xff]   ;;  %v6106_v51 = vld [vmem:[%s7560_s1 + $0x148] sm:$0xff]  }
  0x5b   : > { %5524 = vmatprep.subr.bf16.mxu1 %v6355_v0  ;;  %v1363_v34 = vshrl.u32 %v4874_v24, 16 }
  0x5c   : > { %5489 = vmatpush3.bf16.msra.mxu0 %v6079_v41  ;;  %v6093_v41 = vld [vmem:[%s7560_s1 + $0x178] sm:$0xff]   ;;  %v765_v48 = vor.u32 %v764_v38, %v761_v37  ;;  %v1377_v38 = vshrl.u32 %v4876_v30, 16 }
  0x5d   : > { %5490 = vmatprep.subr.bf16.mxu0 %v6355_v0 }
  0x5e   : > { %5525 = vmatpush3.bf16.msra.mxu1 %v6082_v42  ;;  %v681_v42 = vld [vmem:[%s6524_s23 + $0x38] sm:$0xf]  ;;  %v766_v61 = vrot.slane %v765_v48, 4  ;;  %v1379_v52 = vrot.slane %v1377_v38, 4 }
  0x5f   : > { %5435 = vmatmul.mubr.bf16.gmra.mxu0 %v6077_v45  ;;  %5526 = vmatprep.subr.bf16.mxu1 %v6355_v0  ;;  %v683_v45 = vld [vmem:[%s6524_s23 + $0x40] sm:$0xf]  ;;  %v787_v54 = vshrl.u32 %v681_v42, 16  ;;  %v790_v55 = vshll.u32 %v681_v42, 16  ;;  %v4877_v42 = vld [vmem:[%s6524_s23 + $0xac] sm:$0x1] }
  0x60   : > { %5471 = vmatmul.mubr.bf16.gmra.mxu1 %v6078_v50  ;;  %5438 = vmatprep.mubr.msk.bf16.mxu0 %vm6356_vm0, %v6355_v0  ;;  %v776_v50 = vshll.u32 %v679_v40, 16  ;;  %v801_v56 = vshrl.u32 %v683_v45, 16  ;;  %v771_v10 = vsel %vm6653_vm3, %v766_v61, %v770_v44  ;;  %v6104_v40 = vld [vmem:[%s7560_s1 + $0x150] sm:$0xff]   ;;  %v4880_v48 = vld [vmem:[%s6524_s23 + $0xb8] sm:$0xf] }
  0x61   : > { %5491 = vmatpush3.bf16.msra.mxu0 %v6081_v57  ;;  %5474 = vmatprep.mubr.msk.bf16.mxu1 %vm6356_vm0, %v6355_v0  ;;  %v804_v57 = vshll.u32 %v683_v45, 16  ;;  %v789_v2 = vrot.slane %v787_v54, 4  ;;  %v6100_v45 = vld [vmem:[%s6524_s23 + $0xd0] ss:$8 sps:$4 sm:$0xff]   ;;  %v4882_v61 = vld [vmem:[%s6524_s23 + $0xc0] sm:$0xf] }
  0x62   : > { %5492 = vmatprep.subr.bf16.mxu0 %v6355_v0  ;;  %5527 = vmatpush3.bf16.msra.mxu1 %v6085_v60  ;;  %v752_v60 = vrot.slane %v751_v47, 4  ;;  %v778_v1 = vrot.slane %v776_v50, 5  ;;  %v803_v7 = vrot.slane %v801_v56, 4  ;;  %v6110_v38 = vld [vmem:[%s7560_s1 + $0x1b8] sm:$0xff]  }
  0x63   : > { %5528 = vmatprep.subr.bf16.mxu1 %v6355_v0 }
  0x64   : > { %v757_v9 = vsel %vm6653_vm3, %v752_v60, %v756_v43  ;;  %v4878_v43 = vld [vmem:[%s6524_s23 + $0xb0] sm:$0xf]  ;;  %v1408_v60 = vshll.u32 %v4880_v48, 16 }
  0x65   : > { %5493 = vmatpush3.bf16.msra.mxu0 %v6086_v63  ;;  %v775_v63 = vrot.slane %v773_v49, 4  ;;  %v4819_v21 = vcombine.low %v757_v9, %v771_v10  ;;  %v6103_v49 = vld [vmem:[%s7560_s1 + $0x108] sm:$0xff]   ;;  %v1391_v56 = vshrl.u32 %v4878_v43, 16  ;;  %v6108_v9 = vld [vmem:[%s7560_s1 + $0x140] sm:$0xff]  }
  0x66   : > { %5529 = vmatpush3.bf16.msra.mxu1 %v6087_v3  ;;  %5550 = vmatprep.subr.bf16.mxu0 %v6355_v0  ;;  %v792_v3 = vrot.slane %v790_v55, 5  ;;  %v1386_v55 = vshll.u32 %v4877_v42, 16 }
  0x67   : > { %5439 = vmatmul.mubr.bf16.gmra.mxu0 %v6083_v8  ;;  %5586 = vmatprep.subr.bf16.mxu1 %v6355_v0  ;;  %v806_v8 = vrot.slane %v804_v57, 5  ;;  %v779_v13 = vor.u32 %v778_v1, %v775_v63  ;;  %v1394_v57 = vshll.u32 %v4878_v43, 16  ;;  %v4884_v1 = vld [vmem:[%s6524_s23 + $0xc8] sm:$0xf]  ;;  %v1393_v5 = vrot.slane %v1391_v56, 4 }
  0x68   : > { %5475 = vmatmul.mubr.bf16.gmra.mxu1 %v6084_v11  ;;  %5494 = vmatprep.mubr.msk.bf16.mxu0 %vm6356_vm0, %v6355_v0  ;;  %v684_v11 = vld [vmem:[%s6524_s23 + $0x44] sm:$0x1]  ;;  %v793_v16 = vor.u32 %v792_v3, %v789_v2 }
  0x69   : > { %5530 = vmatprep.mubr.msk.bf16.mxu1 %vm6356_vm0, %v6355_v0  ;;  %v807_v19 = vor.u32 %v806_v8, %v803_v7  ;;  %v810_v20 = vshll.u32 %v684_v11, 16  ;;  %v780_v25 = vrot.slane %v779_v13, 4  ;;  %v1419_v7 = vshrl.u32 %v4882_v61, 16 }
  0x6a   : > { %v794_v27 = vrot.slane %v793_v16, 4  ;;  %v1422_v8 = vshll.u32 %v4882_v61, 16  ;;  %v1410_v11 = vrot.slane %v1408_v60, 5  ;;  %v1436_v13 = vshll.u32 %v4884_v1, 16  ;;  %v4890_v61 = vld [vmem:[%s6524_s23 + $0xe0] sm:$0xf] }
  0x6b   : > { %v808_v32 = vrot.slane %v807_v19, 4  ;;  %v812_v33 = vrot.slane %v810_v20, 5 }
  0x6c   : > { %v799_v37 = vsel %vm6653_vm3, %v794_v27, %v798_v28 }
  0x6d   : > { %v813_v50 = vsel %vm6653_vm3, %v808_v32, %v812_v33 }
  0x6e   : > { %v4821_v2 = vcombine.low %v813_v50, %v813_v50  ;;  %v6111_v50 = vld [vmem:[%s7560_s1 + $0x1b0] sm:$0xff]  }
  0x6f   : > { %5495 = vmatmul.mubr.bf16.vlgmr.msra.gmra.mxu0 %v4817_v39  ;;  %v1380_v39 = vshll.u32 %v4876_v30, 16 }
  0x70   : > { %5551 = vmatpush3.bf16.msra.mxu0 %v6088_v35  ;;  %5531 = vmatmul.mubr.bf16.vlgmr.msra.gmra.mxu1 %v6089_v36  ;;  %v1366_v35 = vshll.u32 %v4874_v24, 16  ;;  %v785_v36 = vsel %vm6653_vm3, %v780_v25, %v784_v26  ;;  %v1421_v24 = vrot.slane %v1419_v7, 4  ;;  %v1424_v25 = vrot.slane %v1422_v8, 5  ;;  %v6117_v7 = vld [vmem:[%s7560_s1 + $0x1a0] sm:$0xff]   ;;  %v6118_v8 = vld [vmem:[%s7560_s1 + $0x1e8] sm:$0xff]  }
  0x71   : > { %5552 = vmatprep.subr.bf16.mxu0 %v6355_v0  ;;  %5498 = vmatprep.mubr.msk.bf16.mxu0 %vm6356_vm0, %v6355_v0  ;;  %v4820_v44 = vcombine.low %v785_v36, %v799_v37  ;;  %v4886_v37 = vld [vmem:[%s6524_s23 + $0xd0] sm:$0xf] }
  0x72   : > { %5534 = vmatprep.mubr.msk.bf16.mxu1 %vm6356_vm0, %v6355_v0  ;;  %5587 = vmatpush3.bf16.msra.mxu1 %v6093_v41  ;;  %v4875_v41 = vld [vmem:[%s6524_s23 + $0xa4] sm:$0x1]  ;;  %v1368_v47 = vrot.slane %v1366_v35, 5  ;;  %v1425_v43 = vor.u32 %v1424_v25, %v1421_v24 }
  0x73   : > { %5588 = vmatprep.subr.bf16.mxu1 %v6355_v0  ;;  %v1372_v54 = vshll.u32 %v4875_v41, 16  ;;  %v4888_v41 = vld [vmem:[%s6524_s23 + $0xd8] sm:$0xf] }
  0x74   : > { %5553 = vmatpush3.bf16.msra.mxu0 %v6090_v46  ;;  %v1365_v46 = vrot.slane %v1363_v34, 4  ;;  %v6109_v34 = vld [vmem:[%s6524_s23 + $0xf0] ss:$8 sps:$4 sm:$0xff]  }
  0x75   : > { %5554 = vmatprep.subr.bf16.mxu0 %v6355_v0  ;;  %v1374_v17 = vrot.slane %v1372_v54, 5 }
  0x76   : > { %5589 = vmatpush3.bf16.msra.mxu1 %v6094_v53  ;;  %v1382_v53 = vrot.slane %v1380_v39, 5  ;;  %v1369_v63 = vor.u32 %v1368_v47, %v1365_v46 }
  0x77   : > { %5499 = vmatmul.mubr.bf16.gmra.mxu0 %v4818_v59  ;;  %5590 = vmatprep.subr.bf16.mxu1 %v6355_v0  ;;  %v1405_v59 = vshrl.u32 %v4880_v48, 16  ;;  %v1447_v48 = vshrl.u32 %v4886_v37, 16 }
  0x78   : > { %5535 = vmatmul.mubr.bf16.gmra.mxu1 %v6091_v62  ;;  %5555 = vmatpush3.bf16.msra.mxu0 %v6092_v58  ;;  %v4879_v58 = vld [vmem:[%s6524_s23 + $0xb4] sm:$0x1]  ;;  %v6107_v62 = vld [vmem:[%s7560_s1 + $0x100] sm:$0xff]   ;;  %v1383_v3 = vor.u32 %v1382_v53, %v1379_v52  ;;  %v1370_v16 = vrot.slane %v1369_v63, 4  ;;  %v1464_v52 = vshll.u32 %v4888_v41, 16  ;;  %v1426_v53 = vrot.slane %v1425_v43, 4 }
  0x79   : > { %5502 = vmatprep.mubr.msk.bf16.mxu0 %vm6356_vm0, %v6355_v0  ;;  %5556 = vmatprep.subr.bf16.mxu0 %v6355_v0  ;;  %v1407_v10 = vrot.slane %v1405_v59, 4  ;;  %v1400_v19 = vshll.u32 %v4879_v58, 16  ;;  %v1449_v56 = vrot.slane %v1447_v48, 4  ;;  %v6112_v58 = vld [vmem:[%s6524_s23 + $0x100] ss:$8 sps:$4 sm:$0xff]  }
  0x7a   : > { %5538 = vmatprep.mubr.msk.bf16.mxu1 %vm6356_vm0, %v6355_v0  ;;  %5591 = vmatpush3.bf16.msra.mxu1 %v6097_v6  ;;  %v1396_v6 = vrot.slane %v1394_v57, 5  ;;  %v1384_v20 = vrot.slane %v1383_v3, 4  ;;  %v1375_v30 = vsel %vm6653_vm3, %v1370_v16, %v1374_v17  ;;  %v4887_v63 = vld [vmem:[%s6524_s23 + $0xd4] sm:$0x1]  ;;  %v1466_v3 = vrot.slane %v1464_v52, 5 }
  0x7b   : > { %5592 = vmatprep.subr.bf16.mxu1 %v6355_v0  ;;  %v1411_v27 = vor.u32 %v1410_v11, %v1407_v10  ;;  %v1402_v35 = vrot.slane %v1400_v19, 5  ;;  %v6120_v11 = vld [vmem:[%s7560_s1 + $0x1e0] sm:$0xff]   ;;  %v6119_v19 = vld [vmem:[%s7560_s1 + $0x198] sm:$0xff]   ;;  %v4952_v48 = vld [vmem:[%s6524_s23 + $0x14] sm:$0x1] }
  0x7c   : > { %5557 = vmatpush3.bf16.msra.mxu0 %v6095_v12  ;;  %v1433_v12 = vshrl.u32 %v4884_v1, 16  ;;  %v1397_v26 = vor.u32 %v1396_v6, %v1393_v5  ;;  %v4889_v1 = vld [vmem:[%s6524_s23 + $0xdc] sm:$0x1]  ;;  %v1475_v5 = vshrl.u32 %v4890_v61, 16  ;;  %v1478_v6 = vshll.u32 %v4890_v61, 16  ;;  %v6128_v61 = vld [vmem:[%s7560_s1 + $0x180] sm:$0xff]  }
  0x7d   : > { %5558 = vmatprep.subr.bf16.mxu0 %v6355_v0  ;;  %v1470_v10 = vshll.u32 %v4889_v1, 16 }
  0x7e   : > { %5593 = vmatpush3.bf16.msra.mxu1 %v6099_v18  ;;  %v1388_v18 = vrot.slane %v1386_v55, 5  ;;  %v1435_v28 = vrot.slane %v1433_v12, 4  ;;  %v1398_v39 = vrot.slane %v1397_v26, 4  ;;  %v6115_v55 = vld [vmem:[%s7560_s1 + $0x1f0] sm:$0xff]   ;;  %v1480_v16 = vrot.slane %v1478_v6, 5 }
  0x7f   : > { %5503 = vmatmul.mubr.bf16.gmra.mxu0 %v4819_v21  ;;  %5594 = vmatprep.subr.bf16.mxu1 %v6355_v0  ;;  %v1414_v21 = vshll.u32 %v4881_v4, 16 }
  0x80   : > { %5539 = vmatmul.mubr.bf16.gmra.mxu1 %v6096_v22  ;;  %5559 = vmatpush3.bf16.msra.mxu0 %v6098_v23  ;;  %v4883_v22 = vld [vmem:[%s6524_s23 + $0xc4] sm:$0x1]  ;;  %v4885_v23 = vld [vmem:[%s6524_s23 + $0xcc] sm:$0x1]  ;;  %v1403_v59 = vsel %vm6653_vm3, %v1398_v39, %v1402_v35  ;;  %v6121_v39 = vld [vmem:[%s6524_s23 + $0x120] ss:$8 sps:$4 sm:$0xff]  }
  0x81   : > { %5506 = vmatprep.mubr.msk.bf16.mxu0 %vm6356_vm0, %v6355_v0  ;;  %5542 = vmatprep.mubr.msk.bf16.mxu1 %vm6356_vm0, %v6355_v0  ;;  %v1428_v32 = vshll.u32 %v4883_v22, 16  ;;  %v1442_v33 = vshll.u32 %v4885_v23, 16  ;;  %v1416_v36 = vrot.slane %v1414_v21, 5  ;;  %v6116_v21 = vld [vmem:[%s6524_s23 + $0x110] ss:$8 sps:$4 sm:$0xff]   ;;  %v1472_v23 = vrot.slane %v1470_v10, 5 }
  0x82   : > { %5560 = vmatprep.subr.bf16.mxu0 %v6355_v0  ;;  %5595 = vmatpush3.bf16.msra.mxu1 %v6102_v29  ;;  %v1438_v29 = vrot.slane %v1436_v13, 5  ;;  %v4956_v10 = vld [vmem:[%s6524_s23 + $0x24] sm:$0x1] }
  0x83   : > { %5596 = vmatprep.subr.bf16.mxu1 %v6355_v0  ;;  %v1430_v46 = vrot.slane %v1428_v32, 5  ;;  %v1444_v47 = vrot.slane %v1442_v33, 5  ;;  %v6122_v33 = vld [vmem:[%s7560_s1 + $0x190] sm:$0xff]  }
  0x84   : > { %5561 = vmatpush3.bf16.msra.mxu0 %v6101_v31  ;;  %v1389_v31 = vsel %vm6653_vm3, %v1384_v20, %v1388_v18  ;;  %v4891_v20 = vld [vmem:[%s6524_s23 + $0xe4] sm:$0x1] }
  0x85   : > { %5562 = vmatprep.subr.bf16.mxu0 %v6355_v0  ;;  %v4892_v42 = vcombine.low %v1375_v30, %v1389_v31  ;;  %v1431_v17 = vsel %vm6653_vm3, %v1426_v53, %v1430_v46  ;;  %v4949_v30 = vld [vmem:[%s6524_s23 + $0x8] sm:$0xf] }
  0x86   : > { %5597 = vmatpush3.bf16.msra.mxu1 %v6104_v40  ;;  %v1412_v40 = vrot.slane %v1411_v27, 4  ;;  %v6124_v53 = vld [vmem:[%s7560_s1 + $0x188] sm:$0xff]  }
  0x87   : > { %5507 = vmatmul.mubr.bf16.gmra.mxu0 %v4820_v44  ;;  %5598 = vmatprep.subr.bf16.mxu1 %v6355_v0  ;;  %v1439_v44 = vor.u32 %v1438_v29, %v1435_v28  ;;  %v1484_v28 = vshll.u32 %v4891_v20, 16  ;;  %v6123_v29 = vld [vmem:[%s7560_s1 + $0x1d8] sm:$0xff]  }
  0x88   : > { %5543 = vmatmul.mubr.bf16.gmra.mxu1 %v6100_v45  ;;  %5510 = vmatprep.mubr.msk.bf16.mxu0 %vm6356_vm0, %v6355_v0  ;;  %v6114_v45 = vld [vmem:[%s7560_s1 + $0x1f8] sm:$0xff]   ;;  %v1417_v60 = vsel %vm6653_vm3, %v1412_v40, %v1416_v36  ;;  %v6125_v40 = vld [vmem:[%s7560_s1 + $0x1d0] sm:$0xff]  }
  0x89   : > { %5563 = vmatpush3.bf16.msra.mxu0 %v6103_v49  ;;  %5546 = vmatprep.mubr.msk.bf16.mxu1 %vm6356_vm0, %v6355_v0  ;;  %v1450_v49 = vshll.u32 %v4886_v37, 16  ;;  %v1440_v54 = vrot.slane %v1439_v44, 4  ;;  %v4893_v4 = vcombine.low %v1403_v59, %v1417_v60  ;;  %v1486_v36 = vrot.slane %v1484_v28, 5  ;;  %v4953_v37 = vld [vmem:[%s6524_s23 + $0x18] sm:$0xf] }
  0x8a   : > { %5564 = vmatprep.subr.bf16.mxu0 %v6355_v0  ;;  %5599 = vmatpush3.bf16.msra.mxu1 %v6106_v51  ;;  %v1461_v51 = vshrl.u32 %v4888_v41, 16  ;;  %v2037_v41 = vshrl.u32 %v4949_v30, 16  ;;  %v4950_v44 = vld [vmem:[%s6524_s23 + $0xc] sm:$0x1]  ;;  %v4963_v28 = vld [vmem:[%s6524_s23 + $0x40] sm:$0xf] }
  0x8b   : > { %5600 = vmatprep.subr.bf16.mxu1 %v6355_v0  ;;  %v1452_v57 = vrot.slane %v1450_v49, 5  ;;  %v1445_v18 = vsel %vm6653_vm3, %v1440_v54, %v1444_v47  ;;  %v4957_v47 = vld [vmem:[%s6524_s23 + $0x28] sm:$0xf]  ;;  %v2065_v49 = vshrl.u32 %v4953_v37, 16 }
  0x8c   : > { %v4894_v24 = vcombine.low %v1431_v17, %v1445_v18  ;;  %v2093_v59 = vshrl.u32 %v4957_v47, 16  ;;  %v2096_v60 = vshll.u32 %v4957_v47, 16  ;;  %v2138_v47 = vshll.u32 %v4963_v28, 16 }
  0x8d   : > { %5565 = vmatpush3.bf16.msra.mxu0 %v6107_v62  ;;  %v6113_v62 = vld [vmem:[%s7560_s1 + $0x1a8] sm:$0xff]   ;;  %v1453_v12 = vor.u32 %v1452_v57, %v1449_v56  ;;  %v2039_v56 = vrot.slane %v2037_v41, 4 }
  0x8e   : > { %5601 = vmatpush3.bf16.msra.mxu1 %v6108_v9  ;;  %5622 = vmatprep.subr.bf16.mxu0 %v6355_v0  ;;  %v1456_v9 = vshll.u32 %v4887_v63, 16  ;;  %v2095_v17 = vrot.slane %v2093_v59, 4  ;;  %v2098_v18 = vrot.slane %v2096_v60, 5  ;;  %v6136_v59 = vld [vmem:[%s7560_s1 + $0x228] sm:$0xff]   ;;  %v6138_v60 = vld [vmem:[%s7560_s1 + $0x220] sm:$0xff]  }
  0x8f   : > { %5511 = vmatmul.mubr.bf16.gmra.mxu0 %v4821_v2  ;;  %5658 = vmatprep.subr.bf16.mxu1 %v6355_v0  ;;  %v1463_v2 = vrot.slane %v1461_v51, 4  ;;  %v1454_v25 = vrot.slane %v1453_v12, 4 }
  0x90   : > { %5547 = vmatmul.mubr.bf16.gmra.mxu1 %v6105_v15  ;;  %5566 = vmatprep.mubr.msk.bf16.mxu0 %vm6356_vm0, %v6355_v0  ;;  %v1477_v15 = vrot.slane %v1475_v5, 4  ;;  %v1458_v22 = vrot.slane %v1456_v9, 5  ;;  %v2067_v5 = vrot.slane %v2065_v49, 4  ;;  %v6126_v9 = vld [vmem:[%s6524_s23 + $0x130] ss:$0 sps:$4 sm:$0xff]  }
  0x91   : > { %5602 = vmatprep.mubr.msk.bf16.mxu1 %vm6356_vm0, %v6355_v0  ;;  %v1467_v13 = vor.u32 %v1466_v3, %v1463_v2  ;;  %v2060_v2 = vshll.u32 %v4952_v48, 16  ;;  %v6129_v3 = vld [vmem:[%s7560_s1 + $0x1c0] sm:$0xff]   ;;  %v6131_v48 = vld [vmem:[%s7560_s1 + $0x238] sm:$0xff]  }
  0x92   : > { %v1481_v27 = vor.u32 %v1480_v16, %v1477_v15  ;;  %v1459_v31 = vsel %vm6653_vm3, %v1454_v25, %v1458_v22  ;;  %v4960_v16 = vld [vmem:[%s6524_s23 + $0x34] sm:$0x1]  ;;  %v6132_v49 = vld [vmem:[%s6524_s23 + $0x58] ss:$8 sps:$4 sm:$0xff]  }
  0x93   : > { %v1468_v26 = vrot.slane %v1467_v13, 4 }
  0x94   : > { %v1482_v35 = vrot.slane %v1481_v27, 4 }
  0x95   : > { %v1473_v32 = vsel %vm6653_vm3, %v1468_v26, %v1472_v23  ;;  %v4961_v23 = vld [vmem:[%s6524_s23 + $0x38] sm:$0xf]  ;;  %v2088_v26 = vshll.u32 %v4956_v10, 16 }
  0x96   : > { %v4895_v43 = vcombine.low %v1459_v31, %v1473_v32  ;;  %v1487_v54 = vsel %vm6653_vm3, %v1482_v35, %v1486_v36  ;;  %v2116_v32 = vshll.u32 %v4960_v16, 16  ;;  %v2121_v35 = vshrl.u32 %v4961_v23, 16 }
  0x97   : > { %5567 = vmatmul.mubr.bf16.vlgmr.msra.gmra.mxu0 %v6109_v34  ;;  %v4951_v34 = vld [vmem:[%s6524_s23 + $0x10] sm:$0xf] }
  0x98   : > { %5623 = vmatpush3.bf16.msra.mxu0 %v6110_v38  ;;  %5603 = vmatmul.mubr.bf16.vlgmr.msra.gmra.mxu1 %v4892_v42  ;;  %v4955_v38 = vld [vmem:[%s6524_s23 + $0x20] sm:$0xf]  ;;  %v2040_v42 = vshll.u32 %v4949_v30, 16  ;;  %v2054_v46 = vshll.u32 %v4951_v34, 16 }
  0x99   : > { %5624 = vmatprep.subr.bf16.mxu0 %v6355_v0  ;;  %5570 = vmatprep.mubr.msk.bf16.mxu0 %vm6356_vm0, %v6355_v0  ;;  %v2079_v51 = vshrl.u32 %v4955_v38, 16  ;;  %v2082_v52 = vshll.u32 %v4955_v38, 16  ;;  %v2124_v38 = vshll.u32 %v4961_v23, 16 }
  0x9a   : > { %5606 = vmatprep.mubr.msk.bf16.mxu1 %vm6356_vm0, %v6355_v0  ;;  %5659 = vmatpush3.bf16.msra.mxu1 %v6114_v45  ;;  %v2051_v45 = vshrl.u32 %v4951_v34, 16  ;;  %v2042_v57 = vrot.slane %v2040_v42, 5  ;;  %v2056_v1 = vrot.slane %v2054_v46, 5  ;;  %v2099_v34 = vor.u32 %v2098_v18, %v2095_v17  ;;  %v4965_v17 = vld [vmem:[%s6524_s23 + $0x48] sm:$0xf] }
  0x9b   : > { %5660 = vmatprep.subr.bf16.mxu1 %v6355_v0  ;;  %v6928_v42 = vrot.slane %v2088_v26, 5  ;;  %v6935_v46 = vrot.slane %v2116_v32, 5 }
  0x9c   : > { %5625 = vmatpush3.bf16.msra.mxu0 %v6111_v50  ;;  %v2068_v50 = vshll.u32 %v4953_v37, 16  ;;  %v2053_v63 = vrot.slane %v2051_v45, 4  ;;  %v2043_v15 = vor.u32 %v2042_v57, %v2039_v56  ;;  %v6133_v56 = vld [vmem:[%s7560_s1 + $0x230] sm:$0xff]   ;;  %v6134_v57 = vld [vmem:[%s6524_s23 + $0x18] ss:$8 sps:$4 sm:$0xff]  }
  0x9d   : > { %5626 = vmatprep.subr.bf16.mxu0 %v6355_v0 }
  0x9e   : > { %5661 = vmatpush3.bf16.msra.mxu1 %v6115_v55  ;;  %v6127_v55 = vld [vmem:[%s7560_s1 + $0x1c8] sm:$0xff]   ;;  %v2070_v6 = vrot.slane %v2068_v50, 5  ;;  %v6941_v50 = vrot.slane %v2099_v34, 4 }
  0x9f   : > { %5571 = vmatmul.mubr.bf16.gmra.mxu0 %v6112_v58  ;;  %5662 = vmatprep.subr.bf16.mxu1 %v6355_v0  ;;  %v4959_v58 = vld [vmem:[%s6524_s23 + $0x30] sm:$0xf] }
  0xa0   : > { %5607 = vmatmul.mubr.bf16.gmra.mxu1 %v4893_v4  ;;  %5627 = vmatpush3.bf16.msra.mxu0 %v6113_v62  ;;  %v2046_v62 = vshll.u32 %v4950_v44, 16  ;;  %v4954_v4 = vld [vmem:[%s6524_s23 + $0x1c] sm:$0x1]  ;;  %v2107_v12 = vshrl.u32 %v4959_v58, 16  ;;  %v2110_v13 = vshll.u32 %v4959_v58, 16 }
  0xa1   : > { %5574 = vmatprep.mubr.msk.bf16.mxu0 %vm6356_vm0, %v6355_v0  ;;  %5628 = vmatprep.subr.bf16.mxu0 %v6355_v0  ;;  %v2074_v22 = vshll.u32 %v4954_v4, 16  ;;  %v6130_v44 = vld [vmem:[%s6524_s23 + $0x8] ss:$8 sps:$4 sm:$0xff]  }
  0xa2   : > { %5610 = vmatprep.mubr.msk.bf16.mxu1 %vm6356_vm0, %v6355_v0  ;;  %5663 = vmatpush3.bf16.msra.mxu1 %v6118_v8  ;;  %v2084_v8 = vrot.slane %v2082_v52, 5  ;;  %v6909_v20 = vrot.slane %v2046_v62, 5  ;;  %v2109_v30 = vrot.slane %v2107_v12, 4  ;;  %v2112_v31 = vrot.slane %v2110_v13, 5  ;;  %v6135_v58 = vld [vmem:[%s6524_s23 + $0x68] ss:$8 sps:$4 sm:$0xff]  }
  0xa3   : > { %5664 = vmatprep.subr.bf16.mxu1 %v6355_v0  ;;  %v6920_v37 = vrot.slane %v2074_v22, 5  ;;  %v6945_v52 = vrot.slane %v2124_v38, 5  ;;  %v6139_v62 = vld [vmem:[%s6524_s23 + $0x78] ss:$8 sps:$4 sm:$0xff]   ;;  %v6144_v4 = vld [vmem:[%s7560_s1 + $0x208] sm:$0xff]  }
  0xa4   : > { %5629 = vmatpush3.bf16.msra.mxu0 %v6117_v7  ;;  %v2081_v7 = vrot.slane %v2079_v51, 4  ;;  %v2113_v45 = vor.u32 %v2112_v31, %v2109_v30  ;;  %v6943_v51 = vrot.slane %v2121_v35, 4  ;;  %v4962_v13 = vld [vmem:[%s6524_s23 + $0x3c] sm:$0x1] }
  0xa5   : > { %5630 = vmatprep.subr.bf16.mxu0 %v6355_v0 }
  0xa6   : > { %5665 = vmatpush3.bf16.msra.mxu1 %v6120_v11  ;;  %v4958_v11 = vld [vmem:[%s6524_s23 + $0x2c] sm:$0x1]  ;;  %v2085_v25 = vor.u32 %v2084_v8, %v2081_v7  ;;  %v6146_v7 = vld [vmem:[%s6524_s23 + $0x98] ss:$0 sps:$4 sm:$0xff]  }
  0xa7   : > { %5575 = vmatmul.mubr.bf16.gmra.mxu0 %v6116_v21  ;;  %5666 = vmatprep.subr.bf16.mxu1 %v6355_v0  ;;  %v2057_v21 = vor.u32 %v2056_v1, %v2053_v63  ;;  %v2102_v27 = vshll.u32 %v4958_v11, 16  ;;  %v6140_v63 = vld [vmem:[%s7560_s1 + $0x218] sm:$0xff]   ;;  %v6143_v1 = vld [vmem:[%s7560_s1 + $0x210] sm:$0xff]  }
  0xa8   : > { %5611 = vmatmul.mubr.bf16.gmra.mxu1 %v4894_v24  ;;  %5631 = vmatpush3.bf16.msra.mxu0 %v6119_v19  ;;  %v4896_v19 = vcombine.low %v1487_v54, %v1487_v54  ;;  %v2071_v24 = vor.u32 %v2070_v6, %v2067_v5  ;;  %v6926_v41 = vrot.slane %v2085_v25, 4  ;;  %v6949_v54 = vrot.slane %v2113_v45, 4  ;;  %v6147_v5 = vld [vmem:[%s7560_s1 + $0x200] sm:$0xff]   ;;  %v6145_v6 = vld [vmem:[%s6524_s23 + $0x48] ss:$0 sps:$4 sm:$0xff]  }
  0xa9   : > { %5578 = vmatprep.mubr.msk.bf16.mxu0 %vm6356_vm0, %v6355_v0  ;;  %5614 = vmatprep.mubr.msk.bf16.mxu1 %vm6356_vm0, %v6355_v0  ;;  %v6918_v36 = vrot.slane %v2057_v21, 4  ;;  %v2152_v25 = vshll.u32 %v4965_v17, 16 }
  0xaa   : > { %5632 = vmatprep.subr.bf16.mxu0 %v6355_v0  ;;  %5667 = vmatpush3.bf16.msra.mxu1 %v6123_v29  ;;  %v6913_v29 = vrot.slane %v2060_v2, 5  ;;  %v6141_v2 = vld [vmem:[%s6524_s23 + $0x38] ss:$8 sps:$4 sm:$0xff]   ;;  %v2091_v12 = vsel %vm6653_vm3, %v6926_v41, %v6928_v42  ;;  %v2119_v22 = vsel %vm6653_vm3, %v6949_v54, %v6935_v46 }
  0xab   : > { %5668 = vmatprep.subr.bf16.mxu1 %v6355_v0  ;;  %v2154_v32 = vrot.slane %v2152_v25, 5 }
  0xac   : > { %5633 = vmatpush3.bf16.msra.mxu0 %v6122_v33  ;;  %v6916_v33 = vrot.slane %v2043_v15, 4  ;;  %v4964_v15 = vld [vmem:[%s6524_s23 + $0x44] sm:$0x1] }
  0xad   : > { %5634 = vmatprep.subr.bf16.mxu0 %v6355_v0  ;;  %v2144_v21 = vshll.u32 %v4964_v15, 16 }
  0xae   : > { %5669 = vmatpush3.bf16.msra.mxu1 %v6125_v40  ;;  %v6924_v40 = vrot.slane %v2071_v24, 4  ;;  %v2049_v8 = vsel %vm6653_vm3, %v6916_v33, %v6909_v20  ;;  %v2130_v20 = vshll.u32 %v4962_v13, 16  ;;  %v2149_v24 = vshrl.u32 %v4965_v17, 16  ;;  %v4966_v33 = vld [vmem:[%s6524_s23 + $0x4c] sm:$0x1] }
  0xaf   : > { %5579 = vmatmul.mubr.bf16.gmra.mxu0 %v6121_v39  ;;  %5670 = vmatprep.subr.bf16.mxu1 %v6355_v0  ;;  %v2135_v39 = vshrl.u32 %v4963_v28, 16  ;;  %v2146_v28 = vrot.slane %v2144_v21, 5 }
  0xb0   : > { %5615 = vmatmul.mubr.bf16.gmra.mxu1 %v4895_v43  ;;  %5582 = vmatprep.mubr.msk.bf16.mxu0 %vm6356_vm0, %v6355_v0  ;;  %v6930_v43 = vrot.slane %v2102_v27, 5  ;;  %v2077_v11 = vsel %vm6653_vm3, %v6924_v40, %v6920_v37  ;;  %v2132_v27 = vrot.slane %v2130_v20, 5  ;;  %v2151_v31 = vrot.slane %v2149_v24, 4 }
  0xb1   : > { %5635 = vmatpush3.bf16.msra.mxu0 %v6124_v53  ;;  %5618 = vmatprep.mubr.msk.bf16.mxu1 %vm6356_vm0, %v6355_v0  ;;  %v6947_v53 = vrot.slane %v2135_v39, 4  ;;  %v4968_v16 = vcombine.low %v2077_v11, %v2091_v12  ;;  %v2158_v37 = vshll.u32 %v4966_v33, 16 }
  0xb2   : > { %5636 = vmatprep.subr.bf16.mxu0 %v6355_v0  ;;  %5671 = vmatpush3.bf16.msra.mxu1 %v6127_v55  ;;  %v6951_v55 = vrot.slane %v2138_v47, 5  ;;  %v2105_v18 = vsel %vm6653_vm3, %v6941_v50, %v6930_v43 }
  0xb3   : > { %5672 = vmatprep.subr.bf16.mxu1 %v6355_v0  ;;  %v4969_v26 = vcombine.low %v2105_v18, %v2119_v22  ;;  %v2160_v40 = vrot.slane %v2158_v37, 5 }
  0xb4   : > { %v2141_v23 = vor.u32 %v6951_v55, %v6947_v53 }
  0xb5   : > { %5637 = vmatpush3.bf16.msra.mxu0 %v6128_v61  ;;  %v6137_v61 = vld [vmem:[%s6524_s23 + $0x28] ss:$8 sps:$4 sm:$0xff]  }
  0xb6   : > { %5673 = vmatpush3.bf16.msra.mxu1 %v6129_v3  ;;  %5694 = vmatprep.subr.bf16.mxu0 %v6355_v0  ;;  %v6142_v3 = vld [vmem:[%s6524_s23 + $0x88] ss:$8 sps:$4 sm:$0xff]   ;;  %v2142_v30 = vrot.slane %v2141_v23, 4 }
  0xb7   : > { %5583 = vmatmul.mubr.bf16.gmra.mxu0 %v6126_v9  ;;  %v2063_v9 = vsel %vm6653_vm3, %v6918_v36, %v6913_v29  ;;  %v2155_v36 = vor.u32 %v2154_v32, %v2151_v31 }
  0xb8   : > { %5619 = vmatmul.mubr.bf16.gmra.mxu1 %v4896_v19  ;;  %5638 = vmatprep.mubr.msk.bf16.mxu0 %vm6356_vm0, %v6355_v0  ;;  %v4967_v10 = vcombine.low %v2049_v8, %v2063_v9  ;;  %v2127_v19 = vor.u32 %v6945_v52, %v6943_v51  ;;  %v2147_v35 = vsel %vm6653_vm3, %v2142_v30, %v2146_v28  ;;  %v6148_v28 = vld [vmem:[#allocation3 + $0x78] sm:$0xff]  }
  0xb9   : > { %5674 = vmatprep.mubr.msk.bf16.mxu1 %vm6356_vm0, %v6355_v0  ;;  %v2156_v39 = vrot.slane %v2155_v36, 4  ;;  %5730 = vmatprep.subr.bf16.mxu1 %v6148_v28 }
  0xba   : > { %v2128_v29 = vrot.slane %v2127_v19, 4 }
  0xbb   : > { %v2161_v41 = vsel %vm6653_vm3, %v2156_v39, %v2160_v40 }
  0xbc   : > { %v2133_v34 = vsel %vm6653_vm3, %v2128_v29, %v2132_v27  ;;  %v4971_v42 = vcombine.low %v2161_v41, %v2161_v41 }
  0xbd   : > { %v4970_v38 = vcombine.low %v2133_v34, %v2147_v35  ;;  %v6357_v34 = vmov 0   ;;  %v6149_v35 = vld [vmem:[#allocation3 + $0x70] sm:$0xff]  }
  0xbe   : > { %2397 = vst [vmem:[#allocation2] sm:$0xf] %v6357_v34  ;;  %2398 = vst [vmem:[#allocation2 + $0xc] sm:$0xf] %v6357_v34 }
  0xbf   : > { %5639 = vmatmul.mubr.bf16.vlgmr.msra.gmra.mxu0 %v6130_v44  ;;  %2399 = vst [vmem:[#allocation2 + $0x18] sm:$0xf] %v6357_v34  ;;  %2400 = vst [vmem:[#allocation2 + $0x24] sm:$0xf] %v6357_v34 }
  0xc0   : > { %5695 = vmatpush3.bf16.msra.mxu0 %v6131_v48  ;;  %5675 = vmatmul.mubr.bf16.vlgmr.msra.gmra.mxu1 %v6132_v49  ;;  %2401 = vst [vmem:[#allocation2 + $0x30] sm:$0xf] %v6357_v34  ;;  %2402 = vst [vmem:[#allocation2 + $0x3c] sm:$0xf] %v6357_v34 }
  0xc1   : > { %5696 = vmatprep.subr.bf16.mxu0 %v6355_v0  ;;  %5642 = vmatprep.mubr.msk.bf16.mxu0 %vm6356_vm0, %v6355_v0  ;;  %2403 = vst [vmem:[#allocation2 + $0x48] sm:$0xf] %v6357_v34  ;;  %2404 = vst [vmem:[#allocation2 + $0x54] sm:$0xf] %v6357_v34 }
  0xc2   : > { %5678 = vmatprep.mubr.msk.bf16.mxu1 %vm6356_vm0, %v6355_v0  ;;  %5731 = vmatpush3.bf16.msra.mxu1 %v6148_v28  ;;  %2405 = vst [vmem:[#allocation2 + $0x60] sm:$0xf] %v6357_v34  ;;  %2412 = vst [vmem:[#allocation2 + $0x8] sm:$0xf] %v6357_v34 }
  0xc3   : > { %2416 = vst [vmem:[#allocation2 + $0x14] sm:$0xf] %v6357_v34  ;;  %2420 = vst [vmem:[#allocation2 + $0x20] sm:$0xf] %v6357_v34  ;;  %5732 = vmatprep.subr.bf16.mxu1 %v6149_v35 }
  0xc4   : > { %5697 = vmatpush3.bf16.msra.mxu0 %v6133_v56  ;;  %2424 = vst [vmem:[#allocation2 + $0x2c] sm:$0xf] %v6357_v34  ;;  %2428 = vst [vmem:[#allocation2 + $0x38] sm:$0xf] %v6357_v34 }
  0xc5   : > { %5698 = vmatprep.subr.bf16.mxu0 %v6355_v0  ;;  %2432 = vst [vmem:[#allocation2 + $0x44] sm:$0xf] %v6357_v34  ;;  %2436 = vst [vmem:[#allocation2 + $0x50] sm:$0xf] %v6357_v34 }
  0xc6   : > { %2440 = vst [vmem:[#allocation2 + $0x5c] sm:$0xf] %v6357_v34  ;;  %2444 = vst [vmem:[#allocation2 + $0x68] sm:$0xf] %v6357_v34  ;;  %5733 = vmatpush3.bf16.msra.mxu1 %v6149_v35 }
  0xc7   : > { %5643 = vmatmul.mubr.bf16.gmra.mxu0 %v6134_v57 }
  0xc8   : > { %5679 = vmatmul.mubr.bf16.gmra.mxu1 %v6135_v58  ;;  %5699 = vmatpush3.bf16.msra.mxu0 %v6136_v59 }
  0xc9   : > { %5646 = vmatprep.mubr.msk.bf16.mxu0 %vm6356_vm0, %v6355_v0  ;;  %5700 = vmatprep.subr.bf16.mxu0 %v6355_v0 }
  0xca   : > { %5682 = vmatprep.mubr.msk.bf16.mxu1 %vm6356_vm0, %v6355_v0 }
  0xcc   : > { %5701 = vmatpush3.bf16.msra.mxu0 %v6138_v60 }
  0xcd   : > { %5702 = vmatprep.subr.bf16.mxu0 %v6355_v0 }
  0xcf   : > { %5647 = vmatmul.mubr.bf16.gmra.mxu0 %v6137_v61 }
  0xd0   : > { %5683 = vmatmul.mubr.bf16.gmra.mxu1 %v6139_v62  ;;  %5703 = vmatpush3.bf16.msra.mxu0 %v6140_v63 }
  0xd1   : > { %5650 = vmatprep.mubr.msk.bf16.mxu0 %vm6356_vm0, %v6355_v0  ;;  %5686 = vmatprep.mubr.msk.bf16.mxu1 %vm6356_vm0, %v6355_v0 }
  0xd2   : > { %5704 = vmatprep.subr.bf16.mxu0 %v6355_v0 }
  0xd4   : > { %5705 = vmatpush3.bf16.msra.mxu0 %v6143_v1 }
  0xd5   : > { %5706 = vmatprep.subr.bf16.mxu0 %v6355_v0 }
  0xd7   : > { %5651 = vmatmul.mubr.bf16.gmra.mxu0 %v6141_v2 }
  0xd8   : > { %5687 = vmatmul.mubr.bf16.gmra.mxu1 %v6142_v3  ;;  %5654 = vmatprep.mubr.msk.bf16.mxu0 %vm6356_vm0, %v6355_v0 }
  0xd9   : > { %5707 = vmatpush3.bf16.msra.mxu0 %v6144_v4  ;;  %5690 = vmatprep.mubr.msk.bf16.mxu1 %vm6356_vm0, %v6355_v0 }
  0xda   : > { %5708 = vmatprep.subr.bf16.mxu0 %v6355_v0 }
  0xdd   : > { %5709 = vmatpush3.bf16.msra.mxu0 %v6147_v5 }
  0xdf   : > { %5655 = vmatmul.mubr.bf16.gmra.mxu0 %v6145_v6 }
  0xe0   : > { %5691 = vmatmul.mubr.bf16.gmra.mxu1 %v6146_v7  ;;  %5710 = vmatprep.mubr.msk.bf16.mxu0 %vm6356_vm0, %v6355_v0 }
  0xe7   : > { %5711 = vmatmul.mubr.bf16.vlgmr.msra.gmra.mxu0 %v4967_v10 }
  0xe8   : > { %5714 = vmatprep.mubr.msk.bf16.mxu0 %vm6356_vm0, %v6355_v0 }
  0xef   : > { %5715 = vmatmul.mubr.bf16.gmra.mxu0 %v4968_v16 }
  0xf0   : > { %5718 = vmatprep.mubr.msk.bf16.mxu0 %vm6356_vm0, %v6355_v0 }
  0xf7   : > { %5719 = vmatmul.mubr.bf16.gmra.mxu0 %v4969_v26 }
  0xf8   : > { %5722 = vmatprep.mubr.msk.bf16.mxu0 %vm6356_vm0, %v6355_v0 }
  0xff   : > { %5723 = vmatmul.mubr.bf16.gmra.mxu0 %v4970_v38 }
 0x100   : > { %5726 = vmatprep.mubr.msk.bf16.mxu0 %vm6356_vm0, %v6355_v0 }
 0x107   : > { %v481_v43 = vpop.f32.mrf.mxu0  ;;  %5727 = vmatmul.mubr.bf16.gmra.mxu0 %v4971_v42  ;;  %v629_v44 = vpop.f32.mrf.mxu1  ;;  %v6150_v42 = vld [vmem:[#allocation3 + $0x68] sm:$0xff]  }
 0x108   : > { %v630_v45 = vadd.f32 %v629_v44, %v481_v43  ;;  %5734 = vmatprep.subr.bf16.mxu1 %v6150_v42 }
 0x109   : > { %v5424_v46 = vpop.f32.mrf.mxu0  ;;  %v5460_v47 = vpop.f32.mrf.mxu1  ;;  %5735 = vmatpush3.bf16.msra.mxu1 %v6150_v42 }
 0x10b   : > { %v484_v48 = vpop.f32.mrf.mxu0  ;;  %v632_v49 = vpop.f32.mrf.mxu1 }
 0x10c   : > { %v7053_v50 = vadd.f32 %v632_v49, %v484_v48 }
 0x10d   : > { %v5425_v51 = vpop.f32.mrf.mxu0  ;;  %v5461_v52 = vpop.f32.mrf.mxu1 }
 0x10e   : > { %v6151_v51 = vld [vmem:[#allocation3 + $0x60] sm:$0xff]  }
 0x10f   : > { %v489_v53 = vpop.f32.mrf.mxu0  ;;  %5736 = vmatprep.subr.bf16.mxu1 %v6151_v51 }
 0x110   : > { %v637_v54 = vpop.f32.mrf.mxu1  ;;  %5737 = vmatpush3.bf16.msra.mxu1 %v6151_v51 }
 0x111   : > { %v7055_v55 = vadd.f32 %v637_v54, %v489_v53  ;;  %v5428_v0 = vpop.f32.mrf.mxu0  ;;  %v6154_v53 = vld [vmem:[#allocation3 + $0xb0] sm:$0xff]  }
 0x112   : > { %v5464_v56 = vpop.f32.mrf.mxu1 }
 0x113   : > { %v492_v57 = vpop.f32.mrf.mxu0 }
 0x114   : > { %v640_v58 = vpop.f32.mrf.mxu1 }
 0x115   : > { %v7057_v59 = vadd.f32 %v640_v58, %v492_v57  ;;  %v5429_v60 = vpop.f32.mrf.mxu0  ;;  %v6153_v58 = vld [vmem:[#allocation3 + $0x58] sm:$0xff]  }
 0x116   : > { %v5465_v61 = vpop.f32.mrf.mxu1  ;;  %5738 = vmatprep.subr.bf16.mxu1 %v6153_v58 }
 0x117   : > { %v497_v62 = vpop.f32.mrf.mxu0  ;;  %v6155_v61 = vld [vmem:[#allocation3 + $0xa8] sm:$0xff]   ;;  %5739 = vmatpush3.bf16.msra.mxu1 %v6153_v58 }
 0x118   : > { %v645_v63 = vpop.f32.mrf.mxu1 }
 0x119   : > { %v7059_v1 = vadd.f32 %v645_v63, %v497_v62  ;;  %v5432_v2 = vpop.f32.mrf.mxu0 }
 0x11a   : > { %v5468_v3 = vpop.f32.mrf.mxu1 }
 0x11b   : > { %v500_v4 = vpop.f32.mrf.mxu0 }
 0x11c   : > { %v648_v5 = vpop.f32.mrf.mxu1 }
 0x11d   : > { %v7061_v6 = vadd.f32 %v648_v5, %v500_v4  ;;  %v5433_v7 = vpop.f32.mrf.mxu0  ;;  %v6156_v4 = vld [vmem:[#allocation3 + $0x50] sm:$0xff]  }
 0x11e   : > { %v5469_v8 = vpop.f32.mrf.mxu1  ;;  %v6157_v7 = vld [vmem:[#allocation3 + $0xa0] sm:$0xff]   ;;  %5740 = vmatprep.subr.bf16.mxu1 %v6156_v4 }
 0x11f   : > { %v505_v9 = vpop.f32.mrf.mxu0  ;;  %5741 = vmatpush3.bf16.msra.mxu1 %v6156_v4 }
 0x120   : > { %v653_v10 = vpop.f32.mrf.mxu1 }
 0x121   : > { %v7063_v11 = vadd.f32 %v653_v10, %v505_v9  ;;  %v5436_v12 = vpop.f32.mrf.mxu0 }
 0x122   : > { %v5472_v13 = vpop.f32.mrf.mxu1 }
 0x123   : > { %v508_v15 = vpop.f32.mrf.mxu0 }
 0x124   : > { %v656_v16 = vpop.f32.mrf.mxu1 }
 0x125   : > { %v7065_v17 = vadd.f32 %v656_v16, %v508_v15  ;;  %v5437_v18 = vpop.f32.mrf.mxu0  ;;  %v6160_v16 = vld [vmem:[#allocation3 + $0x98] sm:$0xff]  }
 0x126   : > { %v5473_v19 = vpop.f32.mrf.mxu1 }
 0x127   : > { %v513_v20 = vpop.f32.mrf.mxu0 }
 0x128   : > { %v661_v21 = vpop.f32.mrf.mxu1 }
 0x129   : > { %v7067_v22 = vadd.f32 %v661_v21, %v513_v20  ;;  %v5440_v23 = vpop.f32.mrf.mxu0 }
 0x12a   : > { %v5476_v24 = vpop.f32.mrf.mxu1 }
 0x12b   : > { %v516_v25 = vpop.f32.mrf.mxu0 }
 0x12c   : > { %v664_v26 = vpop.f32.mrf.mxu1  ;;  %v6162_v25 = vld [vmem:[#allocation3 + $0x90] sm:$0xff]  }
 0x12d   : > { %v5441_v27 = vpop.f32.mrf.mxu0 }
 0x12e   : > { %v5477_v29 = vpop.f32.mrf.mxu1 }
 0x12f   : > { %v931_v30 = vpop.f32.mrf.mxu0 }
 0x130   : > { %v969_v31 = vadd.f32 %v931_v30, %v630_v45  ;;  %v1114_v32 = vpop.f32.mrf.mxu1  ;;  %v6152_v45 = vld [vmem:[#allocation3 + $0xb8] sm:$0xff]  }
 0x131   : > { %v5496_v33 = vpop.f32.mrf.mxu0  ;;  %5778 = vmatprep.subr.bf16.mxu0 %v6152_v45 }
 0x132   : > { %v7087_v36 = vadd.f32 %v1114_v32, %v969_v31  ;;  %v5532_v37 = vpop.f32.mrf.mxu1  ;;  %5779 = vmatpush3.bf16.msra.mxu0 %v6152_v45  ;;  %v6165_v32 = vld [vmem:[#allocation3 + $0x88] sm:$0xff]  }
 0x133   : > { %v934_v38 = vpop.f32.mrf.mxu0  ;;  %5780 = vmatprep.subr.bf16.mxu0 %v6154_v53 }
 0x134   : > { %v970_v39 = vadd.f32 %v934_v38, %v7053_v50  ;;  %v1117_v40 = vpop.f32.mrf.mxu1 }
 0x135   : > { %v5497_v41 = vpop.f32.mrf.mxu0 }
 0x136   : > { %v7090_v43 = vadd.f32 %v1117_v40, %v970_v39  ;;  %v5533_v44 = vpop.f32.mrf.mxu1  ;;  %5781 = vmatpush3.bf16.msra.mxu0 %v6154_v53  ;;  %v6167_v41 = vld [vmem:[#allocation3 + $0x80] sm:$0xff]  }
 0x137   : > { %v939_v46 = vpop.f32.mrf.mxu0  ;;  %5782 = vmatprep.subr.bf16.mxu0 %v6155_v61 }
 0x138   : > { %v971_v47 = vadd.f32 %v939_v46, %v7055_v55  ;;  %v1122_v48 = vpop.f32.mrf.mxu1 }
 0x139   : > { %v5500_v49 = vpop.f32.mrf.mxu0 }
 0x13a   : > { %v7093_v52 = vadd.f32 %v1122_v48, %v971_v47  ;;  %v5536_v50 = vpop.f32.mrf.mxu1  ;;  %5783 = vmatpush3.bf16.msra.mxu0 %v6155_v61  ;;  %v7114_v47 = vld [vmem:[#allocation3 + $0x138] sm:$0xff]  }
 0x13b   : > { %v942_v54 = vpop.f32.mrf.mxu0  ;;  %5784 = vmatprep.subr.bf16.mxu0 %v6157_v7 }
 0x13c   : > { %v972_v0 = vadd.f32 %v942_v54, %v7057_v59  ;;  %v1125_v56 = vpop.f32.mrf.mxu1 }
 0x13d   : > { %v5501_v57 = vpop.f32.mrf.mxu0 }
 0x13e   : > { %v7096_v55 = vadd.f32 %v1125_v56, %v972_v0  ;;  %v5537_v60 = vpop.f32.mrf.mxu1  ;;  %5785 = vmatpush3.bf16.msra.mxu0 %v6157_v7 }
 0x13f   : > { %v947_v62 = vpop.f32.mrf.mxu0  ;;  %5786 = vmatprep.subr.bf16.mxu0 %v6160_v16 }
 0x140   : > { %v973_v63 = vadd.f32 %v947_v62, %v7059_v1  ;;  %v1130_v2 = vpop.f32.mrf.mxu1  ;;  %v6158_v1 = vld [vmem:[#allocation3 + $0x48] sm:$0xff]  }
 0x141   : > { %v5504_v3 = vpop.f32.mrf.mxu0  ;;  %5742 = vmatprep.subr.bf16.mxu1 %v6158_v1 }
 0x142   : > { %v7099_v59 = vadd.f32 %v1130_v2, %v973_v63  ;;  %v5540_v5 = vpop.f32.mrf.mxu1  ;;  %5743 = vmatpush3.bf16.msra.mxu1 %v6158_v1  ;;  %5787 = vmatpush3.bf16.msra.mxu0 %v6160_v16 }
 0x143   : > { %v950_v8 = vpop.f32.mrf.mxu0  ;;  %5788 = vmatprep.subr.bf16.mxu0 %v6162_v25 }
 0x144   : > { %v974_v9 = vadd.f32 %v950_v8, %v7061_v6  ;;  %v1133_v10 = vpop.f32.mrf.mxu1  ;;  %v6161_v6 = vld [vmem:[#allocation3 + $0x40] sm:$0xff]  }
 0x145   : > { %v5505_v12 = vpop.f32.mrf.mxu0  ;;  %5744 = vmatprep.subr.bf16.mxu1 %v6161_v6 }
 0x146   : > { %v7102_v13 = vadd.f32 %v1133_v10, %v974_v9  ;;  %v5541_v15 = vpop.f32.mrf.mxu1  ;;  %5745 = vmatpush3.bf16.msra.mxu1 %v6161_v6  ;;  %5789 = vmatpush3.bf16.msra.mxu0 %v6162_v25 }
 0x147   : > { %v955_v18 = vpop.f32.mrf.mxu0  ;;  %5790 = vmatprep.subr.bf16.mxu0 %v6165_v32 }
 0x148   : > { %v975_v19 = vadd.f32 %v955_v18, %v7063_v11  ;;  %v1138_v20 = vpop.f32.mrf.mxu1  ;;  %v7108_v11 = vld [vmem:[#allocation3 + $0x38] sm:$0xff]  }
 0x149   : > { %v5508_v21 = vpop.f32.mrf.mxu0  ;;  %5754 = vmatprep.subr.bf16.mxu1 %v7108_v11 }
 0x14a   : > { %v7105_v23 = vadd.f32 %v1138_v20, %v975_v19  ;;  %v5544_v24 = vpop.f32.mrf.mxu1  ;;  %5791 = vmatpush3.bf16.msra.mxu0 %v6165_v32 }
 0x14b   : > { %v958_v26 = vpop.f32.mrf.mxu0  ;;  %5792 = vmatprep.subr.bf16.mxu0 %v6167_v41 }
 0x14c   : > { %v976_v27 = vadd.f32 %v958_v26, %v7065_v17  ;;  %v1141_v28 = vpop.f32.mrf.mxu1 }
 0x14d   : > { %v5509_v29 = vpop.f32.mrf.mxu0 }
 0x14e   : > { %v7110_v30 = vadd.f32 %v1141_v28, %v976_v27  ;;  %v5545_v31 = vpop.f32.mrf.mxu1  ;;  %5793 = vmatpush3.bf16.msra.mxu0 %v6167_v41 }
 0x14f   : > { %v963_v33 = vpop.f32.mrf.mxu0  ;;  %5826 = vmatprep.subr.bf16.mxu0 %v7114_v47 }
 0x150   : > { %v977_v35 = vadd.f32 %v963_v33, %v7067_v22  ;;  %v1146_v37 = vpop.f32.mrf.mxu1 }
 0x151   : > { %v5512_v38 = vpop.f32.mrf.mxu0 }
 0x152   : > { %v1160_v17 = vadd.f32 %v1146_v37, %v977_v35  ;;  %v5548_v39 = vpop.f32.mrf.mxu1 }
 0x153   : > { %v966_v40 = vpop.f32.mrf.mxu0 }
 0x154   : > { %v1149_v42 = vpop.f32.mrf.mxu1 }
 0x155   : > { %v5513_v44 = vpop.f32.mrf.mxu0 }
 0x156   : > { %v5549_v45 = vpop.f32.mrf.mxu1 }
 0x157   : > { %v1297_v46 = vpop.f32.mrf.mxu0 }
 0x158   : > { %v1335_v48 = vadd.f32 %v1297_v46, %v7087_v36  ;;  %v1605_v49 = vpop.f32.mrf.mxu1 }
 0x159   : > { %v5568_v22 = vpop.f32.mrf.mxu0 }
 0x15a   : > { %v7118_v51 = vadd.f32 %v1605_v49, %v1335_v48  ;;  %v5604_v50 = vpop.f32.mrf.mxu1 }
 0x15b   : > { %v1300_v53 = vpop.f32.mrf.mxu0 }
 0x15c   : > { %v1336_v54 = vadd.f32 %v1300_v53, %v7090_v43  ;;  %v1608_v0 = vpop.f32.mrf.mxu1 }
 0x15d   : > { %v5569_v56 = vpop.f32.mrf.mxu0 }
 0x15e   : > { %v7121_v57 = vadd.f32 %v1608_v0, %v1336_v54  ;;  %v5605_v58 = vpop.f32.mrf.mxu1 }
 0x15f   : > { %v1305_v60 = vpop.f32.mrf.mxu0 }
 0x160   : > { %v1337_v61 = vadd.f32 %v1305_v60, %v7093_v52  ;;  %v1613_v62 = vpop.f32.mrf.mxu1 }
 0x161   : > { %v5572_v36 = vpop.f32.mrf.mxu0 }
 0x162   : > { %v7124_v63 = vadd.f32 %v1613_v62, %v1337_v61  ;;  %v5608_v2 = vpop.f32.mrf.mxu1 }
 0x163   : > { %v1308_v3 = vpop.f32.mrf.mxu0 }
 0x164   : > { %v1338_v4 = vadd.f32 %v1308_v3, %v7096_v55  ;;  %v1616_v5 = vpop.f32.mrf.mxu1 }
 0x165   : > { %v5573_v7 = vpop.f32.mrf.mxu0 }
 0x166   : > { %v7127_v8 = vadd.f32 %v1616_v5, %v1338_v4  ;;  %v5609_v43 = vpop.f32.mrf.mxu1 }
 0x167   : > { %v1313_v9 = vpop.f32.mrf.mxu0 }
 0x168   : > { %v1339_v10 = vadd.f32 %v1313_v9, %v7099_v59  ;;  %v1621_v12 = vpop.f32.mrf.mxu1 }
 0x169   : > { %v5576_v1 = vpop.f32.mrf.mxu0 }
 0x16a   : > { %v7130_v15 = vadd.f32 %v1621_v12, %v1339_v10  ;;  %v5612_v52 = vpop.f32.mrf.mxu1 }
 0x16b   : > { %v1316_v16 = vpop.f32.mrf.mxu0 }
 0x16c   : > { %v1340_v18 = vadd.f32 %v1316_v16, %v7102_v13  ;;  %v1624_v19 = vpop.f32.mrf.mxu1 }
 0x16d   : > { %v5577_v20 = vpop.f32.mrf.mxu0 }
 0x16e   : > { %v7133_v21 = vadd.f32 %v1624_v19, %v1340_v18  ;;  %v5613_v55 = vpop.f32.mrf.mxu1 }
 0x16f   : > { %v1321_v6 = vpop.f32.mrf.mxu0 }
 0x170   : > { %v1341_v24 = vadd.f32 %v1321_v6, %v7105_v23  ;;  %v1629_v25 = vpop.f32.mrf.mxu1 }
 0x171   : > { %v5580_v26 = vpop.f32.mrf.mxu0 }
 0x172   : > { %v7136_v27 = vadd.f32 %v1629_v25, %v1341_v24  ;;  %v5616_v59 = vpop.f32.mrf.mxu1 }
 0x173   : > { %v1324_v28 = vpop.f32.mrf.mxu0 }
 0x174   : > { %v1342_v29 = vadd.f32 %v1324_v28, %v7110_v30  ;;  %v1632_v31 = vpop.f32.mrf.mxu1 }
 0x175   : > { %v5581_v32 = vpop.f32.mrf.mxu0 }
 0x176   : > { %v7139_v33 = vadd.f32 %v1632_v31, %v1342_v29  ;;  %v5617_v13 = vpop.f32.mrf.mxu1 }
 0x177   : > { %v1329_v35 = vpop.f32.mrf.mxu0 }
 0x178   : > { %v1343_v37 = vadd.f32 %v1329_v35, %v1160_v17  ;;  %v1637_v38 = vpop.f32.mrf.mxu1 }
 0x179   : > { %v5584_v39 = vpop.f32.mrf.mxu0 }
 0x17a   : > { %v7141_v40 = vadd.f32 %v1637_v38, %v1343_v37  ;;  %v5620_v23 = vpop.f32.mrf.mxu1  ;;  %v7162_v38 = vld [vmem:[%s7562_s3] ss:$0 sm:$0xff] }
 0x17b   : > { %v1332_v41 = vpop.f32.mrf.mxu0 }
 0x17c   : > { %v1640_v42 = vpop.f32.mrf.mxu1 }
 0x17d   : > { %v5585_v44 = vpop.f32.mrf.mxu0 }
 0x17e   : > { %v5621_v45 = vpop.f32.mrf.mxu1 }
 0x17f   : > { %v1788_v46 = vpop.f32.mrf.mxu0 }
 0x180   : > { %v1971_v48 = vpop.f32.mrf.mxu1  ;;  %v1826_v26 = vadd.f32 %v1788_v46, %v7118_v51 }
 0x181   : > { %v5640_v49 = vpop.f32.mrf.mxu0 }
 0x182   : > { %v5676_v30 = vpop.f32.mrf.mxu1  ;;  %v2009_v32 = vadd.f32 %v1971_v48, %v1826_v26 }
 0x183   : > { %v1791_v22 = vpop.f32.mrf.mxu0 }
 0x184   : > { %v1974_v50 = vpop.f32.mrf.mxu1  ;;  %v1827_v13 = vadd.f32 %v1791_v22, %v7121_v57 }
 0x185   : > { %v5641_v53 = vpop.f32.mrf.mxu0 }
 0x186   : > { %v5677_v54 = vpop.f32.mrf.mxu1  ;;  %v2010_v41 = vadd.f32 %v1974_v50, %v1827_v13 }
 0x187   : > { %v1796_v0 = vpop.f32.mrf.mxu0 }
 0x188   : > { %v1979_v56 = vpop.f32.mrf.mxu1  ;;  %v1828_v42 = vadd.f32 %v1796_v0, %v7124_v63 }
 0x189   : > { %v5644_v17 = vpop.f32.mrf.mxu0 }
 0x18a   : > { %v5680_v58 = vpop.f32.mrf.mxu1  ;;  %v2011_v49 = vadd.f32 %v1979_v56, %v1828_v42  ;;  %v2452_v42 = vld [vmem:[#allocation2] sm:$0x8] }
 0x18b   : > { %v1799_v60 = vpop.f32.mrf.mxu0 }
 0x18c   : > { %v1982_v61 = vpop.f32.mrf.mxu1  ;;  %v1829_v57 = vadd.f32 %v1799_v60, %v7127_v8 }
 0x18d   : > { %v5645_v62 = vpop.f32.mrf.mxu0 }
 0x18e   : > { %v5681_v36 = vpop.f32.mrf.mxu1  ;;  %v2012_v63 = vadd.f32 %v1982_v61, %v1829_v57 }
 0x18f   : > { %v1804_v2 = vpop.f32.mrf.mxu0 }
 0x190   : > { %v1987_v3 = vpop.f32.mrf.mxu1  ;;  %v1830_v0 = vadd.f32 %v1804_v2, %v7130_v15 }
 0x191   : > { %v5648_v4 = vpop.f32.mrf.mxu0 }
 0x192   : > { %v5684_v5 = vpop.f32.mrf.mxu1 }
 0x193   : > { %v1807_v7 = vpop.f32.mrf.mxu0  ;;  %v2013_v5 = vadd.f32 %v1987_v3, %v1830_v0 }
 0x194   : > { %v7143_v43 = vpop.f32.mrf.mxu1 }
 0x195   : > { %v5649_v9 = vpop.f32.mrf.mxu0 }
 0x196   : > { %v5685_v10 = vpop.f32.mrf.mxu1  ;;  %v1831_v9 = vadd.f32 %v1807_v7, %v7133_v21 }
 0x197   : > { %v7145_v12 = vpop.f32.mrf.mxu0 }
 0x198   : > { %v7147_v1 = vpop.f32.mrf.mxu1  ;;  %v1832_v3 = vadd.f32 %v7145_v12, %v7136_v27 }
 0x199   : > { %v5652_v52 = vpop.f32.mrf.mxu0 }
 0x19a   : > { %v5688_v16 = vpop.f32.mrf.mxu1 }
 0x19b   : > { %v7149_v18 = vpop.f32.mrf.mxu0 }
 0x19c   : > { %v7151_v19 = vpop.f32.mrf.mxu1  ;;  %v1833_v27 = vadd.f32 %v7149_v18, %v7139_v33 }
 0x19d   : > { %v5653_v20 = vpop.f32.mrf.mxu0 }
 0x19e   : > { %v5689_v55 = vpop.f32.mrf.mxu1 }
 0x19f   : > { %v7153_v6 = vpop.f32.mrf.mxu0 }
 0x1a0   : > { %v7155_v24 = vpop.f32.mrf.mxu1 }
 0x1a1   : > { %v5656_v25 = vpop.f32.mrf.mxu0 }
 0x1a2   : > { %v5692_v59 = vpop.f32.mrf.mxu1  ;;  %v2014_v25 = vadd.f32 %v7143_v43, %v1831_v9  ;;  %v2015_v43 = vadd.f32 %v7147_v1, %v1832_v3  ;;  %v1834_v1 = vadd.f32 %v7153_v6, %v7141_v40 }
 0x1a3   : > { %v1823_v28 = vpop.f32.mrf.mxu0 }
 0x1a4   : > { %v2006_v29 = vpop.f32.mrf.mxu1 }
 0x1a5   : > { %v5657_v31 = vpop.f32.mrf.mxu0 }
 0x1a6   : > { %v5693_v35 = vpop.f32.mrf.mxu1 }
 0x1a7   : > { %v2279_v37 = vpop.f32.mrf.mxu0 }
 0x1a8   : > { %v2317_v39 = vadd.f32 %v2279_v37, %v2009_v32  ;;  %v2854_v32 = vld [vmem:[#allocation2 + $0x8] sm:$0x1]  ;;  %v2856_v37 = vld [vmem:[#allocation2 + $0x14] sm:$0x1] }
 0x1a9   : > { %v5712_v23 = vpop.f32.mrf.mxu0 }
 0x1aa   : > { %v2333_v51 = vadd.f32 %v7162_v38, %v2317_v39 }
 0x1ab   : > { %v2282_v44 = vpop.f32.mrf.mxu0 }
 0x1ac   : > { %v2342_v45 = vmax.f32 %v2333_v51, 0.0  ;;  %v2318_v46 = vadd.f32 %v2282_v44, %v2010_v41  ;;  %v2877_v41 = vshll.u32 %v2854_v32, 16 }
 0x1ad   : > { %v5713_v48 = vpop.f32.mrf.mxu0 }
 0x1ae   : > { %v5143_v30 = vpack.c.bf16 %v2342_v45, %v2342_v45  ;;  %v2334_v22 = vadd.f32 %v7162_v38, %v2318_v46  ;;  %v2454_v46 = vld [vmem:[#allocation2 + $0xc] sm:$0x8]  ;;  %v2891_v48 = vshll.u32 %v2856_v37, 16  ;;  %v7197_v0 = vrot.slane %v2877_v41, 5 }
 0x1af   : > { %v2287_v53 = vpop.f32.mrf.mxu0 }
 0x1b0   : > { %2388 = vst [vmem:[#allocation2 + $0x4] sm:$0xf] %v5143_v30  ;;  %v2343_v54 = vmax.f32 %v2334_v22, 0.0  ;;  %v2319_v17 = vadd.f32 %v2287_v53, %v2011_v49  ;;  %v2016_v49 = vadd.f32 %v7151_v19, %v1833_v27  ;;  %v2470_v53 = vshrl.u32 %v2452_v42, 16 }
 0x1b1   : > { %v5716_v50 = vpop.f32.mrf.mxu0 }
 0x1b2   : > { %v5144_v58 = vpack.c.bf16 %v2343_v54, %v2343_v54  ;;  %v2335_v62 = vadd.f32 %v7162_v38, %v2319_v17  ;;  %v7214_v3 = vrot.slane %v2470_v53, 11 }
 0x1b3   : > { %v2290_v36 = vpop.f32.mrf.mxu0 }
 0x1b4   : > { %2389 = vst [vmem:[#allocation2 + $0x10] sm:$0xf] %v5144_v58  ;;  %v2344_v56 = vmax.f32 %v2335_v62, 0.0  ;;  %v2320_v8 = vadd.f32 %v2290_v36, %v2012_v63  ;;  %v2483_v58 = vshrl.u32 %v2454_v46, 16  ;;  %v7203_v36 = vld [vmem:[#allocation2 + $0x20] sm:$0x1] }
 0x1b5   : > { %v5717_v4 = vpop.f32.mrf.mxu0 }
 0x1b6   : > { %v5145_v10 = vpack.c.bf16 %v2344_v56, %v2344_v56  ;;  %v2336_v61 = vadd.f32 %v7162_v38, %v2320_v8  ;;  %v2017_v56 = vadd.f32 %v7155_v24, %v1834_v1 }
 0x1b7   : > { %v2409_v52 = vld [vmem:[#allocation2 + $0x4] sm:$0x8]  ;;  %v2295_v15 = vpop.f32.mrf.mxu0 }
 0x1b8   : > { %v2410_v2 = vsel %vm7170_vm6, 0, %v2409_v52  ;;  %2390 = vst [vmem:[#allocation2 + $0x1c] sm:$0xf] %v5145_v10  ;;  %v2345_v16 = vmax.f32 %v2336_v61, 0.0  ;;  %v2321_v20 = vadd.f32 %v2295_v15, %v2013_v5  ;;  %v7208_v10 = vrot.slane %v2891_v48, 5 }
 0x1b9   : > { %2411 = vst [vmem:[#allocation2 + $0x4] sm:$0x8] %v2410_v2  ;;  %v5720_v55 = vpop.f32.mrf.mxu0 }
 0x1ba   : > { %2449 = vst [vmem:[#allocation2 + $0x4] sm:$0xf] %v6357_v34  ;;  %v5146_v21 = vpack.c.bf16 %v2345_v16, %v2345_v16  ;;  %v2337_v7 = vadd.f32 %v7162_v38, %v2321_v20  ;;  %v7211_v16 = vld [vmem:[#allocation2 + $0x2c] sm:$0x1] }
 0x1bb   : > { %v2413_v26 = vld [vmem:[#allocation2 + $0x10] sm:$0x8]  ;;  %v2298_v59 = vpop.f32.mrf.mxu0 }
 0x1bc   : > { %v2414_v28 = vsel %vm7170_vm6, 0, %v2413_v26  ;;  %2391 = vst [vmem:[#allocation2 + $0x28] sm:$0xf] %v5146_v21  ;;  %v2346_v29 = vmax.f32 %v2337_v7, 0.0  ;;  %v2322_v31 = vadd.f32 %v2298_v59, %v2014_v25  ;;  %v2905_v25 = vshll.u32 %v7203_v36, 16 }
 0x1bd   : > { %2415 = vst [vmem:[#allocation2 + $0x10] sm:$0x8] %v2414_v28  ;;  %v5721_v13 = vpop.f32.mrf.mxu0  ;;  %v7216_v21 = vrot.slane %v2483_v58, 11 }
 0x1be   : > { %v5147_v12 = vpack.c.bf16 %v2346_v29, %v2346_v29  ;;  %v2338_v35 = vadd.f32 %v7162_v38, %v2322_v31 }
 0x1bf   : > { %v2417_v39 = vld [vmem:[#allocation2 + $0x1c] sm:$0x8]  ;;  %v2303_v23 = vpop.f32.mrf.mxu0 }
 0x1c0   : > { %v2418_v51 = vsel %vm7170_vm6, 0, %v2417_v39  ;;  %2392 = vst [vmem:[#allocation2 + $0x34] sm:$0xf] %v5147_v12  ;;  %v2347_v44 = vmax.f32 %v2338_v35, 0.0  ;;  %v2323_v45 = vadd.f32 %v2303_v23, %v2015_v43  ;;  %v2919_v43 = vshll.u32 %v7211_v16, 16 }
 0x1c1   : > { %2419 = vst [vmem:[#allocation2 + $0x1c] sm:$0x8] %v2418_v51  ;;  %v5724_v33 = vpop.f32.mrf.mxu0  ;;  %v2853_v18 = vld [vmem:[#allocation2 + $0x4] sm:$0xf] }
 0x1c2   : > { %v5148_v57 = vpack.c.bf16 %v2347_v44, %v2347_v44  ;;  %v2339_v30 = vadd.f32 %v7162_v38, %v2323_v45  ;;  %v7195_v22 = vld [vmem:[#allocation2 + $0x4] sm:$0xf]  ;;  %v2868_v50 = vshrl.u32 %v2853_v18, 16  ;;  %v2871_v63 = vshll.u32 %v2853_v18, 16 }
 0x1c3   : > { %v2421_v54 = vld [vmem:[#allocation2 + $0x28] sm:$0x8]  ;;  %v2306_v17 = vpop.f32.mrf.mxu0  ;;  %v2475_v31 = vshrl.u32 %v7195_v22, 16 }
 0x1c4   : > { %v2422_v40 = vsel %vm7170_vm6, 0, %v2421_v54  ;;  %2393 = vst [vmem:[#allocation2 + $0x40] sm:$0xf] %v5148_v57  ;;  %v2348_v6 = vmax.f32 %v2339_v30, 0.0  ;;  %v2324_v62 = vadd.f32 %v2306_v17, %v2016_v49  ;;  %v7201_v19 = vld [vmem:[#allocation2 + $0x10] sm:$0xf] }
 0x1c5   : > { %2423 = vst [vmem:[#allocation2 + $0x28] sm:$0x8] %v2422_v40  ;;  %v5725_v8 = vpop.f32.mrf.mxu0  ;;  %v4997_v4 = vcombine.low %v7195_v22, %v7201_v19  ;;  %v2855_v5 = vld [vmem:[#allocation2 + $0x10] sm:$0xf]  ;;  %v2870_v9 = vrot.slane %v2868_v50, 4  ;;  %v2873_v15 = vrot.slane %v2871_v63, 5 }
 0x1c6   : > { %v5149_v61 = vpack.c.bf16 %v2348_v6, %v2348_v6  ;;  %v2340_v52 = vadd.f32 %v7162_v38, %v2324_v62  ;;  %v2882_v2 = vshrl.u32 %v2855_v5, 16  ;;  %v2885_v24 = vshll.u32 %v2855_v5, 16  ;;  %v6166_v30 = vld [vmem:[#allocation3 + $0x30] sm:$0xff]  }
 0x1c7   : > { %v2425_v20 = vld [vmem:[#allocation2 + $0x34] sm:$0x8]  ;;  %v2311_v55 = vpop.f32.mrf.mxu0  ;;  %5746 = vmatprep.mubr.bf16.mxu1 %v4997_v4  ;;  %v2874_v28 = vor.u32 %v2873_v15, %v2870_v9  ;;  %v2488_v41 = vshrl.u32 %v7201_v19, 16  ;;  %v2477_v40 = vrot.slane %v2475_v31, 7  ;;  %v2491_v5 = vshll.u32 %v7201_v19, 16 }
 0x1c8   : > { %v2426_v7 = vsel %vm7170_vm6, 0, %v2425_v20  ;;  %2394 = vst [vmem:[#allocation2 + $0x4c] sm:$0xf] %v5149_v61  ;;  %v2349_v26 = vmax.f32 %v2340_v52, 0.0  ;;  %v2325_v59 = vadd.f32 %v2311_v55, %v2017_v56  ;;  %v2857_v29 = vld [vmem:[#allocation2 + $0x1c] sm:$0xf] }
 0x1c9   : > { %2427 = vst [vmem:[#allocation2 + $0x34] sm:$0x8] %v2426_v7  ;;  %v2884_v32 = vrot.slane %v2882_v2, 4  ;;  %v2887_v13 = vrot.slane %v2885_v24, 5  ;;  %v5728_v27 = vpop.f32.mrf.mxu0  ;;  %v2875_v37 = vrot.slane %v2874_v28, 4  ;;  %v2896_v39 = vshrl.u32 %v2857_v29, 16 }
 0x1ca   : > { %v5150_v12 = vpack.c.bf16 %v2349_v26, %v2349_v26  ;;  %v2341_v35 = vadd.f32 %v7162_v38, %v2325_v59  ;;  %v7224_v42 = vld [vmem:[#allocation2 + $0x1c] sm:$0xf]  ;;  %v2899_v44 = vshll.u32 %v2857_v29, 16  ;;  %v2478_v38 = vshll.u32 %v7195_v22, 16  ;;  %v6168_v9 = vld [vmem:[#allocation3 + $0x28] sm:$0xff]  }
 0x1cb   : > { %v2429_v23 = vld [vmem:[#allocation2 + $0x40] sm:$0x8]  ;;  %v2888_v51 = vor.u32 %v2887_v13, %v2884_v32  ;;  %v2314_v45 = vpop.f32.mrf.mxu0  ;;  %v2880_v49 = vsel %vm6653_vm3, %v2875_v37, %v7197_v0  ;;  %v2898_v17 = vrot.slane %v2896_v39, 4  ;;  %v2490_v6 = vrot.slane %v2488_v41, 7  ;;  %v2864_v2 = vld [vmem:[#allocation2 + $0x44] sm:$0x1] }
 0x1cc   : > { %v2430_v46 = vsel %vm7170_vm6, 0, %v2429_v23  ;;  %2395 = vst [vmem:[#allocation2 + $0x58] sm:$0xf] %v5150_v12  ;;  %v2350_v1 = vmax.f32 %v2341_v35, 0.0  ;;  %v7228_v33 = vld [vmem:[#allocation2 + $0x28] sm:$0xf]  ;;  %v2480_v26 = vor.u32 %v2478_v38, %v2477_v40 }
 0x1cd   : > { %v2859_v18 = vld [vmem:[#allocation2 + $0x28] sm:$0xf]  ;;  %2431 = vst [vmem:[#allocation2 + $0x40] sm:$0x8] %v2430_v46  ;;  %v4998_v48 = vcombine.low %v7224_v42, %v7228_v33  ;;  %v2889_v57 = vrot.slane %v2888_v51, 4  ;;  %v5729_v53 = vpop.f32.mrf.mxu0  ;;  %v2901_v50 = vrot.slane %v2899_v44, 5  ;;  %v2493_v59 = vor.u32 %v2491_v5, %v2490_v6 }
 0x1ce   : > { %v5151_v54 = vpack.c.bf16 %v2350_v1, %v2350_v1  ;;  %v2910_v63 = vshrl.u32 %v2859_v18, 16  ;;  %v2913_v62 = vshll.u32 %v2859_v18, 16  ;;  %v2907_v61 = vrot.slane %v2905_v25, 5  ;;  %v6173_v44 = vld [vmem:[#allocation3 + $0x130] sm:$0xff]   ;;  %v2866_v1 = vld [vmem:[#allocation2 + $0x50] sm:$0x1] }
 0x1cf   : > { %v2433_v58 = vld [vmem:[#allocation2 + $0x4c] sm:$0x8]  ;;  %5747 = vmatmul.mubr.bf16.vlgmr.msra.gmra.mxu1 %v4998_v48  ;;  %v2894_v22 = vsel %vm6653_vm3, %v2889_v57, %v7208_v10  ;;  %v2902_v56 = vor.u32 %v2901_v50, %v2898_v17  ;;  %v2921_v15 = vrot.slane %v2919_v43, 5  ;;  %v2862_v10 = vld [vmem:[#allocation2 + $0x38] sm:$0x1]  ;;  %v2947_v39 = vshll.u32 %v2864_v2, 16 }
 0x1d0   : > { %v2434_v36 = vsel %vm7170_vm6, 0, %v2433_v58  ;;  %2396 = vst [vmem:[#allocation2 + $0x64] sm:$0xf] %v5151_v54  ;;  %5755 = vmatpush3.bf16.msra.mxu1 %v7108_v11  ;;  %v5021_v0 = vcombine.low %v2880_v49, %v2894_v22  ;;  %v2912_v8 = vrot.slane %v2910_v63, 4  ;;  %v2861_v4 = vld [vmem:[#allocation2 + $0x34] sm:$0xf]  ;;  %v2481_v45 = vsel %vm7251_vm9, %v7214_v3, %v2480_v26 }
 0x1d1   : > { %2435 = vst [vmem:[#allocation2 + $0x4c] sm:$0x8] %v2434_v36  ;;  %5756 = vmatprep.subr.bf16.mxu1 %v6166_v30  ;;  %v2915_v52 = vrot.slane %v2913_v62, 5  ;;  %v2924_v16 = vshrl.u32 %v2861_v4, 16  ;;  %v2927_v20 = vshll.u32 %v2861_v4, 16  ;;  %v2903_v11 = vrot.slane %v2902_v56, 4 }
 0x1d2   : > { %5794 = vmatprep.mubr.bf16.mxu0 %v5021_v0  ;;  %v7243_v24 = vld [vmem:[#allocation2 + $0x34] sm:$0xf]  ;;  %v6171_v43 = vld [vmem:[#allocation3 + $0x20] sm:$0xff]   ;;  %v2933_v27 = vshll.u32 %v2862_v10, 16  ;;  %v2494_v46 = vsel %vm7251_vm9, %v7216_v21, %v2493_v59  ;;  %v6174_v53 = vld [vmem:[#allocation3 + $0x18] sm:$0xff]   ;;  %v2961_v50 = vshll.u32 %v2866_v1, 16 }
 0x1d3   : > { %v2437_v55 = vld [vmem:[#allocation2 + $0x58] sm:$0x8]  ;;  %v2916_v7 = vor.u32 %v2915_v52, %v2912_v8  ;;  %v2926_v31 = vrot.slane %v2924_v16, 4  ;;  %v2929_v12 = vrot.slane %v2927_v20, 5  ;;  %v2908_v41 = vsel %vm6653_vm3, %v2903_v11, %v2907_v61  ;;  %v6176_v0 = vld [vmem:[#allocation3 + $0x10] sm:$0xff]   ;;  %v6177_v10 = vld [vmem:[#allocation3 + $0x120] sm:$0xff]  }
 0x1d4   : > { %v2438_v19 = vsel %vm7170_vm6, 0, %v2437_v55  ;;  %5757 = vmatpush3.bf16.msra.mxu1 %v6166_v30  ;;  %v7247_v28 = vld [vmem:[#allocation2 + $0x40] sm:$0xf]  ;;  %v2935_v21 = vrot.slane %v2933_v27, 5  ;;  %v5009_v63 = vcombine.low %v2481_v45, %v2494_v46  ;;  %v2949_v6 = vrot.slane %v2947_v39, 5  ;;  %v6175_v22 = vld [vmem:[#allocation3 + $0x128] sm:$0xff]  }
 0x1d5   : > { %v2863_v29 = vld [vmem:[#allocation2 + $0x40] sm:$0xf]  ;;  %2439 = vst [vmem:[#allocation2 + $0x58] sm:$0x8] %v2438_v19  ;;  %5758 = vmatprep.subr.bf16.mxu1 %v6168_v9  ;;  %v4999_v32 = vcombine.low %v7243_v24, %v7247_v28  ;;  %v2917_v13 = vrot.slane %v2916_v7, 4  ;;  %v2930_v49 = vor.u32 %v2929_v12, %v2926_v31  ;;  %v2514_v56 = vshrl.u32 %v7228_v33, 16 }
 0x1d6   : > { %v2938_v35 = vshrl.u32 %v2863_v29, 16  ;;  %v2941_v37 = vshll.u32 %v2863_v29, 16  ;;  %v2963_v4 = vrot.slane %v2961_v50, 5  ;;  %v2458_v61 = vld [vmem:[#allocation2 + $0x24] sm:$0x8]  ;;  %v2501_v52 = vshrl.u32 %v7224_v42, 16 }
 0x1d7   : > { %v2441_v23 = vld [vmem:[#allocation2 + $0x64] sm:$0x8]  ;;  %5750 = vmatprep.mubr.bf16.mxu1 %v4999_v32  ;;  %v2922_v51 = vsel %vm6653_vm3, %v2917_v13, %v2921_v15  ;;  %v2931_v58 = vrot.slane %v2930_v49, 4  ;;  %v2462_v16 = vld [vmem:[#allocation2 + $0x3c] sm:$0x8]  ;;  %v2527_v20 = vshrl.u32 %v7243_v24, 16 }
 0x1d8   : > { %v2442_v18 = vsel %vm7170_vm6, 0, %v2441_v23  ;;  %5759 = vmatpush3.bf16.msra.mxu1 %v6168_v9  ;;  %v5022_v38 = vcombine.low %v2908_v41, %v2922_v51  ;;  %v7269_v48 = vld [vmem:[#allocation2 + $0x4c] sm:$0xf]  ;;  %v2940_v57 = vrot.slane %v2938_v35, 4  ;;  %v2943_v54 = vrot.slane %v2941_v37, 5  ;;  %v6179_v11 = vld [vmem:[#allocation3 + $0x8] sm:$0xff]  }
 0x1d9   : > { %v2865_v30 = vld [vmem:[#allocation2 + $0x4c] sm:$0xf]  ;;  %2443 = vst [vmem:[#allocation2 + $0x64] sm:$0x8] %v2442_v18  ;;  %5760 = vmatprep.subr.bf16.mxu1 %v6171_v43  ;;  %v5000_v3 = vcombine.low %v7269_v48, %v7269_v48  ;;  %v2936_v5 = vsel %vm6653_vm3, %v2931_v58, %v2935_v21  ;;  %v7283_v55 = vld [vmem:[#allocation2 + $0x1c] sm:$0xf] }
 0x1da   : > { %2451 = vst [vmem:[#allocation2 + $0x64] sm:$0xf] %v6357_v34  ;;  %5795 = vmatmul.mubr.bf16.vlgmr.msra.gmra.mxu0 %v5022_v38  ;;  %v2952_v60 = vshrl.u32 %v2865_v30, 16  ;;  %v2955_v17 = vshll.u32 %v2865_v30, 16  ;;  %v2944_v40 = vor.u32 %v2943_v54, %v2940_v57  ;;  %v2456_v7 = vld [vmem:[#allocation2 + $0x18] sm:$0x8] }
 0x1db   : > { %5827 = vmatpush3.bf16.msra.mxu0 %v7114_v47  ;;  %5751 = vmatmul.mubr.bf16.gmra.mxu1 %v5000_v3  ;;  %v2540_v47 = vshrl.u32 %v7247_v28, 16  ;;  %v2516_v26 = vrot.slane %v2514_v56, 7  ;;  %v2509_v19 = vshrl.u32 %v2458_v61, 16  ;;  %v2460_v29 = vld [vmem:[#allocation2 + $0x30] sm:$0x8]  ;;  %v2503_v27 = vrot.slane %v2501_v52, 7 }
 0x1dc   : > { %5761 = vmatpush3.bf16.msra.mxu1 %v6171_v43  ;;  %5828 = vmatprep.subr.bf16.mxu0 %v6173_v44  ;;  %v2954_v62 = vrot.slane %v2952_v60, 4  ;;  %v2957_v36 = vrot.slane %v2955_v17, 5  ;;  %v2945_v34 = vrot.slane %v2944_v40, 4  ;;  %v7287_v13 = vld [vmem:[#allocation2 + $0x10] sm:$0xf]  ;;  %v2535_v43 = vshrl.u32 %v2462_v16, 16 }
 0x1dd   : > { %5770 = vmatprep.mubr.bf16.mxu1 %v5009_v63  ;;  %5762 = vmatprep.subr.bf16.mxu1 %v6174_v53  ;;  %v2542_v31 = vrot.slane %v2540_v47, 7  ;;  %v2517_v12 = vshll.u32 %v7228_v33, 16  ;;  %v5052_v35 = vcombine.low %v7287_v13, %v7283_v55  ;;  %v6180_v37 = vld [vmem:[#allocation3 + $0x118] sm:$0xff]   ;;  %v2496_v39 = vshrl.u32 %v2456_v7, 16  ;;  %v6181_v51 = vld [vmem:[#allocation3] sm:$0xff]   ;;  %v6184_v47 = vld [vmem:[#allocation3 + $0x108] sm:$0xff]  }
 0x1de   : > { %v2958_v8 = vor.u32 %v2957_v36, %v2954_v62  ;;  %v2950_v9 = vsel %vm6653_vm3, %v2945_v34, %v2949_v6  ;;  %v2529_v23 = vrot.slane %v2527_v20, 7  ;;  %v2543_v41 = vshll.u32 %v7247_v28, 16  ;;  %v2464_v30 = vld [vmem:[#allocation2 + $0x48] sm:$0x8]  ;;  %v6182_v28 = vld [vmem:[#allocation3 + $0x110] sm:$0xff]   ;;  %v6186_v16 = vld [vmem:[#allocation3 + $0x100] sm:$0xff]  }
 0x1df   : > { %5829 = vmatpush3.bf16.msra.mxu0 %v6173_v44  ;;  %v5023_v15 = vcombine.low %v2936_v5, %v2950_v9  ;;  %v2522_v44 = vshrl.u32 %v2460_v29, 16  ;;  %v2504_v45 = vshll.u32 %v7224_v42, 16  ;;  %v2553_v46 = vshrl.u32 %v7269_v48, 16  ;;  %v3118_v54 = vld [vmem:[#allocation2 + $0x18] sm:$0x8]  ;;  %v6183_v21 = vld [vmem:[#allocation3 + $0xf8] sm:$0xff]  }
 0x1e0   : > { %5763 = vmatpush3.bf16.msra.mxu1 %v6174_v53  ;;  %5830 = vmatprep.subr.bf16.mxu0 %v6175_v22  ;;  %v2959_v2 = vrot.slane %v2958_v8, 4  ;;  %v4993_v33 = vrot.slane %v2509_v19, 11  ;;  %v2519_v1 = vor.u32 %v2517_v12, %v2516_v26  ;;  %v2530_v18 = vshll.u32 %v7243_v24, 16  ;;  %v3116_v50 = vld [vmem:[#allocation2 + $0xc] sm:$0x8]  ;;  %v6185_v5 = vld [vmem:[#allocation3 + $0xf0] sm:$0xff]  }
 0x1e1   : > { %5764 = vmatprep.subr.bf16.mxu1 %v6176_v0  ;;  %5798 = vmatprep.mubr.bf16.mxu0 %v5023_v15  ;;  %v3149_v38 = vshrl.u32 %v7283_v55, 16  ;;  %v4995_v49 = vrot.slane %v2535_v43, 11  ;;  %v2545_v57 = vor.u32 %v2543_v41, %v2542_v31  ;;  %v4992_v3 = vrot.slane %v2496_v39, 11  ;;  %v6187_v20 = vld [vmem:[#allocation3 + $0xe8] sm:$0xff]   ;;  %v7311_v7 = vld [vmem:[#allocation2 + $0x1c] sm:$0xf] }
 0x1e2   : > { %v2964_v59 = vsel %vm6653_vm3, %v2959_v2, %v2963_v4  ;;  %v2506_v53 = vor.u32 %v2504_v45, %v2503_v27  ;;  %v3136_v42 = vshrl.u32 %v7287_v13, 16  ;;  %v4994_v60 = vrot.slane %v2522_v44, 11  ;;  %v7309_v2 = vld [vmem:[#allocation2 + $0x28] sm:$0xf]  ;;  %v3793_v29 = vld [vmem:[#allocation2 + $0x24] sm:$0x8] }
 0x1e3   : > { %5831 = vmatpush3.bf16.msra.mxu0 %v6175_v22  ;;  %v5024_v32 = vcombine.low %v2964_v59, %v2964_v59  ;;  %v2532_v17 = vor.u32 %v2530_v18, %v2529_v23  ;;  %v2555_v24 = vrot.slane %v2553_v46, 7  ;;  %v2520_v63 = vsel %vm7251_vm9, %v4993_v33, %v2519_v1  ;;  %v3791_v31 = vld [vmem:[#allocation2 + $0x18] sm:$0x8]  ;;  %v7321_v27 = vld [vmem:[#allocation2 + $0x34] sm:$0xf]  ;;  %v6189_v12 = vld [vmem:[#allocation3 + $0x1b8] sm:$0xff]  }
 0x1e4   : > { %5765 = vmatpush3.bf16.msra.mxu1 %v6176_v0  ;;  %5832 = vmatprep.subr.bf16.mxu0 %v6177_v10  ;;  %v2548_v58 = vshrl.u32 %v2464_v30, 16  ;;  %v3151_v40 = vrot.slane %v3149_v38, 7  ;;  %v2546_v6 = vsel %vm7251_vm9, %v4995_v49, %v2545_v57  ;;  %v3144_v22 = vshrl.u32 %v3118_v54, 16  ;;  %v7323_v39 = vld [vmem:[#allocation2 + $0x4c] sm:$0xf]  ;;  %v6192_v33 = vld [vmem:[#allocation3 + $0x1b0] sm:$0xff]  }
 0x1e5   : > { %5799 = vmatmul.mubr.bf16.gmra.mxu0 %v5024_v32  ;;  %5766 = vmatprep.subr.bf16.mxu1 %v6179_v11  ;;  %v2556_v62 = vshll.u32 %v7269_v48, 16  ;;  %v2507_v36 = vsel %vm7251_vm9, %v4992_v3, %v2506_v53  ;;  %v3131_v34 = vshrl.u32 %v3116_v50, 16  ;;  %v3138_v0 = vrot.slane %v3136_v42, 7  ;;  %v3120_v44 = vld [vmem:[#allocation2 + $0x24] sm:$0x8]  ;;  %v6195_v50 = vld [vmem:[#allocation3 + $0x1a8] sm:$0xff]  }
 0x1e6   : > { %5842 = vmatprep.mubr.bf16.mxu0 %v5052_v35  ;;  %v3152_v56 = vshll.u32 %v7283_v55, 16  ;;  %v5010_v8 = vcombine.low %v2507_v36, %v2520_v63  ;;  %v2533_v4 = vsel %vm7251_vm9, %v4994_v60, %v2532_v17  ;;  %v4996_v61 = vrot.slane %v2548_v58, 11  ;;  %v6191_v35 = vld [vmem:[#allocation3 + $0xe0] sm:$0xff]   ;;  %v7329_v46 = vld [vmem:[#allocation2 + $0x40] sm:$0xf]  ;;  %v6193_v57 = vld [vmem:[#allocation3 + $0xd8] sm:$0xff]  }
 0x1e7   : > { %5833 = vmatpush3.bf16.msra.mxu0 %v6177_v10  ;;  %v5011_v9 = vcombine.low %v2533_v4, %v2546_v6  ;;  %v2558_v52 = vor.u32 %v2556_v62, %v2555_v24  ;;  %v3139_v48 = vshll.u32 %v7287_v13, 16  ;;  %v5034_v15 = vrot.slane %v3144_v22, 11  ;;  %v3529_v30 = vld [vmem:[#allocation2 + $0x14] sm:$0x1]  ;;  %v3122_v54 = vld [vmem:[#allocation2 + $0x30] sm:$0x8] }
 0x1e8   : > { %5767 = vmatpush3.bf16.msra.mxu1 %v6179_v11  ;;  %5834 = vmatprep.subr.bf16.mxu0 %v6180_v37  ;;  %v3154_v10 = vor.u32 %v3152_v56, %v3151_v40  ;;  %v5033_v55 = vrot.slane %v3131_v34, 11  ;;  %v3824_v59 = vshrl.u32 %v7309_v2, 16  ;;  %v3811_v32 = vshrl.u32 %v7311_v7, 16  ;;  %v3124_v42 = vld [vmem:[#allocation2 + $0x3c] sm:$0x8] }
 0x1e9   : > { %5768 = vmatprep.subr.bf16.mxu1 %v6181_v51  ;;  %v3141_v11 = vor.u32 %v3139_v48, %v3138_v0  ;;  %v2559_v26 = vsel %vm7251_vm9, %v4996_v61, %v2558_v52  ;;  %v3819_v23 = vshrl.u32 %v3793_v29, 16  ;;  %v3806_v1 = vshrl.u32 %v3791_v31, 16  ;;  %v3126_v60 = vld [vmem:[#allocation2 + $0x48] sm:$0x8]  ;;  %v3531_v17 = vld [vmem:[#allocation2 + $0x20] sm:$0x1] }
 0x1ea   : > { %v3155_v19 = vsel %vm7251_vm9, %v5034_v15, %v3154_v10  ;;  %v5012_v13 = vcombine.low %v2559_v26, %v2559_v26  ;;  %v3826_v41 = vrot.slane %v3824_v59, 7  ;;  %v3813_v18 = vrot.slane %v3811_v32, 7  ;;  %v3795_v58 = vld [vmem:[#allocation2 + $0x30] sm:$0x8]  ;;  %v7335_v40 = vld [vmem:[#allocation2 + $0x58] sm:$0xf] }
 0x1eb   : > { %5835 = vmatpush3.bf16.msra.mxu0 %v6180_v37  ;;  %v3142_v43 = vsel %vm7251_vm9, %v5033_v55, %v3141_v11  ;;  %v3827_v38 = vshll.u32 %v7309_v2, 16  ;;  %v5054_v49 = vcombine.low %v7329_v46, %v7323_v39  ;;  %v5077_v3 = vrot.slane %v3819_v23, 11  ;;  %v6196_v6 = vld [vmem:[#allocation3 + $0xd0] sm:$0xff]   ;;  %v6197_v10 = vld [vmem:[#allocation3 + $0x1a0] sm:$0xff]   ;;  %v6198_v55 = vld [vmem:[#allocation3 + $0xc8] sm:$0xff]  }
 0x1ec   : > { %5769 = vmatpush3.bf16.msra.mxu1 %v6181_v51  ;;  %5836 = vmatprep.subr.bf16.mxu0 %v6182_v28  ;;  %v5040_v37 = vcombine.low %v3142_v43, %v3155_v19  ;;  %v7325_v51 = vld [vmem:[#allocation2 + $0x28] sm:$0xf]  ;;  %v5076_v24 = vrot.slane %v3806_v1, 11  ;;  %v3170_v22 = vshrl.u32 %v3122_v54, 16  ;;  %v3183_v62 = vshrl.u32 %v3124_v42, 16 }
 0x1ed   : > { %5802 = vmatprep.subr.bf16.mxu1 %v6183_v21  ;;  %v5053_v45 = vcombine.low %v7325_v51, %v7321_v27  ;;  %v3829_v53 = vor.u32 %v3827_v38, %v3826_v41  ;;  %v3552_v36 = vshll.u32 %v3529_v30, 16  ;;  %v3175_v34 = vshrl.u32 %v7321_v27, 16  ;;  %v3797_v19 = vld [vmem:[#allocation2 + $0x3c] sm:$0x8]  ;;  %v3801_v41 = vld [vmem:[#allocation2 + $0x54] sm:$0x8] }
 0x1ee   : > { %v3196_v56 = vshrl.u32 %v3126_v60, 16  ;;  %v3201_v4 = vshrl.u32 %v7323_v39, 16  ;;  %v3162_v61 = vshrl.u32 %v7325_v51, 16  ;;  %v3188_v52 = vshrl.u32 %v7329_v46, 16  ;;  %v6199_v1 = vld [vmem:[#allocation3 + $0x198] sm:$0xff]   ;;  %v6201_v60 = vld [vmem:[#allocation3 + $0x190] sm:$0xff]  }
 0x1ef   : > { %5837 = vmatpush3.bf16.msra.mxu0 %v6182_v28  ;;  %5771 = vmatmul.mubr.bf16.vlgmr.msra.gmra.mxu1 %v5010_v8  ;;  %v3814_v28 = vshll.u32 %v7311_v7, 16  ;;  %v3830_v0 = vsel %vm7251_vm9, %v5077_v3, %v3829_v53  ;;  %v3566_v8 = vshll.u32 %v3531_v17, 16  ;;  %v5055_v48 = vcombine.low %v7335_v40, %v7335_v40  ;;  %v7364_v3 = vld [vmem:[#allocation2 + $0x48] sm:$0x8]  ;;  %v7368_v42 = vld [vmem:[#allocation2 + $0x40] sm:$0xf] }
 0x1f0   : > { %5774 = vmatprep.mubr.bf16.mxu1 %v5011_v9  ;;  %5803 = vmatpush3.bf16.msra.mxu1 %v6183_v21  ;;  %v3157_v21 = vshrl.u32 %v3120_v44, 16  ;;  %v3832_v9 = vshrl.u32 %v3795_v58, 16  ;;  %v7349_v11 = vrot.slane %v3170_v22, 11  ;;  %v7351_v26 = vrot.slane %v3183_v62, 11  ;;  %v7374_v22 = vld [vmem:[#allocation2 + $0x34] sm:$0xf] }
 0x1f1   : > { %5838 = vmatprep.subr.bf16.mxu0 %v6184_v47  ;;  %5804 = vmatprep.subr.bf16.mxu1 %v6185_v5  ;;  %v3816_v63 = vor.u32 %v3814_v28, %v3813_v18  ;;  %v7353_v59 = vrot.slane %v3552_v36, 5  ;;  %v3177_v29 = vrot.slane %v3175_v34, 7  ;;  %v7355_v31 = vrot.slane %v3196_v56, 11  ;;  %v7378_v62 = vld [vmem:[#allocation2 + $0x60] sm:$0x8] }
 0x1f2   : > { %v7357_v43 = vrot.slane %v3566_v8, 5  ;;  %v7359_v23 = vrot.slane %v3832_v9, 11  ;;  %v3164_v44 = vrot.slane %v3162_v61, 7  ;;  %v3845_v18 = vshrl.u32 %v3797_v19, 16  ;;  %v7381_v8 = vld [vmem:[#allocation2 + $0x4c] sm:$0xf] }
 0x1f3   : > { %5839 = vmatpush3.bf16.msra.mxu0 %v6184_v47  ;;  %v7341_v47 = vrot.slane %v3157_v21, 11  ;;  %v3817_v15 = vsel %vm7251_vm9, %v5076_v24, %v3816_v63  ;;  %v3204_v38 = vshll.u32 %v7323_v39, 16  ;;  %v3165_v53 = vshll.u32 %v7325_v51, 16  ;;  %v7372_v63 = vld [vmem:[#allocation2 + $0x58] sm:$0xf] }
 0x1f4   : > { %5805 = vmatpush3.bf16.msra.mxu1 %v6185_v5  ;;  %5840 = vmatprep.subr.bf16.mxu0 %v6186_v16  ;;  %v3128_v5 = vld [vmem:[#allocation2 + $0x54] sm:$0x8]  ;;  %v3191_v54 = vshll.u32 %v7329_v46, 16  ;;  %v3871_v21 = vshrl.u32 %v3801_v41, 16  ;;  %v7376_v46 = vrot.slane %v3845_v18, 11  ;;  %v3850_v56 = vshrl.u32 %v7368_v42, 16 }
 0x1f5   : > { %5806 = vmatprep.subr.bf16.mxu1 %v6187_v20  ;;  %v3209_v32 = vshrl.u32 %v3128_v5, 16  ;;  %v3167_v58 = vor.u32 %v3165_v53, %v3164_v44  ;;  %v3858_v5 = vshrl.u32 %v7364_v3, 16  ;;  %v3876_v61 = vshrl.u32 %v7372_v63, 16  ;;  %v7402_v19 = vld [vmem:[#allocation2 + $0x64] sm:$0xf]  ;;  %v6206_v53 = vld [vmem:[#allocation3 + $0x168] sm:$0xff]  }
 0x1f6   : > { %v7387_v9 = vrot.slane %v3871_v21, 11  ;;  %v3889_v18 = vshrl.u32 %v7402_v19, 16  ;;  %v5096_v14 = vcombine.low %v7374_v22, %v7368_v42 }
 0x1f7   : > { %5841 = vmatpush3.bf16.msra.mxu0 %v6186_v16  ;;  %5775 = vmatmul.mubr.bf16.gmra.mxu1 %v5012_v13  ;;  %v3530_v16 = vld [vmem:[#allocation2 + $0x1c] sm:$0xf]  ;;  %v3528_v13 = vld [vmem:[#allocation2 + $0x10] sm:$0xf]  ;;  %v7370_v39 = vrot.slane %v3209_v32, 11 }
 0x1f8   : > { %5807 = vmatpush3.bf16.msra.mxu1 %v6187_v20  ;;  %5818 = vmatprep.mubr.bf16.mxu1 %v5040_v37  ;;  %v5083_v20 = vcombine.low %v3817_v15, %v3830_v0  ;;  %v3560_v37 = vshll.u32 %v3530_v16, 16  ;;  %v3543_v30 = vshrl.u32 %v3528_v13, 16  ;;  %v3546_v28 = vshll.u32 %v3528_v13, 16  ;;  %v6204_v32 = vld [vmem:[#allocation3 + $0x170] sm:$0xff]  }
 0x1f9   : > { %5874 = vmatprep.subr.bf16.mxu0 %v6189_v12  ;;  %5808 = vmatprep.subr.bf16.mxu1 %v6191_v35 }
 0x1fa   : > { %5843 = vmatmul.mubr.bf16.vlgmr.msra.gmra.mxu0 %v5053_v45  ;;  %v3178_v45 = vshll.u32 %v7321_v27, 16  ;;  %v3562_v24 = vrot.slane %v3560_v37, 5  ;;  %v3545_v34 = vrot.slane %v3543_v30, 4  ;;  %v3548_v0 = vrot.slane %v3546_v28, 5  ;;  %v4203_v37 = vld [vmem:[#allocation2 + $0x1c] sm:$0xf] }
 0x1fb   : > { %5846 = vmatprep.mubr.bf16.mxu0 %v5054_v49  ;;  %5875 = vmatpush3.bf16.msra.mxu0 %v6189_v12  ;;  %v3203_v12 = vrot.slane %v3201_v4, 7  ;;  %v6200_v49 = vld [vmem:[#allocation3 + $0xc0] sm:$0xff]   ;;  %v4218_v30 = vshrl.u32 %v4203_v37, 16  ;;  %v4221_v28 = vshll.u32 %v4203_v37, 16 }
 0x1fc   : > { %5809 = vmatpush3.bf16.msra.mxu1 %v6191_v35  ;;  %5876 = vmatprep.subr.bf16.mxu0 %v6192_v33  ;;  %v3557_v35 = vshrl.u32 %v3530_v16, 16  ;;  %v3180_v27 = vor.u32 %v3178_v45, %v3177_v29  ;;  %v4205_v16 = vld [vmem:[#allocation2 + $0x28] sm:$0xf]  ;;  %v3538_v37 = vld [vmem:[#allocation2 + $0x4c] sm:$0xf] }
 0x1fd   : > { %5810 = vmatprep.subr.bf16.mxu1 %v6193_v57  ;;  %v3206_v17 = vor.u32 %v3204_v38, %v3203_v12  ;;  %v3549_v12 = vor.u32 %v3548_v0, %v3545_v34  ;;  %v4232_v44 = vshrl.u32 %v4205_v16, 16  ;;  %v4235_v45 = vshll.u32 %v4205_v16, 16  ;;  %v6205_v38 = vld [vmem:[#allocation3 + $0x180] sm:$0xff]  }
 0x1fe   : > { %v3181_v4 = vsel %vm7251_vm9, %v7349_v11, %v3180_v27  ;;  %v3863_v11 = vshrl.u32 %v7381_v8, 16  ;;  %v3840_v27 = vshll.u32 %v7374_v22, 16  ;;  %v4206_v34 = vld [vmem:[#allocation2 + $0x2c] sm:$0x1]  ;;  %v5080_v0 = vrot.slane %v3858_v5, 11 }
 0x1ff   : > { %5877 = vmatpush3.bf16.msra.mxu0 %v6192_v33  ;;  %v3190_v33 = vrot.slane %v3188_v52, 7  ;;  %v3207_v52 = vsel %vm7251_vm9, %v7355_v31, %v3206_v17  ;;  %v6203_v31 = vld [vmem:[#allocation3 + $0x188] sm:$0xff]  }
 0x200   : > { %5811 = vmatpush3.bf16.msra.mxu1 %v6193_v57  ;;  %5878 = vmatprep.subr.bf16.mxu0 %v6195_v50  ;;  %v3214_v57 = vshrl.u32 %v7335_v40, 16 }
 0x201   : > { %5812 = vmatprep.subr.bf16.mxu1 %v6196_v6  ;;  %v3193_v51 = vor.u32 %v3191_v54, %v3190_v33  ;;  %v3550_v54 = vrot.slane %v3549_v12, 4 }
 0x202   : > { %5847 = vmatmul.mubr.bf16.gmra.mxu0 %v5055_v48  ;;  %v3216_v36 = vrot.slane %v3214_v57, 7  ;;  %v3217_v48 = vshll.u32 %v7335_v40, 16  ;;  %v3884_v40 = vshrl.u32 %v7378_v62, 16  ;;  %v3879_v57 = vshll.u32 %v7372_v63, 16  ;;  %v3536_v62 = vld [vmem:[#allocation2 + $0x40] sm:$0xf] }
 0x203   : > { %5879 = vmatpush3.bf16.msra.mxu0 %v6195_v50  ;;  %5890 = vmatprep.mubr.bf16.mxu0 %v5083_v20  ;;  %v3559_v50 = vrot.slane %v3557_v35, 4  ;;  %v3168_v20 = vsel %vm7251_vm9, %v7341_v47, %v3167_v58  ;;  %v3852_v35 = vrot.slane %v3850_v56, 7  ;;  %v3878_v47 = vrot.slane %v3876_v61, 7 }
 0x204   : > { %5813 = vmatpush3.bf16.msra.mxu1 %v6196_v6  ;;  %5880 = vmatprep.subr.bf16.mxu0 %v6197_v10  ;;  %v6202_v6 = vld [vmem:[#allocation3 + $0x178] sm:$0xff]   ;;  %v5041_v29 = vcombine.low %v3168_v20, %v3181_v4  ;;  %v3219_v13 = vor.u32 %v3217_v48, %v3216_v36  ;;  %v4237_v58 = vrot.slane %v4235_v45, 5  ;;  %v3891_v36 = vrot.slane %v3889_v18, 7 }
 0x205   : > { %5814 = vmatprep.subr.bf16.mxu1 %v6198_v55  ;;  %v3563_v15 = vor.u32 %v3562_v24, %v3559_v50  ;;  %v3881_v17 = vor.u32 %v3879_v57, %v3878_v47  ;;  %v4204_v50 = vld [vmem:[#allocation2 + $0x20] sm:$0x1]  ;;  %v4234_v24 = vrot.slane %v4232_v44, 4  ;;  %v4220_v4 = vrot.slane %v4218_v30, 4  ;;  %v6210_v47 = vld [vmem:[#allocation3 + $0x158] sm:$0xff]  }
 0x206   : > { %v3220_v3 = vsel %vm7251_vm9, %v7370_v39, %v3219_v13  ;;  %v3892_v39 = vshll.u32 %v7402_v19, 16  ;;  %v4223_v61 = vrot.slane %v4221_v28, 5  ;;  %v3555_v48 = vsel %vm6653_vm3, %v3550_v54, %v7353_v59  ;;  %v6211_v28 = vld [vmem:[#allocation3 + $0x228] sm:$0xff]  }
 0x207   : > { %5881 = vmatpush3.bf16.msra.mxu0 %v6197_v10  ;;  %v3837_v10 = vshrl.u32 %v7374_v22, 16  ;;  %v4227_v16 = vshll.u32 %v4204_v50, 16  ;;  %v3882_v5 = vsel %vm7251_vm9, %v7387_v9, %v3881_v17  ;;  %v6209_v9 = vld [vmem:[#allocation3 + $0x230] sm:$0xff]   ;;  %v3613_v57 = vshrl.u32 %v3538_v37, 16 }
 0x208   : > { %5815 = vmatpush3.bf16.msra.mxu1 %v6198_v55  ;;  %5882 = vmatprep.subr.bf16.mxu0 %v6199_v1  ;;  %v3194_v55 = vsel %vm7251_vm9, %v7351_v26, %v3193_v51  ;;  %v3564_v26 = vrot.slane %v3563_v15, 4  ;;  %v6207_v15 = vld [vmem:[#allocation3 + $0x238] sm:$0xff]   ;;  %v4224_v12 = vor.u32 %v4223_v61, %v4220_v4  ;;  %v3616_v30 = vshll.u32 %v3538_v37, 16  ;;  %v3539_v61 = vld [vmem:[#allocation2 + $0x50] sm:$0x1] }
 0x209   : > { %5816 = vmatprep.subr.bf16.mxu1 %v6200_v49  ;;  %v5042_v41 = vcombine.low %v3194_v55, %v3207_v52  ;;  %v3839_v33 = vrot.slane %v3837_v10, 7  ;;  %v5043_v52 = vcombine.low %v3220_v3, %v3220_v3  ;;  %v6208_v10 = vld [vmem:[#allocation3 + $0x160] sm:$0xff]   ;;  %v4238_v55 = vor.u32 %v4237_v58, %v4234_v24  ;;  %v3541_v37 = vld [vmem:[#allocation2 + $0x5c] sm:$0x1]  ;;  %v6235_v22 = vld [vmem:[%s7564_s5 + $0x20] sm:$0xff]  }
 0x20a   : > { %v4229_v44 = vrot.slane %v4227_v16, 5  ;;  %v4225_v3 = vrot.slane %v4224_v12, 4  ;;  %v3599_v54 = vshrl.u32 %v3536_v62, 16 }
 0x20b   : > { %5883 = vmatpush3.bf16.msra.mxu0 %v6199_v1  ;;  %v3853_v1 = vshll.u32 %v7368_v42, 16  ;;  %v3842_v51 = vor.u32 %v3840_v27, %v3839_v33  ;;  %v3533_v33 = vld [vmem:[#allocation2 + $0x2c] sm:$0x1]  ;;  %v3602_v27 = vshll.u32 %v3536_v62, 16  ;;  %v6240_v42 = vld [vmem:[%s6524_s23 + $0xf8] ss:$8 sps:$4 sm:$0xff]  }
 0x20c   : > { %5817 = vmatpush3.bf16.msra.mxu1 %v6200_v49  ;;  %5884 = vmatprep.subr.bf16.mxu0 %v6201_v60  ;;  %v3865_v49 = vrot.slane %v3863_v11, 7  ;;  %v4241_v11 = vshll.u32 %v4206_v34, 16  ;;  %v3580_v24 = vshll.u32 %v3533_v33, 16  ;;  %v3618_v34 = vrot.slane %v3616_v30, 5 }
 0x20d   : > { %5850 = vmatprep.subr.bf16.mxu1 %v6202_v6  ;;  %v3855_v21 = vor.u32 %v3853_v1, %v3852_v35  ;;  %v3843_v59 = vsel %vm7251_vm9, %v7359_v23, %v3842_v51  ;;  %v3532_v35 = vld [vmem:[#allocation2 + $0x28] sm:$0xf]  ;;  %v3535_v1 = vld [vmem:[#allocation2 + $0x38] sm:$0x1] }
 0x20e   : > { %v3594_v58 = vshll.u32 %v3535_v1, 16 }
 0x20f   : > { %5885 = vmatpush3.bf16.msra.mxu0 %v6201_v60  ;;  %5819 = vmatmul.mubr.bf16.vlgmr.msra.gmra.mxu1 %v5041_v29  ;;  %v3866_v60 = vshll.u32 %v7381_v8, 16  ;;  %v3534_v29 = vld [vmem:[#allocation2 + $0x34] sm:$0xf] }
 0x210   : > { %5822 = vmatprep.mubr.bf16.mxu1 %v5042_v41  ;;  %5851 = vmatpush3.bf16.msra.mxu1 %v6202_v6  ;;  %v3569_v6 = vsel %vm6653_vm3, %v3564_v26, %v7357_v43  ;;  %v3856_v43 = vsel %vm7251_vm9, %v7376_v46, %v3855_v21  ;;  %v5082_v46 = vrot.slane %v3884_v40, 11  ;;  %v3585_v23 = vshrl.u32 %v3534_v29, 16  ;;  %v6212_v21 = vld [vmem:[#allocation3 + $0x150] sm:$0xff]  }
 0x211   : > { %5886 = vmatprep.subr.bf16.mxu0 %v6203_v31  ;;  %5852 = vmatprep.subr.bf16.mxu1 %v6204_v32  ;;  %v3868_v56 = vor.u32 %v3866_v60, %v3865_v49  ;;  %v5064_v20 = vcombine.low %v3555_v48, %v3569_v6  ;;  %v3588_v45 = vshll.u32 %v3534_v29, 16  ;;  %v4239_v40 = vrot.slane %v4238_v55, 4  ;;  %v3537_v49 = vld [vmem:[#allocation2 + $0x44] sm:$0x1]  ;;  %v3540_v6 = vld [vmem:[#allocation2 + $0x58] sm:$0xf] }
 0x212   : > { %v4243_v26 = vrot.slane %v4241_v11, 5  ;;  %v3587_v60 = vrot.slane %v3585_v23, 4  ;;  %v3604_v48 = vrot.slane %v3602_v27, 5  ;;  %v3627_v16 = vshrl.u32 %v3540_v6, 16  ;;  %v6218_v27 = vld [vmem:[#allocation3 + $0x1f8] sm:$0xff]  }
 0x213   : > { %5887 = vmatpush3.bf16.msra.mxu0 %v6203_v31  ;;  %v3894_v31 = vor.u32 %v3892_v39, %v3891_v36  ;;  %v3869_v13 = vsel %vm7251_vm9, %v5080_v0, %v3868_v56  ;;  %v3590_v17 = vrot.slane %v3588_v45, 5  ;;  %v3608_v36 = vshll.u32 %v3537_v49, 16  ;;  %v6213_v56 = vld [vmem:[#allocation3 + $0x220] sm:$0xff]  }
 0x214   : > { %5853 = vmatpush3.bf16.msra.mxu1 %v6204_v32  ;;  %5888 = vmatprep.subr.bf16.mxu0 %v6205_v38  ;;  %v5084_v32 = vcombine.low %v3843_v59, %v3856_v43  ;;  %v5085_v41 = vcombine.low %v3869_v13, %v3882_v5  ;;  %v4244_v25 = vsel %vm6653_vm3, %v4239_v40, %v4243_v26  ;;  %v3615_v39 = vrot.slane %v3613_v57, 4  ;;  %v4209_v5 = vld [vmem:[#allocation2 + $0x40] sm:$0xf]  ;;  %v4207_v59 = vld [vmem:[#allocation2 + $0x34] sm:$0xf] }
 0x215   : > { %5854 = vmatprep.subr.bf16.mxu1 %v6206_v53  ;;  %v3895_v18 = vsel %vm7251_vm9, %v5082_v46, %v3894_v31  ;;  %v4230_v0 = vsel %vm6653_vm3, %v4225_v3, %v4229_v44  ;;  %v3582_v55 = vrot.slane %v3580_v24, 5  ;;  %v3622_v29 = vshll.u32 %v3539_v61, 16  ;;  %v4213_v46 = vld [vmem:[#allocation2 + $0x58] sm:$0xf]  ;;  %v6215_v31 = vld [vmem:[#allocation3 + $0x218] sm:$0xff]   ;;  %v6217_v57 = vld [vmem:[#allocation3 + $0x210] sm:$0xff]  }
 0x216   : > { %v5086_v50 = vcombine.low %v3895_v18, %v3895_v18  ;;  %v5107_v43 = vcombine.low %v4230_v0, %v4244_v25  ;;  %v3619_v11 = vor.u32 %v3618_v34, %v3615_v39  ;;  %v4260_v44 = vshrl.u32 %v4209_v5, 16  ;;  %v4211_v45 = vld [vmem:[#allocation2 + $0x4c] sm:$0xf]  ;;  %v4214_v39 = vld [vmem:[#allocation2 + $0x5c] sm:$0x1] }
 0x217   : > { %5889 = vmatpush3.bf16.msra.mxu0 %v6205_v38  ;;  %5823 = vmatmul.mubr.bf16.gmra.mxu1 %v5043_v52  ;;  %v3571_v38 = vshrl.u32 %v3532_v35, 16  ;;  %v3601_v52 = vrot.slane %v3599_v54, 4  ;;  %v4263_v23 = vshll.u32 %v4209_v5, 16  ;;  %v4246_v40 = vshrl.u32 %v4207_v59, 16 }
 0x218   : > { %5855 = vmatpush3.bf16.msra.mxu1 %v6206_v53  ;;  %5866 = vmatprep.mubr.bf16.mxu1 %v5064_v20  ;;  %v3574_v53 = vshll.u32 %v3532_v35, 16  ;;  %v3630_v20 = vshll.u32 %v3540_v6, 16  ;;  %v3610_v35 = vrot.slane %v3608_v36, 5  ;;  %v4288_v26 = vshrl.u32 %v4213_v46, 16 }
 0x219   : > { %5922 = vmatprep.subr.bf16.mxu0 %v6207_v15  ;;  %5856 = vmatprep.subr.bf16.mxu1 %v6208_v10  ;;  %v3573_v51 = vrot.slane %v3571_v38, 4  ;;  %v3605_v12 = vor.u32 %v3604_v48, %v3601_v52  ;;  %v4291_v33 = vshll.u32 %v4213_v46, 16  ;;  %v3620_v1 = vrot.slane %v3619_v11, 4  ;;  %v4212_v11 = vld [vmem:[#allocation2 + $0x50] sm:$0x1] }
 0x21a   : > { %5891 = vmatmul.mubr.bf16.vlgmr.msra.gmra.mxu0 %v5084_v32  ;;  %v3576_v4 = vrot.slane %v3574_v53, 5  ;;  %v6216_v32 = vld [vmem:[#allocation3 + $0x140] sm:$0xff]   ;;  %v3632_v62 = vrot.slane %v3630_v20, 5  ;;  %v3624_v18 = vrot.slane %v3622_v29, 5  ;;  %v3636_v38 = vshll.u32 %v3541_v37, 16 }
 0x21b   : > { %5894 = vmatprep.mubr.bf16.mxu0 %v5085_v41  ;;  %5923 = vmatpush3.bf16.msra.mxu0 %v6207_v15  ;;  %v6214_v15 = vld [vmem:[#allocation3 + $0x148] sm:$0xff]   ;;  %v4249_v49 = vshll.u32 %v4207_v59, 16  ;;  %v4277_v3 = vshll.u32 %v4211_v45, 16  ;;  %v4215_v53 = vld [vmem:[#allocation2 + $0x64] sm:$0xf]  ;;  %v4248_v24 = vrot.slane %v4246_v40, 4 }
 0x21c   : > { %5857 = vmatpush3.bf16.msra.mxu1 %v6208_v10  ;;  %5924 = vmatprep.subr.bf16.mxu0 %v6209_v9  ;;  %v3591_v10 = vor.u32 %v3590_v17, %v3587_v60  ;;  %v3577_v13 = vor.u32 %v3576_v4, %v3573_v51  ;;  %v4210_v60 = vld [vmem:[#allocation2 + $0x44] sm:$0x1]  ;;  %v4262_v17 = vrot.slane %v4260_v44, 4  ;;  %v4293_v6 = vrot.slane %v4291_v33, 5  ;;  %v4208_v4 = vld [vmem:[#allocation2 + $0x38] sm:$0x1] }
 0x21d   : > { %5858 = vmatprep.subr.bf16.mxu1 %v6210_v47  ;;  %v3625_v51 = vsel %vm6653_vm3, %v3620_v1, %v3624_v18  ;;  %v4251_v36 = vrot.slane %v4249_v49, 5  ;;  %v4302_v34 = vshrl.u32 %v4215_v53, 16  ;;  %v4305_v0 = vshll.u32 %v4215_v53, 16 }
 0x21e   : > { %v3592_v41 = vrot.slane %v3591_v10, 4  ;;  %v3578_v30 = vrot.slane %v3577_v13, 4  ;;  %v4269_v61 = vshll.u32 %v4210_v60, 16  ;;  %v4279_v48 = vrot.slane %v4277_v3, 5  ;;  %v6219_v10 = vld [vmem:[#allocation3 + $0x208] sm:$0xff]  }
 0x21f   : > { %5925 = vmatpush3.bf16.msra.mxu0 %v6209_v9  ;;  %v3596_v9 = vrot.slane %v3594_v58, 5  ;;  %v4290_v58 = vrot.slane %v4288_v26, 4  ;;  %v3638_v20 = vrot.slane %v3636_v38, 5  ;;  %v4304_v13 = vrot.slane %v4302_v34, 4  ;;  %v6234_v34 = vld [vmem:[%s7564_s5 + $0x28] sm:$0xff]  }
 0x220   : > { %5859 = vmatpush3.bf16.msra.mxu1 %v6210_v47  ;;  %5926 = vmatprep.subr.bf16.mxu0 %v6211_v28  ;;  %v3629_v47 = vrot.slane %v3627_v16, 4  ;;  %v6220_v16 = vld [vmem:[#allocation3 + $0x1f0] sm:$0xff]   ;;  %v5095_v3 = vcombine.low %v7311_v7, %v7309_v2 }
 0x221   : > { %5860 = vmatprep.subr.bf16.mxu1 %v6212_v21  ;;  %v3597_v54 = vsel %vm6653_vm3, %v3592_v41, %v3596_v9  ;;  %v4294_v46 = vor.u32 %v4293_v6, %v4290_v58  ;;  %v4307_v9 = vrot.slane %v4305_v0, 5  ;;  %v4216_v41 = vld [vmem:[#allocation2 + $0x68] sm:$0x1]  ;;  %v6226_v7 = vld [vmem:[#allocation3 + $0x1d0] sm:$0xff]   ;;  %v6227_v58 = vld [vmem:[#allocation3 + $0x1c8] sm:$0xff]   ;;  %v5098_v0 = vcombine.low %v7402_v19, %v7402_v19 }
 0x222   : > { %5895 = vmatmul.mubr.bf16.gmra.mxu0 %v5086_v50  ;;  %v4265_v50 = vrot.slane %v4263_v23, 5  ;;  %v3633_v25 = vor.u32 %v3632_v62, %v3629_v47  ;;  %v6222_v47 = vld [vmem:[#allocation3 + $0x1e8] sm:$0xff]   ;;  %v4271_v23 = vrot.slane %v4269_v61, 5  ;;  %v4311_v18 = vshll.u32 %v4216_v41, 16  ;;  %v6228_v6 = vld [vmem:[#allocation3 + $0x1c0] sm:$0xff]  }
 0x223   : > { %5927 = vmatpush3.bf16.msra.mxu0 %v6211_v28  ;;  %5938 = vmatprep.mubr.bf16.mxu0 %v5107_v43  ;;  %v4274_v28 = vshrl.u32 %v4211_v45, 16  ;;  %v4295_v62 = vrot.slane %v4294_v46, 4  ;;  %v4308_v1 = vor.u32 %v4307_v9, %v4304_v13  ;;  %v6238_v19 = vld [vmem:[%s7564_s5 + $0x8] sm:$0xff]   ;;  %v6242_v61 = vld [vmem:[%s6524_s23 + $0x118] ss:$8 sps:$4 sm:$0xff]  }
 0x224   : > { %5861 = vmatpush3.bf16.msra.mxu1 %v6212_v21  ;;  %5928 = vmatprep.subr.bf16.mxu0 %v6213_v56  ;;  %v3606_v21 = vrot.slane %v3605_v12, 4  ;;  %v4266_v5 = vor.u32 %v4265_v50, %v4262_v17  ;;  %v3634_v59 = vrot.slane %v3633_v25, 4  ;;  %v6221_v12 = vld [vmem:[#allocation3 + $0x200] sm:$0xff]   ;;  %v6225_v25 = vld [vmem:[#allocation3 + $0x1d8] sm:$0xff]  }
 0x225   : > { %5862 = vmatprep.subr.bf16.mxu1 %v6214_v15  ;;  %v4276_v52 = vrot.slane %v4274_v28, 4  ;;  %v6224_v28 = vld [vmem:[#allocation3 + $0x1e0] sm:$0xff]  }
 0x226   : > { %v4267_v44 = vrot.slane %v4266_v5, 4  ;;  %v3639_v45 = vsel %vm6653_vm3, %v3634_v59, %v3638_v20 }
 0x227   : > { %5929 = vmatpush3.bf16.msra.mxu0 %v6213_v56  ;;  %v3583_v56 = vsel %vm6653_vm3, %v3578_v30, %v3582_v55  ;;  %v4252_v55 = vor.u32 %v4251_v36, %v4248_v24  ;;  %v4280_v37 = vor.u32 %v4279_v48, %v4276_v52  ;;  %v6232_v36 = vld [vmem:[%s7564_s5 + $0x30] sm:$0xff]   ;;  %v6243_v52 = vld [vmem:[%s6524_s23 + $0x128] ss:$0 sps:$4 sm:$0xff]  }
 0x228   : > { %5863 = vmatpush3.bf16.msra.mxu1 %v6214_v15  ;;  %5930 = vmatprep.subr.bf16.mxu0 %v6215_v31  ;;  %v5065_v43 = vcombine.low %v3583_v56, %v3597_v54  ;;  %v3611_v15 = vsel %vm6653_vm3, %v3606_v21, %v3610_v35  ;;  %v4283_v35 = vshll.u32 %v4212_v11, 16  ;;  %v4272_v30 = vsel %vm6653_vm3, %v4267_v44, %v4271_v23  ;;  %v6239_v56 = vld [vmem:[%s7564_s5] sm:$0xff]  }
 0x229   : > { %5864 = vmatprep.subr.bf16.mxu1 %v6216_v32  ;;  %v5066_v29 = vcombine.low %v3611_v15, %v3625_v51  ;;  %v4253_v26 = vrot.slane %v4252_v55, 4  ;;  %v4281_v38 = vrot.slane %v4280_v37, 4  ;;  %v4313_v21 = vrot.slane %v4311_v18, 5  ;;  %v6230_v51 = vld [vmem:[%s7564_s5 + $0x38] sm:$0xff]  }
 0x22a   : > { %v4285_v49 = vrot.slane %v4283_v35, 5 }
 0x22b   : > { %5931 = vmatpush3.bf16.msra.mxu0 %v6215_v31  ;;  %v4297_v31 = vshll.u32 %v4214_v39, 16  ;;  %v5097_v39 = vcombine.low %v7381_v8, %v7372_v63  ;;  %v6236_v63 = vld [vmem:[%s7564_s5 + $0x18] sm:$0xff]   ;;  %v6237_v8 = vld [vmem:[%s7564_s5 + $0x10] sm:$0xff]  }
 0x22c   : > { %5865 = vmatpush3.bf16.msra.mxu1 %v6216_v32  ;;  %5932 = vmatprep.subr.bf16.mxu0 %v6217_v57  ;;  %v4255_v32 = vshll.u32 %v4208_v4, 16  ;;  %v4286_v17 = vsel %vm6653_vm3, %v4281_v38, %v4285_v49  ;;  %v6241_v4 = vld [vmem:[%s6524_s23 + $0x108] ss:$8 sps:$4 sm:$0xff]   ;;  %s6270_s23 = scalar_lea.vmem %s7505_s15, 448 }
 0x22d   : > { %5898 = vmatprep.subr.bf16.mxu1 %v6218_v27  ;;  %v4299_v40 = vrot.slane %v4297_v31, 5  ;;  %p6271_p11 = scmp.ne.s32.totalorder %s7505_s15, %s6270_s23  ;;  %p6278_p1 = scmp.lt.s32.totalorder %s6276_s22, %s6270_s23 }
 0x22e   : > { %v4257_v33 = vrot.slane %v4255_v32, 5 }
 0x22f   : > { %5933 = vmatpush3.bf16.msra.mxu0 %v6217_v57  ;;  %5867 = vmatmul.mubr.bf16.vlgmr.msra.gmra.mxu1 %v5065_v43  ;;  %v5067_v57 = vcombine.low %v3639_v45, %v3639_v45  ;;  %v4300_v53 = vsel %vm6653_vm3, %v4295_v62, %v4299_v40  ;;  %p6272_p12 = pnand %p6271_p11, %p6441_p4  ;;  %p6279_p2 = por %p6278_p1, %p6277_p0 }
 0x230   : > { %5870 = vmatprep.mubr.bf16.mxu1 %v5066_v29  ;;  %5899 = vmatpush3.bf16.msra.mxu1 %v6218_v27  ;;  %v4258_v54 = vsel %vm6653_vm3, %v4253_v26, %v4257_v33  ;;  %v4309_v27 = vrot.slane %v4308_v1, 4  ;;  %v5109_v50 = vcombine.low %v4286_v17, %v4300_v53 }
 0x231   : > { %5934 = vmatprep.subr.bf16.mxu0 %v6219_v10  ;;  %5900 = vmatprep.subr.bf16.mxu1 %v6220_v16  ;;  %v5108_v60 = vcombine.low %v4258_v54, %v4272_v30  ;;  %p6273_p13 = pneg %p6272_p12 }
 0x232   : > { %v4314_v2 = vsel %vm6653_vm3, %v4309_v27, %v4313_v21 }
 0x233   : > { %5935 = vmatpush3.bf16.msra.mxu0 %v6219_v10  ;;  %v5110_v24 = vcombine.low %v4314_v2, %v4314_v2  ;;  %p6280_p3 = pnand %p6279_p2, %p6273_p13 }
 0x234   : > { %5901 = vmatpush3.bf16.msra.mxu1 %v6220_v16  ;;  %5936 = vmatprep.subr.bf16.mxu0 %v6221_v12 }
 0x235   : > { %5902 = vmatprep.subr.bf16.mxu1 %v6222_v47 }
 0x237   : > { %5937 = vmatpush3.bf16.msra.mxu0 %v6221_v12  ;;  %5871 = vmatmul.mubr.bf16.gmra.mxu1 %v5067_v57 }
 0x238   : > { %5903 = vmatpush3.bf16.msra.mxu1 %v6222_v47  ;;  %5914 = vmatprep.mubr.bf16.mxu1 %v5095_v3 }
 0x239   : > { %5904 = vmatprep.subr.bf16.mxu1 %v6224_v28 }
 0x23a   : > { %5939 = vmatmul.mubr.bf16.vlgmr.msra.gmra.mxu0 %v5108_v60 }
 0x23b   : > { %5942 = vmatprep.mubr.bf16.mxu0 %v5109_v50 }
 0x23c   : > { %5905 = vmatpush3.bf16.msra.mxu1 %v6224_v28 }
 0x23d   : > { %5906 = vmatprep.subr.bf16.mxu1 %v6225_v25 }
 0x240   : > { %5907 = vmatpush3.bf16.msra.mxu1 %v6225_v25 }
 0x241   : > { %5908 = vmatprep.subr.bf16.mxu1 %v6226_v7 }
 0x242   : > { %5943 = vmatmul.mubr.bf16.gmra.mxu0 %v5110_v24 }
 0x244   : > { %5909 = vmatpush3.bf16.msra.mxu1 %v6226_v7 }
 0x245   : > { %5910 = vmatprep.subr.bf16.mxu1 %v6227_v58 }
 0x248   : > { %5911 = vmatpush3.bf16.msra.mxu1 %v6227_v58 }
 0x249   : > { %5912 = vmatprep.subr.bf16.mxu1 %v6228_v6 }
 0x24c   : > { %5913 = vmatpush3.bf16.msra.mxu1 %v6228_v6 }
 0x24d   : > { %5946 = vmatprep.subr.bf16.mxu1 %v6230_v51 }
 0x24f   : > { %5915 = vmatmul.mubr.bf16.vlgmr.msra.gmra.mxu1 %v5096_v14 }
 0x250   : > { %5918 = vmatprep.mubr.bf16.mxu1 %v5097_v39  ;;  %5947 = vmatpush3.bf16.msra.mxu1 %v6230_v51 }
 0x251   : > { %5948 = vmatprep.subr.bf16.mxu1 %v6232_v36 }
 0x254   : > { %5949 = vmatpush3.bf16.msra.mxu1 %v6232_v36 }
 0x255   : > { %5950 = vmatprep.subr.bf16.mxu1 %v6234_v34 }
 0x257   : > { %5919 = vmatmul.mubr.bf16.gmra.mxu1 %v5098_v0 }
 0x258   : > { %5951 = vmatpush3.bf16.msra.mxu1 %v6234_v34  ;;  %5962 = vmatprep.mubr.bf16.mxu1 %v6240_v42 }
 0x259   : > { %5952 = vmatprep.subr.bf16.mxu1 %v6235_v22 }
 0x25c   : > { %5953 = vmatpush3.bf16.msra.mxu1 %v6235_v22 }
 0x25d   : > { %5954 = vmatprep.subr.bf16.mxu1 %v6236_v63 }
 0x260   : > { %5955 = vmatpush3.bf16.msra.mxu1 %v6236_v63 }
 0x261   : > { %5956 = vmatprep.subr.bf16.mxu1 %v6237_v8 }
 0x264   : > { %5957 = vmatpush3.bf16.msra.mxu1 %v6237_v8 }
 0x265   : > { %5958 = vmatprep.subr.bf16.mxu1 %v6238_v19 }
 0x268   : > { %5959 = vmatpush3.bf16.msra.mxu1 %v6238_v19 }
 0x269   : > { %5960 = vmatprep.subr.bf16.mxu1 %v6239_v56 }
 0x26c   : > { %5961 = vmatpush3.bf16.msra.mxu1 %v6239_v56 }
 0x26f   : > { %5963 = vmatmul.mubr.bf16.vlgmr.msra.gmra.mxu1 %v6241_v4 }
 0x270   : > { %5966 = vmatprep.mubr.bf16.mxu1 %v6242_v61 }
 0x277   : > { %5967 = vmatmul.mubr.bf16.gmra.mxu1 %v6243_v52 }
 0x28f   : > { %v5748_v48 = vpop.f32.mrf.mxu1 }
 0x291   : > { %v2696_v43 = vpop.f32.mrf.mxu1 }
 0x293   : > { %v5749_v15 = vpop.f32.mrf.mxu1 }
 0x295   : > { %v2699_v10 = vpop.f32.mrf.mxu1 }
 0x29a   : > { %v5796_v16 = vpop.f32.mrf.mxu0 }
 0x29b   : > { %v5752_v20 = vpop.f32.mrf.mxu1 }
 0x29c   : > { %v3078_v5 = vpop.f32.mrf.mxu0 }
 0x29d   : > { %v2712_v11 = vpop.f32.mrf.mxu1 }
 0x29e   : > { %v5797_v29 = vpop.f32.mrf.mxu0 }
 0x29f   : > { %v5753_v59 = vpop.f32.mrf.mxu1 }
 0x2a0   : > { %v3081_v46 = vpop.f32.mrf.mxu0 }
 0x2a1   : > { %v2715_v13 = vpop.f32.mrf.mxu1 }
 0x2a5   : > { %v5800_v31 = vpop.f32.mrf.mxu0 }
 0x2a7   : > { %v3094_v55 = vpop.f32.mrf.mxu0 }
 0x2a9   : > { %v5801_v32 = vpop.f32.mrf.mxu0 }
 0x2ab   : > { %v3097_v33 = vpop.f32.mrf.mxu0 }
 0x2af   : > { %v5772_v9 = vpop.f32.mrf.mxu1 }
 0x2b0   : > { %v2832_v12 = vadd.f32 %v5772_v9, %v5748_v48 }
 0x2b1   : > { %v2823_v37 = vpop.f32.mrf.mxu1 }
 0x2b2   : > { %v2824_v35 = vadd.f32 %v2823_v37, %v2696_v43  ;;  %v3110_v41 = vadd.f32 %v5796_v16, %v2832_v12 }
 0x2b3   : > { %v5773_v47 = vpop.f32.mrf.mxu1 }
 0x2b4   : > { %v2835_v44 = vadd.f32 %v5773_v47, %v5749_v15  ;;  %v3108_v23 = vadd.f32 %v3078_v5, %v2824_v35 }
 0x2b5   : > { %v2826_v45 = vpop.f32.mrf.mxu1 }
 0x2b6   : > { %v2827_v62 = vadd.f32 %v2826_v45, %v2699_v10  ;;  %v3111_v40 = vadd.f32 %v5797_v29, %v2835_v44 }
 0x2b7   : > { %v5776_v26 = vpop.f32.mrf.mxu1 }
 0x2b8   : > { %v2848_v1 = vadd.f32 %v5776_v26, %v5752_v20  ;;  %v3109_v18 = vadd.f32 %v3081_v46, %v2827_v62 }
 0x2b9   : > { %v2839_v38 = vpop.f32.mrf.mxu1 }
 0x2ba   : > { %v5844_v49 = vpop.f32.mrf.mxu0  ;;  %v2840_v57 = vadd.f32 %v2839_v38, %v2712_v11  ;;  %v3114_v30 = vadd.f32 %v5800_v31, %v2848_v1 }
 0x2bb   : > { %v5777_v28 = vpop.f32.mrf.mxu1 }
 0x2bc   : > { %v3491_v3 = vpop.f32.mrf.mxu0  ;;  %v3112_v53 = vadd.f32 %v3094_v55, %v2840_v57 }
 0x2bd   : > { %v2842_v54 = vpop.f32.mrf.mxu1 }
 0x2be   : > { %v5845_v27 = vpop.f32.mrf.mxu0  ;;  %v2843_v21 = vadd.f32 %v2842_v54, %v2715_v13 }
 0x2c0   : > { %v3494_v60 = vpop.f32.mrf.mxu0  ;;  %v3113_v17 = vadd.f32 %v3097_v33, %v2843_v21 }
 0x2c2   : > { %v5848_v50 = vpop.f32.mrf.mxu0 }
 0x2c4   : > { %v3507_v25 = vpop.f32.mrf.mxu0 }
 0x2c6   : > { %v5849_v2 = vpop.f32.mrf.mxu0 }
 0x2c8   : > { %v3510_v63 = vpop.f32.mrf.mxu0 }
 0x2cf   : > { %v5820_v7 = vpop.f32.mrf.mxu1 }
 0x2d0   : > { %v3366_v24 = vadd.f32 %v5820_v7, %v3110_v41 }
 0x2d1   : > { %v3334_v58 = vpop.f32.mrf.mxu1 }
 0x2d2   : > { %v3364_v6 = vadd.f32 %v3334_v58, %v3108_v23  ;;  %v3523_v51 = vadd.f32 %v5844_v49, %v3366_v24 }
 0x2d3   : > { %v5821_v14 = vpop.f32.mrf.mxu1 }
 0x2d4   : > { %v3367_v36 = vadd.f32 %v5821_v14, %v3111_v40  ;;  %v3521_v39 = vadd.f32 %v3491_v3, %v3364_v6  ;;  %v5127_v14 = vld [vmem:[%s7565_s6] ss:$0 sm:$0xff] }
 0x2d5   : > { %v3337_v34 = vpop.f32.mrf.mxu1 }
 0x2d6   : > { %v3365_v0 = vadd.f32 %v3337_v34, %v3109_v18  ;;  %v3524_v42 = vadd.f32 %v5845_v27, %v3367_v36 }
 0x2d7   : > { %v5824_v22 = vpop.f32.mrf.mxu1 }
 0x2d8   : > { %v3370_v8 = vadd.f32 %v5824_v22, %v3114_v30  ;;  %v3522_v19 = vadd.f32 %v3494_v60, %v3365_v0  ;;  %v5119_v22 = vld [vmem:[%s7563_s4] ss:$0 sm:$0xff] }
 0x2d9   : > { %v3350_v56 = vpop.f32.mrf.mxu1 }
 0x2da   : > { %v5892_v4 = vpop.f32.mrf.mxu0  ;;  %v3368_v61 = vadd.f32 %v3350_v56, %v3112_v53  ;;  %v3527_v52 = vadd.f32 %v5848_v50, %v3370_v8 }
 0x2db   : > { %v5825_v48 = vpop.f32.mrf.mxu1 }
 0x2dc   : > { %v4009_v43 = vpop.f32.mrf.mxu0  ;;  %v3525_v15 = vadd.f32 %v3507_v25, %v3368_v61 }
 0x2dd   : > { %v3353_v10 = vpop.f32.mrf.mxu1 }
 0x2de   : > { %v5893_v16 = vpop.f32.mrf.mxu0  ;;  %v3369_v20 = vadd.f32 %v3353_v10, %v3113_v17 }
 0x2e0   : > { %v4012_v5 = vpop.f32.mrf.mxu0  ;;  %v3526_v11 = vadd.f32 %v3510_v63, %v3369_v20 }
 0x2e2   : > { %v5896_v29 = vpop.f32.mrf.mxu0 }
 0x2e4   : > { %v4025_v59 = vpop.f32.mrf.mxu0 }
 0x2e6   : > { %v5897_v46 = vpop.f32.mrf.mxu0 }
 0x2e8   : > { %v4028_v44 = vpop.f32.mrf.mxu0 }
 0x2ef   : > { %v5868_v31 = vpop.f32.mrf.mxu1 }
 0x2f0   : > { %v3785_v55 = vadd.f32 %v5868_v31, %v3523_v51 }
 0x2f1   : > { %v3753_v32 = vpop.f32.mrf.mxu1 }
 0x2f2   : > { %v3783_v13 = vadd.f32 %v3753_v32, %v3521_v39  ;;  %v4041_v9 = vadd.f32 %v5892_v4, %v3785_v55 }
 0x2f3   : > { %v5869_v12 = vpop.f32.mrf.mxu1 }
 0x2f4   : > { %v3786_v37 = vadd.f32 %v5869_v12, %v3524_v42  ;;  %v4039_v35 = vadd.f32 %v4009_v43, %v3783_v13 }
 0x2f5   : > { %v3756_v41 = vpop.f32.mrf.mxu1 }
 0x2f6   : > { %v3784_v47 = vadd.f32 %v3756_v41, %v3522_v19  ;;  %v4042_v23 = vadd.f32 %v5893_v16, %v3786_v37 }
 0x2f7   : > { %v5872_v45 = vpop.f32.mrf.mxu1 }
 0x2f8   : > { %v3789_v62 = vadd.f32 %v5872_v45, %v3527_v52  ;;  %v4040_v40 = vadd.f32 %v4012_v5, %v3784_v47 }
 0x2f9   : > { %v3769_v26 = vpop.f32.mrf.mxu1 }
 0x2fa   : > { %v5940_v33 = vpop.f32.mrf.mxu0  ;;  %v3787_v1 = vadd.f32 %v3769_v26, %v3525_v15  ;;  %v4045_v18 = vadd.f32 %v5896_v29, %v3789_v62 }
 0x2fb   : > { %v5873_v38 = vpop.f32.mrf.mxu1 }
 0x2fc   : > { %v4428_v49 = vpop.f32.mrf.mxu0  ;;  %v4043_v57 = vadd.f32 %v4025_v59, %v3787_v1 }
 0x2fd   : > { %v3772_v27 = vpop.f32.mrf.mxu1 }
 0x2fe   : > { %v5941_v30 = vpop.f32.mrf.mxu0  ;;  %v3788_v34 = vadd.f32 %v3772_v27, %v3526_v11 }
 0x300   : > { %v4431_v28 = vpop.f32.mrf.mxu0  ;;  %v4044_v15 = vadd.f32 %v4028_v44, %v3788_v34 }
 0x302   : > { %v5944_v3 = vpop.f32.mrf.mxu0 }
 0x304   : > { %v4444_v53 = vpop.f32.mrf.mxu0 }
 0x306   : > { %v5945_v54 = vpop.f32.mrf.mxu0 }
 0x308   : > { %v4447_v31 = vpop.f32.mrf.mxu0 }
 0x30f   : > { %v5916_v21 = vpop.f32.mrf.mxu1 }
 0x310   : > { %v4198_v24 = vadd.f32 %v5916_v21, %v4041_v9 }
 0x311   : > { %v4166_v60 = vpop.f32.mrf.mxu1 }
 0x312   : > { %v4196_v58 = vadd.f32 %v4166_v60, %v4039_v35  ;;  %v4460_v36 = vadd.f32 %v5940_v33, %v4198_v24 }
 0x313   : > { %v5917_v17 = vpop.f32.mrf.mxu1 }
 0x314   : > { %v4199_v6 = vadd.f32 %v5917_v17, %v4042_v23  ;;  %v4458_v0 = vadd.f32 %v4428_v49, %v4196_v58  ;;  %v4474_v61 = vadd.f32 %v5119_v22, %v4460_v36 }
 0x315   : > { %v4169_v50 = vpop.f32.mrf.mxu1 }
 0x316   : > { %v4197_v39 = vadd.f32 %v4169_v50, %v4040_v40  ;;  %v4461_v8 = vadd.f32 %v5941_v30, %v4199_v6  ;;  %v4472_v10 = vadd.f32 %v5119_v22, %v4458_v0 }
 0x317   : > { %v5920_v25 = vpop.f32.mrf.mxu1 }
 0x318   : > { %v4202_v42 = vadd.f32 %v5920_v25, %v4045_v18  ;;  %v4459_v4 = vadd.f32 %v4431_v28, %v4197_v39  ;;  %v4475_v5 = vadd.f32 %v5119_v22, %v4461_v8 }
 0x319   : > { %v4182_v2 = vpop.f32.mrf.mxu1 }
 0x31a   : > { %v4200_v48 = vadd.f32 %v4182_v2, %v4043_v57  ;;  %v4464_v43 = vadd.f32 %v5944_v3, %v4202_v42  ;;  %v4473_v32 = vadd.f32 %v5119_v22, %v4459_v4 }
 0x31b   : > { %v5921_v7 = vpop.f32.mrf.mxu1 }
 0x31c   : > { %v4478_v9 = vadd.f32 %v5119_v22, %v4464_v43  ;;  %v4462_v12 = vadd.f32 %v4444_v53, %v4200_v48 }
 0x31d   : > { %v4185_v51 = vpop.f32.mrf.mxu1 }
 0x31e   : > { %v4201_v29 = vadd.f32 %v4185_v51, %v4044_v15  ;;  %v4476_v38 = vadd.f32 %v5119_v22, %v4462_v12 }
 0x320   : > { %v4463_v23 = vadd.f32 %v4447_v31, %v4201_v29 }
 0x322   : > { %v4477_v28 = vadd.f32 %v5119_v22, %v4463_v23 }
 0x32f   : > { %v5964_v63 = vpop.f32.mrf.mxu1 }
 0x330   : > { %v4623_v19 = vadd.f32 %v5964_v63, %v5127_v14 }
 0x331   : > { %v4614_v56 = vpop.f32.mrf.mxu1 }
 0x332   : > { %v4615_v52 = vadd.f32 %v5127_v14, %v4614_v56  ;;  %v4646_v20 = vadd.f32 %v4623_v19, %v4474_v61 }
 0x333   : > { %v5965_v16 = vpop.f32.mrf.mxu1 }
 0x334   : > { %v4626_v11 = vadd.f32 %v5965_v16, %v5127_v14  ;;  %v4644_v59 = vadd.f32 %v4615_v52, %v4472_v10  ;;  %v4653_v35 = vmax.f32 %v4646_v20, 0.0 }
 0x335   : > { %v4617_v46 = vpop.f32.mrf.mxu1 }
 0x336   : > { %v4647_v55 = vadd.f32 %v4626_v11, %v4475_v5  ;;  %v4618_v13 = vadd.f32 %v5127_v14, %v4617_v46  ;;  %v4651_v45 = vmax.f32 %v4644_v59, 0.0 }
 0x337   : > { %v5968_v37 = vpop.f32.mrf.mxu1 }
 0x338   : > { %v4654_v41 = vmax.f32 %v4647_v55, 0.0  ;;  %v4645_v47 = vadd.f32 %v4618_v13, %v4473_v32  ;;  %v4639_v44 = vadd.f32 %v5968_v37, %v5127_v14 }
 0x339   : > { %v4630_v62 = vpop.f32.mrf.mxu1 }
 0x33a   : > { %v5160_v40 = vpack.c.bf16 %v4654_v41, %v4653_v35  ;;  %v4652_v26 = vmax.f32 %v4645_v47, 0.0  ;;  %v4650_v33 = vadd.f32 %v4639_v44, %v4478_v9  ;;  %v4631_v1 = vadd.f32 %v5127_v14, %v4630_v62 }
 0x33b   : > { %v5969_v18 = vpop.f32.mrf.mxu1 }
 0x33c   : > { %5167 = vst [vmem:[%s308_s12 + $0x8] sm:$0xff] %v5160_v40   ;;  %v5155_v49 = vpack.c.bf16 %v4652_v26, %v4651_v45  ;;  %v4657_v57 = vmax.f32 %v4650_v33, 0.0  ;;  %v4648_v53 = vadd.f32 %v4631_v1, %v4476_v38 }
 0x33d   : > { %v4633_v30 = vpop.f32.mrf.mxu1 }
 0x33e   : > { %5156 = vst [vmem:[%s308_s12] sm:$0xff] %v5155_v49   ;;  %v4664_v3 = vpack.c.bf16 %v4657_v57, %v4657_v57  ;;  %v4634_v54 = vadd.f32 %v5127_v14, %v4633_v30  ;;  %v4655_v21 = vmax.f32 %v4648_v53, 0.0 }
 0x340   : > { %4671 = vst [vmem:[%s308_s12 + $0x18] sm:$0xf] %v4664_v3  ;;  %v4649_v27 = vadd.f32 %v4634_v54, %v4477_v28 }
 0x342   : > { %v4656_v60 = vmax.f32 %v4649_v27, 0.0 }
 0x344   : > { %v5165_v17 = vpack.c.bf16 %v4656_v60, %v4655_v21 }
 0x346   : > { %5168 = vst [vmem:[%s308_s12 + $0x10] sm:$0xff] %v5165_v17  }
 0x347   : > { %6283 = shalt.err (!%p6280_p3)
}
 0x348   : > { %s6284_s10 = scalar_lea.hbm %s7510_s19, 448  ;;  %s6288_s12 = scalar_lea.hbm %s7566_s7, 896 }
 0x349   : > { %p6285_p5 = scmp.ne.s32.totalorder %s7510_s19, %s6284_s10  ;;  %p6289_p9 = scmp.lt.s32.totalorder %s7510_s19, %s7566_s7 }
 0x34a   : > { %p6290_p10 = scmp.lt.s32.totalorder %s6288_s12, %s6284_s10 }
 0x34b   : > { %p6286_p6 = pnand %p6285_p5, %p6441_p4 }
 0x34c   : > { %p6291_p11 = por %p6290_p10, %p6289_p9 }
 0x34d   : > { %p6287_p7 = pneg %p6286_p6 }
 0x34f   : > { %p6292_p12 = pnand %p6291_p11, %p6287_p7 }
 0x351   : > { %6295 = shalt.err (!%p6292_p12)
}
 0x352   : > { %s6359_s18 = smov 64   ;;  %s6360_s23 = smov 4  }
 0x353   : > { %5977 = dma.vmem_to_hbm [thread:$0]  (%p6441_p4), %s7505_s15, 448, %s7510_s19, %s7514_s20, %s6359_s18, %s6359_s18, %s6360_s23  }
 0x354 PF: > { %p5989_p13 = scmp.ge.s32.totalorder %s6350_s29, 2  ;;  %s4703_s27 = sand.u32 1, %s6330_s24  }
 0x355   : > { %s4704_s21 = scalar_lea.sflag [#allocation5], %s4703_s27 }
 0x356   : > { %p5984_p0 = pnand %p5989_p13, %p6448_p8 }
 0x358   : > { %p5985_p1 = pneg %p5984_p0 }
 0x35a   : > { %6325 = dma.done.wait (%p5985_p1), %s4704_s21, 448  }
 0x35b   : > { %6327 = vsyncadd (%p5985_p1), %s4704_s21, 4294966848  ;;  %s21_s29 = sadd.s32 1, %s6350_s29   ;;  %s7577_s24 = smov %s6334_s25 }
 0x35c   : > { %p18_p2 = scmp.ge.s32.totalorder %s21_s29, 4   ;;  %s7578_s25 = smov %s6338_s26 }
 0x35d   : > { %s7579_s26 = smov %s6454_s14  ;;  %s7580_s27 = smov %s6346_s28 }
 0x35e   : > { %s7581_s28 = smov %s7583_s9  ;;  %20 = sbr.rel (!%p18_p2) target bundleno = 5 (0x5), region = 101 }
 0x363   :  { %4709 = vsyncpa [#allocation4], 1 }
 0x364   :  { %4711 = vsyncpa [#allocation4 + $0x1], 1 }
 0x365   :  { %4712 = vsyncpa [#allocation5], 1 }
 0x366   :  { %4714 = vsyncpa [#allocation5 + $0x1], 1 }

</bundles_post_ra>
